<compile_context>
chip_gen: v6e
topology: v6e:2x2x1
jax: 0.10.0
libtpu: 0.0.40
codegen_flags: <defaults>
</compile_context>

<pallas_src>
import functools
import math

import jax
import jax.numpy as jnp
import numpy as np
from jax.experimental import pallas as pl
from jax.experimental.pallas import tpu as pltpu

SCALE_BOUND = 0.11        # compressai GaussianConditional default scale_bound
LIKELIHOOD_BOUND = 1e-9   # compressai EntropyModel default likelihood lower bound
BASE_LOG = 2              # lossyless BASE_LOG (bits)

_EB_FILTERS = (3, 3, 3, 3)
_EB_INIT_SCALE = 10.0


def _eb_layout(filters):
    """Static column offsets for the packed entropy-bottleneck parameter matrix."""
    full = (1,) + tuple(filters) + (1,)
    layout = []
    off = 0
    for i in range(len(filters) + 1):
        fin, fout = full[i], full[i + 1]
        w_off = off
        off += fout * fin
        b_off = off
        off += fout
        if i < len(filters):
            t_off = off
            off += fout
        else:
            t_off = None
        layout.append((fin, fout, w_off, b_off, t_off))
    return layout, off


_EB_LAYOUT, _EB_COLS = _eb_layout(_EB_FILTERS)


def _erf(x):
    # Abramowitz & Stegun 7.1.26 rational approximation (max abs err ~1.5e-7).
    # TODO(synk): torch uses exact erfc; Mosaic has no native erf/erfc lowering,
    # so we use this numerically close elementwise stand-in (exp/mul/add only).
    a1, a2, a3, a4, a5 = (0.254829592, -0.284496736, 1.421413741,
                          -1.453152027, 1.061405429)
    p = 0.3275911
    sgn = jnp.where(x < 0.0, -1.0, 1.0)
    ax = jnp.abs(x)
    t = 1.0 / (1.0 + p * ax)
    poly = t * (a1 + t * (a2 + t * (a3 + t * (a4 + t * a5))))
    return sgn * (1.0 - poly * jnp.exp(-ax * ax))


def _std_cumulative(x):
    # compressai _standardized_cumulative: 0.5 * erfc(-(2**-0.5) * x)
    return 0.5 * (1.0 + _erf(x * (2.0 ** -0.5)))


def _dot(a, b):
    # Single-pass bf16 MXU matmul with f32 accumulation.  Weights are already
    # bf16 (cast once in the wrapper); activations are cast here.
    return jnp.dot(a.astype(jnp.bfloat16), b.astype(jnp.bfloat16),
                   preferred_element_type=jnp.float32)


def _eb_logits_cumulative(x, eb):
    """compressai EntropyBottleneck._logits_cumulative, transposed layout.

    x: [S, m] (side-channels on sublanes, positions on lanes).
    eb: [S, _EB_COLS] packed columns of (softplus(matrix), bias, tanh(factor))
    per layer.  The per-channel 3x3 chain is unrolled as lane-dense elementwise
    ops; each [S, 1] coefficient column is sliced once and broadcast along lanes.
    """
    logits = [x]
    for (fin, fout, w_off, b_off, t_off) in _EB_LAYOUT:
        new = []
        for j in range(fout):
            val = eb[:, b_off + j: b_off + j + 1]            # [S, 1] bias
            for k in range(fin):
                w = eb[:, w_off + j * fin + k: w_off + j * fin + k + 1]
                val = val + w * logits[k]
            if t_off is not None:
                t = eb[:, t_off + j: t_off + j + 1]
                val = val + t * jnp.tanh(val)
            new.append(val)
        logits = new
    return logits[0]


def _encode(z_in, w1a, b1a, w1b, b1b, w1c, b1c, med,
            w2a, b2a, w2b, b2b, w2c, b2c):
    """MXU phase: side_encoder MLP, EB dequantize, merged z_encoder MLP.

    All tensors are [features, positions]; weights are torch-layout [out, in]
    bf16.  Returns (side_z_hat [S, n], gaussian_params [2C, n]).
    """
    h = jnp.maximum(_dot(w1a, z_in) + b1a, 0.0)
    h = jnp.maximum(_dot(w1b, h) + b1b, 0.0)
    side_z = _dot(w1c, h) + b1c
    side_z_hat = jnp.round(side_z - med) + med       # EB dequantize around medians
    g = jnp.maximum(_dot(w2a, side_z_hat) + b2a, 0.0)
    g = jnp.maximum(_dot(w2b, g) + b2b, 0.0)
    gp = _dot(w2c, g) + b2c                          # [2C, n]: scales rows | means rows
    return side_z_hat, gp


def _eb_neg_log_likelihood(side_z_hat, eb):
    """EntropyBottleneck likelihood -> -sum_s log q_s, shape [1, m].

    Lower/upper CDF evaluations and the final sigmoid are fused over [S, 2m].
    """
    m = side_z_hat.shape[-1]
    x2 = jnp.concatenate([side_z_hat - 0.5, side_z_hat + 0.5], axis=-1)  # [S, 2m]
    logits2 = _eb_logits_cumulative(x2, eb)
    lower, upper = logits2[:, :m], logits2[:, m:]
    lpu = lower + upper
    sign = jnp.where(lpu < 0.0, 1.0, jnp.where(lpu > 0.0, -1.0, 0.0))    # -sign(l+u)
    sig2 = jax.nn.sigmoid(jnp.concatenate([sign, sign], axis=-1) * logits2)
    q_s = jnp.maximum(jnp.abs(sig2[:, m:] - sig2[:, :m]), LIKELIHOOD_BOUND)
    return -jnp.sum(jnp.log(q_s), axis=0, keepdims=True)                 # [1, m]


def _gaussian_block(z_in, scales_hat, means_hat, inv_scale_exp, biasing):
    """GaussianConditional (eval mode) -> (z_hat [C, m], -sum_c log q_zls [1, m]).

    The two CDF evaluations are fused into one erf pass on a sublane-stacked
    [2C, m] array (fills the 8-sublane f32 vreg exactly for C=4).
    """
    C = scales_hat.shape[0]
    z_q = jnp.round(z_in - means_hat) + means_hat
    values = jnp.abs(z_q - means_hat)
    inv_s = 1.0 / jnp.maximum(scales_hat, SCALE_BOUND)
    arg = jnp.concatenate([(0.5 - values) * inv_s,
                           (-0.5 - values) * inv_s], axis=0)             # [2C, m]
    cdf = _std_cumulative(arg)
    q_zls = jnp.maximum(cdf[:C] - cdf[C:], LIKELIHOOD_BOUND)
    nlqz = -jnp.sum(jnp.log(q_zls), axis=0, keepdims=True)               # [1, m]
    z_hat = z_q * inv_scale_exp - biasing                                # process_z_out
    return z_hat, nlqz


def _hrate_kernel(chunk, z_ref, w1a_ref, w1b_ref, w1c_ref, w2a_ref, w2b_ref,
                  w2c_ref, hb_ref, cp_ref, sp_ref,
                  zhat_ref, nlq_ref, sz_ref, gp_ref):
    f32 = jnp.float32
    C, tile = z_ref.shape

    # Packed small constant slabs (1-2 vregs each).
    cp = cp_ref[...]                                  # [C, 5]
    scale_exp, inv_scale_exp, biasing = cp[:, 0:1], cp[:, 1:2], cp[:, 2:3]
    b2c = jnp.concatenate([cp[:, 3:4], cp[:, 4:5]], axis=0)              # [2C, 1]
    sp = sp_ref[...]                                  # [S, 2 + _EB_COLS]
    med, b1c, eb = sp[:, 0:1], sp[:, 1:2], sp[:, 2:]

    # ---- Phase 1 (full tile, MXU): side encoder -> EB dequantize -> z encoder.
    z_in = (z_ref[...].astype(f32) + biasing) * scale_exp
    side_z_hat, gp = _encode(
        z_in,
        w1a_ref[...], hb_ref[:, 0:1], w1b_ref[...], hb_ref[:, 1:2],
        w1c_ref[...], b1c, med,
        w2a_ref[...], hb_ref[:, 2:3], w2b_ref[...], hb_ref[:, 3:4],
        w2c_ref[...], b2c)
    sz_ref[...] = side_z_hat
    gp_ref[...] = gp

    # ---- Phase 2 (strip-mined, VPU/EUP): EB likelihood + Gaussian CDF.
    # Fully unrolled with *static* chunk offsets (same traced structure as
    # lax.fori_loop(unroll=True) but with constant addressing); each chunk's
    # results are stored immediately so only ~[S, 2*chunk]-sized intermediates
    # stay live -> no vreg spills from the unrolled EB chain.
    for c in range(tile // chunk):
        sl = pl.ds(c * chunk, chunk)
        nlqs_c = _eb_neg_log_likelihood(sz_ref[:, sl], eb)               # [1, chunk]
        gp_c = gp_ref[:, sl]                                             # [2C, chunk]
        z_in_c = (z_ref[:, sl].astype(f32) + biasing) * scale_exp
        z_hat_c, nlqz_c = _gaussian_block(z_in_c, gp_c[:C], gp_c[C:],
                                          inv_scale_exp, biasing)
        zhat_ref[:, sl] = z_hat_c.astype(zhat_ref.dtype)
        nlq_ref[:, sl] = jnp.concatenate([nlqs_c, nlqz_c],
                                         axis=0).astype(nlq_ref.dtype)


def _prep_kernel_params(params):
    """Torch-layout params -> packed kernel param list (transposed / bf16)."""
    f32, bf16 = jnp.float32, jnp.bfloat16
    scaling = jnp.asarray(params["scaling"], f32).reshape(-1)
    biasing = jnp.asarray(params["biasing"], f32).reshape(-1)
    b2c = jnp.asarray(params["b2c"], f32).reshape(-1)
    C = scaling.shape[0]
    # Per-channel slab [C, 5]: exp(scaling), exp(-scaling), biasing, b2c halves.
    cparams = jnp.stack([jnp.exp(scaling), jnp.exp(-scaling), biasing,
                         b2c[:C], b2c[C:]], axis=1)
    # Hidden-unit bias slab [H, 4]: b1a, b1b, b2a, b2b.
    hbias = jnp.stack([jnp.asarray(params[k], f32).reshape(-1)
                       for k in ("b1a", "b1b", "b2a", "b2b")], axis=1)
    # Side-channel slab [S, 2 + _EB_COLS]: medians, b1c, packed EB density params.
    sparams = jnp.concatenate(
        [jnp.asarray(params["med"], f32).reshape(-1, 1),
         jnp.asarray(params["b1c"], f32).reshape(-1, 1),
         jnp.asarray(params["eb"], f32)], axis=1)
    return [jnp.asarray(params["w1a"]).astype(bf16),
            jnp.asarray(params["w1b"]).astype(bf16),
            jnp.asarray(params["w1c"]).astype(bf16),
            jnp.asarray(params["w2a"]).astype(bf16),
            jnp.asarray(params["w2b"]).astype(bf16),
            jnp.asarray(params["w2c"]).astype(bf16),     # merged [2C, H]
            hbias, cparams, sparams]


def _pick_tile_hw(hw_pad, target=1024):
    """Largest 128-aligned lane tile <= target that divides hw_pad."""
    if hw_pad <= target:
        return hw_pad
    t = (target // 128) * 128
    while t >= 128:
        if hw_pad % t == 0:
            return t
        t -= 128
    return hw_pad


def hrate_hyperprior_spatial_forward(z_raw, params, *, n_channels, side_dim,
                                     tile_hw=None, chunk=128):
    """Forward of HRateHyperpriorSpatial (eval-mode, end-to-end path).

    z_raw: [B, C*side_dim*side_dim] flattened as in torch ('b (c h w)').
    Returns (z_hat [B, C*h*w], rates [B], logs dict, other dict).
    """
    B, raw_dim = z_raw.shape
    C, HW = n_channels, side_dim * side_dim
    assert raw_dim == C * HW

    # 'b (c h w) -> b c (h w)': free reshape (no HBM transpose).  Pad the
    # position axis to a 128 multiple so every block / store is lane-dense
    # (unmasked vst); padded columns are dropped before the rate reduction.
    HW_pad = ((HW + 127) // 128) * 128
    z3 = z_raw.reshape(B, C, HW)
    if HW_pad != HW:
        z3 = jnp.pad(z3, ((0, 0), (0, 0), (0, HW_pad - HW)))

    if tile_hw is None:
        tile_hw = _pick_tile_hw(HW_pad)
        # v7x has 2 TensorCores per chip: keep >= 2 parallel grid iterations.
        if B * (HW_pad // tile_hw) < 2 and HW_pad % 256 == 0:
            tile_hw = HW_pad // 2
    assert HW_pad % tile_hw == 0, "tile_hw must divide the padded position count"
    chunk = min(chunk, tile_hw)
    assert tile_hw % chunk == 0

    p_args = _prep_kernel_params(params)
    S = p_args[-1].shape[0]

    def const_spec(a):
        # Constant-index blocks are only DMA'd once by the pipeline.
        return pl.BlockSpec(a.shape, lambda b, t, _nd=a.ndim: (0,) * _nd)

    in_specs = ([pl.BlockSpec((None, C, tile_hw), lambda b, t: (b, 0, t))]
                + [const_spec(a) for a in p_args])
    out_specs = [
        pl.BlockSpec((None, C, tile_hw), lambda b, t: (b, 0, t)),
        pl.BlockSpec((None, 2, tile_hw), lambda b, t: (b, 0, t)),
    ]
    out_shape = [
        jax.ShapeDtypeStruct((B, C, HW_pad), jnp.float32),
        jax.ShapeDtypeStruct((B, 2, HW_pad), jnp.float32),
    ]

    zhat3, nlq = pl.pallas_call(
        functools.partial(_hrate_kernel, chunk),
        grid=(B, HW_pad // tile_hw),
        in_specs=in_specs,
        out_specs=out_specs,
        out_shape=out_shape,
        scratch_shapes=[pltpu.VMEM((S, tile_hw), jnp.float32),       # side_z_hat
                        pltpu.VMEM((2 * C, tile_hw), jnp.float32)],  # gaussian params
        compiler_params=pltpu.CompilerParams(
            dimension_semantics=("parallel", "parallel"),
            vmem_limit_bytes=48 * 1024 * 1024),
    )(z3, *p_args)

    z_hat = zhat3[:, :, :HW].reshape(B, C * HW)       # 'b c (h w) -> b (c h w)', free
    nlqs, nlqz = nlq[:, 0, :HW], nlq[:, 1, :HW]       # [B, HW] each (valid region)
    rates = jnp.sum(nlqs + nlqz, axis=-1)             # sum over (h, w) per batch

    sd2 = float(side_dim ** 2)
    ln_base = math.log(BASE_LOG)
    logs = {
        "H_q_ZlS": jnp.mean(nlqz) / ln_base * sd2,
        "H_q_Z": jnp.mean(nlqs + nlqz) / ln_base * sd2,
        "H_q_S": jnp.mean(nlqs) / ln_base * sd2,
        "H_ZlX": 0.0 * sd2,
    }
    # TODO(synk): compress/decompress/real_rate (arithmetic range coding) and
    # training-mode additive-uniform-noise quantization are not implementable as
    # Pallas TPU compute; only the deterministic forward/likelihood path is here.
    other = {}
    return z_hat, rates, logs, other


def _reference_forward(z3, p_args):
    """Pure-JAX reference on the same math (checks the Pallas lowering)."""
    (w1a, w1b, w1c, w2a, w2b, w2c, hb, cp, sp) = p_args
    scale_exp, inv_scale_exp, biasing = cp[:, 0:1], cp[:, 1:2], cp[:, 2:3]
    b2c = jnp.concatenate([cp[:, 3:4], cp[:, 4:5]], axis=0)
    med, b1c, eb = sp[:, 0:1], sp[:, 1:2], sp[:, 2:]
    C = cp.shape[0]
    zh, ns, nz = [], [], []
    for b in range(z3.shape[0]):
        z_in = (z3[b].astype(jnp.float32) + biasing) * scale_exp
        side_z_hat, gp = _encode(z_in, w1a, hb[:, 0:1], w1b, hb[:, 1:2],
                                 w1c, b1c, med, w2a, hb[:, 2:3], w2b, hb[:, 3:4],
                                 w2c, b2c)
        nlqs = _eb_neg_log_likelihood(side_z_hat, eb)
        z_hat, nlqz = _gaussian_block(z_in, gp[:C], gp[C:], inv_scale_exp, biasing)
        zh.append(z_hat)
        ns.append(nlqs)
        nz.append(nlqz)
    return jnp.stack(zh), jnp.concatenate(ns, 0), jnp.concatenate(nz, 0)


def init_params(key, n_channels, side_z_dim, hid_dim):
    """Deterministic synthetic init matching the module's parameter shapes.

    Linear weights use torch nn.Linear layout [out_features, in_features]; the
    EntropyBottleneck factorized-density params are pre-packed (softplus / tanh
    already applied, as the eval-mode forward would) as [side_z_dim, 58] columns.
    """
    C, S, H = n_channels, side_z_dim, hid_dim
    ks = list(jax.random.split(key, 32))
    it = iter(ks)

    def linear(kw, kb, fan_in, fan_out):
        w = jax.random.normal(kw, (fan_out, fan_in), jnp.float32) / math.sqrt(fan_in)
        b = 0.01 * jax.random.normal(kb, (fan_out,), jnp.float32)
        return w, b

    p = {}
    # HRateEstimator.scaling / biasing (per-channel); small noise around 0
    p["scaling"] = 0.05 * jax.random.normal(next(it), (C,), jnp.float32)
    p["biasing"] = 0.05 * jax.random.normal(next(it), (C,), jnp.float32)
    # side_encoder MLP (C -> H -> H -> S)
    p["w1a"], p["b1a"] = linear(next(it), next(it), C, H)
    p["w1b"], p["b1b"] = linear(next(it), next(it), H, H)
    p["w1c"], p["b1c"] = linear(next(it), next(it), H, S)
    # z_encoder MLP (S -> H -> H -> 2C)   (is_pred_mean=True)
    p["w2a"], p["b2a"] = linear(next(it), next(it), S, H)
    p["w2b"], p["b2b"] = linear(next(it), next(it), H, H)
    p["w2c"], p["b2c"] = linear(next(it), next(it), H, 2 * C)

    # EntropyBottleneck factorized density params, compressai-style init + noise,
    # packed as [S, 58] columns of (softplus(matrix), bias, tanh(factor)) per layer.
    scale = _EB_INIT_SCALE ** (1.0 / (len(_EB_FILTERS) + 1))
    eb_cols = []
    for (fin, fout, w_off, b_off, t_off) in _EB_LAYOUT:
        init = math.log(math.expm1(1.0 / scale / fout))
        matrix = init + 0.05 * jax.random.normal(next(it), (S, fout, fin), jnp.float32)
        bias = jax.random.uniform(next(it), (S, fout), jnp.float32,
                                  minval=-0.5, maxval=0.5)
        eb_cols.append(jax.nn.softplus(matrix).reshape(S, fout * fin))
        eb_cols.append(bias)
        if t_off is not None:
            factor = 0.1 * jax.random.normal(next(it), (S, fout), jnp.float32)
            eb_cols.append(jnp.tanh(factor))
    p["eb"] = jnp.concatenate(eb_cols, axis=1)
    assert p["eb"].shape == (S, _EB_COLS)
    # medians = quantiles[:, 0, 1] (compressai inits to 0; small noise here)
    p["med"] = 0.1 * jax.random.normal(next(it), (S,), jnp.float32)
    return p


if __name__ == "__main__":
    B = 2
    n_channels = 4
    side_dim = 16
    raw_z_dim = n_channels * side_dim * side_dim      # 1024
    side_z_dim = max(10, n_channels // 5)             # 10 (factor_dim=5 default)
    hid_dim = max(n_channels, 256)                    # 256 (MLP hid_dim rule)

    key = jax.random.PRNGKey(0)
    kz, kp = jax.random.split(key)
    z = jax.random.normal(kz, (B, raw_z_dim), jnp.float32)
    params = init_params(kp, n_channels, side_z_dim, hid_dim)

    z_hat, rates, logs, other = hrate_hyperprior_spatial_forward(
        z, params, n_channels=n_channels, side_dim=side_dim)
    jax.block_until_ready((z_hat, rates))

    # Pure-JAX reference on the same math (sanity check of the Pallas lowering).
    HW = side_dim * side_dim
    z3 = z.reshape(B, n_channels, HW)
    p_args = _prep_kernel_params(params)
    ref_zhat3, ref_nlqs, ref_nlqz = _reference_forward(z3, p_args)
    ref_zhat = ref_zhat3.reshape(B, raw_z_dim)
    ref_rates = jnp.sum(ref_nlqs + ref_nlqz, axis=-1)

    np.testing.assert_allclose(np.asarray(z_hat), np.asarray(ref_zhat),
                               rtol=1e-3, atol=1e-3)
    np.testing.assert_allclose(np.asarray(rates), np.asarray(ref_rates),
                               rtol=1e-3, atol=1e-2)
    assert z_hat.shape == (B, raw_z_dim)
    assert rates.shape == (B,)
    assert bool(jnp.all(jnp.isfinite(rates)))
    print("KERNEL_OK")
</pallas_src>

<mosaic_0001>
module attributes {stable_mosaic.version = 11 : i64} {
  func.func @_hrate_kernel(%arg0: i32, %arg1: i32, %arg2: memref<1x4x256xf32, #tpu.memory_space<vmem>>, %arg3: memref<256x4xbf16, #tpu.memory_space<vmem>>, %arg4: memref<256x256xbf16, #tpu.memory_space<vmem>>, %arg5: memref<10x256xbf16, #tpu.memory_space<vmem>>, %arg6: memref<256x10xbf16, #tpu.memory_space<vmem>>, %arg7: memref<256x256xbf16, #tpu.memory_space<vmem>>, %arg8: memref<8x256xbf16, #tpu.memory_space<vmem>>, %arg9: memref<256x4xf32, #tpu.memory_space<vmem>>, %arg10: memref<4x5xf32, #tpu.memory_space<vmem>>, %arg11: memref<10x60xf32, #tpu.memory_space<vmem>>, %arg12: memref<1x4x256xf32, #tpu.memory_space<vmem>>, %arg13: memref<1x2x256xf32, #tpu.memory_space<vmem>>, %arg14: memref<10x256xf32, #tpu.memory_space<vmem>>, %arg15: memref<8x256xf32, #tpu.memory_space<vmem>>) attributes {dimension_semantics = [#tpu.dimension_semantics<parallel>, #tpu.dimension_semantics<parallel>], iteration_bounds = array<i64: 2, 1>, scalar_prefetch = 0 : i64, scratch_operands = 2 : i64, tpu.core_type = #tpu.core_type<tc>, window_params = [{transform_indices = @transform_0, window_bounds = array<i64: 1, 4, 256>}, {pipeline_mode = #tpu.pipeline_mode<synchronous>, transform_indices = @transform_1, window_bounds = array<i64: 256, 4>}, {pipeline_mode = #tpu.pipeline_mode<synchronous>, transform_indices = @transform_2, window_bounds = array<i64: 256, 256>}, {pipeline_mode = #tpu.pipeline_mode<synchronous>, transform_indices = @transform_3, window_bounds = array<i64: 10, 256>}, {pipeline_mode = #tpu.pipeline_mode<synchronous>, transform_indices = @transform_4, window_bounds = array<i64: 256, 10>}, {pipeline_mode = #tpu.pipeline_mode<synchronous>, transform_indices = @transform_5, window_bounds = array<i64: 256, 256>}, {pipeline_mode = #tpu.pipeline_mode<synchronous>, transform_indices = @transform_6, window_bounds = array<i64: 8, 256>}, {pipeline_mode = #tpu.pipeline_mode<synchronous>, transform_indices = @transform_7, window_bounds = array<i64: 256, 4>}, {pipeline_mode = #tpu.pipeline_mode<synchronous>, transform_indices = @transform_8, window_bounds = array<i64: 4, 5>}, {pipeline_mode = #tpu.pipeline_mode<synchronous>, transform_indices = @transform_9, window_bounds = array<i64: 10, 60>}, {transform_indices = @transform_10, window_bounds = array<i64: 1, 4, 256>}, {transform_indices = @transform_11, window_bounds = array<i64: 1, 2, 256>}]} {
    %c0 = arith.constant 0 : index
    %c0_0 = arith.constant 0 : index
    %0 = vector.load %arg10[%c0, %c0_0] : memref<4x5xf32, #tpu.memory_space<vmem>>, vector<4x5xf32>
    %1 = vector.extract_strided_slice %0 {offsets = [0, 0], sizes = [4, 1], strides = [1, 1]} : vector<4x5xf32> to vector<4x1xf32>
    %2 = vector.extract_strided_slice %0 {offsets = [0, 1], sizes = [4, 1], strides = [1, 1]} : vector<4x5xf32> to vector<4x1xf32>
    %3 = vector.extract_strided_slice %0 {offsets = [0, 2], sizes = [4, 1], strides = [1, 1]} : vector<4x5xf32> to vector<4x1xf32>
    %4 = vector.extract_strided_slice %0 {offsets = [0, 3], sizes = [4, 1], strides = [1, 1]} : vector<4x5xf32> to vector<4x1xf32>
    %5 = vector.extract_strided_slice %0 {offsets = [0, 4], sizes = [4, 1], strides = [1, 1]} : vector<4x5xf32> to vector<4x1xf32>
    %6 = tpu.concatenate %4, %5 in 0 : vector<4x1xf32>, vector<4x1xf32> -> vector<8x1xf32>
    %c0_1 = arith.constant 0 : index
    %c0_2 = arith.constant 0 : index
    %7 = vector.load %arg11[%c0_1, %c0_2] : memref<10x60xf32, #tpu.memory_space<vmem>>, vector<10x60xf32>
    %8 = vector.extract_strided_slice %7 {offsets = [0, 0], sizes = [10, 1], strides = [1, 1]} : vector<10x60xf32> to vector<10x1xf32>
    %9 = vector.extract_strided_slice %7 {offsets = [0, 1], sizes = [10, 1], strides = [1, 1]} : vector<10x60xf32> to vector<10x1xf32>
    %10 = vector.extract_strided_slice %7 {offsets = [0, 2], sizes = [10, 58], strides = [1, 1]} : vector<10x60xf32> to vector<10x58xf32>
    %c0_3 = arith.constant 0 : index
    %c0_4 = arith.constant 0 : index
    %c0_5 = arith.constant 0 : index
    %11 = vector.load %arg2[%c0_3, %c0_4, %c0_5] : memref<1x4x256xf32, #tpu.memory_space<vmem>>, vector<1x4x256xf32>
    %12 = vector.shape_cast %11 : vector<1x4x256xf32> to vector<4x256xf32>
    %13 = vector.broadcast %3 : vector<4x1xf32> to vector<4x256xf32>
    %14 = arith.addf %12, %13 : vector<4x256xf32>
    %15 = vector.broadcast %1 : vector<4x1xf32> to vector<4x256xf32>
    %16 = arith.mulf %14, %15 : vector<4x256xf32>
    %c0_6 = arith.constant 0 : index
    %c0_7 = arith.constant 0 : index
    %17 = vector.load %arg3[%c0_6, %c0_7] : memref<256x4xbf16, #tpu.memory_space<vmem>>, vector<256x4xbf16>
    %c0_8 = arith.constant 0 : index
    %c0_9 = arith.constant 0 : index
    %18 = vector.load %arg9[%c0_8, %c0_9] : memref<256x4xf32, #tpu.memory_space<vmem>>, vector<256x1xf32>
    %c0_10 = arith.constant 0 : index
    %c0_11 = arith.constant 0 : index
    %19 = vector.load %arg4[%c0_10, %c0_11] : memref<256x256xbf16, #tpu.memory_space<vmem>>, vector<256x256xbf16>
    %c0_12 = arith.constant 0 : index
    %c1 = arith.constant 1 : index
    %20 = vector.load %arg9[%c0_12, %c1] : memref<256x4xf32, #tpu.memory_space<vmem>>, vector<256x1xf32>
    %c0_13 = arith.constant 0 : index
    %c0_14 = arith.constant 0 : index
    %21 = vector.load %arg5[%c0_13, %c0_14] : memref<10x256xbf16, #tpu.memory_space<vmem>>, vector<10x256xbf16>
    %c0_15 = arith.constant 0 : index
    %c0_16 = arith.constant 0 : index
    %22 = vector.load %arg6[%c0_15, %c0_16] : memref<256x10xbf16, #tpu.memory_space<vmem>>, vector<256x10xbf16>
    %c0_17 = arith.constant 0 : index
    %c2 = arith.constant 2 : index
    %23 = vector.load %arg9[%c0_17, %c2] : memref<256x4xf32, #tpu.memory_space<vmem>>, vector<256x1xf32>
    %c0_18 = arith.constant 0 : index
    %c0_19 = arith.constant 0 : index
    %24 = vector.load %arg7[%c0_18, %c0_19] : memref<256x256xbf16, #tpu.memory_space<vmem>>, vector<256x256xbf16>
    %c0_20 = arith.constant 0 : index
    %c3 = arith.constant 3 : index
    %25 = vector.load %arg9[%c0_20, %c3] : memref<256x4xf32, #tpu.memory_space<vmem>>, vector<256x1xf32>
    %c0_21 = arith.constant 0 : index
    %c0_22 = arith.constant 0 : index
    %26 = vector.load %arg8[%c0_21, %c0_22] : memref<8x256xbf16, #tpu.memory_space<vmem>>, vector<8x256xbf16>
    %27 = arith.truncf %16 : vector<4x256xf32> to vector<4x256xbf16>
    %cst = arith.constant dense<0.000000e+00> : vector<256x256xf32>
    %28 = tpu.matmul %17, %27, %cst {dimension_numbers = #tpu.dot_dimension_numbers<[1], [0], [0], [1], [0, 0, 1, 1], [], []>} : vector<256x4xbf16>, vector<4x256xbf16>, vector<256x256xf32> -> vector<256x256xf32>
    %29 = vector.broadcast %18 : vector<256x1xf32> to vector<256x256xf32>
    %30 = arith.addf %28, %29 : vector<256x256xf32>
    %cst_23 = arith.constant 0.000000e+00 : f32
    %31 = vector.broadcast %cst_23 : f32 to vector<256x256xf32>
    %32 = arith.maximumf %30, %31 : vector<256x256xf32>
    %33 = arith.truncf %32 : vector<256x256xf32> to vector<256x256xbf16>
    %cst_24 = arith.constant dense<0.000000e+00> : vector<256x256xf32>
    %34 = tpu.matmul %19, %33, %cst_24 {dimension_numbers = #tpu.dot_dimension_numbers<[1], [0], [0], [1], [0, 0, 1, 1], [], []>} : vector<256x256xbf16>, vector<256x256xbf16>, vector<256x256xf32> -> vector<256x256xf32>
    %35 = vector.broadcast %20 : vector<256x1xf32> to vector<256x256xf32>
    %36 = arith.addf %34, %35 : vector<256x256xf32>
    %cst_25 = arith.constant 0.000000e+00 : f32
    %37 = vector.broadcast %cst_25 : f32 to vector<256x256xf32>
    %38 = arith.maximumf %36, %37 : vector<256x256xf32>
    %39 = arith.truncf %38 : vector<256x256xf32> to vector<256x256xbf16>
    %cst_26 = arith.constant dense<0.000000e+00> : vector<10x256xf32>
    %40 = tpu.matmul %21, %39, %cst_26 {dimension_numbers = #tpu.dot_dimension_numbers<[1], [0], [0], [1], [0, 0, 1, 1], [], []>} : vector<10x256xbf16>, vector<256x256xbf16>, vector<10x256xf32> -> vector<10x256xf32>
    %41 = vector.broadcast %9 : vector<10x1xf32> to vector<10x256xf32>
    %42 = arith.addf %40, %41 : vector<10x256xf32>
    %43 = vector.broadcast %8 : vector<10x1xf32> to vector<10x256xf32>
    %44 = arith.subf %42, %43 : vector<10x256xf32>
    %45 = math.roundeven %44 : vector<10x256xf32>
    %46 = vector.broadcast %8 : vector<10x1xf32> to vector<10x256xf32>
    %47 = arith.addf %45, %46 : vector<10x256xf32>
    %48 = arith.truncf %47 : vector<10x256xf32> to vector<10x256xbf16>
    %cst_27 = arith.constant dense<0.000000e+00> : vector<256x256xf32>
    %49 = tpu.matmul %22, %48, %cst_27 {dimension_numbers = #tpu.dot_dimension_numbers<[1], [0], [0], [1], [0, 0, 1, 1], [], []>} : vector<256x10xbf16>, vector<10x256xbf16>, vector<256x256xf32> -> vector<256x256xf32>
    %50 = vector.broadcast %23 : vector<256x1xf32> to vector<256x256xf32>
    %51 = arith.addf %49, %50 : vector<256x256xf32>
    %cst_28 = arith.constant 0.000000e+00 : f32
    %52 = vector.broadcast %cst_28 : f32 to vector<256x256xf32>
    %53 = arith.maximumf %51, %52 : vector<256x256xf32>
    %54 = arith.truncf %53 : vector<256x256xf32> to vector<256x256xbf16>
    %cst_29 = arith.constant dense<0.000000e+00> : vector<256x256xf32>
    %55 = tpu.matmul %24, %54, %cst_29 {dimension_numbers = #tpu.dot_dimension_numbers<[1], [0], [0], [1], [0, 0, 1, 1], [], []>} : vector<256x256xbf16>, vector<256x256xbf16>, vector<256x256xf32> -> vector<256x256xf32>
    %56 = vector.broadcast %25 : vector<256x1xf32> to vector<256x256xf32>
    %57 = arith.addf %55, %56 : vector<256x256xf32>
    %cst_30 = arith.constant 0.000000e+00 : f32
    %58 = vector.broadcast %cst_30 : f32 to vector<256x256xf32>
    %59 = arith.maximumf %57, %58 : vector<256x256xf32>
    %60 = arith.truncf %59 : vector<256x256xf32> to vector<256x256xbf16>
    %cst_31 = arith.constant dense<0.000000e+00> : vector<8x256xf32>
    %61 = tpu.matmul %26, %60, %cst_31 {dimension_numbers = #tpu.dot_dimension_numbers<[1], [0], [0], [1], [0, 0, 1, 1], [], []>} : vector<8x256xbf16>, vector<256x256xbf16>, vector<8x256xf32> -> vector<8x256xf32>
    %62 = vector.broadcast %6 : vector<8x1xf32> to vector<8x256xf32>
    %63 = arith.addf %61, %62 : vector<8x256xf32>
    %c0_32 = arith.constant 0 : index
    %c0_33 = arith.constant 0 : index
    %64 = vector.load %arg14[%c0_32, %c0_33] : memref<10x256xf32, #tpu.memory_space<vmem>>, vector<10x256xf32>
    tpu.vector_store %arg14[%c0_32, %c0_33], %47 {strides = array<i32>} : memref<10x256xf32, #tpu.memory_space<vmem>>, vector<10x256xf32>,
    %c0_34 = arith.constant 0 : index
    %c0_35 = arith.constant 0 : index
    %65 = vector.load %arg15[%c0_34, %c0_35] : memref<8x256xf32, #tpu.memory_space<vmem>>, vector<8x256xf32>
    tpu.vector_store %arg15[%c0_34, %c0_35], %63 {strides = array<i32>} : memref<8x256xf32, #tpu.memory_space<vmem>>, vector<8x256xf32>,
    %c0_36 = arith.constant 0 : index
    %c0_37 = arith.constant 0 : index
    %66 = vector.load %arg14[%c0_36, %c0_37] : memref<10x256xf32, #tpu.memory_space<vmem>>, vector<10x128xf32>
    %cst_38 = arith.constant 5.000000e-01 : f32
    %67 = vector.broadcast %cst_38 : f32 to vector<10x128xf32>
    %68 = arith.subf %66, %67 : vector<10x128xf32>
    %cst_39 = arith.constant 5.000000e-01 : f32
    %69 = vector.broadcast %cst_39 : f32 to vector<10x128xf32>
    %70 = arith.addf %66, %69 : vector<10x128xf32>
    %71 = tpu.concatenate %68, %70 in 1 : vector<10x128xf32>, vector<10x128xf32> -> vector<10x256xf32>
    %72 = vector.extract_strided_slice %10 {offsets = [0, 3], sizes = [10, 1], strides = [1, 1]} : vector<10x58xf32> to vector<10x1xf32>
    %73 = vector.extract_strided_slice %10 {offsets = [0, 0], sizes = [10, 1], strides = [1, 1]} : vector<10x58xf32> to vector<10x1xf32>
    %74 = vector.broadcast %73 : vector<10x1xf32> to vector<10x256xf32>
    %75 = arith.mulf %74, %71 : vector<10x256xf32>
    %76 = vector.broadcast %72 : vector<10x1xf32> to vector<10x256xf32>
    %77 = arith.addf %76, %75 : vector<10x256xf32>
    %78 = vector.extract_strided_slice %10 {offsets = [0, 6], sizes = [10, 1], strides = [1, 1]} : vector<10x58xf32> to vector<10x1xf32>
    %79 = math.tanh %77 : vector<10x256xf32>
    %80 = vector.broadcast %78 : vector<10x1xf32> to vector<10x256xf32>
    %81 = arith.mulf %80, %79 : vector<10x256xf32>
    %82 = arith.addf %77, %81 : vector<10x256xf32>
    %83 = vector.extract_strided_slice %10 {offsets = [0, 4], sizes = [10, 1], strides = [1, 1]} : vector<10x58xf32> to vector<10x1xf32>
    %84 = vector.extract_strided_slice %10 {offsets = [0, 1], sizes = [10, 1], strides = [1, 1]} : vector<10x58xf32> to vector<10x1xf32>
    %85 = vector.broadcast %84 : vector<10x1xf32> to vector<10x256xf32>
    %86 = arith.mulf %85, %71 : vector<10x256xf32>
    %87 = vector.broadcast %83 : vector<10x1xf32> to vector<10x256xf32>
    %88 = arith.addf %87, %86 : vector<10x256xf32>
    %89 = vector.extract_strided_slice %10 {offsets = [0, 7], sizes = [10, 1], strides = [1, 1]} : vector<10x58xf32> to vector<10x1xf32>
    %90 = math.tanh %88 : vector<10x256xf32>
    %91 = vector.broadcast %89 : vector<10x1xf32> to vector<10x256xf32>
    %92 = arith.mulf %91, %90 : vector<10x256xf32>
    %93 = arith.addf %88, %92 : vector<10x256xf32>
    %94 = vector.extract_strided_slice %10 {offsets = [0, 5], sizes = [10, 1], strides = [1, 1]} : vector<10x58xf32> to vector<10x1xf32>
    %95 = vector.extract_strided_slice %10 {offsets = [0, 2], sizes = [10, 1], strides = [1, 1]} : vector<10x58xf32> to vector<10x1xf32>
    %96 = vector.broadcast %95 : vector<10x1xf32> to vector<10x256xf32>
    %97 = arith.mulf %96, %71 : vector<10x256xf32>
    %98 = vector.broadcast %94 : vector<10x1xf32> to vector<10x256xf32>
    %99 = arith.addf %98, %97 : vector<10x256xf32>
    %100 = vector.extract_strided_slice %10 {offsets = [0, 8], sizes = [10, 1], strides = [1, 1]} : vector<10x58xf32> to vector<10x1xf32>
    %101 = math.tanh %99 : vector<10x256xf32>
    %102 = vector.broadcast %100 : vector<10x1xf32> to vector<10x256xf32>
    %103 = arith.mulf %102, %101 : vector<10x256xf32>
    %104 = arith.addf %99, %103 : vector<10x256xf32>
    %105 = vector.extract_strided_slice %10 {offsets = [0, 18], sizes = [10, 1], strides = [1, 1]} : vector<10x58xf32> to vector<10x1xf32>
    %106 = vector.extract_strided_slice %10 {offsets = [0, 9], sizes = [10, 1], strides = [1, 1]} : vector<10x58xf32> to vector<10x1xf32>
    %107 = vector.broadcast %106 : vector<10x1xf32> to vector<10x256xf32>
    %108 = arith.mulf %107, %82 : vector<10x256xf32>
    %109 = vector.broadcast %105 : vector<10x1xf32> to vector<10x256xf32>
    %110 = arith.addf %109, %108 : vector<10x256xf32>
    %111 = vector.extract_strided_slice %10 {offsets = [0, 10], sizes = [10, 1], strides = [1, 1]} : vector<10x58xf32> to vector<10x1xf32>
    %112 = vector.broadcast %111 : vector<10x1xf32> to vector<10x256xf32>
    %113 = arith.mulf %112, %93 : vector<10x256xf32>
    %114 = arith.addf %110, %113 : vector<10x256xf32>
    %115 = vector.extract_strided_slice %10 {offsets = [0, 11], sizes = [10, 1], strides = [1, 1]} : vector<10x58xf32> to vector<10x1xf32>
    %116 = vector.broadcast %115 : vector<10x1xf32> to vector<10x256xf32>
    %117 = arith.mulf %116, %104 : vector<10x256xf32>
    %118 = arith.addf %114, %117 : vector<10x256xf32>
    %119 = vector.extract_strided_slice %10 {offsets = [0, 21], sizes = [10, 1], strides = [1, 1]} : vector<10x58xf32> to vector<10x1xf32>
    %120 = math.tanh %118 : vector<10x256xf32>
    %121 = vector.broadcast %119 : vector<10x1xf32> to vector<10x256xf32>
    %122 = arith.mulf %121, %120 : vector<10x256xf32>
    %123 = arith.addf %118, %122 : vector<10x256xf32>
    %124 = vector.extract_strided_slice %10 {offsets = [0, 19], sizes = [10, 1], strides = [1, 1]} : vector<10x58xf32> to vector<10x1xf32>
    %125 = vector.extract_strided_slice %10 {offsets = [0, 12], sizes = [10, 1], strides = [1, 1]} : vector<10x58xf32> to vector<10x1xf32>
    %126 = vector.broadcast %125 : vector<10x1xf32> to vector<10x256xf32>
    %127 = arith.mulf %126, %82 : vector<10x256xf32>
    %128 = vector.broadcast %124 : vector<10x1xf32> to vector<10x256xf32>
    %129 = arith.addf %128, %127 : vector<10x256xf32>
    %130 = vector.extract_strided_slice %10 {offsets = [0, 13], sizes = [10, 1], strides = [1, 1]} : vector<10x58xf32> to vector<10x1xf32>
    %131 = vector.broadcast %130 : vector<10x1xf32> to vector<10x256xf32>
    %132 = arith.mulf %131, %93 : vector<10x256xf32>
    %133 = arith.addf %129, %132 : vector<10x256xf32>
    %134 = vector.extract_strided_slice %10 {offsets = [0, 14], sizes = [10, 1], strides = [1, 1]} : vector<10x58xf32> to vector<10x1xf32>
    %135 = vector.broadcast %134 : vector<10x1xf32> to vector<10x256xf32>
    %136 = arith.mulf %135, %104 : vector<10x256xf32>
    %137 = arith.addf %133, %136 : vector<10x256xf32>
    %138 = vector.extract_strided_slice %10 {offsets = [0, 22], sizes = [10, 1], strides = [1, 1]} : vector<10x58xf32> to vector<10x1xf32>
    %139 = math.tanh %137 : vector<10x256xf32>
    %140 = vector.broadcast %138 : vector<10x1xf32> to vector<10x256xf32>
    %141 = arith.mulf %140, %139 : vector<10x256xf32>
    %142 = arith.addf %137, %141 : vector<10x256xf32>
    %143 = vector.extract_strided_slice %10 {offsets = [0, 20], sizes = [10, 1], strides = [1, 1]} : vector<10x58xf32> to vector<10x1xf32>
    %144 = vector.extract_strided_slice %10 {offsets = [0, 15], sizes = [10, 1], strides = [1, 1]} : vector<10x58xf32> to vector<10x1xf32>
    %145 = vector.broadcast %144 : vector<10x1xf32> to vector<10x256xf32>
    %146 = arith.mulf %145, %82 : vector<10x256xf32>
    %147 = vector.broadcast %143 : vector<10x1xf32> to vector<10x256xf32>
    %148 = arith.addf %147, %146 : vector<10x256xf32>
    %149 = vector.extract_strided_slice %10 {offsets = [0, 16], sizes = [10, 1], strides = [1, 1]} : vector<10x58xf32> to vector<10x1xf32>
    %150 = vector.broadcast %149 : vector<10x1xf32> to vector<10x256xf32>
    %151 = arith.mulf %150, %93 : vector<10x256xf32>
    %152 = arith.addf %148, %151 : vector<10x256xf32>
    %153 = vector.extract_strided_slice %10 {offsets = [0, 17], sizes = [10, 1], strides = [1, 1]} : vector<10x58xf32> to vector<10x1xf32>
    %154 = vector.broadcast %153 : vector<10x1xf32> to vector<10x256xf32>
    %155 = arith.mulf %154, %104 : vector<10x256xf32>
    %156 = arith.addf %152, %155 : vector<10x256xf32>
    %157 = vector.extract_strided_slice %10 {offsets = [0, 23], sizes = [10, 1], strides = [1, 1]} : vector<10x58xf32> to vector<10x1xf32>
    %158 = math.tanh %156 : vector<10x256xf32>
    %159 = vector.broadcast %157 : vector<10x1xf32> to vector<10x256xf32>
    %160 = arith.mulf %159, %158 : vector<10x256xf32>
    %161 = arith.addf %156, %160 : vector<10x256xf32>
    %162 = vector.extract_strided_slice %10 {offsets = [0, 33], sizes = [10, 1], strides = [1, 1]} : vector<10x58xf32> to vector<10x1xf32>
    %163 = vector.extract_strided_slice %10 {offsets = [0, 24], sizes = [10, 1], strides = [1, 1]} : vector<10x58xf32> to vector<10x1xf32>
    %164 = vector.broadcast %163 : vector<10x1xf32> to vector<10x256xf32>
    %165 = arith.mulf %164, %123 : vector<10x256xf32>
    %166 = vector.broadcast %162 : vector<10x1xf32> to vector<10x256xf32>
    %167 = arith.addf %166, %165 : vector<10x256xf32>
    %168 = vector.extract_strided_slice %10 {offsets = [0, 25], sizes = [10, 1], strides = [1, 1]} : vector<10x58xf32> to vector<10x1xf32>
    %169 = vector.broadcast %168 : vector<10x1xf32> to vector<10x256xf32>
    %170 = arith.mulf %169, %142 : vector<10x256xf32>
    %171 = arith.addf %167, %170 : vector<10x256xf32>
    %172 = vector.extract_strided_slice %10 {offsets = [0, 26], sizes = [10, 1], strides = [1, 1]} : vector<10x58xf32> to vector<10x1xf32>
    %173 = vector.broadcast %172 : vector<10x1xf32> to vector<10x256xf32>
    %174 = arith.mulf %173, %161 : vector<10x256xf32>
    %175 = arith.addf %171, %174 : vector<10x256xf32>
    %176 = vector.extract_strided_slice %10 {offsets = [0, 36], sizes = [10, 1], strides = [1, 1]} : vector<10x58xf32> to vector<10x1xf32>
    %177 = math.tanh %175 : vector<10x256xf32>
    %178 = vector.broadcast %176 : vector<10x1xf32> to vector<10x256xf32>
    %179 = arith.mulf %178, %177 : vector<10x256xf32>
    %180 = arith.addf %175, %179 : vector<10x256xf32>
    %181 = vector.extract_strided_slice %10 {offsets = [0, 34], sizes = [10, 1], strides = [1, 1]} : vector<10x58xf32> to vector<10x1xf32>
    %182 = vector.extract_strided_slice %10 {offsets = [0, 27], sizes = [10, 1], strides = [1, 1]} : vector<10x58xf32> to vector<10x1xf32>
    %183 = vector.broadcast %182 : vector<10x1xf32> to vector<10x256xf32>
    %184 = arith.mulf %183, %123 : vector<10x256xf32>
    %185 = vector.broadcast %181 : vector<10x1xf32> to vector<10x256xf32>
    %186 = arith.addf %185, %184 : vector<10x256xf32>
    %187 = vector.extract_strided_slice %10 {offsets = [0, 28], sizes = [10, 1], strides = [1, 1]} : vector<10x58xf32> to vector<10x1xf32>
    %188 = vector.broadcast %187 : vector<10x1xf32> to vector<10x256xf32>
    %189 = arith.mulf %188, %142 : vector<10x256xf32>
    %190 = arith.addf %186, %189 : vector<10x256xf32>
    %191 = vector.extract_strided_slice %10 {offsets = [0, 29], sizes = [10, 1], strides = [1, 1]} : vector<10x58xf32> to vector<10x1xf32>
    %192 = vector.broadcast %191 : vector<10x1xf32> to vector<10x256xf32>
    %193 = arith.mulf %192, %161 : vector<10x256xf32>
    %194 = arith.addf %190, %193 : vector<10x256xf32>
    %195 = vector.extract_strided_slice %10 {offsets = [0, 37], sizes = [10, 1], strides = [1, 1]} : vector<10x58xf32> to vector<10x1xf32>
    %196 = math.tanh %194 : vector<10x256xf32>
    %197 = vector.broadcast %195 : vector<10x1xf32> to vector<10x256xf32>
    %198 = arith.mulf %197, %196 : vector<10x256xf32>
    %199 = arith.addf %194, %198 : vector<10x256xf32>
    %200 = vector.extract_strided_slice %10 {offsets = [0, 35], sizes = [10, 1], strides = [1, 1]} : vector<10x58xf32> to vector<10x1xf32>
    %201 = vector.extract_strided_slice %10 {offsets = [0, 30], sizes = [10, 1], strides = [1, 1]} : vector<10x58xf32> to vector<10x1xf32>
    %202 = vector.broadcast %201 : vector<10x1xf32> to vector<10x256xf32>
    %203 = arith.mulf %202, %123 : vector<10x256xf32>
    %204 = vector.broadcast %200 : vector<10x1xf32> to vector<10x256xf32>
    %205 = arith.addf %204, %203 : vector<10x256xf32>
    %206 = vector.extract_strided_slice %10 {offsets = [0, 31], sizes = [10, 1], strides = [1, 1]} : vector<10x58xf32> to vector<10x1xf32>
    %207 = vector.broadcast %206 : vector<10x1xf32> to vector<10x256xf32>
    %208 = arith.mulf %207, %142 : vector<10x256xf32>
    %209 = arith.addf %205, %208 : vector<10x256xf32>
    %210 = vector.extract_strided_slice %10 {offsets = [0, 32], sizes = [10, 1], strides = [1, 1]} : vector<10x58xf32> to vector<10x1xf32>
    %211 = vector.broadcast %210 : vector<10x1xf32> to vector<10x256xf32>
    %212 = arith.mulf %211, %161 : vector<10x256xf32>
    %213 = arith.addf %209, %212 : vector<10x256xf32>
    %214 = vector.extract_strided_slice %10 {offsets = [0, 38], sizes = [10, 1], strides = [1, 1]} : vector<10x58xf32> to vector<10x1xf32>
    %215 = math.tanh %213 : vector<10x256xf32>
    %216 = vector.broadcast %214 : vector<10x1xf32> to vector<10x256xf32>
    %217 = arith.mulf %216, %215 : vector<10x256xf32>
    %218 = arith.addf %213, %217 : vector<10x256xf32>
    %219 = vector.extract_strided_slice %10 {offsets = [0, 48], sizes = [10, 1], strides = [1, 1]} : vector<10x58xf32> to vector<10x1xf32>
    %220 = vector.extract_strided_slice %10 {offsets = [0, 39], sizes = [10, 1], strides = [1, 1]} : vector<10x58xf32> to vector<10x1xf32>
    %221 = vector.broadcast %220 : vector<10x1xf32> to vector<10x256xf32>
    %222 = arith.mulf %221, %180 : vector<10x256xf32>
    %223 = vector.broadcast %219 : vector<10x1xf32> to vector<10x256xf32>
    %224 = arith.addf %223, %222 : vector<10x256xf32>
    %225 = vector.extract_strided_slice %10 {offsets = [0, 40], sizes = [10, 1], strides = [1, 1]} : vector<10x58xf32> to vector<10x1xf32>
    %226 = vector.broadcast %225 : vector<10x1xf32> to vector<10x256xf32>
    %227 = arith.mulf %226, %199 : vector<10x256xf32>
    %228 = arith.addf %224, %227 : vector<10x256xf32>
    %229 = vector.extract_strided_slice %10 {offsets = [0, 41], sizes = [10, 1], strides = [1, 1]} : vector<10x58xf32> to vector<10x1xf32>
    %230 = vector.broadcast %229 : vector<10x1xf32> to vector<10x256xf32>
    %231 = arith.mulf %230, %218 : vector<10x256xf32>
    %232 = arith.addf %228, %231 : vector<10x256xf32>
    %233 = vector.extract_strided_slice %10 {offsets = [0, 51], sizes = [10, 1], strides = [1, 1]} : vector<10x58xf32> to vector<10x1xf32>
    %234 = math.tanh %232 : vector<10x256xf32>
    %235 = vector.broadcast %233 : vector<10x1xf32> to vector<10x256xf32>
    %236 = arith.mulf %235, %234 : vector<10x256xf32>
    %237 = arith.addf %232, %236 : vector<10x256xf32>
    %238 = vector.extract_strided_slice %10 {offsets = [0, 49], sizes = [10, 1], strides = [1, 1]} : vector<10x58xf32> to vector<10x1xf32>
    %239 = vector.extract_strided_slice %10 {offsets = [0, 42], sizes = [10, 1], strides = [1, 1]} : vector<10x58xf32> to vector<10x1xf32>
    %240 = vector.broadcast %239 : vector<10x1xf32> to vector<10x256xf32>
    %241 = arith.mulf %240, %180 : vector<10x256xf32>
    %242 = vector.broadcast %238 : vector<10x1xf32> to vector<10x256xf32>
    %243 = arith.addf %242, %241 : vector<10x256xf32>
    %244 = vector.extract_strided_slice %10 {offsets = [0, 43], sizes = [10, 1], strides = [1, 1]} : vector<10x58xf32> to vector<10x1xf32>
    %245 = vector.broadcast %244 : vector<10x1xf32> to vector<10x256xf32>
    %246 = arith.mulf %245, %199 : vector<10x256xf32>
    %247 = arith.addf %243, %246 : vector<10x256xf32>
    %248 = vector.extract_strided_slice %10 {offsets = [0, 44], sizes = [10, 1], strides = [1, 1]} : vector<10x58xf32> to vector<10x1xf32>
    %249 = vector.broadcast %248 : vector<10x1xf32> to vector<10x256xf32>
    %250 = arith.mulf %249, %218 : vector<10x256xf32>
    %251 = arith.addf %247, %250 : vector<10x256xf32>
    %252 = vector.extract_strided_slice %10 {offsets = [0, 52], sizes = [10, 1], strides = [1, 1]} : vector<10x58xf32> to vector<10x1xf32>
    %253 = math.tanh %251 : vector<10x256xf32>
    %254 = vector.broadcast %252 : vector<10x1xf32> to vector<10x256xf32>
    %255 = arith.mulf %254, %253 : vector<10x256xf32>
    %256 = arith.addf %251, %255 : vector<10x256xf32>
    %257 = vector.extract_strided_slice %10 {offsets = [0, 50], sizes = [10, 1], strides = [1, 1]} : vector<10x58xf32> to vector<10x1xf32>
    %258 = vector.extract_strided_slice %10 {offsets = [0, 45], sizes = [10, 1], strides = [1, 1]} : vector<10x58xf32> to vector<10x1xf32>
    %259 = vector.broadcast %258 : vector<10x1xf32> to vector<10x256xf32>
    %260 = arith.mulf %259, %180 : vector<10x256xf32>
    %261 = vector.broadcast %257 : vector<10x1xf32> to vector<10x256xf32>
    %262 = arith.addf %261, %260 : vector<10x256xf32>
    %263 = vector.extract_strided_slice %10 {offsets = [0, 46], sizes = [10, 1], strides = [1, 1]} : vector<10x58xf32> to vector<10x1xf32>
    %264 = vector.broadcast %263 : vector<10x1xf32> to vector<10x256xf32>
    %265 = arith.mulf %264, %199 : vector<10x256xf32>
    %266 = arith.addf %262, %265 : vector<10x256xf32>
    %267 = vector.extract_strided_slice %10 {offsets = [0, 47], sizes = [10, 1], strides = [1, 1]} : vector<10x58xf32> to vector<10x1xf32>
    %268 = vector.broadcast %267 : vector<10x1xf32> to vector<10x256xf32>
    %269 = arith.mulf %268, %218 : vector<10x256xf32>
    %270 = arith.addf %266, %269 : vector<10x256xf32>
    %271 = vector.extract_strided_slice %10 {offsets = [0, 53], sizes = [10, 1], strides = [1, 1]} : vector<10x58xf32> to vector<10x1xf32>
    %272 = math.tanh %270 : vector<10x256xf32>
    %273 = vector.broadcast %271 : vector<10x1xf32> to vector<10x256xf32>
    %274 = arith.mulf %273, %272 : vector<10x256xf32>
    %275 = arith.addf %270, %274 : vector<10x256xf32>
    %276 = vector.extract_strided_slice %10 {offsets = [0, 57], sizes = [10, 1], strides = [1, 1]} : vector<10x58xf32> to vector<10x1xf32>
    %277 = vector.extract_strided_slice %10 {offsets = [0, 54], sizes = [10, 1], strides = [1, 1]} : vector<10x58xf32> to vector<10x1xf32>
    %278 = vector.broadcast %277 : vector<10x1xf32> to vector<10x256xf32>
    %279 = arith.mulf %278, %237 : vector<10x256xf32>
    %280 = vector.broadcast %276 : vector<10x1xf32> to vector<10x256xf32>
    %281 = arith.addf %280, %279 : vector<10x256xf32>
    %282 = vector.extract_strided_slice %10 {offsets = [0, 55], sizes = [10, 1], strides = [1, 1]} : vector<10x58xf32> to vector<10x1xf32>
    %283 = vector.broadcast %282 : vector<10x1xf32> to vector<10x256xf32>
    %284 = arith.mulf %283, %256 : vector<10x256xf32>
    %285 = arith.addf %281, %284 : vector<10x256xf32>
    %286 = vector.extract_strided_slice %10 {offsets = [0, 56], sizes = [10, 1], strides = [1, 1]} : vector<10x58xf32> to vector<10x1xf32>
    %287 = vector.broadcast %286 : vector<10x1xf32> to vector<10x256xf32>
    %288 = arith.mulf %287, %275 : vector<10x256xf32>
    %289 = arith.addf %285, %288 : vector<10x256xf32>
    %290 = vector.extract_strided_slice %289 {offsets = [0, 0], sizes = [10, 128], strides = [1, 1]} : vector<10x256xf32> to vector<10x128xf32>
    %291 = vector.extract_strided_slice %289 {offsets = [0, 128], sizes = [10, 128], strides = [1, 1]} : vector<10x256xf32> to vector<10x128xf32>
    %292 = arith.addf %290, %291 : vector<10x128xf32>
    %cst_40 = arith.constant 0.000000e+00 : f32
    %293 = vector.broadcast %cst_40 : f32 to vector<10x128xf32>
    %294 = arith.cmpf olt, %292, %293 : vector<10x128xf32>
    %cst_41 = arith.constant 0.000000e+00 : f32
    %295 = vector.broadcast %cst_41 : f32 to vector<10x128xf32>
    %296 = arith.cmpf ogt, %292, %295 : vector<10x128xf32>
    %cst_42 = arith.constant -1.000000e+00 : f32
    %cst_43 = arith.constant 0.000000e+00 : f32
    %297 = vector.broadcast %cst_42 : f32 to vector<10x128xf32>
    %298 = vector.broadcast %cst_43 : f32 to vector<10x128xf32>
    %299 = arith.select %296, %297, %298 : vector<10x128xi1>, vector<10x128xf32>
    %cst_44 = arith.constant 1.000000e+00 : f32
    %300 = vector.broadcast %cst_44 : f32 to vector<10x128xf32>
    %301 = arith.select %294, %300, %299 : vector<10x128xi1>, vector<10x128xf32>
    %302 = tpu.concatenate %301, %301 in 1 : vector<10x128xf32>, vector<10x128xf32> -> vector<10x256xf32>
    %303 = arith.mulf %302, %289 : vector<10x256xf32>
    %304 = arith.negf %303 : vector<10x256xf32>
    %305 = math.exp %304 : vector<10x256xf32>
    %cst_45 = arith.constant 1.000000e+00 : f32
    %306 = vector.broadcast %cst_45 : f32 to vector<10x256xf32>
    %307 = arith.addf %306, %305 : vector<10x256xf32>
    %308 = arith.divf %306, %307 : vector<10x256xf32>
    %309 = vector.extract_strided_slice %308 {offsets = [0, 128], sizes = [10, 128], strides = [1, 1]} : vector<10x256xf32> to vector<10x128xf32>
    %310 = vector.extract_strided_slice %308 {offsets = [0, 0], sizes = [10, 128], strides = [1, 1]} : vector<10x256xf32> to vector<10x128xf32>
    %311 = arith.subf %309, %310 : vector<10x128xf32>
    %312 = math.absf %311 : vector<10x128xf32>
    %cst_46 = arith.constant 9.99999971E-10 : f32
    %313 = vector.broadcast %cst_46 : f32 to vector<10x128xf32>
    %314 = arith.maximumf %312, %313 : vector<10x128xf32>
    %315 = math.log %314 : vector<10x128xf32>
    %cst_47 = arith.constant dense<0.000000e+00> : vector<128xf32>
    %316 = vector.multi_reduction <add>, %315, %cst_47 [0] : vector<10x128xf32> to vector<128xf32>
    %317 = vector.shape_cast %316 : vector<128xf32> to vector<1x128xf32>
    %cst_48 = arith.constant 0.000000e+00 : f32
    %318 = vector.broadcast %cst_48 : f32 to vector<1x128xf32>
    %319 = arith.subf %318, %317 : vector<1x128xf32>
    %c0_49 = arith.constant 0 : index
    %c0_50 = arith.constant 0 : index
    %320 = vector.load %arg15[%c0_49, %c0_50] : memref<8x256xf32, #tpu.memory_space<vmem>>, vector<8x128xf32>
    %c0_51 = arith.constant 0 : index
    %c0_52 = arith.constant 0 : index
    %c0_53 = arith.constant 0 : index
    %321 = vector.load %arg2[%c0_51, %c0_52, %c0_53] : memref<1x4x256xf32, #tpu.memory_space<vmem>>, vector<1x4x128xf32>
    %322 = vector.shape_cast %321 : vector<1x4x128xf32> to vector<4x128xf32>
    %323 = vector.broadcast %3 : vector<4x1xf32> to vector<4x128xf32>
    %324 = arith.addf %322, %323 : vector<4x128xf32>
    %325 = vector.broadcast %1 : vector<4x1xf32> to vector<4x128xf32>
    %326 = arith.mulf %324, %325 : vector<4x128xf32>
    %327 = vector.extract_strided_slice %320 {offsets = [0, 0], sizes = [4, 128], strides = [1, 1]} : vector<8x128xf32> to vector<4x128xf32>
    %328 = vector.extract_strided_slice %320 {offsets = [4, 0], sizes = [4, 128], strides = [1, 1]} : vector<8x128xf32> to vector<4x128xf32>
    %329 = arith.subf %326, %328 : vector<4x128xf32>
    %330 = math.roundeven %329 : vector<4x128xf32>
    %331 = arith.addf %330, %328 : vector<4x128xf32>
    %332 = arith.subf %331, %328 : vector<4x128xf32>
    %333 = math.absf %332 : vector<4x128xf32>
    %cst_54 = arith.constant 1.100000e-01 : f32
    %334 = vector.broadcast %cst_54 : f32 to vector<4x128xf32>
    %335 = arith.maximumf %327, %334 : vector<4x128xf32>
    %cst_55 = arith.constant 1.000000e+00 : f32
    %336 = vector.broadcast %cst_55 : f32 to vector<4x128xf32>
    %337 = arith.divf %336, %335 : vector<4x128xf32>
    %cst_56 = arith.constant 5.000000e-01 : f32
    %338 = vector.broadcast %cst_56 : f32 to vector<4x128xf32>
    %339 = arith.subf %338, %333 : vector<4x128xf32>
    %340 = arith.mulf %339, %337 : vector<4x128xf32>
    %cst_57 = arith.constant -5.000000e-01 : f32
    %341 = vector.broadcast %cst_57 : f32 to vector<4x128xf32>
    %342 = arith.subf %341, %333 : vector<4x128xf32>
    %343 = arith.mulf %342, %337 : vector<4x128xf32>
    %344 = tpu.concatenate %340, %343 in 0 : vector<4x128xf32>, vector<4x128xf32> -> vector<8x128xf32>
    %cst_58 = arith.constant 0.707106769 : f32
    %345 = vector.broadcast %cst_58 : f32 to vector<8x128xf32>
    %346 = arith.mulf %344, %345 : vector<8x128xf32>
    %cst_59 = arith.constant 0.000000e+00 : f32
    %347 = vector.broadcast %cst_59 : f32 to vector<8x128xf32>
    %348 = arith.cmpf olt, %346, %347 : vector<8x128xf32>
    %cst_60 = arith.constant -1.000000e+00 : f32
    %cst_61 = arith.constant 1.000000e+00 : f32
    %349 = vector.broadcast %cst_60 : f32 to vector<8x128xf32>
    %350 = vector.broadcast %cst_61 : f32 to vector<8x128xf32>
    %351 = arith.select %348, %349, %350 : vector<8x128xi1>, vector<8x128xf32>
    %352 = math.absf %346 : vector<8x128xf32>
    %cst_62 = arith.constant 0.327591091 : f32
    %353 = vector.broadcast %cst_62 : f32 to vector<8x128xf32>
    %354 = arith.mulf %353, %352 : vector<8x128xf32>
    %cst_63 = arith.constant 1.000000e+00 : f32
    %355 = vector.broadcast %cst_63 : f32 to vector<8x128xf32>
    %356 = arith.addf %355, %354 : vector<8x128xf32>
    %cst_64 = arith.constant 1.000000e+00 : f32
    %357 = vector.broadcast %cst_64 : f32 to vector<8x128xf32>
    %358 = arith.divf %357, %356 : vector<8x128xf32>
    %cst_65 = arith.constant 1.06140542 : f32
    %359 = vector.broadcast %cst_65 : f32 to vector<8x128xf32>
    %360 = arith.mulf %358, %359 : vector<8x128xf32>
    %cst_66 = arith.constant -1.45315206 : f32
    %361 = vector.broadcast %cst_66 : f32 to vector<8x128xf32>
    %362 = arith.addf %361, %360 : vector<8x128xf32>
    %363 = arith.mulf %358, %362 : vector<8x128xf32>
    %cst_67 = arith.constant 1.42141378 : f32
    %364 = vector.broadcast %cst_67 : f32 to vector<8x128xf32>
    %365 = arith.addf %364, %363 : vector<8x128xf32>
    %366 = arith.mulf %358, %365 : vector<8x128xf32>
    %cst_68 = arith.constant -0.284496725 : f32
    %367 = vector.broadcast %cst_68 : f32 to vector<8x128xf32>
    %368 = arith.addf %367, %366 : vector<8x128xf32>
    %369 = arith.mulf %358, %368 : vector<8x128xf32>
    %cst_69 = arith.constant 0.254829586 : f32
    %370 = vector.broadcast %cst_69 : f32 to vector<8x128xf32>
    %371 = arith.addf %370, %369 : vector<8x128xf32>
    %372 = arith.mulf %358, %371 : vector<8x128xf32>
    %cst_70 = arith.constant 0.000000e+00 : f32
    %373 = vector.broadcast %cst_70 : f32 to vector<8x128xf32>
    %374 = arith.subf %373, %352 : vector<8x128xf32>
    %375 = arith.mulf %374, %352 : vector<8x128xf32>
    %376 = math.exp %375 : vector<8x128xf32>
    %377 = arith.mulf %372, %376 : vector<8x128xf32>
    %cst_71 = arith.constant 1.000000e+00 : f32
    %378 = vector.broadcast %cst_71 : f32 to vector<8x128xf32>
    %379 = arith.subf %378, %377 : vector<8x128xf32>
    %380 = arith.mulf %351, %379 : vector<8x128xf32>
    %cst_72 = arith.constant 1.000000e+00 : f32
    %381 = vector.broadcast %cst_72 : f32 to vector<8x128xf32>
    %382 = arith.addf %381, %380 : vector<8x128xf32>
    %cst_73 = arith.constant 5.000000e-01 : f32
    %383 = vector.broadcast %cst_73 : f32 to vector<8x128xf32>
    %384 = arith.mulf %383, %382 : vector<8x128xf32>
    %385 = vector.extract_strided_slice %384 {offsets = [0, 0], sizes = [4, 128], strides = [1, 1]} : vector<8x128xf32> to vector<4x128xf32>
    %386 = vector.extract_strided_slice %384 {offsets = [4, 0], sizes = [4, 128], strides = [1, 1]} : vector<8x128xf32> to vector<4x128xf32>
    %387 = arith.subf %385, %386 : vector<4x128xf32>
    %cst_74 = arith.constant 9.99999971E-10 : f32
    %388 = vector.broadcast %cst_74 : f32 to vector<4x128xf32>
    %389 = arith.maximumf %387, %388 : vector<4x128xf32>
    %390 = math.log %389 : vector<4x128xf32>
    %cst_75 = arith.constant dense<0.000000e+00> : vector<128xf32>
    %391 = vector.multi_reduction <add>, %390, %cst_75 [0] : vector<4x128xf32> to vector<128xf32>
    %392 = vector.shape_cast %391 : vector<128xf32> to vector<1x128xf32>
    %cst_76 = arith.constant 0.000000e+00 : f32
    %393 = vector.broadcast %cst_76 : f32 to vector<1x128xf32>
    %394 = arith.subf %393, %392 : vector<1x128xf32>
    %395 = vector.broadcast %2 : vector<4x1xf32> to vector<4x128xf32>
    %396 = arith.mulf %331, %395 : vector<4x128xf32>
    %397 = vector.broadcast %3 : vector<4x1xf32> to vector<4x128xf32>
    %398 = arith.subf %396, %397 : vector<4x128xf32>
    %c0_77 = arith.constant 0 : index
    %c0_78 = arith.constant 0 : index
    %c0_79 = arith.constant 0 : index
    %399 = vector.load %arg12[%c0_77, %c0_78, %c0_79] : memref<1x4x256xf32, #tpu.memory_space<vmem>>, vector<1x4x128xf32>
    %400 = vector.shape_cast %399 : vector<1x4x128xf32> to vector<4x128xf32>
    %401 = vector.shape_cast %398 : vector<4x128xf32> to vector<1x4x128xf32>
    tpu.vector_store %arg12[%c0_77, %c0_78, %c0_79], %401 {strides = array<i32>} : memref<1x4x256xf32, #tpu.memory_space<vmem>>, vector<1x4x128xf32>,
    %402 = tpu.concatenate %319, %394 in 0 : vector<1x128xf32>, vector<1x128xf32> -> vector<2x128xf32>
    %c0_80 = arith.constant 0 : index
    %c0_81 = arith.constant 0 : index
    %c0_82 = arith.constant 0 : index
    %403 = vector.load %arg13[%c0_80, %c0_81, %c0_82] : memref<1x2x256xf32, #tpu.memory_space<vmem>>, vector<1x2x128xf32>
    %404 = vector.shape_cast %403 : vector<1x2x128xf32> to vector<2x128xf32>
    %405 = vector.shape_cast %402 : vector<2x128xf32> to vector<1x2x128xf32>
    tpu.vector_store %arg13[%c0_80, %c0_81, %c0_82], %405 {strides = array<i32>} : memref<1x2x256xf32, #tpu.memory_space<vmem>>, vector<1x2x128xf32>,
    %c0_83 = arith.constant 0 : index
    %c128 = arith.constant 128 : index
    %406 = vector.load %arg14[%c0_83, %c128] : memref<10x256xf32, #tpu.memory_space<vmem>>, vector<10x128xf32>
    %cst_84 = arith.constant 5.000000e-01 : f32
    %407 = vector.broadcast %cst_84 : f32 to vector<10x128xf32>
    %408 = arith.subf %406, %407 : vector<10x128xf32>
    %cst_85 = arith.constant 5.000000e-01 : f32
    %409 = vector.broadcast %cst_85 : f32 to vector<10x128xf32>
    %410 = arith.addf %406, %409 : vector<10x128xf32>
    %411 = tpu.concatenate %408, %410 in 1 : vector<10x128xf32>, vector<10x128xf32> -> vector<10x256xf32>
    %412 = vector.extract_strided_slice %10 {offsets = [0, 3], sizes = [10, 1], strides = [1, 1]} : vector<10x58xf32> to vector<10x1xf32>
    %413 = vector.extract_strided_slice %10 {offsets = [0, 0], sizes = [10, 1], strides = [1, 1]} : vector<10x58xf32> to vector<10x1xf32>
    %414 = vector.broadcast %413 : vector<10x1xf32> to vector<10x256xf32>
    %415 = arith.mulf %414, %411 : vector<10x256xf32>
    %416 = vector.broadcast %412 : vector<10x1xf32> to vector<10x256xf32>
    %417 = arith.addf %416, %415 : vector<10x256xf32>
    %418 = vector.extract_strided_slice %10 {offsets = [0, 6], sizes = [10, 1], strides = [1, 1]} : vector<10x58xf32> to vector<10x1xf32>
    %419 = math.tanh %417 : vector<10x256xf32>
    %420 = vector.broadcast %418 : vector<10x1xf32> to vector<10x256xf32>
    %421 = arith.mulf %420, %419 : vector<10x256xf32>
    %422 = arith.addf %417, %421 : vector<10x256xf32>
    %423 = vector.extract_strided_slice %10 {offsets = [0, 4], sizes = [10, 1], strides = [1, 1]} : vector<10x58xf32> to vector<10x1xf32>
    %424 = vector.extract_strided_slice %10 {offsets = [0, 1], sizes = [10, 1], strides = [1, 1]} : vector<10x58xf32> to vector<10x1xf32>
    %425 = vector.broadcast %424 : vector<10x1xf32> to vector<10x256xf32>
    %426 = arith.mulf %425, %411 : vector<10x256xf32>
    %427 = vector.broadcast %423 : vector<10x1xf32> to vector<10x256xf32>
    %428 = arith.addf %427, %426 : vector<10x256xf32>
    %429 = vector.extract_strided_slice %10 {offsets = [0, 7], sizes = [10, 1], strides = [1, 1]} : vector<10x58xf32> to vector<10x1xf32>
    %430 = math.tanh %428 : vector<10x256xf32>
    %431 = vector.broadcast %429 : vector<10x1xf32> to vector<10x256xf32>
    %432 = arith.mulf %431, %430 : vector<10x256xf32>
    %433 = arith.addf %428, %432 : vector<10x256xf32>
    %434 = vector.extract_strided_slice %10 {offsets = [0, 5], sizes = [10, 1], strides = [1, 1]} : vector<10x58xf32> to vector<10x1xf32>
    %435 = vector.extract_strided_slice %10 {offsets = [0, 2], sizes = [10, 1], strides = [1, 1]} : vector<10x58xf32> to vector<10x1xf32>
    %436 = vector.broadcast %435 : vector<10x1xf32> to vector<10x256xf32>
    %437 = arith.mulf %436, %411 : vector<10x256xf32>
    %438 = vector.broadcast %434 : vector<10x1xf32> to vector<10x256xf32>
    %439 = arith.addf %438, %437 : vector<10x256xf32>
    %440 = vector.extract_strided_slice %10 {offsets = [0, 8], sizes = [10, 1], strides = [1, 1]} : vector<10x58xf32> to vector<10x1xf32>
    %441 = math.tanh %439 : vector<10x256xf32>
    %442 = vector.broadcast %440 : vector<10x1xf32> to vector<10x256xf32>
    %443 = arith.mulf %442, %441 : vector<10x256xf32>
    %444 = arith.addf %439, %443 : vector<10x256xf32>
    %445 = vector.extract_strided_slice %10 {offsets = [0, 18], sizes = [10, 1], strides = [1, 1]} : vector<10x58xf32> to vector<10x1xf32>
    %446 = vector.extract_strided_slice %10 {offsets = [0, 9], sizes = [10, 1], strides = [1, 1]} : vector<10x58xf32> to vector<10x1xf32>
    %447 = vector.broadcast %446 : vector<10x1xf32> to vector<10x256xf32>
    %448 = arith.mulf %447, %422 : vector<10x256xf32>
    %449 = vector.broadcast %445 : vector<10x1xf32> to vector<10x256xf32>
    %450 = arith.addf %449, %448 : vector<10x256xf32>
    %451 = vector.extract_strided_slice %10 {offsets = [0, 10], sizes = [10, 1], strides = [1, 1]} : vector<10x58xf32> to vector<10x1xf32>
    %452 = vector.broadcast %451 : vector<10x1xf32> to vector<10x256xf32>
    %453 = arith.mulf %452, %433 : vector<10x256xf32>
    %454 = arith.addf %450, %453 : vector<10x256xf32>
    %455 = vector.extract_strided_slice %10 {offsets = [0, 11], sizes = [10, 1], strides = [1, 1]} : vector<10x58xf32> to vector<10x1xf32>
    %456 = vector.broadcast %455 : vector<10x1xf32> to vector<10x256xf32>
    %457 = arith.mulf %456, %444 : vector<10x256xf32>
    %458 = arith.addf %454, %457 : vector<10x256xf32>
    %459 = vector.extract_strided_slice %10 {offsets = [0, 21], sizes = [10, 1], strides = [1, 1]} : vector<10x58xf32> to vector<10x1xf32>
    %460 = math.tanh %458 : vector<10x256xf32>
    %461 = vector.broadcast %459 : vector<10x1xf32> to vector<10x256xf32>
    %462 = arith.mulf %461, %460 : vector<10x256xf32>
    %463 = arith.addf %458, %462 : vector<10x256xf32>
    %464 = vector.extract_strided_slice %10 {offsets = [0, 19], sizes = [10, 1], strides = [1, 1]} : vector<10x58xf32> to vector<10x1xf32>
    %465 = vector.extract_strided_slice %10 {offsets = [0, 12], sizes = [10, 1], strides = [1, 1]} : vector<10x58xf32> to vector<10x1xf32>
    %466 = vector.broadcast %465 : vector<10x1xf32> to vector<10x256xf32>
    %467 = arith.mulf %466, %422 : vector<10x256xf32>
    %468 = vector.broadcast %464 : vector<10x1xf32> to vector<10x256xf32>
    %469 = arith.addf %468, %467 : vector<10x256xf32>
    %470 = vector.extract_strided_slice %10 {offsets = [0, 13], sizes = [10, 1], strides = [1, 1]} : vector<10x58xf32> to vector<10x1xf32>
    %471 = vector.broadcast %470 : vector<10x1xf32> to vector<10x256xf32>
    %472 = arith.mulf %471, %433 : vector<10x256xf32>
    %473 = arith.addf %469, %472 : vector<10x256xf32>
    %474 = vector.extract_strided_slice %10 {offsets = [0, 14], sizes = [10, 1], strides = [1, 1]} : vector<10x58xf32> to vector<10x1xf32>
    %475 = vector.broadcast %474 : vector<10x1xf32> to vector<10x256xf32>
    %476 = arith.mulf %475, %444 : vector<10x256xf32>
    %477 = arith.addf %473, %476 : vector<10x256xf32>
    %478 = vector.extract_strided_slice %10 {offsets = [0, 22], sizes = [10, 1], strides = [1, 1]} : vector<10x58xf32> to vector<10x1xf32>
    %479 = math.tanh %477 : vector<10x256xf32>
    %480 = vector.broadcast %478 : vector<10x1xf32> to vector<10x256xf32>
    %481 = arith.mulf %480, %479 : vector<10x256xf32>
    %482 = arith.addf %477, %481 : vector<10x256xf32>
    %483 = vector.extract_strided_slice %10 {offsets = [0, 20], sizes = [10, 1], strides = [1, 1]} : vector<10x58xf32> to vector<10x1xf32>
    %484 = vector.extract_strided_slice %10 {offsets = [0, 15], sizes = [10, 1], strides = [1, 1]} : vector<10x58xf32> to vector<10x1xf32>
    %485 = vector.broadcast %484 : vector<10x1xf32> to vector<10x256xf32>
    %486 = arith.mulf %485, %422 : vector<10x256xf32>
    %487 = vector.broadcast %483 : vector<10x1xf32> to vector<10x256xf32>
    %488 = arith.addf %487, %486 : vector<10x256xf32>
    %489 = vector.extract_strided_slice %10 {offsets = [0, 16], sizes = [10, 1], strides = [1, 1]} : vector<10x58xf32> to vector<10x1xf32>
    %490 = vector.broadcast %489 : vector<10x1xf32> to vector<10x256xf32>
    %491 = arith.mulf %490, %433 : vector<10x256xf32>
    %492 = arith.addf %488, %491 : vector<10x256xf32>
    %493 = vector.extract_strided_slice %10 {offsets = [0, 17], sizes = [10, 1], strides = [1, 1]} : vector<10x58xf32> to vector<10x1xf32>
    %494 = vector.broadcast %493 : vector<10x1xf32> to vector<10x256xf32>
    %495 = arith.mulf %494, %444 : vector<10x256xf32>
    %496 = arith.addf %492, %495 : vector<10x256xf32>
    %497 = vector.extract_strided_slice %10 {offsets = [0, 23], sizes = [10, 1], strides = [1, 1]} : vector<10x58xf32> to vector<10x1xf32>
    %498 = math.tanh %496 : vector<10x256xf32>
    %499 = vector.broadcast %497 : vector<10x1xf32> to vector<10x256xf32>
    %500 = arith.mulf %499, %498 : vector<10x256xf32>
    %501 = arith.addf %496, %500 : vector<10x256xf32>
    %502 = vector.extract_strided_slice %10 {offsets = [0, 33], sizes = [10, 1], strides = [1, 1]} : vector<10x58xf32> to vector<10x1xf32>
    %503 = vector.extract_strided_slice %10 {offsets = [0, 24], sizes = [10, 1], strides = [1, 1]} : vector<10x58xf32> to vector<10x1xf32>
    %504 = vector.broadcast %503 : vector<10x1xf32> to vector<10x256xf32>
    %505 = arith.mulf %504, %463 : vector<10x256xf32>
    %506 = vector.broadcast %502 : vector<10x1xf32> to vector<10x256xf32>
    %507 = arith.addf %506, %505 : vector<10x256xf32>
    %508 = vector.extract_strided_slice %10 {offsets = [0, 25], sizes = [10, 1], strides = [1, 1]} : vector<10x58xf32> to vector<10x1xf32>
    %509 = vector.broadcast %508 : vector<10x1xf32> to vector<10x256xf32>
    %510 = arith.mulf %509, %482 : vector<10x256xf32>
    %511 = arith.addf %507, %510 : vector<10x256xf32>
    %512 = vector.extract_strided_slice %10 {offsets = [0, 26], sizes = [10, 1], strides = [1, 1]} : vector<10x58xf32> to vector<10x1xf32>
    %513 = vector.broadcast %512 : vector<10x1xf32> to vector<10x256xf32>
    %514 = arith.mulf %513, %501 : vector<10x256xf32>
    %515 = arith.addf %511, %514 : vector<10x256xf32>
    %516 = vector.extract_strided_slice %10 {offsets = [0, 36], sizes = [10, 1], strides = [1, 1]} : vector<10x58xf32> to vector<10x1xf32>
    %517 = math.tanh %515 : vector<10x256xf32>
    %518 = vector.broadcast %516 : vector<10x1xf32> to vector<10x256xf32>
    %519 = arith.mulf %518, %517 : vector<10x256xf32>
    %520 = arith.addf %515, %519 : vector<10x256xf32>
    %521 = vector.extract_strided_slice %10 {offsets = [0, 34], sizes = [10, 1], strides = [1, 1]} : vector<10x58xf32> to vector<10x1xf32>
    %522 = vector.extract_strided_slice %10 {offsets = [0, 27], sizes = [10, 1], strides = [1, 1]} : vector<10x58xf32> to vector<10x1xf32>
    %523 = vector.broadcast %522 : vector<10x1xf32> to vector<10x256xf32>
    %524 = arith.mulf %523, %463 : vector<10x256xf32>
    %525 = vector.broadcast %521 : vector<10x1xf32> to vector<10x256xf32>
    %526 = arith.addf %525, %524 : vector<10x256xf32>
    %527 = vector.extract_strided_slice %10 {offsets = [0, 28], sizes = [10, 1], strides = [1, 1]} : vector<10x58xf32> to vector<10x1xf32>
    %528 = vector.broadcast %527 : vector<10x1xf32> to vector<10x256xf32>
    %529 = arith.mulf %528, %482 : vector<10x256xf32>
    %530 = arith.addf %526, %529 : vector<10x256xf32>
    %531 = vector.extract_strided_slice %10 {offsets = [0, 29], sizes = [10, 1], strides = [1, 1]} : vector<10x58xf32> to vector<10x1xf32>
    %532 = vector.broadcast %531 : vector<10x1xf32> to vector<10x256xf32>
    %533 = arith.mulf %532, %501 : vector<10x256xf32>
    %534 = arith.addf %530, %533 : vector<10x256xf32>
    %535 = vector.extract_strided_slice %10 {offsets = [0, 37], sizes = [10, 1], strides = [1, 1]} : vector<10x58xf32> to vector<10x1xf32>
    %536 = math.tanh %534 : vector<10x256xf32>
    %537 = vector.broadcast %535 : vector<10x1xf32> to vector<10x256xf32>
    %538 = arith.mulf %537, %536 : vector<10x256xf32>
    %539 = arith.addf %534, %538 : vector<10x256xf32>
    %540 = vector.extract_strided_slice %10 {offsets = [0, 35], sizes = [10, 1], strides = [1, 1]} : vector<10x58xf32> to vector<10x1xf32>
    %541 = vector.extract_strided_slice %10 {offsets = [0, 30], sizes = [10, 1], strides = [1, 1]} : vector<10x58xf32> to vector<10x1xf32>
    %542 = vector.broadcast %541 : vector<10x1xf32> to vector<10x256xf32>
    %543 = arith.mulf %542, %463 : vector<10x256xf32>
    %544 = vector.broadcast %540 : vector<10x1xf32> to vector<10x256xf32>
    %545 = arith.addf %544, %543 : vector<10x256xf32>
    %546 = vector.extract_strided_slice %10 {offsets = [0, 31], sizes = [10, 1], strides = [1, 1]} : vector<10x58xf32> to vector<10x1xf32>
    %547 = vector.broadcast %546 : vector<10x1xf32> to vector<10x256xf32>
    %548 = arith.mulf %547, %482 : vector<10x256xf32>
    %549 = arith.addf %545, %548 : vector<10x256xf32>
    %550 = vector.extract_strided_slice %10 {offsets = [0, 32], sizes = [10, 1], strides = [1, 1]} : vector<10x58xf32> to vector<10x1xf32>
    %551 = vector.broadcast %550 : vector<10x1xf32> to vector<10x256xf32>
    %552 = arith.mulf %551, %501 : vector<10x256xf32>
    %553 = arith.addf %549, %552 : vector<10x256xf32>
    %554 = vector.extract_strided_slice %10 {offsets = [0, 38], sizes = [10, 1], strides = [1, 1]} : vector<10x58xf32> to vector<10x1xf32>
    %555 = math.tanh %553 : vector<10x256xf32>
    %556 = vector.broadcast %554 : vector<10x1xf32> to vector<10x256xf32>
    %557 = arith.mulf %556, %555 : vector<10x256xf32>
    %558 = arith.addf %553, %557 : vector<10x256xf32>
    %559 = vector.extract_strided_slice %10 {offsets = [0, 48], sizes = [10, 1], strides = [1, 1]} : vector<10x58xf32> to vector<10x1xf32>
    %560 = vector.extract_strided_slice %10 {offsets = [0, 39], sizes = [10, 1], strides = [1, 1]} : vector<10x58xf32> to vector<10x1xf32>
    %561 = vector.broadcast %560 : vector<10x1xf32> to vector<10x256xf32>
    %562 = arith.mulf %561, %520 : vector<10x256xf32>
    %563 = vector.broadcast %559 : vector<10x1xf32> to vector<10x256xf32>
    %564 = arith.addf %563, %562 : vector<10x256xf32>
    %565 = vector.extract_strided_slice %10 {offsets = [0, 40], sizes = [10, 1], strides = [1, 1]} : vector<10x58xf32> to vector<10x1xf32>
    %566 = vector.broadcast %565 : vector<10x1xf32> to vector<10x256xf32>
    %567 = arith.mulf %566, %539 : vector<10x256xf32>
    %568 = arith.addf %564, %567 : vector<10x256xf32>
    %569 = vector.extract_strided_slice %10 {offsets = [0, 41], sizes = [10, 1], strides = [1, 1]} : vector<10x58xf32> to vector<10x1xf32>
    %570 = vector.broadcast %569 : vector<10x1xf32> to vector<10x256xf32>
    %571 = arith.mulf %570, %558 : vector<10x256xf32>
    %572 = arith.addf %568, %571 : vector<10x256xf32>
    %573 = vector.extract_strided_slice %10 {offsets = [0, 51], sizes = [10, 1], strides = [1, 1]} : vector<10x58xf32> to vector<10x1xf32>
    %574 = math.tanh %572 : vector<10x256xf32>
    %575 = vector.broadcast %573 : vector<10x1xf32> to vector<10x256xf32>
    %576 = arith.mulf %575, %574 : vector<10x256xf32>
    %577 = arith.addf %572, %576 : vector<10x256xf32>
    %578 = vector.extract_strided_slice %10 {offsets = [0, 49], sizes = [10, 1], strides = [1, 1]} : vector<10x58xf32> to vector<10x1xf32>
    %579 = vector.extract_strided_slice %10 {offsets = [0, 42], sizes = [10, 1], strides = [1, 1]} : vector<10x58xf32> to vector<10x1xf32>
    %580 = vector.broadcast %579 : vector<10x1xf32> to vector<10x256xf32>
    %581 = arith.mulf %580, %520 : vector<10x256xf32>
    %582 = vector.broadcast %578 : vector<10x1xf32> to vector<10x256xf32>
    %583 = arith.addf %582, %581 : vector<10x256xf32>
    %584 = vector.extract_strided_slice %10 {offsets = [0, 43], sizes = [10, 1], strides = [1, 1]} : vector<10x58xf32> to vector<10x1xf32>
    %585 = vector.broadcast %584 : vector<10x1xf32> to vector<10x256xf32>
    %586 = arith.mulf %585, %539 : vector<10x256xf32>
    %587 = arith.addf %583, %586 : vector<10x256xf32>
    %588 = vector.extract_strided_slice %10 {offsets = [0, 44], sizes = [10, 1], strides = [1, 1]} : vector<10x58xf32> to vector<10x1xf32>
    %589 = vector.broadcast %588 : vector<10x1xf32> to vector<10x256xf32>
    %590 = arith.mulf %589, %558 : vector<10x256xf32>
    %591 = arith.addf %587, %590 : vector<10x256xf32>
    %592 = vector.extract_strided_slice %10 {offsets = [0, 52], sizes = [10, 1], strides = [1, 1]} : vector<10x58xf32> to vector<10x1xf32>
    %593 = math.tanh %591 : vector<10x256xf32>
    %594 = vector.broadcast %592 : vector<10x1xf32> to vector<10x256xf32>
    %595 = arith.mulf %594, %593 : vector<10x256xf32>
    %596 = arith.addf %591, %595 : vector<10x256xf32>
    %597 = vector.extract_strided_slice %10 {offsets = [0, 50], sizes = [10, 1], strides = [1, 1]} : vector<10x58xf32> to vector<10x1xf32>
    %598 = vector.extract_strided_slice %10 {offsets = [0, 45], sizes = [10, 1], strides = [1, 1]} : vector<10x58xf32> to vector<10x1xf32>
    %599 = vector.broadcast %598 : vector<10x1xf32> to vector<10x256xf32>
    %600 = arith.mulf %599, %520 : vector<10x256xf32>
    %601 = vector.broadcast %597 : vector<10x1xf32> to vector<10x256xf32>
    %602 = arith.addf %601, %600 : vector<10x256xf32>
    %603 = vector.extract_strided_slice %10 {offsets = [0, 46], sizes = [10, 1], strides = [1, 1]} : vector<10x58xf32> to vector<10x1xf32>
    %604 = vector.broadcast %603 : vector<10x1xf32> to vector<10x256xf32>
    %605 = arith.mulf %604, %539 : vector<10x256xf32>
    %606 = arith.addf %602, %605 : vector<10x256xf32>
    %607 = vector.extract_strided_slice %10 {offsets = [0, 47], sizes = [10, 1], strides = [1, 1]} : vector<10x58xf32> to vector<10x1xf32>
    %608 = vector.broadcast %607 : vector<10x1xf32> to vector<10x256xf32>
    %609 = arith.mulf %608, %558 : vector<10x256xf32>
    %610 = arith.addf %606, %609 : vector<10x256xf32>
    %611 = vector.extract_strided_slice %10 {offsets = [0, 53], sizes = [10, 1], strides = [1, 1]} : vector<10x58xf32> to vector<10x1xf32>
    %612 = math.tanh %610 : vector<10x256xf32>
    %613 = vector.broadcast %611 : vector<10x1xf32> to vector<10x256xf32>
    %614 = arith.mulf %613, %612 : vector<10x256xf32>
    %615 = arith.addf %610, %614 : vector<10x256xf32>
    %616 = vector.extract_strided_slice %10 {offsets = [0, 57], sizes = [10, 1], strides = [1, 1]} : vector<10x58xf32> to vector<10x1xf32>
    %617 = vector.extract_strided_slice %10 {offsets = [0, 54], sizes = [10, 1], strides = [1, 1]} : vector<10x58xf32> to vector<10x1xf32>
    %618 = vector.broadcast %617 : vector<10x1xf32> to vector<10x256xf32>
    %619 = arith.mulf %618, %577 : vector<10x256xf32>
    %620 = vector.broadcast %616 : vector<10x1xf32> to vector<10x256xf32>
    %621 = arith.addf %620, %619 : vector<10x256xf32>
    %622 = vector.extract_strided_slice %10 {offsets = [0, 55], sizes = [10, 1], strides = [1, 1]} : vector<10x58xf32> to vector<10x1xf32>
    %623 = vector.broadcast %622 : vector<10x1xf32> to vector<10x256xf32>
    %624 = arith.mulf %623, %596 : vector<10x256xf32>
    %625 = arith.addf %621, %624 : vector<10x256xf32>
    %626 = vector.extract_strided_slice %10 {offsets = [0, 56], sizes = [10, 1], strides = [1, 1]} : vector<10x58xf32> to vector<10x1xf32>
    %627 = vector.broadcast %626 : vector<10x1xf32> to vector<10x256xf32>
    %628 = arith.mulf %627, %615 : vector<10x256xf32>
    %629 = arith.addf %625, %628 : vector<10x256xf32>
    %630 = vector.extract_strided_slice %629 {offsets = [0, 0], sizes = [10, 128], strides = [1, 1]} : vector<10x256xf32> to vector<10x128xf32>
    %631 = vector.extract_strided_slice %629 {offsets = [0, 128], sizes = [10, 128], strides = [1, 1]} : vector<10x256xf32> to vector<10x128xf32>
    %632 = arith.addf %630, %631 : vector<10x128xf32>
    %cst_86 = arith.constant 0.000000e+00 : f32
    %633 = vector.broadcast %cst_86 : f32 to vector<10x128xf32>
    %634 = arith.cmpf olt, %632, %633 : vector<10x128xf32>
    %cst_87 = arith.constant 0.000000e+00 : f32
    %635 = vector.broadcast %cst_87 : f32 to vector<10x128xf32>
    %636 = arith.cmpf ogt, %632, %635 : vector<10x128xf32>
    %cst_88 = arith.constant -1.000000e+00 : f32
    %cst_89 = arith.constant 0.000000e+00 : f32
    %637 = vector.broadcast %cst_88 : f32 to vector<10x128xf32>
    %638 = vector.broadcast %cst_89 : f32 to vector<10x128xf32>
    %639 = arith.select %636, %637, %638 : vector<10x128xi1>, vector<10x128xf32>
    %cst_90 = arith.constant 1.000000e+00 : f32
    %640 = vector.broadcast %cst_90 : f32 to vector<10x128xf32>
    %641 = arith.select %634, %640, %639 : vector<10x128xi1>, vector<10x128xf32>
    %642 = tpu.concatenate %641, %641 in 1 : vector<10x128xf32>, vector<10x128xf32> -> vector<10x256xf32>
    %643 = arith.mulf %642, %629 : vector<10x256xf32>
    %644 = arith.negf %643 : vector<10x256xf32>
    %645 = math.exp %644 : vector<10x256xf32>
    %cst_91 = arith.constant 1.000000e+00 : f32
    %646 = vector.broadcast %cst_91 : f32 to vector<10x256xf32>
    %647 = arith.addf %646, %645 : vector<10x256xf32>
    %648 = arith.divf %646, %647 : vector<10x256xf32>
    %649 = vector.extract_strided_slice %648 {offsets = [0, 128], sizes = [10, 128], strides = [1, 1]} : vector<10x256xf32> to vector<10x128xf32>
    %650 = vector.extract_strided_slice %648 {offsets = [0, 0], sizes = [10, 128], strides = [1, 1]} : vector<10x256xf32> to vector<10x128xf32>
    %651 = arith.subf %649, %650 : vector<10x128xf32>
    %652 = math.absf %651 : vector<10x128xf32>
    %cst_92 = arith.constant 9.99999971E-10 : f32
    %653 = vector.broadcast %cst_92 : f32 to vector<10x128xf32>
    %654 = arith.maximumf %652, %653 : vector<10x128xf32>
    %655 = math.log %654 : vector<10x128xf32>
    %cst_93 = arith.constant dense<0.000000e+00> : vector<128xf32>
    %656 = vector.multi_reduction <add>, %655, %cst_93 [0] : vector<10x128xf32> to vector<128xf32>
    %657 = vector.shape_cast %656 : vector<128xf32> to vector<1x128xf32>
    %cst_94 = arith.constant 0.000000e+00 : f32
    %658 = vector.broadcast %cst_94 : f32 to vector<1x128xf32>
    %659 = arith.subf %658, %657 : vector<1x128xf32>
    %c0_95 = arith.constant 0 : index
    %c128_96 = arith.constant 128 : index
    %660 = vector.load %arg15[%c0_95, %c128_96] : memref<8x256xf32, #tpu.memory_space<vmem>>, vector<8x128xf32>
    %c0_97 = arith.constant 0 : index
    %c0_98 = arith.constant 0 : index
    %c128_99 = arith.constant 128 : index
    %661 = vector.load %arg2[%c0_97, %c0_98, %c128_99] : memref<1x4x256xf32, #tpu.memory_space<vmem>>, vector<1x4x128xf32>
    %662 = vector.shape_cast %661 : vector<1x4x128xf32> to vector<4x128xf32>
    %663 = vector.broadcast %3 : vector<4x1xf32> to vector<4x128xf32>
    %664 = arith.addf %662, %663 : vector<4x128xf32>
    %665 = vector.broadcast %1 : vector<4x1xf32> to vector<4x128xf32>
    %666 = arith.mulf %664, %665 : vector<4x128xf32>
    %667 = vector.extract_strided_slice %660 {offsets = [0, 0], sizes = [4, 128], strides = [1, 1]} : vector<8x128xf32> to vector<4x128xf32>
    %668 = vector.extract_strided_slice %660 {offsets = [4, 0], sizes = [4, 128], strides = [1, 1]} : vector<8x128xf32> to vector<4x128xf32>
    %669 = arith.subf %666, %668 : vector<4x128xf32>
    %670 = math.roundeven %669 : vector<4x128xf32>
    %671 = arith.addf %670, %668 : vector<4x128xf32>
    %672 = arith.subf %671, %668 : vector<4x128xf32>
    %673 = math.absf %672 : vector<4x128xf32>
    %cst_100 = arith.constant 1.100000e-01 : f32
    %674 = vector.broadcast %cst_100 : f32 to vector<4x128xf32>
    %675 = arith.maximumf %667, %674 : vector<4x128xf32>
    %cst_101 = arith.constant 1.000000e+00 : f32
    %676 = vector.broadcast %cst_101 : f32 to vector<4x128xf32>
    %677 = arith.divf %676, %675 : vector<4x128xf32>
    %cst_102 = arith.constant 5.000000e-01 : f32
    %678 = vector.broadcast %cst_102 : f32 to vector<4x128xf32>
    %679 = arith.subf %678, %673 : vector<4x128xf32>
    %680 = arith.mulf %679, %677 : vector<4x128xf32>
    %cst_103 = arith.constant -5.000000e-01 : f32
    %681 = vector.broadcast %cst_103 : f32 to vector<4x128xf32>
    %682 = arith.subf %681, %673 : vector<4x128xf32>
    %683 = arith.mulf %682, %677 : vector<4x128xf32>
    %684 = tpu.concatenate %680, %683 in 0 : vector<4x128xf32>, vector<4x128xf32> -> vector<8x128xf32>
    %cst_104 = arith.constant 0.707106769 : f32
    %685 = vector.broadcast %cst_104 : f32 to vector<8x128xf32>
    %686 = arith.mulf %684, %685 : vector<8x128xf32>
    %cst_105 = arith.constant 0.000000e+00 : f32
    %687 = vector.broadcast %cst_105 : f32 to vector<8x128xf32>
    %688 = arith.cmpf olt, %686, %687 : vector<8x128xf32>
    %cst_106 = arith.constant -1.000000e+00 : f32
    %cst_107 = arith.constant 1.000000e+00 : f32
    %689 = vector.broadcast %cst_106 : f32 to vector<8x128xf32>
    %690 = vector.broadcast %cst_107 : f32 to vector<8x128xf32>
    %691 = arith.select %688, %689, %690 : vector<8x128xi1>, vector<8x128xf32>
    %692 = math.absf %686 : vector<8x128xf32>
    %cst_108 = arith.constant 0.327591091 : f32
    %693 = vector.broadcast %cst_108 : f32 to vector<8x128xf32>
    %694 = arith.mulf %693, %692 : vector<8x128xf32>
    %cst_109 = arith.constant 1.000000e+00 : f32
    %695 = vector.broadcast %cst_109 : f32 to vector<8x128xf32>
    %696 = arith.addf %695, %694 : vector<8x128xf32>
    %cst_110 = arith.constant 1.000000e+00 : f32
    %697 = vector.broadcast %cst_110 : f32 to vector<8x128xf32>
    %698 = arith.divf %697, %696 : vector<8x128xf32>
    %cst_111 = arith.constant 1.06140542 : f32
    %699 = vector.broadcast %cst_111 : f32 to vector<8x128xf32>
    %700 = arith.mulf %698, %699 : vector<8x128xf32>
    %cst_112 = arith.constant -1.45315206 : f32
    %701 = vector.broadcast %cst_112 : f32 to vector<8x128xf32>
    %702 = arith.addf %701, %700 : vector<8x128xf32>
    %703 = arith.mulf %698, %702 : vector<8x128xf32>
    %cst_113 = arith.constant 1.42141378 : f32
    %704 = vector.broadcast %cst_113 : f32 to vector<8x128xf32>
    %705 = arith.addf %704, %703 : vector<8x128xf32>
    %706 = arith.mulf %698, %705 : vector<8x128xf32>
    %cst_114 = arith.constant -0.284496725 : f32
    %707 = vector.broadcast %cst_114 : f32 to vector<8x128xf32>
    %708 = arith.addf %707, %706 : vector<8x128xf32>
    %709 = arith.mulf %698, %708 : vector<8x128xf32>
    %cst_115 = arith.constant 0.254829586 : f32
    %710 = vector.broadcast %cst_115 : f32 to vector<8x128xf32>
    %711 = arith.addf %710, %709 : vector<8x128xf32>
    %712 = arith.mulf %698, %711 : vector<8x128xf32>
    %cst_116 = arith.constant 0.000000e+00 : f32
    %713 = vector.broadcast %cst_116 : f32 to vector<8x128xf32>
    %714 = arith.subf %713, %692 : vector<8x128xf32>
    %715 = arith.mulf %714, %692 : vector<8x128xf32>
    %716 = math.exp %715 : vector<8x128xf32>
    %717 = arith.mulf %712, %716 : vector<8x128xf32>
    %cst_117 = arith.constant 1.000000e+00 : f32
    %718 = vector.broadcast %cst_117 : f32 to vector<8x128xf32>
    %719 = arith.subf %718, %717 : vector<8x128xf32>
    %720 = arith.mulf %691, %719 : vector<8x128xf32>
    %cst_118 = arith.constant 1.000000e+00 : f32
    %721 = vector.broadcast %cst_118 : f32 to vector<8x128xf32>
    %722 = arith.addf %721, %720 : vector<8x128xf32>
    %cst_119 = arith.constant 5.000000e-01 : f32
    %723 = vector.broadcast %cst_119 : f32 to vector<8x128xf32>
    %724 = arith.mulf %723, %722 : vector<8x128xf32>
    %725 = vector.extract_strided_slice %724 {offsets = [0, 0], sizes = [4, 128], strides = [1, 1]} : vector<8x128xf32> to vector<4x128xf32>
    %726 = vector.extract_strided_slice %724 {offsets = [4, 0], sizes = [4, 128], strides = [1, 1]} : vector<8x128xf32> to vector<4x128xf32>
    %727 = arith.subf %725, %726 : vector<4x128xf32>
    %cst_120 = arith.constant 9.99999971E-10 : f32
    %728 = vector.broadcast %cst_120 : f32 to vector<4x128xf32>
    %729 = arith.maximumf %727, %728 : vector<4x128xf32>
    %730 = math.log %729 : vector<4x128xf32>
    %cst_121 = arith.constant dense<0.000000e+00> : vector<128xf32>
    %731 = vector.multi_reduction <add>, %730, %cst_121 [0] : vector<4x128xf32> to vector<128xf32>
    %732 = vector.shape_cast %731 : vector<128xf32> to vector<1x128xf32>
    %cst_122 = arith.constant 0.000000e+00 : f32
    %733 = vector.broadcast %cst_122 : f32 to vector<1x128xf32>
    %734 = arith.subf %733, %732 : vector<1x128xf32>
    %735 = vector.broadcast %2 : vector<4x1xf32> to vector<4x128xf32>
    %736 = arith.mulf %671, %735 : vector<4x128xf32>
    %737 = vector.broadcast %3 : vector<4x1xf32> to vector<4x128xf32>
    %738 = arith.subf %736, %737 : vector<4x128xf32>
    %c0_123 = arith.constant 0 : index
    %c0_124 = arith.constant 0 : index
    %c128_125 = arith.constant 128 : index
    %739 = vector.load %arg12[%c0_123, %c0_124, %c128_125] : memref<1x4x256xf32, #tpu.memory_space<vmem>>, vector<1x4x128xf32>
    %740 = vector.shape_cast %739 : vector<1x4x128xf32> to vector<4x128xf32>
    %741 = vector.shape_cast %738 : vector<4x128xf32> to vector<1x4x128xf32>
    tpu.vector_store %arg12[%c0_123, %c0_124, %c128_125], %741 {strides = array<i32>} : memref<1x4x256xf32, #tpu.memory_space<vmem>>, vector<1x4x128xf32>,
    %742 = tpu.concatenate %659, %734 in 0 : vector<1x128xf32>, vector<1x128xf32> -> vector<2x128xf32>
    %c0_126 = arith.constant 0 : index
    %c0_127 = arith.constant 0 : index
    %c128_128 = arith.constant 128 : index
    %743 = vector.load %arg13[%c0_126, %c0_127, %c128_128] : memref<1x2x256xf32, #tpu.memory_space<vmem>>, vector<1x2x128xf32>
    %744 = vector.shape_cast %743 : vector<1x2x128xf32> to vector<2x128xf32>
    %745 = vector.shape_cast %742 : vector<2x128xf32> to vector<1x2x128xf32>
    tpu.vector_store %arg13[%c0_126, %c0_127, %c128_128], %745 {strides = array<i32>} : memref<1x2x256xf32, #tpu.memory_space<vmem>>, vector<1x2x128xf32>,
    return
  }
  func.func @transform_0(%arg0: i32, %arg1: i32) -> (i32, i32, i32) {
    %c0_i32 = arith.constant 0 : i32
    %c0_i32_0 = arith.constant 0 : i32
    return %arg0, %c0_i32, %arg1 : i32, i32, i32
  }
  func.func @transform_1(%arg0: i32, %arg1: i32) -> (i32, i32) {
    %c0_i32 = arith.constant 0 : i32
    %c0_i32_0 = arith.constant 0 : i32
    %c0_i32_1 = arith.constant 0 : i32
    return %c0_i32, %c0_i32_0 : i32, i32
  }
  func.func @transform_2(%arg0: i32, %arg1: i32) -> (i32, i32) {
    %c0_i32 = arith.constant 0 : i32
    %c0_i32_0 = arith.constant 0 : i32
    %c0_i32_1 = arith.constant 0 : i32
    return %c0_i32, %c0_i32_0 : i32, i32
  }
  func.func @transform_3(%arg0: i32, %arg1: i32) -> (i32, i32) {
    %c0_i32 = arith.constant 0 : i32
    %c0_i32_0 = arith.constant 0 : i32
    %c0_i32_1 = arith.constant 0 : i32
    return %c0_i32, %c0_i32_0 : i32, i32
  }
  func.func @transform_4(%arg0: i32, %arg1: i32) -> (i32, i32) {
    %c0_i32 = arith.constant 0 : i32
    %c0_i32_0 = arith.constant 0 : i32
    %c0_i32_1 = arith.constant 0 : i32
    return %c0_i32, %c0_i32_0 : i32, i32
  }
  func.func @transform_5(%arg0: i32, %arg1: i32) -> (i32, i32) {
    %c0_i32 = arith.constant 0 : i32
    %c0_i32_0 = arith.constant 0 : i32
    %c0_i32_1 = arith.constant 0 : i32
    return %c0_i32, %c0_i32_0 : i32, i32
  }
  func.func @transform_6(%arg0: i32, %arg1: i32) -> (i32, i32) {
    %c0_i32 = arith.constant 0 : i32
    %c0_i32_0 = arith.constant 0 : i32
    %c0_i32_1 = arith.constant 0 : i32
    return %c0_i32, %c0_i32_0 : i32, i32
  }
  func.func @transform_7(%arg0: i32, %arg1: i32) -> (i32, i32) {
    %c0_i32 = arith.constant 0 : i32
    %c0_i32_0 = arith.constant 0 : i32
    %c0_i32_1 = arith.constant 0 : i32
    return %c0_i32, %c0_i32_0 : i32, i32
  }
  func.func @transform_8(%arg0: i32, %arg1: i32) -> (i32, i32) {
    %c0_i32 = arith.constant 0 : i32
    %c0_i32_0 = arith.constant 0 : i32
    %c0_i32_1 = arith.constant 0 : i32
    return %c0_i32, %c0_i32_0 : i32, i32
  }
  func.func @transform_9(%arg0: i32, %arg1: i32) -> (i32, i32) {
    %c0_i32 = arith.constant 0 : i32
    %c0_i32_0 = arith.constant 0 : i32
    %c0_i32_1 = arith.constant 0 : i32
    return %c0_i32, %c0_i32_0 : i32, i32
  }
  func.func @transform_10(%arg0: i32, %arg1: i32) -> (i32, i32, i32) {
    %c0_i32 = arith.constant 0 : i32
    %c0_i32_0 = arith.constant 0 : i32
    return %arg0, %c0_i32, %arg1 : i32, i32, i32
  }
  func.func @transform_11(%arg0: i32, %arg1: i32) -> (i32, i32, i32) {
    %c0_i32 = arith.constant 0 : i32
    %c0_i32_0 = arith.constant 0 : i32
    return %arg0, %c0_i32, %arg1 : i32, i32, i32
  }
}

</mosaic_0001>

<bundles_post_ra>
// kernel: tpu_custom_call.1
= control target key start
LH: loop header
LB: loop body
LE: loop exit
PB: predicated region body
PF: predicated region fallthrough
CT: control target
= control target key end

     0   :  { %s9103_s0 = inlined_call_operand.hbm [shape: f32[2,4,256], index: 0, kind: input, shape index: {}]   ;;  %s9104_s1 = inlined_call_operand.vmem [shape: bf16[256,4], index: 1, kind: input, shape index: {}]   ;;  %s9105_s2 = inlined_call_operand.vmem [shape: bf16[256,256], index: 2, kind: input, shape index: {}]   ;;  %s9106_s3 = inlined_call_operand.vmem [shape: bf16[10,256], index: 3, kind: input, shape index: {}]   ;;  %s9107_s4 = inlined_call_operand.vmem [shape: bf16[256,10], index: 4, kind: input, shape index: {}]   ;;  %s9108_s5 = inlined_call_operand.vmem [shape: bf16[256,256], index: 5, kind: input, shape index: {}]   ;;  %s9109_s6 = inlined_call_operand.hbm [shape: bf16[8,256], index: 6, kind: input, shape index: {}]   ;;  %s9110_s7 = inlined_call_operand.vmem [shape: f32[256,4], index: 7, kind: input, shape index: {}]   ;;  %s9111_s8 = inlined_call_operand.vmem [shape: f32[4,5], index: 8, kind: input, shape index: {}]   ;;  %s9112_s9 = inlined_call_operand.hbm [shape: f32[10,60], index: 9, kind: input, shape index: {}]   ;;  %s9113_s10 = inlined_call_operand.hbm [shape: f32[2,4,256], index: 10, kind: output, shape index: {0}]   ;;  %s9114_s11 = inlined_call_operand.hbm [shape: f32[2,2,256], index: 11, kind: output, shape index: {1}]  }
   0x1   :  { %9493 = sst [smem:[#allocation191_spill]] %s9109_s6 }
   0x2   :  { %9494 = sst [smem:[#allocation192_spill]] %s9112_s9 }
   0x3   :  { %9495 = sst [smem:[#allocation193_spill]] %s9114_s11 }
   0x4   :  { %17 = vsyncpa [#allocation5], 0 }
   0x5   :  { %19 = vsyncpa [#allocation5 + $0x1], 0 }
   0x6   :  { %20 = vsyncpa [#allocation8], 0 }
   0x7   :  { %21 = vsyncpa [#allocation6], 0 }
   0x8   :  { %23 = vsyncpa [#allocation6 + $0x1], 0 }
   0x9   :  { %24 = vsyncpa [#allocation12], 0 }
   0xa   :  { %26 = vsyncpa [#allocation12 + $0x1], 0  ;;  %s6051_s17 = smov 0   ;;  %s6053_s18 = smov 0  }
   0xb   :  { %s6055_s19 = smov 0   ;;  %s6057_s20 = smov 0  }
   0xc   :  { %s6059_s21 = smov 0   ;;  %s6061_s22 = smov 0  }
   0xd LB: > { %9496 = sst [smem:[#allocation17_spill]] %s5898_s17  ;;  %s4831_s23 = sadd.s32 4294967295, %s5918_s22   ;;  %s5918_s22 = sphi %s6061_s22, %s32_s22   ;;  %s5914_s21 = sphi %s6059_s21, %s10019_s21   ;;  %s5910_s20 = sphi %s6057_s20, %s10018_s20   ;;  %s5906_s19 = sphi %s6055_s19, %s10022_s19   ;;  %s5902_s18 = sphi %s6053_s18, %s10021_s18   ;;  %s5898_s17 = sphi %s6051_s17, %s10020_s17  }
   0xe   : > { %9497 = sst [smem:[#allocation18_spill]] %s5914_s21  ;;  %s4832_s24 = sadd.s32 4294967294, %s5918_s22  }
   0xf   : > { %p66_p0 = scmp.ne.s32.totalorder %s5902_s18, %s5898_s17  ;;  %p6085_p1 = scmp.eq.s32.totalorder %s4831_s23, 0 }
  0x10   : > { %p6089_p2 = scmp.eq.s32.totalorder %s4831_s23, 1  ;;  %p287_p3 = scmp.eq.s32.totalorder %s4832_s24, 1 }
  0x11   : > { %s9498_s25 = scalar_select %p6085_p1, 1, 0 }
  0x12   : > { %s9499_s26 = scalar_select %p6089_p2, 1, 0 }
  0x13   : > { %p6095_p4 = por %p6085_p1, %p66_p0  ;;  %p4833_p5 = scmp.ge.s32.totalorder %s5918_s22, 1 }
  0x14   : > { %p6100_p6 = por %p287_p3, %p66_p0  ;;  %p322_p7 = scmp.lt.s32.totalorder %s5918_s22, 3 }
  0x15   : > { %s9500_s27 = scalar_select %p6095_p4, 1, 0 }
  0x16   : > { %s9501_s28 = scalar_select %p6100_p6, 1, 0 }
  0x17   : > { %p6105_p8 = pnand %p4833_p5, %p322_p7  ;;  %s5920_s30 = smov [#allocation7]  }
  0x18   : > { %9502 = sst [smem:[#allocation19_spill]] %s9501_s28  ;;  %s350_s12 = sshll.u32 %s5920_s30, 4  ;;  %s351_s12 = int_to_ptr.vmem [resolvable:$true] %s350_s12 }
  0x19   : > { %s9503_s29 = scalar_select %p6105_p8, 1, 0 }
  0x1a   : > { %p5065_p10 = pneg %p6105_p8  ;;  %s5921_s13 = smov [#allocation9]  }
  0x1b   : > { %s366_s14 = sshll.u32 %s5921_s13, 4  ;;  %s5735_s16 = scalar_lea.vmem %s351_s12, 128  ;;  %s367_s14 = int_to_ptr.vmem [resolvable:$true] %s366_s14 }
  0x1c   : > { %p6114_p11 = pnand %p5065_p10, %p6085_p1  ;;  %p5736_p13 = scmp.ne.s32.totalorder %s351_s12, %s5735_s16 }
  0x1d   : > { %p5743_p5 = scmp.lt.s32.totalorder %s351_s12, %s351_s12  ;;  %p5744_p7 = scmp.lt.s32.totalorder %s5735_s16, %s5735_s16 }
  0x1e   : > { %p5726_p12 = pneg %p6114_p11 }
  0x1f   : > { %p5745_p9 = por %p5744_p7, %p5743_p5 }
  0x20   : > { %p5738_p0 = pnand %p5736_p13, %p5726_p12 }
  0x22   : > { %p5739_p3 = pneg %p5738_p0 }
  0x24   : > { %p5746_p6 = pnand %p5745_p9, %p5739_p3 }
  0x26   : > { %5749 = shalt.err (!%p5746_p6)
}
  0x27   : > { %s9505_s6 = sld [smem:[#allocation191_spill]]  ;;  %s5761_s30 = scalar_lea.vmem %s367_s14, 256 }
  0x28   : > { %p5762_p10 = scmp.ne.s32.totalorder %s367_s14, %s5761_s30  ;;  %p5769_p13 = scmp.lt.s32.totalorder %s367_s14, %s367_s14 }
  0x29   : > { %p5770_p0 = scmp.lt.s32.totalorder %s5761_s30, %s5761_s30 }
  0x2a   : > { %p5764_p1 = pnand %p5762_p10, %p5726_p12 }
  0x2b   : > { %p5771_p8 = por %p5770_p0, %p5769_p13 }
  0x2c   : > { %p5765_p4 = pneg %p5764_p1 }
  0x2d   : > { %5068 = dma.hbm_to_vmem [thread:$0]  (!%p6114_p11), %s9505_s6, 128, %s351_s12, [#allocation8]  }
  0x2e   : > { %p5772_p2 = pnand %p5771_p8, %p5765_p4 }
  0x30   : > { %5775 = shalt.err (!%p5772_p2)
}
  0x31   : > { %s5922_s13 = smov 128   ;;  %s5923_s12 = smov 8  }
  0x32   : > { %s9506_s9 = sld [smem:[#allocation192_spill]]  ;;  %s44_s24 = sadd.s32 1, %s5914_s21 }
  0x33   : > { %s53_s30 = sadd.s32 1, %s5906_s19  ;;  %p46_p1 = scmp.ge.s32.totalorder %s44_s24, 2 }
  0x34   : > { %p60_p2 = scmp.ne.s32.totalorder %s5906_s19, %s5902_s18  ;;  %p61_p4 = scmp.eq.s32.totalorder %s5918_s22, 0 }
  0x35   : > { %p5085_p6 = scmp.lt.s32.totalorder %s5918_s22, 2  ;;  %s10024_s24 = smov (%p46_p1, %s44_s24), 0 }
  0x36   : > { %9507 = sst [smem:[#allocation20_spill]] %s10024_s24  ;;  %p62_p8 = por %p61_p4, %p60_p2 }
  0x37   : > { %p9508_p9 = scmp.ne.s32.totalorder %s9499_s26, 0  ;;  %s48_s15 = ssub.s32 %s5914_s21, %s10024_s24 }
  0x38   : > { %5071 = dma.hbm_to_vmem [thread:$0]  (!%p6114_p11), %s9506_s9, 256, %s367_s14, [#allocation8], %s5922_s13, %s5922_s13, %s5923_s12  }
  0x39   : > { %p6146_p12 = por %p9508_p9, %p60_p2  ;;  %s380_s16 = sand.u32 1, %s5906_s19  }
  0x3a   : > { %p51_p3 = scmp.eq.s32.totalorder %s48_s15, 0  ;;  %s4837_s14 = sshll.u32 %s380_s16, 3 }
  0x3b   : > { %s5000_s13 = sshll.u32 %s5914_s21, 7  ;;  %s384_s17 = scalar_lea.vmem [#allocation4], %s4837_s14 }
  0x3c   : > { %s6155_s12 = scalar_select %p51_p3, %s5906_s19, %s53_s30  }
  0x3d   : > { %s392_s28 = scalar_lea.hbm %s9103_s0, %s5000_s13  ;;  %s394_s11 = sshll.u32 %s384_s17, 4  ;;  %s395_s11 = int_to_ptr.vmem [resolvable:$true] %s394_s11 }
  0x3e   : > { %p6162_p11 = pnand %p5085_p6, %p62_p8  ;;  %s381_s24 = scalar_lea.sflag [#allocation5], %s380_s16 }
  0x3f   : > { %s5789_s15 = scalar_lea.vmem %s395_s11, 128  ;;  %s5924_s30 = smov [#allocation4]  }
  0x40   : > { %p5778_p5 = pneg %p6162_p11  ;;  %p5790_p7 = scmp.ne.s32.totalorder %s395_s11, %s5789_s15 }
  0x41   : > { %s5794_s21 = sshll.u32 %s5924_s30, 4  ;;  %s5795_s21 = int_to_ptr.vmem [resolvable:$false] %s5794_s21 }
  0x42   : > { %p5792_p10 = pnand %p5790_p7, %p5778_p5  ;;  %s5796_s9 = scalar_lea.vmem %s5795_s21, 256 }
  0x43   : > { %p5797_p0 = scmp.lt.s32.totalorder %s395_s11, %s5795_s21  ;;  %p5798_p1 = scmp.lt.s32.totalorder %s5796_s9, %s5789_s15 }
  0x44   : > { %p5793_p13 = pneg %p5792_p10 }
  0x45   : > { %p5799_p2 = por %p5798_p1, %p5797_p0 }
  0x47   : > { %p5800_p4 = pnand %p5799_p2, %p5793_p13 }
  0x49   : > { %5803 = shalt.err (!%p5800_p4)
}
  0x4a   : > { %5075 = dma.hbm_to_vmem [thread:$0]  (!%p6162_p11), %s392_s28, 128, %s395_s11, %s381_s24  }
  0x4b   : > { %p9511_p6 = scmp.ne.s32.totalorder %s9503_s29, 0 }
  0x4d   : > { %403 = sbr.rel (%p9511_p6) target bundleno = 2217 (0x8a9), region = 60 }
  0x52   : > { %s6173_s17 = sand.u32 1, %s5902_s18   ;;  %p9512_p8 = scmp.ne.s32.totalorder %s9500_s27, 0 }
  0x53   : > { %s4841_s16 = sshll.u32 %s6173_s17, 3  ;;  %s406_s14 = scalar_lea.sflag [#allocation5], %s6173_s17 }
  0x54   : > { %s6179_s21 = scalar_lea.vmem [#allocation4], %s4841_s16 }
  0x55   : > { %5881 = dma.done.wait (%p9512_p8), %s406_s14, 128  }
  0x56   : > { %5883 = vsyncadd (%p9512_p8), %s406_s14, 4294967168  ;;  %p9513_p9 = scmp.ne.s32.totalorder %s9498_s25, 0 }
  0x58   : > { %5885 = dma.done.wait (%p9513_p9), [#allocation8], 384  }
  0x59   : > { %5887 = vsyncadd (%p9513_p9), [#allocation8], 4294966912  ;;  %v9125_v0 = vmov 2   ;;  %v9127_v1 = vmov 0   ;;  %v465_v2 = vld [vmem:[%s9111_s8] sm:$0xf]  ;;  %v482_v29 = vlaneseq }
  0x5a   : > { %5205 = vset.pattern.permute.xlu0 %v9125_v0  ;;  %996 = vmatprep.mubr.bf16.mxu0 %v9127_v1  ;;  %v6199_v3 = vld [vmem:[%s9110_s7 + $0x68] sm:$0xff]  ;;  %v6204_v4 = vld [vmem:[%s9110_s7 + $0x58] sm:$0xff]  ;;  %v6264_v14 = vld [vmem:[%s9110_s7 + $0x70] sm:$0xff]  ;;  %v5927_v27 = vmov 839922192   ;;  %vm957_vm0 = vcmask 1041408  }
  0x5b   : > { %5207 = vset.pattern.permute.xlu1 %v9127_v1  ;;  %477 = vperm.xlu0 %5205, %v465_v2   ;;  %v6210_v5 = vld [vmem:[%s9110_s7 + $0x48] sm:$0xff]  ;;  %v6216_v6 = vld [vmem:[%s9110_s7 + $0x38] sm:$0xff]  ;;  %v6288_v18 = vld [vmem:[%s9110_s7 + $0x60] sm:$0xff]  ;;  %v480_v28 = vunpack.c.l.s4 %v5927_v27  ;;  %v483_v31 = vshrl.u32 %v482_v29, 7  ;;  %vm908_vm1 = vcmask 31744   ;;  %s5938_s11 = smov 127  }
  0x5c   : > { %9514 = vst [vmem:[#allocation21_spill] sm:$0xff] %v6210_v5  ;;  %9515 = vst [vmem:[#allocation22_spill] sm:$0xff] %v6216_v6  ;;  %v6222_v7 = vld [vmem:[%s9110_s7 + $0x28] sm:$0xff]  ;;  %v6228_v8 = vld [vmem:[%s9110_s7 + $0x18] sm:$0xff]  ;;  %740 = vperm.xlu1 %5207, %v6264_v14   ;;  %vm471_vm2 = vcmask 1043456   ;;  %vm2172_vm7 = vcmask 1044480  }
  0x5d   : > { %9516 = vst [vmem:[#allocation23_spill] sm:$0xff] %v6222_v7  ;;  %9517 = vst [vmem:[#allocation24_spill] sm:$0xff] %v6228_v8  ;;  %v6234_v9 = vld [vmem:[%s9110_s7 + $0x8] sm:$0xff]  ;;  %v6240_v10 = vld [vmem:[%s9110_s7 + $0xf8] sm:$0xff]  ;;  %v481_v30 = vunpack.c.0.s8 %v480_v28  ;;  %vm2123_vm8 = vcmask 80896   ;;  %s453_s24 = scalar_lea.vmem [#allocation10], %s4841_s16 }
  0x5e   : > { %9518 = vst [vmem:[#allocation25_spill] sm:$0xff] %v6234_v9  ;;  %9519 = vst [vmem:[#allocation26_spill] sm:$0xff] %v6240_v10  ;;  %v6246_v11 = vld [vmem:[%s9110_s7 + $0xe8] sm:$0xff]  ;;  %v6252_v12 = vld [vmem:[%s9110_s7 + $0xd8] sm:$0xff]  ;;  %s4677_s13 = sshll.u32 %s453_s24, 4  ;;  %s4656_s16 = scalar_lea.sflag [#allocation6], %s6173_s17  ;;  %s9018_s13 = int_to_ptr.vmem [resolvable:$true] %s4677_s13 }
  0x5f   : > { %5206 = vset.pattern.permute.xlu0 %v9127_v1  ;;  %9520 = vst [vmem:[#allocation27_spill] sm:$0xff] %v6246_v11  ;;  %9521 = vst [vmem:[#allocation28_spill] sm:$0xff] %v6252_v12  ;;  %v6258_v13 = vld [vmem:[%s9110_s7 + $0xc8] sm:$0xff]  ;;  %v6271_v15 = vld [vmem:[%s9110_s7 + $0xb8] sm:$0xff]  ;;  %v484_v34 = vsub.s32 %v481_v30, %v483_v31  ;;  %s5804_s30 = scalar_lea.vmem %s9018_s13, 128  ;;  %s5988_s9 = smov [#allocation10]  }
  0x60   : > { %489 = vperm.xlu0 %5206, %v465_v2   ;;  %9522 = vst [vmem:[#allocation29_spill] sm:$0xff] %v6258_v13  ;;  %9523 = vst [vmem:[#allocation30_spill] sm:$0xff] %v6271_v15  ;;  %v6277_v16 = vld [vmem:[%s9110_s7 + $0x78] sm:$0xff]  ;;  %v6282_v17 = vld [vmem:[%s9110_s7 + $0xa8] sm:$0xff]  ;;  %p5805_p3 = scmp.ne.s32.totalorder %s9018_s13, %s5804_s30  ;;  %s5808_s14 = sshll.u32 %s5988_s9, 4  ;;  %s5809_s14 = int_to_ptr.vmem [resolvable:$false] %s5808_s14 }
  0x61   : > { %9524 = vst [vmem:[#allocation31_spill] sm:$0xff] %v6277_v16  ;;  %9525 = vst [vmem:[#allocation32_spill] sm:$0xff] %v6282_v17  ;;  %745 = vperm.xlu1 %5207, %v6277_v16   ;;  %v6294_v19 = vld [vmem:[%s9110_s7 + $0x98] sm:$0xff]  ;;  %v6301_v20 = vld [vmem:[%s9110_s7 + $0x50] sm:$0xff]  ;;  %p5811_p7 = scmp.lt.s32.totalorder %s9018_s13, %s5809_s14 }
  0x62   : > { %9526 = vst [vmem:[#allocation33_spill] sm:$0xff] %v6294_v19  ;;  %9527 = vst [vmem:[#allocation34_spill] sm:$0xff] %v6301_v20  ;;  %v6306_v21 = vld [vmem:[%s9110_s7 + $0x88] sm:$0xff]  ;;  %v6312_v22 = vld [vmem:[%s9110_s7 + $0x40] sm:$0xff]  ;;  %p5806_p11 = pnand %p5805_p3, %p6146_p12 }
  0x63   : > { %9528 = vst [vmem:[#allocation35_spill] sm:$0xff] %v6306_v21  ;;  %9529 = vst [vmem:[#allocation36_spill] sm:$0xff] %v6312_v22  ;;  %v6319_v23 = vld [vmem:[%s9110_s7 + $0x30] sm:$0xff]  ;;  %v6325_v24 = vld [vmem:[%s9110_s7 + $0x20] sm:$0xff] }
  0x64   : > { %735 = vperm.xlu0 %5206, %v6199_v3   ;;  %9530 = vst [vmem:[#allocation37_spill] sm:$0xff] %v6319_v23  ;;  %9531 = vst [vmem:[#allocation38_spill] sm:$0xff] %v6325_v24  ;;  %v6331_v25 = vld [vmem:[%s9110_s7 + $0x10] sm:$0xff]  ;;  %v6337_v26 = vld [vmem:[%s9110_s7] sm:$0xff]  ;;  %p5807_p5 = pneg %p5806_p11 }
  0x65   : > { %730 = vperm.xlu1 %5207, %v6288_v18   ;;  %9532 = vst [vmem:[#allocation39_spill] sm:$0xff] %v6331_v25  ;;  %9533 = vst [vmem:[#allocation40_spill] sm:$0xff] %v6337_v26  ;;  %v6343_v32 = vld [vmem:[%s9110_s7 + $0xf0] sm:$0xff]  ;;  %v6349_v33 = vld [vmem:[%s9110_s7 + $0xe0] sm:$0xff] }
  0x66   : > { %9534 = vst [vmem:[#allocation41_spill] sm:$0xff] %v6343_v32  ;;  %9535 = vst [vmem:[#allocation42_spill] sm:$0xff] %v6349_v33  ;;  %v6358_v37 = vld [vmem:[%s9110_s7 + $0xd0] sm:$0xff]  ;;  %v475_v38 = vld [vmem:[%s6179_s21] sm:$0xff] }
  0x67   : > { %9537 = vst [vmem:[#allocation44_spill] sm:$0xff] %v6358_v37  ;;  %v6365_v39 = vld [vmem:[%s9110_s7 + $0xc0] sm:$0xff]  ;;  %v6374_v46 = vld [vmem:[%s9110_s7 + $0xb0] sm:$0xff]  ;;  %v5314_v53 = vld [vmem:[%s9104_s1 + $0x8] sm:$0xff]  }
  0x68   : > { %725 = vperm.xlu0 %5206, %v6204_v4   ;;  %9538 = vst [vmem:[#allocation45_spill] sm:$0xff] %v6365_v39  ;;  %9540 = vst [vmem:[#allocation47_spill] sm:$0xff] %v6374_v46  ;;  %v6380_v48 = vld [vmem:[%s9110_s7 + $0xa0] sm:$0xff]  ;;  %v6391_v51 = vld [vmem:[%s9110_s7 + $0x90] sm:$0xff] }
  0x69   : > { %720 = vperm.xlu1 %5207, %v6301_v20   ;;  %9541 = vst [vmem:[#allocation48_spill] sm:$0xff] %v6380_v48  ;;  %v5313_v50 = vld [vmem:[%s9104_s1] sm:$0xff]   ;;  %9542 = vst [vmem:[#allocation49_spill] sm:$0xff] %v6391_v51  ;;  %v5315_v54 = vld [vmem:[%s9104_s1 + $0x10] sm:$0xff]  }
  0x6a   : > { %v6399_v52 = vld [vmem:[%s9110_s7 + $0x80] sm:$0xff]  ;;  %v5316_v55 = vld [vmem:[%s9104_s1 + $0x18] sm:$0xff]   ;;  %v5318_v57 = vld [vmem:[%s9104_s1 + $0x28] sm:$0xff]  }
  0x6b   : > { %9543 = vst [vmem:[#allocation50_spill] sm:$0xff] %v6399_v52  ;;  %v5317_v56 = vld [vmem:[%s9104_s1 + $0x20] sm:$0xff]   ;;  %v5319_v58 = vld [vmem:[%s9104_s1 + $0x30] sm:$0xff]   ;;  %v5320_v59 = vld [vmem:[%s9104_s1 + $0x38] sm:$0xff]  }
  0x6c   : > { %715 = vperm.xlu0 %5206, %v6210_v5   ;;  %v5321_v60 = vld [vmem:[%s9104_s1 + $0x40] sm:$0xff]   ;;  %v5322_v61 = vld [vmem:[%s9104_s1 + $0x48] sm:$0xff]   ;;  %v5323_v62 = vld [vmem:[%s9104_s1 + $0x50] sm:$0xff]  }
  0x6d   : > { %710 = vperm.xlu1 %5207, %v6312_v22   ;;  %v5324_v63 = vld [vmem:[%s9104_s1 + $0x58] sm:$0xff]   ;;  %v5325_v2 = vld [vmem:[%s9104_s1 + $0x60] sm:$0xff]   ;;  %v5326_v27 = vld [vmem:[%s9104_s1 + $0x68] sm:$0xff]  }
  0x6e   : > { %v5327_v28 = vld [vmem:[%s9104_s1 + $0x70] sm:$0xff]   ;;  %v5328_v29 = vld [vmem:[%s9104_s1 + $0x78] sm:$0xff]  }
  0x70   : > { %705 = vperm.xlu0 %5206, %v6216_v6  }
  0x71   : > { %700 = vperm.xlu1 %5207, %v6319_v23  }
  0x74   : > { %695 = vperm.xlu0 %5206, %v6222_v7  }
  0x75   : > { %690 = vperm.xlu1 %5207, %v6325_v24  }
  0x78   : > { %685 = vperm.xlu0 %5206, %v6228_v8  }
  0x79   : > { %680 = vperm.xlu1 %5207, %v6331_v25  }
  0x7c   : > { %675 = vperm.xlu0 %5206, %v6234_v9  }
  0x7d   : > { %670 = vperm.xlu1 %5207, %v6337_v26  }
  0x80   : > { %825 = vperm.xlu0 %5206, %v6240_v10  }
  0x81   : > { %820 = vperm.xlu1 %5207, %v6343_v32  }
  0x84   : > { %815 = vperm.xlu0 %5206, %v6246_v11  }
  0x85   : > { %810 = vperm.xlu1 %5207, %v6349_v33  }
  0x88   : > { %805 = vperm.xlu0 %5206, %v6252_v12  }
  0x89   : > { %800 = vperm.xlu1 %5207, %v6358_v37  }
  0x8c   : > { %795 = vperm.xlu0 %5206, %v6258_v13  }
  0x8d   : > { %790 = vperm.xlu1 %5207, %v6365_v39  }
  0x90   : > { %785 = vperm.xlu0 %5206, %v6271_v15  }
  0x91   : > { %780 = vperm.xlu1 %5207, %v6374_v46  }
  0x94   : > { %775 = vperm.xlu0 %5206, %v6282_v17  }
  0x95   : > { %770 = vperm.xlu1 %5207, %v6380_v48  }
  0x98   : > { %765 = vperm.xlu0 %5206, %v6294_v19  }
  0x99   : > { %760 = vperm.xlu1 %5207, %v6391_v51  }
  0x9c   : > { %755 = vperm.xlu0 %5206, %v6306_v21  }
  0x9d   : > { %750 = vperm.xlu1 %5207, %v6399_v52  }
  0xd6   : > { %v6352_v35 = vpop.permute.xlu0 %477 }
  0xd7   : > { %9536 = vst [vmem:[#allocation43_spill] sm:$0xff] %v6352_v35  ;;  %v485_v36 = vrot.slane %v6352_v35, %v484_v34  ;;  %v6476_v30 = vpop.permute.xlu1 %740 }
  0xd9   : > { %v487_v42 = vadd.f32 %v485_v36, %v475_v38 }
  0xdb   : > { %v6367_v40 = vpop.permute.xlu0 %489 }
  0xdc   : > { %9539 = vst [vmem:[#allocation46_spill] sm:$0xff] %v6367_v40  ;;  %v497_v41 = vrot.slane %v6367_v40, %v484_v34  ;;  %v6478_v31 = vpop.permute.xlu1 %745 }
  0xde   : > { %v499_v43 = vmul.f32 %v497_v41, %v487_v42 }
  0xdf   : > { %v6482_v36 = vpop.permute.xlu0 %735 }
  0xe0   : > { %v664_v44 = vcombine.high %v499_v43, %v499_v43  ;;  %v666_v45 = vpack.c.bf16 %v499_v43, %v499_v43  ;;  %v6480_v34 = vpop.permute.xlu1 %730 }
  0xe2   : > { %v667_v47 = vpack.c.bf16 %v664_v44, %v664_v44  ;;  %v959_v49 = vsel %vm957_vm0, %v666_v45, 0 }
  0xe3   : > { %v6486_v41 = vpop.permute.xlu0 %725 }
  0xe4   : > { %4862 = vmatprep.subr.msk.bf16.mxu0 %vm957_vm0, %v667_v47  ;;  %v6484_v38 = vpop.permute.xlu1 %720 }
  0xe5   : > { %979 = vmatpush1.bf16.msra.mxu0 %v959_v49 }
  0xe7   : > { %v6490_v43 = vpop.permute.xlu0 %715 }
  0xe8   : > { %4863 = vmatmul.mubr.msk.bf16.vlgmr.msra.gmra.mxu0 %vm908_vm1, %v5313_v50  ;;  %v6488_v42 = vpop.permute.xlu1 %710 }
  0xe9   : > { %1006 = vmatprep.mubr.bf16.mxu0 %v9127_v1 }
  0xeb   : > { %v6494_v45 = vpop.permute.xlu0 %705 }
  0xec   : > { %v6492_v44 = vpop.permute.xlu1 %700 }
  0xef   : > { %v6498_v49 = vpop.permute.xlu0 %695 }
  0xf0   : > { %4864 = vmatmul.mubr.msk.bf16.gmra.mxu0 %vm908_vm1, %v5314_v53  ;;  %v6496_v47 = vpop.permute.xlu1 %690 }
  0xf1   : > { %1016 = vmatprep.mubr.bf16.mxu0 %v9127_v1 }
  0xf3   : > { %v6502_v53 = vpop.permute.xlu0 %685 }
  0xf4   : > { %v6500_v50 = vpop.permute.xlu1 %680 }
  0xf8   : > { %4865 = vmatmul.mubr.msk.bf16.gmra.mxu0 %vm908_vm1, %v5315_v54  ;;  %v9124_v54 = vmov 1  }
  0xf9   : > { %1026 = vmatprep.mubr.bf16.mxu0 %v9127_v1  ;;  %5208 = vset.pattern.permute.xlu1 %v9124_v54 }
  0xfa   : > { %5209 = vset.pattern.permute.xlu0 %v9124_v54  ;;  %1310 = vperm.xlu1 %5208, %v6264_v14  }
  0xfb   : > { %1314 = vperm.xlu0 %5209, %v6277_v16  }
  0xfe   : > { %1302 = vperm.xlu1 %5208, %v6288_v18  }
  0xff   : > { %1294 = vperm.xlu0 %5209, %v6301_v20  }
 0x100   : > { %4866 = vmatmul.mubr.msk.bf16.gmra.mxu0 %vm908_vm1, %v5316_v55  ;;  %v6506_v55 = vpop.permute.xlu1 %670 }
 0x101   : > { %1036 = vmatprep.mubr.bf16.mxu0 %v9127_v1 }
 0x102   : > { %1306 = vperm.xlu1 %5208, %v6199_v3  }
 0x103   : > { %1286 = vperm.xlu0 %5209, %v6312_v22  }
 0x106   : > { %1298 = vperm.xlu1 %5208, %v6204_v4  }
 0x107   : > { %1278 = vperm.xlu0 %5209, %v6319_v23  }
 0x108   : > { %4867 = vmatmul.mubr.msk.bf16.gmra.mxu0 %vm908_vm1, %v5317_v56 }
 0x109   : > { %1046 = vmatprep.mubr.bf16.mxu0 %v9127_v1 }
 0x10a   : > { %1290 = vperm.xlu1 %5208, %v6210_v5  }
 0x10b   : > { %1270 = vperm.xlu0 %5209, %v6325_v24  }
 0x10e   : > { %1282 = vperm.xlu1 %5208, %v6216_v6  }
 0x10f   : > { %1262 = vperm.xlu0 %5209, %v6331_v25   ;;  %v5331_v25 = vld [vmem:[%s9105_s2 + $0x4] ss:$8 sps:$4 sm:$0xff]  }
 0x110   : > { %4868 = vmatmul.mubr.msk.bf16.gmra.mxu0 %vm908_vm1, %v5318_v57  ;;  %1573 = vmatprep.mubr.bf16.mxu1 %v5331_v25 }
 0x111   : > { %1056 = vmatprep.mubr.bf16.mxu0 %v9127_v1 }
 0x112   : > { %1274 = vperm.xlu1 %5208, %v6222_v7  }
 0x113   : > { %1254 = vperm.xlu0 %5209, %v6337_v26  }
 0x116   : > { %1266 = vperm.xlu1 %5208, %v6228_v8  }
 0x117   : > { %1374 = vperm.xlu0 %5209, %v6343_v32  }
 0x118   : > { %4869 = vmatmul.mubr.msk.bf16.gmra.mxu0 %vm908_vm1, %v5319_v58 }
 0x119   : > { %1066 = vmatprep.mubr.bf16.mxu0 %v9127_v1 }
 0x11a   : > { %1258 = vperm.xlu1 %5208, %v6234_v9  }
 0x11b   : > { %1366 = vperm.xlu0 %5209, %v6349_v33  }
 0x11e   : > { %1378 = vperm.xlu1 %5208, %v6240_v10  }
 0x11f   : > { %1358 = vperm.xlu0 %5209, %v6358_v37  }
 0x120   : > { %4870 = vmatmul.mubr.msk.bf16.gmra.mxu0 %vm908_vm1, %v5320_v59  ;;  %v6513_v59 = vpop.permute.xlu0 %675 }
 0x121   : > { %1076 = vmatprep.mubr.bf16.mxu0 %v9127_v1 }
 0x122   : > { %1370 = vperm.xlu1 %5208, %v6246_v11  }
 0x123   : > { %1350 = vperm.xlu0 %5209, %v6365_v39  }
 0x126   : > { %1362 = vperm.xlu1 %5208, %v6252_v12  }
 0x127   : > { %1342 = vperm.xlu0 %5209, %v6374_v46  }
 0x128   : > { %4871 = vmatmul.mubr.msk.bf16.gmra.mxu0 %vm908_vm1, %v5321_v60 }
 0x129   : > { %1086 = vmatprep.mubr.bf16.mxu0 %v9127_v1 }
 0x12a   : > { %1354 = vperm.xlu1 %5208, %v6258_v13  }
 0x12b   : > { %1334 = vperm.xlu0 %5209, %v6380_v48  }
 0x12e   : > { %1346 = vperm.xlu1 %5208, %v6271_v15  }
 0x12f   : > { %1326 = vperm.xlu0 %5209, %v6391_v51  }
 0x130   : > { %4872 = vmatmul.mubr.msk.bf16.gmra.mxu0 %vm908_vm1, %v5322_v61 }
 0x131   : > { %1096 = vmatprep.mubr.bf16.mxu0 %v9127_v1 }
 0x132   : > { %1338 = vperm.xlu1 %5208, %v6282_v17  }
 0x133   : > { %1318 = vperm.xlu0 %5209, %v6399_v52  }
 0x136   : > { %1330 = vperm.xlu1 %5208, %v6294_v19  }
 0x138   : > { %4873 = vmatmul.mubr.msk.bf16.gmra.mxu0 %vm908_vm1, %v5323_v62 }
 0x139   : > { %1106 = vmatprep.mubr.bf16.mxu0 %v9127_v1 }
 0x13a   : > { %1322 = vperm.xlu1 %5208, %v6306_v21  }
 0x140   : > { %4874 = vmatmul.mubr.msk.bf16.gmra.mxu0 %vm908_vm1, %v5324_v63 }
 0x141   : > { %1116 = vmatprep.mubr.bf16.mxu0 %v9127_v1 }
 0x148   : > { %4875 = vmatmul.mubr.msk.bf16.gmra.mxu0 %vm908_vm1, %v5325_v2 }
 0x149   : > { %1126 = vmatprep.mubr.bf16.mxu0 %v9127_v1 }
 0x150   : > { %4876 = vmatmul.mubr.msk.bf16.gmra.mxu0 %vm908_vm1, %v5326_v27 }
 0x151   : > { %1136 = vmatprep.mubr.bf16.mxu0 %v9127_v1 }
 0x158   : > { %4877 = vmatmul.mubr.msk.bf16.gmra.mxu0 %vm908_vm1, %v5327_v28 }
 0x159   : > { %1146 = vmatprep.mubr.bf16.mxu0 %v9127_v1 }
 0x160   : > { %4878 = vmatmul.mubr.msk.bf16.gmra.mxu0 %vm908_vm1, %v5328_v29 }
 0x1a8   : > { %v998_v56 = vpop.f32.mrf.mxu0 }
 0x1a9   : > { %v999_v58 = vadd.f32 %v998_v56, %v6506_v55 }
 0x1aa   : > { %v6510_v57 = vpop.f32.mrf.mxu0 }
 0x1ab   : > { %v1157_v63 = vmax.f32 %v999_v58, 0.0 }
 0x1ac   : > { %v1002_v60 = vpop.f32.mrf.mxu0 }
 0x1ad   : > { %v1003_v61 = vadd.f32 %v1002_v60, %v6513_v59 }
 0x1ae   : > { %v6518_v62 = vpop.f32.mrf.mxu0 }
 0x1af   : > { %v1159_v2 = vmax.f32 %v1003_v61, 0.0 }
 0x1b0   : > { %v1008_v27 = vpop.f32.mrf.mxu0 }
 0x1b1   : > { %v6522_v28 = vpack.c.bf16 %v1159_v2, %v1157_v63  ;;  %v1009_v56 = vadd.f32 %v1008_v27, %v6500_v50 }
 0x1b2   : > { %v6524_v29 = vpop.f32.mrf.mxu0 }
 0x1b3   : > { %9544 = vst [vmem:[#allocation51_spill] sm:$0xff] %v6522_v28  ;;  %v1161_v61 = vmax.f32 %v1009_v56, 0.0  ;;  %v6546_v56 = vpop.permute.xlu1 %820 }
 0x1b4   : > { %v1012_v54 = vpop.f32.mrf.mxu0  ;;  %9546 = vst [vmem:[#allocation53_spill] sm:$0xff] %v6546_v56 }
 0x1b5   : > { %v1013_v60 = vadd.f32 %v1012_v54, %v6502_v53 }
 0x1b6   : > { %v6530_v58 = vpop.f32.mrf.mxu0 }
 0x1b7   : > { %v1163_v0 = vmax.f32 %v1013_v60, 0.0  ;;  %v6558_v35 = vpop.permute.xlu1 %810 }
 0x1b8   : > { %v6532_v1 = vpop.f32.mrf.mxu0  ;;  %9548 = vst [vmem:[#allocation55_spill] sm:$0xff] %v6558_v35 }
 0x1b9   : > { %v6536_v63 = vpack.c.bf16 %v1163_v0, %v1161_v61  ;;  %v6552_v0 = vpop.permute.xlu0 %825 }
 0x1ba   : > { %v6538_v2 = vpop.f32.mrf.mxu0  ;;  %9547 = vst [vmem:[#allocation54_spill] sm:$0xff] %v6552_v0 }
 0x1bb   : > { %9545 = vst [vmem:[#allocation52_spill] sm:$0xff] %v6536_v63  ;;  %v6572_v16 = vpop.permute.xlu1 %800 }
 0x1bc   : > { %v6540_v27 = vpop.f32.mrf.mxu0  ;;  %9550 = vst [vmem:[#allocation57_spill] sm:$0xff] %v6572_v16 }
 0x1bd   : > { %v6564_v23 = vpop.permute.xlu0 %815 }
 0x1be   : > { %v6544_v54 = vpop.f32.mrf.mxu0  ;;  %9549 = vst [vmem:[#allocation56_spill] sm:$0xff] %v6564_v23 }
 0x1bf   : > { %v6585_v33 = vpop.permute.xlu1 %790 }
 0x1c0   : > { %v6548_v60 = vpop.f32.mrf.mxu0  ;;  %9552 = vst [vmem:[#allocation59_spill] sm:$0xff] %v6585_v33 }
 0x1c1   : > { %v6581_v32 = vpop.permute.xlu0 %805 }
 0x1c2   : > { %v6554_v61 = vpop.f32.mrf.mxu0  ;;  %9551 = vst [vmem:[#allocation58_spill] sm:$0xff] %v6581_v32 }
 0x1c3   : > { %v6593_v37 = vpop.permute.xlu1 %780 }
 0x1c4   : > { %v6556_v40 = vpop.f32.mrf.mxu0  ;;  %9554 = vst [vmem:[#allocation61_spill] sm:$0xff] %v6593_v37 }
 0x1c5   : > { %v6589_v56 = vpop.permute.xlu0 %795 }
 0x1c6   : > { %v6562_v24 = vpop.f32.mrf.mxu0  ;;  %9553 = vst [vmem:[#allocation60_spill] sm:$0xff] %v6589_v56 }
 0x1c7   : > { %v6599_v10 = vpop.permute.xlu1 %770 }
 0x1c8   : > { %v6566_v22 = vpop.f32.mrf.mxu0  ;;  %9556 = vst [vmem:[#allocation63_spill] sm:$0xff] %v6599_v10 }
 0x1c9   : > { %v6597_v33 = vpop.permute.xlu0 %785 }
 0x1ca   : > { %v6570_v20 = vpop.f32.mrf.mxu0  ;;  %9555 = vst [vmem:[#allocation62_spill] sm:$0xff] %v6597_v33 }
 0x1cb   : > { %v6607_v48 = vpop.permute.xlu1 %760 }
 0x1cc   : > { %v6577_v26 = vpop.f32.mrf.mxu0 }
 0x1cd   : > { %v6603_v46 = vpop.permute.xlu0 %775 }
 0x1ce   : > { %v1044_v35 = vpop.f32.mrf.mxu0  ;;  %9557 = vst [vmem:[#allocation64_spill] sm:$0xff] %v6603_v46 }
 0x1cf   : > { %v751_v6 = vpop.permute.xlu1 %750 }
 0x1d0   : > { %v6583_v0 = vpop.f32.mrf.mxu0 }
 0x1d1   : > { %v6613_v13 = vpop.permute.xlu0 %765 }
 0x1d2   : > { %v1050_v16 = vpop.f32.mrf.mxu0 }
 0x1d4   : > { %v1052_v23 = vpop.f32.mrf.mxu0 }
 0x1d5   : > { %v1053_v21 = vadd.f32 %v1052_v23, %v6486_v41 }
 0x1d6   : > { %v1054_v25 = vpop.f32.mrf.mxu0 }
 0x1d8   : > { %v1058_v32 = vpop.f32.mrf.mxu0 }
 0x1d9   : > { %v1059_v5 = vadd.f32 %v1058_v32, %v6480_v34 }
 0x1da   : > { %v1060_v11 = vpop.f32.mrf.mxu0 }
 0x1db   : > { %v1061_v17 = vadd.f32 %v1060_v11, %v6480_v34  ;;  %v1051_v11 = vadd.f32 %v1050_v16, %v6484_v38  ;;  %v1035_v16 = vadd.f32 %v6562_v24, %v6494_v45  ;;  %v1181_v23 = vmax.f32 %v1059_v5, 0.0 }
 0x1dc   : > { %v1062_v39 = vpop.f32.mrf.mxu0 }
 0x1dd   : > { %v1063_v8 = vadd.f32 %v1062_v39, %v6482_v36  ;;  %v1182_v63 = vmax.f32 %v1061_v17, 0.0  ;;  %v6623_v39 = vld [vmem:[#allocation9 + $0x8] sm:$0x3]  ;;  %v1041_v17 = vadd.f32 %v6570_v20, %v6488_v42 }
 0x1de   : > { %v1064_v56 = vpop.f32.mrf.mxu0  ;;  %1837 = vperm.xlu1 %5208, %v6623_v39  }
 0x1df   : > { %v1065_v10 = vadd.f32 %v1064_v56, %v6482_v36  ;;  %v1045_v36 = vadd.f32 %v1044_v35, %v6490_v43 }
 0x1e0   : > { %v1068_v12 = vpop.f32.mrf.mxu0 }
 0x1e1   : > { %v1069_v46 = vadd.f32 %v1068_v12, %v6476_v30  ;;  %v1184_v56 = vmax.f32 %v1065_v10, 0.0 }
 0x1e2   : > { %v1070_v37 = vpop.f32.mrf.mxu0 }
 0x1e3   : > { %v1071_v15 = vadd.f32 %v1070_v37, %v6476_v30  ;;  %v1055_v37 = vadd.f32 %v1054_v25, %v6486_v41  ;;  %v1185_v12 = vmax.f32 %v1069_v46, 0.0  ;;  %v1183_v25 = vmax.f32 %v1063_v8, 0.0 }
 0x1e4   : > { %v1072_v33 = vpop.f32.mrf.mxu0  ;;  %v1234_v46 = vpack.c.bf16 %v1184_v56, %v1182_v63  ;;  %v1176_v63 = vmax.f32 %v1045_v36, 0.0 }
 0x1e5   : > { %v1073_v51 = vadd.f32 %v1072_v33, %v6478_v31  ;;  %v1186_v33 = vmax.f32 %v1071_v15, 0.0  ;;  %v1180_v32 = vmax.f32 %v1055_v37, 0.0  ;;  %v1179_v37 = vmax.f32 %v1053_v21, 0.0 }
 0x1e6   : > { %v1074_v9 = vpop.f32.mrf.mxu0  ;;  %v1233_v24 = vpack.c.bf16 %v1183_v25, %v1181_v23  ;;  %v1031_v21 = vadd.f32 %v6554_v61, %v6492_v44  ;;  %v1172_v25 = vmax.f32 %v1035_v16, 0.0 }
 0x1e7   : > { %v1075_v52 = vadd.f32 %v1074_v9, %v6478_v31  ;;  %v1187_v7 = vmax.f32 %v1073_v51, 0.0  ;;  %v756_v51 = vpop.permute.xlu0 %755 }
 0x1e8   : > { %v1078_v19 = vpop.f32.mrf.mxu0 }
 0x1e9   : > { %v1188_v28 = vmax.f32 %v1075_v52, 0.0  ;;  %v1079_v9 = vadd.f32 %v1078_v19, %v751_v6  ;;  %v1235_v15 = vpack.c.bf16 %v1187_v7, %v1185_v12  ;;  %v1049_v19 = vadd.f32 %v6583_v0, %v6484_v38 }
 0x1ea   : > { %v1080_v30 = vpop.f32.mrf.mxu0  ;;  %v1178_v7 = vmax.f32 %v1051_v11, 0.0  ;;  %v1039_v0 = vadd.f32 %v6566_v22, %v6488_v42 }
 0x1eb   : > { %v1236_v31 = vpack.c.bf16 %v1188_v28, %v1186_v33  ;;  %v1081_v52 = vadd.f32 %v1080_v30, %v751_v6  ;;  %v1189_v35 = vmax.f32 %v1079_v9, 0.0  ;;  %v1043_v6 = vadd.f32 %v6577_v26, %v6490_v43 }
 0x1ec   : > { %v1082_v10 = vpop.f32.mrf.mxu0  ;;  %v9558_v33 = vmov 0   ;;  %v1232_v38 = vpack.c.bf16 %v1180_v32, %v1178_v7  ;;  %v1177_v30 = vmax.f32 %v1049_v19, 0.0  ;;  %v1174_v26 = vmax.f32 %v1041_v17, 0.0 }
 0x1ed   : > { %v1083_v34 = vadd.f32 %v1082_v10, %v756_v51  ;;  %1541 = vmatprep.subr.bf16.mxu1 %v1236_v31  ;;  %5211 = vset.pattern.permute.xlu1 %v9558_v33  ;;  %v1190_v20 = vmax.f32 %v1081_v52, 0.0  ;;  %v1025_v31 = vadd.f32 %v6544_v54, %v6498_v49  ;;  %v1175_v36 = vmax.f32 %v1043_v6, 0.0 }
 0x1ee   : > { %v1084_v8 = vpop.f32.mrf.mxu0  ;;  %1542 = vmatpush1.bf16.msra.mxu1 %v1235_v15  ;;  %1898 = vperm.xlu1 %5211, %v6623_v39   ;;  %v1231_v22 = vpack.c.bf16 %v1179_v37, %v1177_v30  ;;  %v1230_v15 = vpack.c.bf16 %v1176_v63, %v1174_v26  ;;  %v9559_v32 = vmov 2   ;;  %v1021_v54 = vadd.f32 %v6538_v2, %v6496_v47  ;;  %v9562_v26 = vld [vmem:[#allocation51_spill] sm:$0xff] }
 0x1ef   : > { %v1191_v41 = vmax.f32 %v1083_v34, 0.0  ;;  %v1085_v28 = vadd.f32 %v1084_v8, %v756_v51  ;;  %1543 = vmatprep.subr.bf16.mxu1 %v1234_v46  ;;  %v1033_v51 = vadd.f32 %v6556_v40, %v6494_v45  ;;  %v1015_v46 = vadd.f32 %v6530_v58, %v6502_v53 }
 0x1f0   : > { %v1088_v56 = vpop.f32.mrf.mxu0  ;;  %v1029_v40 = vadd.f32 %v6548_v60, %v6492_v44  ;;  %v1173_v45 = vmax.f32 %v1039_v0, 0.0  ;;  %v1023_v53 = vadd.f32 %v6540_v27, %v6498_v49  ;;  %v1168_v58 = vmax.f32 %v1025_v31, 0.0 }
 0x1f1   : > { %v6637_v12 = vpack.c.bf16 %v1191_v41, %v1189_v35  ;;  %v1192_v5 = vmax.f32 %v1085_v28, 0.0  ;;  %v1089_v9 = vadd.f32 %v1088_v56, %v6607_v48  ;;  %v1171_v19 = vmax.f32 %v1033_v51, 0.0  ;;  %v9564_v51 = vld [vmem:[#allocation23_spill] sm:$0xff] }
 0x1f2   : > { %v1090_v11 = vpop.f32.mrf.mxu0  ;;  %1544 = vmatpush1.bf16.msra.mxu1 %v1233_v24  ;;  %5212 = vset.pattern.permute.xlu1 %v9559_v32  ;;  %v1229_v2 = vpack.c.bf16 %v1175_v36, %v1173_v45  ;;  %v1169_v35 = vmax.f32 %v1029_v40, 0.0  ;;  %v1166_v49 = vmax.f32 %v1021_v54, 0.0  ;;  %v1167_v28 = vmax.f32 %v1023_v53, 0.0  ;;  %v9567_v54 = vld [vmem:[#allocation26_spill] sm:$0xff]  ;;  %v9570_v53 = vld [vmem:[#allocation56_spill] sm:$0xff] }
 0x1f3   : > { %v6644_v43 = vpack.c.bf16 %v1192_v5, %v1190_v20  ;;  %1545 = vmatprep.subr.bf16.mxu1 %v1232_v38  ;;  %v1091_v10 = vadd.f32 %v1090_v11, %v6607_v48  ;;  %1972 = vperm.xlu1 %5212, %v6264_v14   ;;  %v1170_v48 = vmax.f32 %v1031_v21, 0.0  ;;  %v1193_v34 = vmax.f32 %v1089_v9, 0.0  ;;  %v9563_v9 = vld [vmem:[#allocation22_spill] sm:$0xff] }
 0x1f4   : > { %v1092_v42 = vpop.f32.mrf.mxu0  ;;  %v1019_v14 = vadd.f32 %v6532_v1, %v6496_v47  ;;  %v1227_v6 = vpack.c.bf16 %v1171_v19, %v1169_v35  ;;  %v1005_v1 = vadd.f32 %v6518_v62, %v6513_v59  ;;  %v1164_v47 = vmax.f32 %v1015_v46, 0.0  ;;  %v9571_v19 = vld [vmem:[#allocation53_spill] sm:$0xff] }
 0x1f5   : > { %v1093_v61 = vadd.f32 %v1092_v42, %v6613_v13  ;;  %v1194_v44 = vmax.f32 %v1091_v10, 0.0  ;;  %v1228_v7 = vpack.c.bf16 %v1172_v25, %v1170_v48  ;;  %v1226_v37 = vpack.c.bf16 %v1168_v58, %v1166_v49  ;;  %v9565_v42 = vld [vmem:[#allocation24_spill] sm:$0xff]  ;;  %v9573_v35 = vld [vmem:[#allocation29_spill] sm:$0xff] }
 0x1f6   : > { %v1094_v52 = vpop.f32.mrf.mxu0  ;;  %1546 = vmatpush1.bf16.msra.mxu1 %v1231_v22  ;;  %v1165_v24 = vmax.f32 %v1019_v14, 0.0  ;;  %v1160_v5 = vmax.f32 %v1005_v1, 0.0 }
 0x1f7   : > { %v1195_v16 = vmax.f32 %v1093_v61, 0.0  ;;  %v1095_v17 = vadd.f32 %v1094_v52, %v6613_v13  ;;  %1547 = vmatprep.subr.bf16.mxu1 %v1230_v15  ;;  %1964 = vperm.xlu1 %5212, %v6288_v18   ;;  %v1011_v13 = vadd.f32 %v6524_v29, %v6500_v50  ;;  %v1001_v18 = vadd.f32 %v6510_v57, %v6506_v55  ;;  %v9560_v55 = vld [vmem:[#allocation52_spill] sm:$0xff]  ;;  %v9561_v57 = vld [vmem:[#allocation21_spill] sm:$0xff]  ;;  %v9568_v52 = vld [vmem:[#allocation27_spill] sm:$0xff] }
 0x1f8   : > { %v6664_v23 = vpop.f32.mrf.mxu0  ;;  %v1225_v29 = vpack.c.bf16 %v1167_v28, %v1165_v24  ;;  %v9566_v61 = vld [vmem:[#allocation25_spill] sm:$0xff] }
 0x1f9   : > { %v6666_v60 = vpack.c.bf16 %v1195_v16, %v1193_v34  ;;  %v1196_v8 = vmax.f32 %v1095_v17, 0.0  ;;  %v1162_v50 = vmax.f32 %v1011_v13, 0.0  ;;  %v1158_v59 = vmax.f32 %v1001_v18, 0.0  ;;  %v9569_v16 = vld [vmem:[#allocation28_spill] sm:$0xff]  ;;  %v9574_v13 = vld [vmem:[#allocation55_spill] sm:$0xff] }
 0x1fa   : > { %v6670_v41 = vpop.f32.mrf.mxu0  ;;  %1548 = vmatpush1.bf16.msra.mxu1 %v1229_v2 }
 0x1fb   : > { %v6675_v27 = vpack.c.bf16 %v1196_v8, %v1194_v44  ;;  %1549 = vmatprep.subr.bf16.mxu1 %v1228_v7  ;;  %1968 = vperm.xlu1 %5212, %v6199_v3   ;;  %v1224_v38 = vpack.c.bf16 %v1164_v47, %v1162_v50  ;;  %v1222_v3 = vpack.c.bf16 %v1160_v5, %v1158_v59  ;;  %v9572_v44 = vld [vmem:[#allocation54_spill] sm:$0xff]  ;;  %v9577_v59 = vld [vmem:[#allocation57_spill] sm:$0xff] }
 0x1fc   : > { %v6677_v63 = vpop.f32.mrf.mxu0  ;;  %v9575_v47 = vld [vmem:[#allocation58_spill] sm:$0xff] }
 0x1fe   : > { %v6681_v56 = vpop.f32.mrf.mxu0  ;;  %1550 = vmatpush1.bf16.msra.mxu1 %v1227_v6 }
 0x1ff   : > { %1551 = vmatprep.subr.bf16.mxu1 %v1226_v37  ;;  %1960 = vperm.xlu1 %5212, %v6204_v4  }
 0x200   : > { %v6686_v20 = vpop.f32.mrf.mxu0 }
 0x202   : > { %v6688_v0 = vpop.f32.mrf.mxu0  ;;  %1552 = vmatpush1.bf16.msra.mxu1 %v1225_v29 }
 0x203   : > { %1553 = vmatprep.subr.bf16.mxu1 %v1224_v38  ;;  %1952 = vperm.xlu1 %5212, %v9561_v57   ;;  %v9576_v38 = vld [vmem:[#allocation30_spill] sm:$0xff] }
 0x204   : > { %v6691_v62 = vpop.f32.mrf.mxu0 }
 0x206   : > { %v6693_v30 = vpop.f32.mrf.mxu0  ;;  %1554 = vmatpush1.bf16.msra.mxu1 %v9560_v55 }
 0x207   : > { %1555 = vmatprep.subr.bf16.mxu1 %v1222_v3  ;;  %1944 = vperm.xlu1 %5212, %v9563_v9  }
 0x208   : > { %v6697_v11 = vpop.f32.mrf.mxu0 }
 0x20a   : > { %v1120_v21 = vpop.f32.mrf.mxu0  ;;  %1556 = vmatpush1.bf16.msra.mxu1 %v9562_v26 }
 0x20b   : > { %1936 = vperm.xlu1 %5212, %v9564_v51  }
 0x20c   : > { %v1122_v4 = vpop.f32.mrf.mxu0 }
 0x20e   : > { %v1124_v31 = vpop.f32.mrf.mxu0 }
 0x20f   : > { %1928 = vperm.xlu1 %5212, %v9565_v42   ;;  %v9578_v42 = vld [vmem:[#allocation60_spill] sm:$0xff] }
 0x210   : > { %v1128_v36 = vpop.f32.mrf.mxu0 }
 0x212   : > { %v1130_v22 = vpop.f32.mrf.mxu0 }
 0x213   : > { %1920 = vperm.xlu1 %5212, %v9566_v61   ;;  %v1131_v3 = vadd.f32 %v1130_v22, %v9577_v59  ;;  %v1125_v61 = vadd.f32 %v1124_v31, %v9578_v42 }
 0x214   : > { %v1132_v25 = vpop.f32.mrf.mxu0 }
 0x215   : > { %v1133_v26 = vadd.f32 %v1132_v25, %v9575_v47  ;;  %v1210_v22 = vmax.f32 %v1131_v3, 0.0 }
 0x216   : > { %v1134_v10 = vpop.f32.mrf.mxu0 }
 0x217   : > { %2040 = vperm.xlu1 %5212, %v9567_v54   ;;  %v1135_v37 = vadd.f32 %v1134_v10, %v9575_v47  ;;  %v1129_v54 = vadd.f32 %v1128_v36, %v9577_v59  ;;  %v1211_v25 = vmax.f32 %v1133_v26, 0.0  ;;  %v6752_v26 = vld [vmem:[#allocation9] sm:$0xff] }
 0x218   : > { %v1138_v15 = vpop.f32.mrf.mxu0  ;;  %1832 = vperm.xlu0 %5209, %v6752_v26  }
 0x219   : > { %v1139_v29 = vadd.f32 %v1138_v15, %v9574_v13  ;;  %v9579_v15 = vld [vmem:[#allocation32_spill] sm:$0xff] }
 0x21a   : > { %v1140_v46 = vpop.f32.mrf.mxu0 }
 0x21b   : > { %2032 = vperm.xlu1 %5212, %v9568_v52   ;;  %v1141_v49 = vadd.f32 %v1140_v46, %v9574_v13  ;;  %v1212_v46 = vmax.f32 %v1135_v37, 0.0 }
 0x21c   : > { %v1142_v40 = vpop.f32.mrf.mxu0  ;;  %5210 = vset.pattern.permute.xlu0 %v9558_v33 }
 0x21d   : > { %v1143_v6 = vadd.f32 %v1142_v40, %v9570_v53  ;;  %v1214_v55 = vmax.f32 %v1141_v49, 0.0  ;;  %v1213_v40 = vmax.f32 %v1139_v29, 0.0  ;;  %1894 = vperm.xlu0 %5210, %v6752_v26  }
 0x21e   : > { %v1144_v45 = vpop.f32.mrf.mxu0 }
 0x21f   : > { %2024 = vperm.xlu1 %5212, %v9569_v16   ;;  %v1145_v58 = vadd.f32 %v1144_v45, %v9570_v53  ;;  %v1215_v9 = vmax.f32 %v1143_v6, 0.0  ;;  %v9580_v45 = vld [vmem:[#allocation59_spill] sm:$0xff]  ;;  %v9581_v16 = vld [vmem:[#allocation62_spill] sm:$0xff]  ;;  %v1248_v53 = vpack.c.bf16 %v1212_v46, %v1210_v22 }
 0x220   : > { %v1148_v48 = vpop.f32.mrf.mxu0  ;;  %v1121_v52 = vadd.f32 %v1120_v21, %v9580_v45  ;;  %v1115_v31 = vadd.f32 %v6693_v30, %v9581_v16  ;;  %v1119_v36 = vadd.f32 %v6697_v11, %v9580_v45  ;;  %v9584_v30 = vld [vmem:[#allocation64_spill] sm:$0xff]  ;;  %v5335_v46 = vld [vmem:[%s9105_s2 + $0x24] ss:$8 sps:$4 sm:$0xff]   ;;  %v5337_v22 = vld [vmem:[%s9105_s2 + $0x20] ss:$8 sps:$4 sm:$0xff]  }
 0x221   : > { %v1149_v7 = vadd.f32 %v1148_v48, %v9571_v19  ;;  %v1216_v24 = vmax.f32 %v1145_v58, 0.0  ;;  %v1123_v48 = vadd.f32 %v1122_v4, %v9578_v42  ;;  %v1209_v58 = vmax.f32 %v1129_v54, 0.0  ;;  %5213 = vset.pattern.permute.xlu0 %v9559_v32  ;;  %v5334_v42 = vld [vmem:[%s9105_s2 + $0x10] ss:$8 sps:$4 sm:$0xff]   ;;  %v9590_v54 = vld [vmem:[#allocation34_spill] sm:$0xff] }
 0x222   : > { %v1150_v34 = vpop.f32.mrf.mxu0  ;;  %v1113_v4 = vadd.f32 %v6691_v62, %v9581_v16  ;;  %v1205_v49 = vmax.f32 %v1119_v36, 0.0  ;;  %v1103_v62 = vadd.f32 %v6677_v63, %v9584_v30  ;;  %v9593_v16 = vld [vmem:[#allocation38_spill] sm:$0xff] }
 0x223   : > { %v1151_v2 = vadd.f32 %v1150_v34, %v9571_v19  ;;  %2016 = vperm.xlu1 %5212, %v9573_v35   ;;  %v1217_v5 = vmax.f32 %v1149_v7, 0.0  ;;  %v1250_v10 = vpack.c.bf16 %v1216_v24, %v1214_v55  ;;  %v1249_v34 = vpack.c.bf16 %v1215_v9, %v1213_v40  ;;  %v9582_v19 = vld [vmem:[#allocation33_spill] sm:$0xff]  ;;  %v9588_v55 = vld [vmem:[#allocation39_spill] sm:$0xff]  ;;  %v5695_v9 = vld [vmem:[%s9110_s7 + $0x28] sm:$0xff] }
 0x224   : > { %v1152_v17 = vpop.f32.mrf.mxu0  ;;  %v1247_v7 = vpack.c.bf16 %v1211_v25, %v1209_v58  ;;  %v1204_v35 = vmax.f32 %v1115_v31, 0.0  ;;  %v1203_v47 = vmax.f32 %v1113_v4, 0.0  ;;  %v5699_v40 = vld [vmem:[%s9110_s7 + $0x68] sm:$0xff]  ;;  %v9592_v25 = vld [vmem:[#allocation37_spill] sm:$0xff]  ;;  %v5340_v31 = vld [vmem:[%s9105_s2 + $0x30] ss:$8 sps:$4 sm:$0xff]  }
 0x225   : > { %v1153_v8 = vadd.f32 %v1152_v17, %v9572_v44  ;;  %v1218_v18 = vmax.f32 %v1151_v2, 0.0  ;;  %v1208_v17 = vmax.f32 %v1125_v61, 0.0  ;;  %v9583_v2 = vld [vmem:[#allocation61_spill] sm:$0xff]  ;;  %v6780_v61 = vpop.permute.xlu1 %1310  ;;  %v5346_v4 = vld [vmem:[%s9105_s2 + $0x50] ss:$8 sps:$4 sm:$0xff]  }
 0x226   : > { %v1154_v14 = vpop.f32.mrf.mxu0  ;;  %v1111_v21 = vadd.f32 %v6688_v0, %v9583_v2  ;;  %v1109_v11 = vadd.f32 %v6686_v20, %v9583_v2  ;;  %v9586_v0 = vld [vmem:[#allocation63_spill] sm:$0xff]  ;;  %v5343_v36 = vld [vmem:[%s9105_s2 + $0x40] ss:$8 sps:$4 sm:$0xff]  }
 0x227   : > { %v1155_v28 = vadd.f32 %v1154_v14, %v9572_v44  ;;  %v1219_v1 = vmax.f32 %v1153_v8, 0.0  ;;  %2008 = vperm.xlu1 %5212, %v9576_v38   ;;  %v1206_v44 = vmax.f32 %v1121_v52, 0.0  ;;  %v1207_v8 = vmax.f32 %v1123_v48, 0.0  ;;  %v9591_v52 = vld [vmem:[#allocation36_spill] sm:$0xff]  ;;  %v9594_v2 = vld [vmem:[#allocation41_spill] sm:$0xff] }
 0x228   : > { %v1105_v14 = vadd.f32 %v6681_v56, %v9584_v30  ;;  %v1101_v6 = vadd.f32 %v6670_v41, %v9586_v0  ;;  %v1201_v20 = vmax.f32 %v1109_v11, 0.0  ;;  %v9587_v41 = vld [vmem:[#allocation40_spill] sm:$0xff] }
 0x229   : > { %v1220_v50 = vmax.f32 %v1155_v28, 0.0  ;;  %v1251_v51 = vpack.c.bf16 %v1219_v1, %v1217_v5  ;;  %v1246_v13 = vpack.c.bf16 %v1208_v17, %v1206_v44  ;;  %v9585_v28 = vld [vmem:[#allocation35_spill] sm:$0xff]  ;;  %v1202_v1 = vmax.f32 %v1111_v21, 0.0  ;;  %v6792_v45 = vpop.permute.xlu1 %1302  ;;  %v5341_v17 = vld [vmem:[%s9105_s2 + $0x44] ss:$8 sps:$4 sm:$0xff]  }
 0x22a   : > { %v1245_v37 = vpack.c.bf16 %v1207_v8, %v1205_v49  ;;  %v1200_v56 = vmax.f32 %v1105_v14, 0.0  ;;  %v1198_v29 = vmax.f32 %v1101_v6, 0.0  ;;  %v1199_v5 = vmax.f32 %v1103_v62, 0.0  ;;  %v5338_v48 = vld [vmem:[%s9105_s2 + $0x34] ss:$8 sps:$4 sm:$0xff]   ;;  %v9595_v44 = vld [vmem:[#allocation42_spill] sm:$0xff] }
 0x22b   : > { %v1252_v57 = vpack.c.bf16 %v1220_v50, %v1218_v18  ;;  %2000 = vperm.xlu1 %5212, %v9579_v15   ;;  %v1244_v24 = vpack.c.bf16 %v1204_v35, %v1202_v1  ;;  %v1099_v18 = vadd.f32 %v6664_v23, %v9586_v0  ;;  %v5929_v50 = vmov 3   ;;  %v5694_v23 = vld [vmem:[%s9110_s7 + $0x18] sm:$0xff]  ;;  %v5702_v14 = vld [vmem:[%s9110_s7 + $0xe8] sm:$0xff]  ;;  %v9597_v35 = vld [vmem:[#allocation45_spill] sm:$0xff] }
 0x22c   : > { %v1243_v59 = vpack.c.bf16 %v1203_v47, %v1201_v20  ;;  %v1242_v3 = vpack.c.bf16 %v1200_v56, %v1198_v29  ;;  %v5701_v8 = vld [vmem:[%s9110_s7 + $0xd8] sm:$0xff]  ;;  %v9598_v0 = vld [vmem:[#allocation47_spill] sm:$0xff]  ;;  %v5353_v47 = vld [vmem:[%s9105_s2 + $0x84] ss:$8 sps:$4 sm:$0xff]  }
 0x22d   : > { %1557 = vmatprep.subr.bf16.mxu1 %v1252_v57  ;;  %v1197_v63 = vmax.f32 %v1099_v18, 0.0  ;;  %v5350_v11 = vld [vmem:[%s9105_s2 + $0x74] ss:$8 sps:$4 sm:$0xff]   ;;  %v5352_v1 = vld [vmem:[%s9105_s2 + $0x70] ss:$8 sps:$4 sm:$0xff]   ;;  %v9600_v56 = vld [vmem:[#allocation49_spill] sm:$0xff] }
 0x22e   : > { %1558 = vmatpush2.bf16.msra.mxu1 %v1251_v51  ;;  %v5332_v51 = vld [vmem:[%s9105_s2 + $0x14] ss:$8 sps:$4 sm:$0xff]   ;;  %v5355_v18 = vld [vmem:[%s9105_s2 + $0x80] ss:$8 sps:$4 sm:$0xff]  }
 0x22f   : > { %1559 = vmatprep.subr.bf16.mxu1 %v1250_v10  ;;  %1992 = vperm.xlu1 %5212, %v9582_v19   ;;  %v1241_v57 = vpack.c.bf16 %v1199_v5, %v1197_v63  ;;  %v5698_v10 = vld [vmem:[%s9110_s7 + $0x58] sm:$0xff]  ;;  %v6898_v63 = vpop.permute.xlu0 %1314 }
 0x230   : > { %v5703_v49 = vld [vmem:[%s9110_s7 + $0xf8] sm:$0xff] }
 0x231   : > { %v9599_v6 = vld [vmem:[#allocation48_spill] sm:$0xff] }
 0x232   : > { %1560 = vmatpush2.bf16.msra.mxu1 %v1249_v34  ;;  %v6803_v34 = vpop.permute.xlu1 %1306  ;;  %v5356_v20 = vld [vmem:[%s9105_s2 + $0x94] ss:$8 sps:$4 sm:$0xff]  }
 0x233   : > { %1561 = vmatprep.subr.bf16.mxu1 %v1248_v53  ;;  %1984 = vperm.xlu1 %5212, %v9585_v28  }
 0x236   : > { %1562 = vmatpush2.bf16.msra.mxu1 %v1247_v7  ;;  %v6814_v53 = vpop.permute.xlu1 %1298  ;;  %v9596_v7 = vld [vmem:[#allocation44_spill] sm:$0xff] }
 0x237   : > { %1563 = vmatprep.subr.bf16.mxu1 %v1246_v13  ;;  %5214 = vset.pattern.permute.xlu1 %v5929_v50  ;;  %v5349_v13 = vld [vmem:[%s9105_s2 + $0x60] ss:$8 sps:$4 sm:$0xff]  }
 0x238   : > { %2469 = vperm.xlu1 %5214, %v9587_v41  }
 0x23a   : > { %1564 = vmatpush2.bf16.msra.mxu1 %v1245_v37  ;;  %v6822_v58 = vpop.permute.xlu1 %1290  ;;  %v5930_v37 = vmov 5  }
 0x23b   : > { %1565 = vmatprep.subr.bf16.mxu1 %v1244_v24  ;;  %v9602_v24 = vld [vmem:[#allocation50_spill] sm:$0xff] }
 0x23c   : > { %2477 = vperm.xlu1 %5214, %v9588_v55  }
 0x23e   : > { %1566 = vmatpush2.bf16.msra.mxu1 %v1243_v59  ;;  %v6832_v21 = vpop.permute.xlu1 %1282  ;;  %v5358_v59 = vld [vmem:[%s9105_s2 + $0x90] ss:$8 sps:$4 sm:$0xff]  }
 0x23f   : > { %1567 = vmatprep.subr.bf16.mxu1 %v1242_v3  ;;  %v5359_v3 = vld [vmem:[%s9105_s2 + $0xa4] ss:$8 sps:$4 sm:$0xff]  }
 0x240   : > { %2481 = vperm.xlu1 %5214, %v5694_v23   ;;  %v5932_v23 = vmov 6  }
 0x242   : > { %1568 = vmatpush2.bf16.msra.mxu1 %v1241_v57  ;;  %v6845_v30 = vpop.permute.xlu1 %1274 }
 0x243   : > { %1569 = vmatprep.subr.bf16.mxu1 %v6675_v27  ;;  %v5329_v27 = vld [vmem:[%s9105_s2] ss:$8 sps:$4 sm:$0xff]  }
 0x244   : > { %2489 = vperm.xlu1 %5214, %v5695_v9   ;;  %v6906_v9 = vpop.permute.xlu0 %1294 }
 0x246   : > { %1570 = vmatpush2.bf16.msra.mxu1 %v6666_v60  ;;  %v5697_v60 = vld [vmem:[%s9110_s7 + $0x48] sm:$0xff] }
 0x247   : > { %1571 = vmatprep.subr.bf16.mxu1 %v6644_v43  ;;  %v5696_v43 = vld [vmem:[%s9110_s7 + $0x38] sm:$0xff] }
 0x248   : > { %2497 = vperm.xlu1 %5214, %v5696_v43  }
 0x24a   : > { %1572 = vmatpush2.bf16.msra.mxu1 %v6637_v12  ;;  %v9589_v12 = vld [vmem:[#allocation31_spill] sm:$0xff] }
 0x24b   : > { %1976 = vperm.xlu0 %5213, %v9589_v12  }
 0x24c   : > { %2505 = vperm.xlu1 %5214, %v5697_v60   ;;  %v6918_v60 = vpop.permute.xlu0 %1286 }
 0x24d   : > { %1574 = vmatmul.mubr.bf16.vlgmr.msra.gmra.mxu1 %v5329_v27  ;;  %v5361_v27 = vld [vmem:[%s9105_s2 + $0xa0] ss:$8 sps:$4 sm:$0xff]  }
 0x24e   : > { %1583 = vmatprep.mubr.bf16.mxu1 %v5332_v51  ;;  %v5362_v51 = vld [vmem:[%s9105_s2 + $0xb4] ss:$8 sps:$4 sm:$0xff]  }
 0x24f   : > { %1956 = vperm.xlu0 %5213, %v9590_v54  }
 0x250   : > { %2513 = vperm.xlu1 %5214, %v5698_v10   ;;  %v5365_v10 = vld [vmem:[%s9105_s2 + $0xc4] ss:$8 sps:$4 sm:$0xff]  }
 0x253   : > { %1948 = vperm.xlu0 %5213, %v9591_v52   ;;  %v9187_v52 = vmov 4  }
 0x254   : > { %2521 = vperm.xlu1 %5214, %v5699_v40   ;;  %v6932_v40 = vpop.permute.xlu0 %1278 }
 0x255   : > { %1584 = vmatmul.mubr.bf16.gmra.mxu1 %v5334_v42  ;;  %v9188_v42 = vmov 9  }
 0x256   : > { %1593 = vmatprep.mubr.bf16.mxu1 %v5335_v46  ;;  %v5364_v46 = vld [vmem:[%s9105_s2 + $0xb0] ss:$8 sps:$4 sm:$0xff]  }
 0x257   : > { %1940 = vperm.xlu0 %5213, %v9592_v25   ;;  %v5368_v25 = vld [vmem:[%s9105_s2 + $0xd4] ss:$8 sps:$4 sm:$0xff]  }
 0x258   : > { %2529 = vperm.xlu1 %5214, %v9589_v12  }
 0x25b   : > { %1932 = vperm.xlu0 %5213, %v9593_v16   ;;  %v6944_v16 = vpop.permute.xlu0 %1270 }
 0x25c   : > { %2537 = vperm.xlu1 %5214, %v9585_v28   ;;  %v6860_v28 = vpop.permute.xlu1 %1266 }
 0x25d   : > { %1594 = vmatmul.mubr.bf16.gmra.mxu1 %v5337_v22 }
 0x25e   : > { %1603 = vmatprep.mubr.bf16.mxu1 %v5338_v48  ;;  %v5367_v48 = vld [vmem:[%s9105_s2 + $0xc0] ss:$8 sps:$4 sm:$0xff]  }
 0x25f   : > { %1924 = vperm.xlu0 %5213, %v9588_v55  }
 0x260   : > { %2545 = vperm.xlu1 %5214, %v9582_v19   ;;  %v5344_v19 = vld [vmem:[%s9105_s2 + $0x54] ss:$8 sps:$4 sm:$0xff]   ;;  %v6869_v62 = vpop.permute.xlu1 %1258 }
 0x263   : > { %1916 = vperm.xlu0 %5213, %v9587_v41   ;;  %v5931_v41 = vmov 8  }
 0x264   : > { %2553 = vperm.xlu1 %5214, %v9579_v15   ;;  %v5700_v15 = vld [vmem:[%s9110_s7 + $0xc8] sm:$0xff] }
 0x265   : > { %1604 = vmatmul.mubr.bf16.gmra.mxu1 %v5340_v31  ;;  %v5935_v31 = vmov 7  }
 0x266   : > { %1613 = vmatprep.mubr.bf16.mxu1 %v5341_v17 }
 0x267   : > { %2036 = vperm.xlu0 %5213, %v9594_v2   ;;  %v5370_v2 = vld [vmem:[%s9105_s2 + $0xd0] ss:$8 sps:$4 sm:$0xff]  }
 0x268   : > { %2561 = vperm.xlu1 %5214, %v9576_v38   ;;  %v5347_v38 = vld [vmem:[%s9105_s2 + $0x64] ss:$8 sps:$4 sm:$0xff]  }
 0x26b   : > { %2028 = vperm.xlu0 %5213, %v9595_v44  }
 0x26c   : > { %2569 = vperm.xlu1 %5214, %v5700_v15   ;;  %v5371_v15 = vld [vmem:[%s9105_s2 + $0xe4] ss:$8 sps:$4 sm:$0xff]  }
 0x26d   : > { %1614 = vmatmul.mubr.bf16.gmra.mxu1 %v5343_v36 }
 0x26e   : > { %1623 = vmatprep.mubr.bf16.mxu1 %v5344_v19  ;;  %v6952_v19 = vpop.permute.xlu0 %1262 }
 0x26f   : > { %2020 = vperm.xlu0 %5213, %v9596_v7   ;;  %v9184_v7 = vmov 11  }
 0x270   : > { %2577 = vperm.xlu1 %5214, %v5701_v8  }
 0x273   : > { %2012 = vperm.xlu0 %5213, %v9597_v35   ;;  %v5374_v35 = vld [vmem:[%s9105_s2 + $0xf4] ss:$8 sps:$4 sm:$0xff]  }
 0x274   : > { %2585 = vperm.xlu1 %5214, %v5702_v14   ;;  %v5373_v14 = vld [vmem:[%s9105_s2 + $0xe0] ss:$8 sps:$4 sm:$0xff]  }
 0x275   : > { %1624 = vmatmul.mubr.bf16.gmra.mxu1 %v5346_v4  ;;  %v9186_v4 = vmov 10  }
 0x276   : > { %1633 = vmatprep.mubr.bf16.mxu1 %v5347_v38  ;;  %v6964_v38 = vpop.permute.xlu0 %1254 }
 0x277   : > { %2004 = vperm.xlu0 %5213, %v9598_v0  }
 0x278   : > { %2593 = vperm.xlu1 %5214, %v5703_v49  }
 0x27b   : > { %1996 = vperm.xlu0 %5213, %v9599_v6   ;;  %v5939_v6 = vmov 20  }
 0x27c   : > { %5215 = vset.pattern.permute.xlu1 %v9559_v32  ;;  %v6876_v32 = vpop.permute.xlu1 %1378 }
 0x27d   : > { %1634 = vmatmul.mubr.bf16.gmra.mxu1 %v5349_v13  ;;  %3111 = vperm.xlu1 %5215, %v6752_v26   ;;  %9601 = vst [vmem:[#allocation52_spill] sm:$0xff] %v6876_v32  ;;  %v6976_v13 = vpop.permute.xlu0 %1374 }
 0x27e   : > { %1643 = vmatprep.mubr.bf16.mxu1 %v5350_v11  ;;  %9613 = vst [vmem:[#allocation53_spill] sm:$0xff] %v6976_v13  ;;  %v6981_v11 = vld [vmem:[%s9111_s8] sm:$0xf] }
 0x27f   : > { %1988 = vperm.xlu0 %5213, %v9600_v56   ;;  %v467_v49 = vrot.slane %v6981_v11, 4 }
 0x280   : > { %v6886_v29 = vpop.permute.xlu1 %1370 }
 0x281   : > { %5216 = vset.pattern.permute.xlu1 %v5930_v37  ;;  %9603 = vst [vmem:[#allocation21_spill] sm:$0xff] %v6886_v29  ;;  %v5376_v37 = vld [vmem:[%s9105_s2 + $0xf0] ss:$8 sps:$4 sm:$0xff]  }
 0x282   : > { %3123 = vperm.xlu1 %5216, %v6752_v26  }
 0x283   : > { %1980 = vperm.xlu0 %5213, %v9602_v24  }
 0x284   : > { %v6890_v5 = vpop.permute.xlu1 %1362 }
 0x285   : > { %1644 = vmatmul.mubr.bf16.gmra.mxu1 %v5352_v1  ;;  %9604 = vst [vmem:[#allocation51_spill] sm:$0xff] %v6890_v5  ;;  %v9671_v5 = vmov 12  }
 0x286   : > { %1653 = vmatprep.mubr.bf16.mxu1 %v5353_v47  ;;  %3127 = vperm.xlu1 %5216, %v6623_v39   ;;  %v6989_v47 = vpop.permute.xlu0 %1366 }
 0x287   : > { %468 = vrot.lane.b32.xlu0 %v467_v49, %s5938_s11  ;;  %9616 = vst [vmem:[#allocation55_spill] sm:$0xff] %v6989_v47  ;;  %s5810_s11 = scalar_lea.vmem %s5809_s14, 256 }
 0x288   : > { %v6901_v55 = vpop.permute.xlu1 %1354  ;;  %p5812_p10 = scmp.lt.s32.totalorder %s5810_s11, %s5804_s30 }
 0x289   : > { %9605 = vst [vmem:[#allocation22_spill] sm:$0xff] %v6901_v55 }
 0x28a   : > { %5219 = vset.pattern.permute.xlu1 %v5931_v41  ;;  %v7000_v24 = vpop.permute.xlu0 %1358  ;;  %p5813_p13 = por %p5812_p10, %p5811_p7 }
 0x28b   : > { %3143 = vperm.xlu1 %5219, %v6623_v39   ;;  %3115 = vperm.xlu0 %5213, %v6623_v39   ;;  %9618 = vst [vmem:[#allocation30_spill] sm:$0xff] %v7000_v24 }
 0x28c   : > { %v6904_v57 = vpop.permute.xlu1 %1346  ;;  %p5814_p0 = pnand %p5813_p13, %p5807_p5 }
 0x28d   : > { %1654 = vmatmul.mubr.bf16.gmra.mxu1 %v5355_v18  ;;  %9606 = vst [vmem:[#allocation23_spill] sm:$0xff] %v6904_v57  ;;  %v9183_v18 = vmov 12   ;;  %v9670_v57 = vmov 11  }
 0x28e   : > { %1663 = vmatprep.mubr.bf16.mxu1 %v5356_v20 }
 0x28f   : > { %5220 = vset.pattern.permute.xlu1 %v5929_v50  ;;  %5217 = vset.pattern.permute.xlu0 %v5931_v41 }
 0x290   : > { %3155 = vperm.xlu1 %5220, %v6752_v26   ;;  %v6915_v43 = vpop.permute.xlu1 %1338  ;;  %3139 = vperm.xlu0 %5217, %v6752_v26  }
 0x291   : > { %9607 = vst [vmem:[#allocation24_spill] sm:$0xff] %v6915_v43 }
 0x294   : > { %5221 = vset.pattern.permute.xlu1 %v5932_v23  ;;  %v6920_v12 = vpop.permute.xlu1 %1330  ;;  %5218 = vset.pattern.permute.xlu0 %v5929_v50  ;;  %v7013_v23 = vpop.permute.xlu0 %1350 }
 0x295   : > { %1664 = vmatmul.mubr.bf16.gmra.mxu1 %v5358_v59  ;;  %3167 = vperm.xlu1 %5221, %v6752_v26   ;;  %v5705_v59 = vld [vmem:[%s9110_s7 + $0x8] sm:$0xff]  ;;  %9621 = vst [vmem:[#allocation32_spill] sm:$0xff] %v7013_v23 }
 0x296   : > { %1673 = vmatprep.mubr.bf16.mxu1 %v5359_v3  ;;  %2473 = vperm.xlu0 %5218, %v5705_v59   ;;  %v9182_v3 = vmov 13  }
 0x298   : > { %v6930_v54 = vpop.permute.xlu1 %1322 }
 0x299   : > { %3171 = vperm.xlu1 %5221, %v6623_v39  }
 0x29c   : > { %v6936_v22 = vpop.permute.xlu1 %1837 }
 0x29d   : > { %1674 = vmatmul.mubr.bf16.gmra.mxu1 %v5361_v27  ;;  %5223 = vset.pattern.permute.xlu1 %v9188_v42  ;;  %9608 = vst [vmem:[#allocation25_spill] sm:$0xff] %v6936_v22  ;;  %v5706_v27 = vld [vmem:[%s9110_s7 + $0x20] sm:$0xff] }
 0x29e   : > { %1683 = vmatprep.mubr.bf16.mxu1 %v5362_v51  ;;  %3187 = vperm.xlu1 %5223, %v6623_v39   ;;  %v5942_v51 = vmov 23  }
 0x29f   : > { %2485 = vperm.xlu0 %5218, %v5706_v27   ;;  %v5711_v27 = vld [vmem:[%s9110_s7 + $0x70] sm:$0xff] }
 0x2a0   : > { %v6946_v17 = vpop.permute.xlu1 %1898 }
 0x2a1   : > { %9609 = vst [vmem:[#allocation26_spill] sm:$0xff] %v6946_v17 }
 0x2a2   : > { %5224 = vset.pattern.permute.xlu1 %v9187_v52  ;;  %v5948_v52 = vmov 17  }
 0x2a3   : > { %3199 = vperm.xlu1 %5224, %v6752_v26  }
 0x2a4   : > { %v6949_v36 = vpop.permute.xlu1 %1972 }
 0x2a5   : > { %1684 = vmatmul.mubr.bf16.gmra.mxu1 %v5364_v46  ;;  %9610 = vst [vmem:[#allocation27_spill] sm:$0xff] %v6949_v36  ;;  %v7022_v46 = vpop.permute.xlu0 %1342 }
 0x2a6   : > { %1693 = vmatprep.mubr.bf16.mxu1 %v5365_v10  ;;  %9623 = vst [vmem:[#allocation62_spill] sm:$0xff] %v7022_v46  ;;  %v5707_v10 = vld [vmem:[%s9110_s7 + $0x30] sm:$0xff] }
 0x2a7   : > { %5226 = vset.pattern.permute.xlu1 %v5935_v31  ;;  %2493 = vperm.xlu0 %5218, %v5707_v10   ;;  %v5945_v10 = vmov 15  }
 0x2a8   : > { %3211 = vperm.xlu1 %5226, %v6752_v26   ;;  %v6960_v44 = vpop.permute.xlu1 %1964 }
 0x2a9   : > { %9611 = vst [vmem:[#allocation28_spill] sm:$0xff] %v6960_v44 }
 0x2ac   : > { %3215 = vperm.xlu1 %5226, %v6623_v39   ;;  %v6966_v8 = vpop.permute.xlu1 %1968 }
 0x2ad   : > { %1694 = vmatmul.mubr.bf16.gmra.mxu1 %v5367_v48  ;;  %9612 = vst [vmem:[#allocation56_spill] sm:$0xff] %v6966_v8 }
 0x2ae   : > { %1703 = vmatprep.mubr.bf16.mxu1 %v5368_v25  ;;  %v5708_v25 = vld [vmem:[%s9110_s7 + $0x40] sm:$0xff] }
 0x2af   : > { %2501 = vperm.xlu0 %5218, %v5708_v25  }
 0x2b0   : > { %5228 = vset.pattern.permute.xlu1 %v9186_v4  ;;  %v6984_v0 = vpop.permute.xlu1 %1960 }
 0x2b1   : > { %3231 = vperm.xlu1 %5228, %v6623_v39   ;;  %9614 = vst [vmem:[#allocation54_spill] sm:$0xff] %v6984_v0 }
 0x2b4   : > { %v6987_v1 = vpop.permute.xlu1 %1952 }
 0x2b5   : > { %1704 = vmatmul.mubr.bf16.gmra.mxu1 %v5370_v2  ;;  %5229 = vset.pattern.permute.xlu1 %v9184_v7  ;;  %9615 = vst [vmem:[#allocation29_spill] sm:$0xff] %v6987_v1  ;;  %v7035_v2 = vpop.permute.xlu0 %1334  ;;  %v9189_v7 = vmov 24  }
 0x2b6   : > { %1713 = vmatprep.mubr.bf16.mxu1 %v5371_v15  ;;  %3243 = vperm.xlu1 %5229, %v6752_v26   ;;  %9626 = vst [vmem:[#allocation64_spill] sm:$0xff] %v7035_v2  ;;  %v9181_v15 = vmov 14  }
 0x2b8   : > { %v6996_v56 = vpop.permute.xlu1 %1944 }
 0x2b9   : > { %9617 = vst [vmem:[#allocation58_spill] sm:$0xff] %v6996_v56  ;;  %v7044_v49 = vpop.permute.xlu0 %1326 }
 0x2ba   : > { %5231 = vset.pattern.permute.xlu1 %v5939_v6  ;;  %v9180_v6 = vmov 21  }
 0x2bb   : > { %3255 = vperm.xlu1 %5231, %v6752_v26  }
 0x2bc   : > { %v7003_v20 = vpop.permute.xlu1 %1936 }
 0x2bd   : > { %1714 = vmatmul.mubr.bf16.gmra.mxu1 %v5373_v14  ;;  %9619 = vst [vmem:[#allocation57_spill] sm:$0xff] %v7003_v20  ;;  %v5709_v14 = vld [vmem:[%s9110_s7 + $0x50] sm:$0xff]  ;;  %v7058_v25 = vpop.permute.xlu0 %1318 }
 0x2be   : > { %1723 = vmatprep.mubr.bf16.mxu1 %v5374_v35  ;;  %2509 = vperm.xlu0 %5218, %v5709_v14   ;;  %v5712_v14 = vld [vmem:[%s9110_s7 + $0x80] sm:$0xff] }
 0x2bf   : > { %3259 = vperm.xlu1 %5231, %v6623_v39  }
 0x2c0   : > { %v7010_v41 = vpop.permute.xlu1 %1928 }
 0x2c1   : > { %9620 = vst [vmem:[#allocation60_spill] sm:$0xff] %v7010_v41 }
 0x2c3   : > { %5233 = vset.pattern.permute.xlu1 %v9183_v18 }
 0x2c4   : > { %3271 = vperm.xlu1 %5233, %v6623_v39   ;;  %v7019_v50 = vpop.permute.xlu1 %1920 }
 0x2c5   : > { %1724 = vmatmul.mubr.bf16.gmra.mxu1 %v5376_v37  ;;  %9622 = vst [vmem:[#allocation59_spill] sm:$0xff] %v7019_v50  ;;  %v5710_v37 = vld [vmem:[%s9110_s7 + $0x60] sm:$0xff] }
 0x2c6   : > { %2517 = vperm.xlu0 %5218, %v5710_v37  }
 0x2c8   : > { %5234 = vset.pattern.permute.xlu1 %v9182_v3  ;;  %v7027_v48 = vpop.permute.xlu1 %2040 }
 0x2c9   : > { %3283 = vperm.xlu1 %5234, %v6752_v26   ;;  %9624 = vst [vmem:[#allocation33_spill] sm:$0xff] %v7027_v48 }
 0x2ca   : > { %2525 = vperm.xlu0 %5218, %v5711_v27   ;;  %v5713_v27 = vld [vmem:[%s9110_s7 + $0x90] sm:$0xff] }
 0x2cc   : > { %v7033_v31 = vpop.permute.xlu1 %2032 }
 0x2cd   : > { %5236 = vset.pattern.permute.xlu1 %v5942_v51  ;;  %9625 = vst [vmem:[#allocation61_spill] sm:$0xff] %v7033_v31 }
 0x2ce   : > { %3303 = vperm.xlu1 %5236, %v6752_v26   ;;  %2533 = vperm.xlu0 %5218, %v5712_v14   ;;  %v5714_v14 = vld [vmem:[%s9110_s7 + $0xa0] sm:$0xff] }
 0x2d0   : > { %v7042_v35 = vpop.permute.xlu1 %2024 }
 0x2d1   : > { %9627 = vst [vmem:[#allocation35_spill] sm:$0xff] %v7042_v35  ;;  %v9202_v35 = vmov 18  }
 0x2d2   : > { %3307 = vperm.xlu1 %5236, %v6623_v39   ;;  %2541 = vperm.xlu0 %5218, %v5713_v27  }
 0x2d4   : > { %v7050_v59 = vpop.permute.xlu1 %2016 }
 0x2d5   : > { %9628 = vst [vmem:[#allocation63_spill] sm:$0xff] %v7050_v59 }
 0x2d6   : > { %5238 = vset.pattern.permute.xlu1 %v9181_v15  ;;  %v9185_v15 = vmov 16   ;;  %2549 = vperm.xlu0 %5218, %v5714_v14   ;;  %v5716_v14 = vld [vmem:[%s9110_s7 + $0xc0] sm:$0xff] }
 0x2d7   : > { %3323 = vperm.xlu1 %5238, %v6623_v39  }
 0x2d8   : > { %v7056_v51 = vpop.permute.xlu1 %2008 }
 0x2d9   : > { %9629 = vst [vmem:[#allocation40_spill] sm:$0xff] %v7056_v51  ;;  %v9198_v51 = vmov 22  }
 0x2db   : > { %5239 = vset.pattern.permute.xlu1 %v9180_v6  ;;  %v7066_v6 = vpop.permute.xlu0 %1832 }
 0x2dc   : > { %3331 = vperm.xlu1 %5239, %v6752_v26   ;;  %v7064_v37 = vpop.permute.xlu1 %2000  ;;  %9631 = vst [vmem:[#allocation31_spill] sm:$0xff] %v7066_v6  ;;  %v9253_v6 = vmov 36  }
 0x2dd   : > { %9630 = vst [vmem:[#allocation39_spill] sm:$0xff] %v7064_v37 }
 0x2df   : > { %v7076_v3 = vpop.permute.xlu0 %1894 }
 0x2e0   : > { %5241 = vset.pattern.permute.xlu1 %v5945_v10  ;;  %v7072_v10 = vpop.permute.xlu1 %1992  ;;  %9633 = vst [vmem:[#allocation36_spill] sm:$0xff] %v7076_v3  ;;  %v9666_v3 = vmov 4  }
 0x2e1   : > { %3343 = vperm.xlu1 %5241, %v6752_v26   ;;  %9632 = vst [vmem:[#allocation34_spill] sm:$0xff] %v7072_v10 }
 0x2e3   : > { %v7085_v27 = vpop.permute.xlu0 %1976 }
 0x2e4   : > { %v7081_v18 = vpop.permute.xlu1 %1984  ;;  %9635 = vst [vmem:[#allocation38_spill] sm:$0xff] %v7085_v27 }
 0x2e5   : > { %3347 = vperm.xlu1 %5241, %v6623_v39   ;;  %9634 = vst [vmem:[#allocation37_spill] sm:$0xff] %v7081_v18 }
 0x2e7   : > { %v7092_v42 = vpop.permute.xlu0 %1956 }
 0x2e8   : > { %v7090_v4 = vpop.permute.xlu1 %2469  ;;  %9637 = vst [vmem:[#allocation42_spill] sm:$0xff] %v7092_v42 }
 0x2e9   : > { %5243 = vset.pattern.permute.xlu1 %v9185_v15  ;;  %v5715_v15 = vld [vmem:[%s9110_s7 + $0xb0] sm:$0xff]  ;;  %9636 = vst [vmem:[#allocation41_spill] sm:$0xff] %v7090_v4 }
 0x2ea   : > { %3363 = vperm.xlu1 %5243, %v6623_v39   ;;  %2557 = vperm.xlu0 %5218, %v5715_v15   ;;  %v5717_v15 = vld [vmem:[%s9110_s7 + $0xd0] sm:$0xff] }
 0x2eb   : > { %v7100_v37 = vpop.permute.xlu0 %1948 }
 0x2ec   : > { %9639 = vst [vmem:[#allocation45_spill] sm:$0xff] %v7100_v37 }
 0x2ee   : > { %5244 = vset.pattern.permute.xlu1 %v9189_v7  ;;  %2565 = vperm.xlu0 %5218, %v5716_v14   ;;  %v7097_v7 = vpop.permute.xlu1 %2477  ;;  %v5718_v14 = vld [vmem:[%s9110_s7 + $0xe0] sm:$0xff] }
 0x2ef   : > { %3379 = vperm.xlu1 %5244, %v6752_v26   ;;  %9638 = vst [vmem:[#allocation44_spill] sm:$0xff] %v7097_v7 }
 0x2f2   : > { %2573 = vperm.xlu0 %5218, %v5717_v15   ;;  %v7105_v4 = vpop.permute.xlu1 %2481  ;;  %v5719_v15 = vld [vmem:[%s9110_s7 + $0xf0] sm:$0xff] }
 0x2f3   : > { %5246 = vset.pattern.permute.xlu1 %v5948_v52  ;;  %9640 = vst [vmem:[#allocation47_spill] sm:$0xff] %v7105_v4  ;;  %v7108_v52 = vpop.permute.xlu0 %1940 }
 0x2f4   : > { %3395 = vperm.xlu1 %5246, %v6752_v26   ;;  %9641 = vst [vmem:[#allocation48_spill] sm:$0xff] %v7108_v52 }
 0x2f6   : > { %2581 = vperm.xlu0 %5218, %v5718_v14   ;;  %v7113_v7 = vpop.permute.xlu1 %2489 }
 0x2f7   : > { %9642 = vst [vmem:[#allocation49_spill] sm:$0xff] %v7113_v7  ;;  %v7117_v59 = vpop.permute.xlu0 %1932 }
 0x2f8   : > { %3399 = vperm.xlu1 %5246, %v6623_v39   ;;  %9643 = vst [vmem:[#allocation50_spill] sm:$0xff] %v7117_v59 }
 0x2fa   : > { %2589 = vperm.xlu0 %5218, %v5719_v15   ;;  %v7122_v4 = vpop.permute.xlu1 %2497 }
 0x2fb   : > { %9644 = vst [vmem:[#allocation65_spill] sm:$0xff] %v7122_v4  ;;  %v7126_v14 = vpop.permute.xlu0 %1924 }
 0x2fc   : > { %5248 = vset.pattern.permute.xlu1 %v9198_v51  ;;  %9645 = vst [vmem:[#allocation66_spill] sm:$0xff] %v7126_v14  ;;  %v5951_v51 = vmov 19   ;;  %v5957_v14 = vmov 38  }
 0x2fd   : > { %3411 = vperm.xlu1 %5248, %v6623_v39  }
 0x2fe   : > { %v7128_v7 = vpop.permute.xlu1 %2505 }
 0x2ff   : > { %9646 = vst [vmem:[#allocation67_spill] sm:$0xff] %v7128_v7  ;;  %v7131_v48 = vpop.permute.xlu0 %1916  ;;  %v9215_v7 = vmov 25  }
 0x300   : > { %9647 = vst [vmem:[#allocation68_spill] sm:$0xff] %v7131_v48 }
 0x301   : > { %5249 = vset.pattern.permute.xlu1 %v9202_v35 }
 0x302   : > { %3419 = vperm.xlu1 %5249, %v6752_v26   ;;  %v7133_v31 = vpop.permute.xlu1 %2513 }
 0x303   : > { %9648 = vst [vmem:[#allocation69_spill] sm:$0xff] %v7133_v31  ;;  %v7136_v4 = vpop.permute.xlu0 %2036 }
 0x304   : > { %9649 = vst [vmem:[#allocation70_spill] sm:$0xff] %v7136_v4 }
 0x306   : > { %5251 = vset.pattern.permute.xlu1 %v5951_v51  ;;  %v7141_v52 = vpop.permute.xlu1 %2521 }
 0x307   : > { %3435 = vperm.xlu1 %5251, %v6752_v26   ;;  %9650 = vst [vmem:[#allocation71_spill] sm:$0xff] %v7141_v52  ;;  %v7145_v37 = vpop.permute.xlu0 %2028 }
 0x308   : > { %9651 = vst [vmem:[#allocation72_spill] sm:$0xff] %v7145_v37 }
 0x30a   : > { %v7156_v52 = vpop.permute.xlu1 %2529 }
 0x30b   : > { %3439 = vperm.xlu1 %5251, %v6623_v39   ;;  %9653 = vst [vmem:[#allocation74_spill] sm:$0xff] %v7156_v52 }
 0x30d   : > { %v1575_v15 = vpop.f32.mrf.mxu1 }
 0x30e   : > { %v1576_v59 = vadd.f32 %v1575_v15, %v6964_v38  ;;  %v7152_v15 = vpop.permute.xlu0 %2020  ;;  %v7168_v52 = vpop.permute.xlu1 %2537 }
 0x30f   : > { %v7138_v35 = vpop.f32.mrf.mxu1  ;;  %5253 = vset.pattern.permute.xlu1 %v9215_v7  ;;  %9652 = vst [vmem:[#allocation73_spill] sm:$0xff] %v7152_v15  ;;  %v5954_v15 = vmov 35   ;;  %9655 = vst [vmem:[#allocation76_spill] sm:$0xff] %v7168_v52 }
 0x310   : > { %3459 = vperm.xlu1 %5253, %v6623_v39   ;;  %v1734_v18 = vmax.f32 %v1576_v59, 0.0 }
 0x311   : > { %v1579_v10 = vpop.f32.mrf.mxu1 }
 0x312   : > { %v1580_v51 = vadd.f32 %v1579_v10, %v6869_v62  ;;  %v9220_v10 = vmov 26   ;;  %v7162_v59 = vpop.permute.xlu0 %2012 }
 0x313   : > { %v7147_v31 = vpop.f32.mrf.mxu1  ;;  %9654 = vst [vmem:[#allocation75_spill] sm:$0xff] %v7162_v59  ;;  %v7179_v59 = vld [vmem:[#allocation9 + $0x8] sm:$0x3] }
 0x314   : > { %v1736_v4 = vmax.f32 %v1580_v51, 0.0  ;;  %5254 = vset.pattern.permute.xlu1 %v9220_v10 }
 0x315   : > { %v1585_v1 = vpop.f32.mrf.mxu1  ;;  %3471 = vperm.xlu1 %5254, %v6752_v26  }
 0x316   : > { %v7150_v42 = vpack.c.bf16 %v1736_v4, %v1734_v18  ;;  %v1586_v7 = vadd.f32 %v1585_v1, %v6952_v19  ;;  %v7173_v10 = vpop.permute.xlu0 %2004 }
 0x317   : > { %v7154_v56 = vpop.f32.mrf.mxu1  ;;  %9656 = vst [vmem:[#allocation77_spill] sm:$0xff] %v7173_v10 }
 0x318   : > { %v1738_v18 = vmax.f32 %v1586_v7, 0.0 }
 0x319   : > { %v1589_v37 = vpop.f32.mrf.mxu1  ;;  %5256 = vset.pattern.permute.xlu1 %v5954_v15 }
 0x31a   : > { %v1590_v39 = vadd.f32 %v1589_v37, %v6860_v28  ;;  %3483 = vperm.xlu1 %5256, %v6752_v26   ;;  %v7182_v7 = vpop.permute.xlu0 %1996 }
 0x31b   : > { %v7164_v4 = vpop.f32.mrf.mxu1  ;;  %9657 = vst [vmem:[#allocation78_spill] sm:$0xff] %v7182_v7  ;;  %v9235_v7 = vmov 28  }
 0x31c   : > { %v1740_v51 = vmax.f32 %v1590_v39, 0.0  ;;  %v7186_v39 = vpop.permute.xlu1 %2545 }
 0x31d   : > { %v7166_v20 = vpop.f32.mrf.mxu1  ;;  %9658 = vst [vmem:[#allocation79_spill] sm:$0xff] %v7186_v39 }
 0x31e   : > { %v7171_v1 = vpack.c.bf16 %v1740_v51, %v1738_v18  ;;  %3487 = vperm.xlu1 %5256, %v7179_v59   ;;  %v9230_v18 = vmov 27   ;;  %v7192_v51 = vpop.permute.xlu0 %1988 }
 0x31f   : > { %v7175_v0 = vpop.f32.mrf.mxu1  ;;  %9659 = vst [vmem:[#allocation80_spill] sm:$0xff] %v7192_v51 }
 0x320   : > { %v7198_v27 = vpop.permute.xlu1 %2553 }
 0x321   : > { %v7177_v37 = vpop.f32.mrf.mxu1  ;;  %9660 = vst [vmem:[#allocation81_spill] sm:$0xff] %v7198_v27  ;;  %v5379_v27 = vld [vmem:[%s9106_s3 + $0x4] ss:$8 sps:$4 sm:$0x1f]  }
 0x322   : > { %5258 = vset.pattern.permute.xlu1 %v9230_v18  ;;  %v7201_v36 = vpop.permute.xlu0 %1980  ;;  %1882 = vmatprep.mubr.bf16.mxu0 %v5379_v27  ;;  %v9247_v27 = vmov 29  }
 0x323   : > { %v7184_v15 = vpop.f32.mrf.mxu1  ;;  %3499 = vperm.xlu1 %5258, %v7179_v59   ;;  %9661 = vst [vmem:[#allocation82_spill] sm:$0xff] %v7201_v36 }
 0x324   : > { %v7210_v41 = vpop.permute.xlu1 %2561 }
 0x325   : > { %v7188_v52 = vpop.f32.mrf.mxu1  ;;  %9662 = vst [vmem:[#allocation83_spill] sm:$0xff] %v7210_v41 }
 0x326   : > { %v469_v8 = vpop.permute.xlu0 %468 }
 0x327   : > { %v7194_v10 = vpop.f32.mrf.mxu1  ;;  %5259 = vset.pattern.permute.xlu1 %v9235_v7  ;;  %v472_v7 = vsel %vm471_vm2, %v6981_v11, %v469_v8  ;;  %v9664_v8 = vmov 9  }
 0x328   : > { %3511 = vperm.xlu1 %5259, %v6752_v26   ;;  %3047 = vperm.xlu0 %5218, %v472_v7   ;;  %v7225_v48 = vpop.permute.xlu1 %2569 }
 0x329   : > { %v7196_v44 = vpop.f32.mrf.mxu1  ;;  %9663 = vst [vmem:[#allocation84_spill] sm:$0xff] %v7225_v48 }
 0x32b   : > { %v7203_v39 = vpop.f32.mrf.mxu1 }
 0x32c   : > { %5261 = vset.pattern.permute.xlu1 %v5957_v14  ;;  %3159 = vperm.xlu0 %5218, %v7179_v59   ;;  %v7231_v7 = vpop.permute.xlu1 %2577 }
 0x32d   : > { %v7206_v18 = vpop.f32.mrf.mxu1  ;;  %3531 = vperm.xlu1 %5261, %v6752_v26   ;;  %9665 = vst [vmem:[#allocation85_spill] sm:$0xff] %v7231_v7  ;;  %v5960_v7 = vmov 30  }
 0x32f   : > { %v7208_v51 = vpop.f32.mrf.mxu1 }
 0x330   : > { %5222 = vset.pattern.permute.xlu0 %v9664_v8  ;;  %v7238_v33 = vpop.permute.xlu1 %2585 }
 0x331   : > { %v7217_v36 = vpop.f32.mrf.mxu1  ;;  %3535 = vperm.xlu1 %5261, %v7179_v59   ;;  %3183 = vperm.xlu0 %5222, %v6752_v26   ;;  %9667 = vst [vmem:[#allocation86_spill] sm:$0xff] %v7238_v33 }
 0x333   : > { %v7220_v50 = vpop.f32.mrf.mxu1 }
 0x334   : > { %v7243_v46 = vpop.permute.xlu1 %2593 }
 0x335   : > { %v7223_v41 = vpop.f32.mrf.mxu1  ;;  %5263 = vset.pattern.permute.xlu1 %v9247_v27  ;;  %5225 = vset.pattern.permute.xlu0 %v9666_v3  ;;  %v9668_v27 = vmov 10   ;;  %9669 = vst [vmem:[#allocation87_spill] sm:$0xff] %v7243_v46 }
 0x336   : > { %3551 = vperm.xlu1 %5263, %v7179_v59   ;;  %3203 = vperm.xlu0 %5225, %v7179_v59  }
 0x337   : > { %v1627_v17 = vpop.f32.mrf.mxu1 }
 0x338   : > { %v7256_v13 = vpop.permute.xlu1 %3111 }
 0x339   : > { %v1629_v11 = vpop.f32.mrf.mxu1  ;;  %9672 = vst [vmem:[#allocation88_spill] sm:$0xff] %v7256_v13 }
 0x33a   : > { %5264 = vset.pattern.permute.xlu1 %v9253_v6  ;;  %5227 = vset.pattern.permute.xlu0 %v9668_v27 }
 0x33b   : > { %v1631_v14 = vpop.f32.mrf.mxu1  ;;  %3559 = vperm.xlu1 %5264, %v6752_v26   ;;  %3227 = vperm.xlu0 %5227, %v6752_v26  }
 0x33d   : > { %v1635_v22 = vpop.f32.mrf.mxu1 }
 0x33f   : > { %v1637_v48 = vpop.f32.mrf.mxu1  ;;  %5266 = vset.pattern.permute.xlu1 %v5960_v7  ;;  %5230 = vset.pattern.permute.xlu0 %v9670_v57 }
 0x340   : > { %3571 = vperm.xlu1 %5266, %v6752_v26   ;;  %3247 = vperm.xlu0 %5230, %v7179_v59   ;;  %v1638_v24 = vadd.f32 %v1637_v48, %v6792_v45 }
 0x341   : > { %v1639_v8 = vpop.f32.mrf.mxu1 }
 0x342   : > { %v1640_v57 = vadd.f32 %v1639_v8, %v6803_v34  ;;  %v1759_v8 = vmax.f32 %v1638_v24, 0.0  ;;  %v5962_v24 = vmov 39  }
 0x343   : > { %v1641_v2 = vpop.f32.mrf.mxu1 }
 0x344   : > { %3575 = vperm.xlu1 %5266, %v7179_v59   ;;  %v1642_v27 = vadd.f32 %v1641_v2, %v6803_v34  ;;  %5232 = vset.pattern.permute.xlu0 %v9671_v5  ;;  %v9263_v2 = vmov 31   ;;  %v7264_v5 = vadd.f32 %v7203_v39, %v6832_v21  ;;  %v1636_v34 = vadd.f32 %v1635_v22, %v6792_v45 }
 0x345   : > { %v1645_v43 = vpop.f32.mrf.mxu1  ;;  %3267 = vperm.xlu0 %5232, %v6752_v26   ;;  %v9673_v39 = vmov 13  }
 0x346   : > { %v1646_v7 = vadd.f32 %v1645_v43, %v6780_v61  ;;  %v1761_v43 = vmax.f32 %v1642_v27, 0.0 }
 0x347   : > { %v1647_v3 = vpop.f32.mrf.mxu1 }
 0x348   : > { %v1648_v33 = vadd.f32 %v1647_v3, %v6780_v61  ;;  %5268 = vset.pattern.permute.xlu1 %v9263_v2  ;;  %v1632_v61 = vadd.f32 %v1631_v14, %v6814_v53  ;;  %v1760_v14 = vmax.f32 %v1640_v57, 0.0  ;;  %v1811_v45 = vpack.c.bf16 %v1761_v43, %v1759_v8 }
 0x349   : > { %v1649_v6 = vpop.f32.mrf.mxu1  ;;  %3591 = vperm.xlu1 %5268, %v7179_v59   ;;  %5235 = vset.pattern.permute.xlu0 %v9673_v39 }
 0x34a   : > { %v1650_v23 = vadd.f32 %v1649_v6, %v6898_v63  ;;  %v1763_v6 = vmax.f32 %v1648_v33, 0.0  ;;  %v1622_v33 = vadd.f32 %v7220_v50, %v6822_v58  ;;  %v1757_v29 = vmax.f32 %v1632_v61, 0.0  ;;  %3287 = vperm.xlu0 %5235, %v7179_v59  }
 0x34b   : > { %v1651_v55 = vpop.f32.mrf.mxu1 }
 0x34c   : > { %v1652_v46 = vadd.f32 %v1651_v55, %v6898_v63  ;;  %v1764_v47 = vmax.f32 %v1650_v23, 0.0  ;;  %v1762_v63 = vmax.f32 %v1646_v7, 0.0  ;;  %v1628_v23 = vadd.f32 %v1627_v17, %v6906_v9 }
 0x34d   : > { %v1655_v32 = vpop.f32.mrf.mxu1  ;;  %5269 = vset.pattern.permute.xlu1 %v5962_v24  ;;  %v1753_v61 = vmax.f32 %v1622_v33, 0.0 }
 0x34e   : > { %v1765_v48 = vmax.f32 %v1652_v46, 0.0  ;;  %v1656_v2 = vadd.f32 %v1655_v32, %v7058_v25  ;;  %v1630_v46 = vadd.f32 %v1629_v11, %v6814_v53  ;;  %v1812_v27 = vpack.c.bf16 %v1764_v47, %v1762_v63  ;;  %v7280_v11 = vpop.permute.xlu1 %3123  ;;  %3607 = vperm.xlu1 %5269, %v6752_v26  }
 0x34f   : > { %v1657_v55 = vpop.f32.mrf.mxu1  ;;  %v1618_v32 = vadd.f32 %v7208_v51, %v6918_v60  ;;  %v1626_v53 = vadd.f32 %v7223_v41, %v6906_v9  ;;  %v1758_v47 = vmax.f32 %v1636_v34, 0.0  ;;  %9674 = vst [vmem:[#allocation89_spill] sm:$0xff] %v7280_v11  ;;  %v1620_v51 = vadd.f32 %v7217_v36, %v6822_v58 }
 0x350   : > { %v1813_v3 = vpack.c.bf16 %v1765_v48, %v1763_v6  ;;  %v1658_v22 = vadd.f32 %v1657_v55, %v7058_v25  ;;  %v1755_v25 = vmax.f32 %v1628_v23, 0.0  ;;  %v1766_v7 = vmax.f32 %v1656_v2, 0.0 }
 0x351   : > { %v1659_v13 = vpop.f32.mrf.mxu1  ;;  %v1756_v9 = vmax.f32 %v1630_v46, 0.0  ;;  %v1810_v41 = vpack.c.bf16 %v1760_v14, %v1758_v47  ;;  %v7291_v2 = vadd.f32 %v7164_v4, %v6860_v28  ;;  %v1754_v55 = vmax.f32 %v1626_v53, 0.0 }
 0x352   : > { %v1660_v17 = vadd.f32 %v1659_v13, %v6930_v54  ;;  %1850 = vmatprep.subr.bf16.mxu0 %v1813_v3  ;;  %v1809_v6 = vpack.c.bf16 %v1757_v29, %v1755_v25  ;;  %v1767_v48 = vmax.f32 %v1658_v22, 0.0  ;;  %v5963_v58 = vmov 32   ;;  %v7305_v46 = vpop.permute.xlu1 %3127 }
 0x353   : > { %v1661_v50 = vpop.f32.mrf.mxu1  ;;  %1851 = vmatpush1.bf16.msra.mxu0 %v1812_v27  ;;  %5271 = vset.pattern.permute.xlu1 %v5963_v58  ;;  %v1608_v36 = vadd.f32 %v7194_v10, %v6932_v40  ;;  %v1751_v29 = vmax.f32 %v1618_v32, 0.0  ;;  %v1602_v28 = vadd.f32 %v7184_v15, %v6845_v30  ;;  %v1752_v4 = vmax.f32 %v1620_v51, 0.0  ;;  %9675 = vst [vmem:[#allocation90_spill] sm:$0xff] %v7305_v46 }
 0x354   : > { %v1768_v13 = vmax.f32 %v1660_v17, 0.0  ;;  %v1662_v57 = vadd.f32 %v1661_v50, %v6930_v54  ;;  %1852 = vmatprep.subr.bf16.mxu0 %v1811_v45  ;;  %v1616_v54 = vadd.f32 %v7206_v18, %v6918_v60  ;;  %3627 = vperm.xlu1 %5271, %v7179_v59   ;;  %v1610_v60 = vadd.f32 %v7196_v44, %v6832_v21 }
 0x355   : > { %v1665_v43 = vpop.f32.mrf.mxu1  ;;  %v1808_v18 = vpack.c.bf16 %v1756_v9, %v1754_v55  ;;  %v9676_v10 = vmov 14   ;;  %v1749_v14 = vmax.f32 %v7264_v5, 0.0  ;;  %v1807_v27 = vpack.c.bf16 %v1753_v61, %v1751_v29 }
 0x356   : > { %v7287_v34 = vpack.c.bf16 %v1768_v13, %v1766_v7  ;;  %v1769_v63 = vmax.f32 %v1662_v57, 0.0  ;;  %v1666_v3 = vadd.f32 %v1665_v43, %v7044_v49  ;;  %5237 = vset.pattern.permute.xlu0 %v9676_v10  ;;  %v1598_v15 = vadd.f32 %v7175_v0, %v6944_v16  ;;  %v7329_v51 = vpop.permute.xlu1 %3143 }
 0x357   : > { %v1667_v23 = vpop.f32.mrf.mxu1  ;;  %1853 = vmatpush1.bf16.msra.mxu0 %v1810_v41  ;;  %3319 = vperm.xlu0 %5237, %v6752_v26   ;;  %v1600_v21 = vadd.f32 %v7177_v37, %v6845_v30  ;;  %v1606_v44 = vadd.f32 %v7188_v52, %v6932_v40  ;;  %v1750_v22 = vmax.f32 %v1616_v54, 0.0  ;;  %v1747_v5 = vmax.f32 %v1608_v36, 0.0  ;;  %9678 = vst [vmem:[#allocation91_spill] sm:$0xff] %v7329_v51 }
 0x358   : > { %v7297_v8 = vpack.c.bf16 %v1769_v63, %v1767_v48  ;;  %1854 = vmatprep.subr.bf16.mxu0 %v1809_v6  ;;  %v1668_v39 = vadd.f32 %v1667_v23, %v7044_v49  ;;  %v1770_v32 = vmax.f32 %v1666_v3, 0.0  ;;  %3623 = vperm.xlu1 %5271, %v6752_v26   ;;  %v1745_v47 = vmax.f32 %v1602_v28, 0.0 }
 0x359   : > { %v1669_v33 = vpop.f32.mrf.mxu1  ;;  %v1748_v50 = vmax.f32 %v1610_v60, 0.0  ;;  %v1806_v0 = vpack.c.bf16 %v1752_v4, %v1750_v22  ;;  %v1805_v52 = vpack.c.bf16 %v1749_v14, %v1747_v5  ;;  %v9677_v7 = vmov 21  }
 0x35a   : > { %v1670_v45 = vadd.f32 %v1669_v33, %v6920_v12  ;;  %v1771_v30 = vmax.f32 %v1668_v39, 0.0  ;;  %v1596_v13 = vadd.f32 %v7166_v20, %v6944_v16  ;;  %v1746_v57 = vmax.f32 %v1606_v44, 0.0 }
 0x35b   : > { %v1671_v17 = vpop.f32.mrf.mxu1  ;;  %1855 = vmatpush1.bf16.msra.mxu0 %v1808_v18  ;;  %5240 = vset.pattern.permute.xlu0 %v9677_v7  ;;  %v1588_v61 = vadd.f32 %v7154_v56, %v6952_v19  ;;  %v1743_v9 = vmax.f32 %v1598_v15, 0.0  ;;  %v5964_v43 = vmov 33   ;;  %v1744_v6 = vmax.f32 %v1600_v21, 0.0 }
 0x35c   : > { %v1772_v53 = vmax.f32 %v1670_v45, 0.0  ;;  %v1672_v49 = vadd.f32 %v1671_v17, %v6920_v12  ;;  %1856 = vmatprep.subr.bf16.mxu0 %v1807_v27  ;;  %3335 = vperm.xlu0 %5240, %v7179_v59   ;;  %v1804_v16 = vpack.c.bf16 %v1748_v50, %v1746_v57  ;;  %v1582_v48 = vadd.f32 %v7147_v31, %v6869_v62  ;;  %v7351_v62 = vpop.permute.xlu1 %3155  ;;  %v7370_v27 = vld [vmem:[#allocation9] sm:$0xff] }
 0x35d   : > { %v7320_v25 = vpop.f32.mrf.mxu1  ;;  %5273 = vset.pattern.permute.xlu1 %v5964_v43  ;;  %v1741_v63 = vmax.f32 %v7291_v2, 0.0  ;;  %v1803_v54 = vpack.c.bf16 %v1745_v47, %v1743_v9  ;;  %v1742_v19 = vmax.f32 %v1596_v13, 0.0  ;;  %v9679_v55 = vmov 16   ;;  %9680 = vst [vmem:[#allocation92_spill] sm:$0xff] %v7351_v62 }
 0x35e   : > { %v7322_v37 = vpack.c.bf16 %v1772_v53, %v1770_v32  ;;  %v1773_v40 = vmax.f32 %v1672_v49, 0.0  ;;  %3651 = vperm.xlu1 %5273, %v7179_v59   ;;  %v1578_v23 = vadd.f32 %v7138_v35, %v6964_v38  ;;  %v1739_v58 = vmax.f32 %v1588_v61, 0.0 }
 0x35f   : > { %v7327_v12 = vpop.f32.mrf.mxu1  ;;  %1857 = vmatpush1.bf16.msra.mxu0 %v1806_v0  ;;  %v1802_v36 = vpack.c.bf16 %v1744_v6, %v1742_v19  ;;  %v5965_v31 = vmov 37   ;;  %v1737_v2 = vmax.f32 %v1582_v48, 0.0  ;;  %v9681_v35 = vmov 24  }
 0x360   : > { %v7334_v41 = vpack.c.bf16 %v1773_v40, %v1771_v30  ;;  %1858 = vmatprep.subr.bf16.mxu0 %v1805_v52  ;;  %5242 = vset.pattern.permute.xlu0 %v9679_v55  ;;  %v1801_v3 = vpack.c.bf16 %v1741_v63, %v1739_v58  ;;  %v1735_v38 = vmax.f32 %v1578_v23, 0.0  ;;  %v5966_v18 = vmov 34   ;;  %v7364_v10 = vpop.permute.xlu1 %3167  ;;  %v9695_v55 = vld [vmem:[#allocation53_spill] sm:$0xff]  ;;  %v9696_v58 = vld [vmem:[#allocation52_spill] sm:$0xff] }
 0x361   : > { %v7337_v20 = vpop.f32.mrf.mxu1  ;;  %3359 = vperm.xlu0 %5242, %v6752_v26   ;;  %9682 = vst [vmem:[#allocation93_spill] sm:$0xff] %v7364_v10  ;;  %v9683_v14 = vmov 22   ;;  %v9685_v15 = vmov 18   ;;  %v5967_v44 = vmov 41   ;;  %v9687_v5 = vmov 25  }
 0x362   : > { %5274 = vset.pattern.permute.xlu1 %v5965_v31  ;;  %v1799_v4 = vpack.c.bf16 %v1737_v2, %v1735_v38  ;;  %v5968_v32 = vmov 40   ;;  %v9688_v47 = vmov 26   ;;  %v5969_v30 = vmov 50  }
 0x363   : > { %v7343_v56 = vpop.f32.mrf.mxu1  ;;  %1859 = vmatpush1.bf16.msra.mxu0 %v1804_v16  ;;  %3635 = vperm.xlu1 %5274, %v6752_v26   ;;  %v9690_v7 = vmov 27   ;;  %v5970_v13 = vmov 42   ;;  %v9692_v6 = vmov 28   ;;  %v9697_v38 = vmov 29  }
 0x364   : > { %1860 = vmatprep.subr.bf16.mxu0 %v1803_v54  ;;  %v7379_v45 = vpop.permute.xlu1 %3171  ;;  %v9694_v54 = vld [vmem:[#allocation21_spill] sm:$0xff] }
 0x365   : > { %v7349_v29 = vpop.f32.mrf.mxu1  ;;  %5245 = vset.pattern.permute.xlu0 %v9681_v35  ;;  %9684 = vst [vmem:[#allocation94_spill] sm:$0xff] %v7379_v45  ;;  %v9698_v35 = vld [vmem:[#allocation55_spill] sm:$0xff] }
 0x366   : > { %3383 = vperm.xlu0 %5245, %v7179_v59  }
 0x367   : > { %v7355_v28 = vpop.f32.mrf.mxu1  ;;  %1861 = vmatpush1.bf16.msra.mxu0 %v1802_v36  ;;  %5276 = vset.pattern.permute.xlu1 %v5966_v18 }
 0x368   : > { %1862 = vmatprep.subr.bf16.mxu0 %v1801_v3  ;;  %3667 = vperm.xlu1 %5276, %v7179_v59   ;;  %v7389_v17 = vpop.permute.xlu1 %3187 }
 0x369   : > { %v7358_v60 = vpop.f32.mrf.mxu1  ;;  %9686 = vst [vmem:[#allocation95_spill] sm:$0xff] %v7389_v17 }
 0x36a   : > { %5247 = vset.pattern.permute.xlu0 %v9683_v14 }
 0x36b   : > { %v7361_v33 = vpop.f32.mrf.mxu1  ;;  %1863 = vmatpush1.bf16.msra.mxu0 %v7171_v1  ;;  %3407 = vperm.xlu0 %5247, %v7370_v27  }
 0x36c   : > { %1864 = vmatprep.subr.bf16.mxu0 %v1799_v4  ;;  %3663 = vperm.xlu1 %5276, %v7370_v27   ;;  %v7396_v0 = vpop.permute.xlu1 %3199 }
 0x36d   : > { %v7367_v26 = vpop.f32.mrf.mxu1  ;;  %9689 = vst [vmem:[#allocation96_spill] sm:$0xff] %v7396_v0 }
 0x36f   : > { %v7373_v39 = vpop.f32.mrf.mxu1  ;;  %1865 = vmatpush1.bf16.msra.mxu0 %v7150_v42  ;;  %5250 = vset.pattern.permute.xlu0 %v9685_v15 }
 0x370   : > { %3423 = vperm.xlu0 %5250, %v7179_v59   ;;  %5278 = vset.pattern.permute.xlu1 %v5967_v44  ;;  %v7402_v61 = vpop.permute.xlu1 %3211 }
 0x371   : > { %v7377_v1 = vpop.f32.mrf.mxu1  ;;  %3703 = vperm.xlu1 %5278, %v7179_v59   ;;  %9691 = vst [vmem:[#allocation97_spill] sm:$0xff] %v7402_v61 }
 0x373   : > { %v7382_v21 = vpop.f32.mrf.mxu1 }
 0x374   : > { %5252 = vset.pattern.permute.xlu0 %v9687_v5  ;;  %v7408_v63 = vpop.permute.xlu1 %3215  ;;  %v9699_v5 = vld [vmem:[#allocation51_spill] sm:$0xff] }
 0x375   : > { %v7387_v22 = vpop.f32.mrf.mxu1  ;;  %3455 = vperm.xlu0 %5252, %v7370_v27   ;;  %5279 = vset.pattern.permute.xlu1 %v5968_v32  ;;  %9693 = vst [vmem:[#allocation98_spill] sm:$0xff] %v7408_v63 }
 0x376   : > { %3683 = vperm.xlu1 %5279, %v7370_v27  }
 0x377   : > { %v1707_v42 = vpop.f32.mrf.mxu1 }
 0x379   : > { %v1709_v53 = vpop.f32.mrf.mxu1  ;;  %5255 = vset.pattern.permute.xlu0 %v9688_v47 }
 0x37a   : > { %3475 = vperm.xlu0 %5255, %v7179_v59   ;;  %5281 = vset.pattern.permute.xlu1 %v5969_v30 }
 0x37b   : > { %v1711_v49 = vpop.f32.mrf.mxu1  ;;  %3715 = vperm.xlu1 %5281, %v7179_v59  }
 0x37c   : > { %v1712_v47 = vadd.f32 %v1711_v49, %v9699_v5  ;;  %v5971_v49 = vmov 43  }
 0x37d   : > { %v1715_v50 = vpop.f32.mrf.mxu1 }
 0x37e   : > { %5257 = vset.pattern.permute.xlu0 %v9690_v7 }
 0x37f   : > { %v1717_v40 = vpop.f32.mrf.mxu1  ;;  %3495 = vperm.xlu0 %5257, %v7370_v27   ;;  %5282 = vset.pattern.permute.xlu1 %v5970_v13 }
 0x380   : > { %3727 = vperm.xlu1 %5282, %v7179_v59   ;;  %v1718_v4 = vadd.f32 %v1717_v40, %v9698_v35  ;;  %v9701_v40 = vld [vmem:[#allocation30_spill] sm:$0xff] }
 0x381   : > { %v1719_v52 = vpop.f32.mrf.mxu1 }
 0x382   : > { %v1720_v14 = vadd.f32 %v1719_v52, %v9694_v54  ;;  %v1710_v52 = vadd.f32 %v1709_v53, %v9699_v5  ;;  %v9704_v53 = vld [vmem:[#allocation32_spill] sm:$0xff]  ;;  %v9707_v5 = vld [vmem:[#allocation23_spill] sm:$0xff] }
 0x383   : > { %v1721_v57 = vpop.f32.mrf.mxu1  ;;  %5260 = vset.pattern.permute.xlu0 %v9692_v6 }
 0x384   : > { %3515 = vperm.xlu0 %5260, %v7179_v59   ;;  %5284 = vset.pattern.permute.xlu1 %v5969_v30  ;;  %v1722_v19 = vadd.f32 %v1721_v57, %v9694_v54  ;;  %v1792_v54 = vmax.f32 %v1720_v14, 0.0 }
 0x385   : > { %v1725_v9 = vpop.f32.mrf.mxu1  ;;  %3711 = vperm.xlu1 %5284, %v7370_v27  }
 0x386   : > { %v1726_v2 = vadd.f32 %v1725_v9, %v9695_v55  ;;  %v1793_v30 = vmax.f32 %v1722_v19, 0.0  ;;  %v1716_v9 = vadd.f32 %v1715_v50, %v9698_v35  ;;  %v9703_v19 = vld [vmem:[#allocation22_spill] sm:$0xff] }
 0x387   : > { %v1727_v16 = vpop.f32.mrf.mxu1  ;;  %v1702_v50 = vadd.f32 %v7382_v21, %v9703_v19 }
 0x388   : > { %v1728_v23 = vadd.f32 %v1727_v16, %v9695_v55  ;;  %5262 = vset.pattern.permute.xlu0 %v9697_v38  ;;  %v1794_v6 = vmax.f32 %v1726_v2, 0.0  ;;  %v7422_v16 = vpop.permute.xlu1 %3231  ;;  %v1791_v55 = vmax.f32 %v1718_v4, 0.0  ;;  %v1698_v38 = vadd.f32 %v7373_v39, %v9704_v53 }
 0x389   : > { %v1729_v48 = vpop.f32.mrf.mxu1  ;;  %3547 = vperm.xlu0 %5262, %v7370_v27   ;;  %5285 = vset.pattern.permute.xlu1 %v5970_v13  ;;  %9700 = vst [vmem:[#allocation21_spill] sm:$0xff] %v7422_v16  ;;  %v9702_v13 = vmov 36   ;;  %v1700_v4 = vadd.f32 %v7377_v1, %v9703_v19  ;;  %v1696_v39 = vadd.f32 %v7367_v26, %v9704_v53  ;;  %v9708_v1 = vld [vmem:[#allocation62_spill] sm:$0xff] }
 0x38a   : > { %v1730_v36 = vadd.f32 %v1729_v48, %v9696_v58  ;;  %3723 = vperm.xlu1 %5285, %v7370_v27   ;;  %v1795_v7 = vmax.f32 %v1728_v23, 0.0  ;;  %v1708_v48 = vadd.f32 %v1707_v42, %v9701_v40  ;;  %v1789_v23 = vmax.f32 %v1712_v47, 0.0 }
 0x38b   : > { %v1731_v3 = vpop.f32.mrf.mxu1  ;;  %v1827_v2 = vpack.c.bf16 %v1793_v30, %v1791_v55  ;;  %v1706_v42 = vadd.f32 %v7387_v22, %v9701_v40  ;;  %v1692_v47 = vadd.f32 %v7361_v33, %v9707_v5  ;;  %v1785_v22 = vmax.f32 %v1702_v50, 0.0  ;;  %v9709_v55 = vld [vmem:[#allocation24_spill] sm:$0xff] }
 0x38c   : > { %v1732_v18 = vadd.f32 %v1731_v3, %v9696_v58  ;;  %v1796_v15 = vmax.f32 %v1730_v36, 0.0  ;;  %v1790_v3 = vmax.f32 %v1716_v9, 0.0  ;;  %v1787_v35 = vmax.f32 %v1708_v48, 0.0  ;;  %v7438_v14 = vpop.permute.xlu1 %3243 }
 0x38d   : > { %5265 = vset.pattern.permute.xlu0 %v9702_v13  ;;  %9705 = vst [vmem:[#allocation53_spill] sm:$0xff] %v7438_v14  ;;  %v1688_v9 = vadd.f32 %v7355_v28, %v9708_v1  ;;  %v1690_v33 = vadd.f32 %v7358_v60, %v9707_v5  ;;  %v1784_v40 = vmax.f32 %v1700_v4, 0.0  ;;  %v1781_v13 = vmax.f32 %v1692_v47, 0.0 }
 0x38e   : > { %v1797_v57 = vmax.f32 %v1732_v18, 0.0  ;;  %v1828_v36 = vpack.c.bf16 %v1796_v15, %v1794_v6  ;;  %3563 = vperm.xlu0 %5265, %v7179_v59   ;;  %5286 = vset.pattern.permute.xlu1 %v5971_v49  ;;  %v1788_v18 = vmax.f32 %v1710_v52, 0.0  ;;  %v1826_v21 = vpack.c.bf16 %v1792_v54, %v1790_v3 }
 0x38f   : > { %3743 = vperm.xlu1 %5286, %v7179_v59   ;;  %v9706_v15 = vmov 31   ;;  %v1825_v30 = vpack.c.bf16 %v1789_v23, %v1787_v35  ;;  %v1783_v6 = vmax.f32 %v1698_v38, 0.0  ;;  %v1686_v26 = vadd.f32 %v7349_v29, %v9708_v1 }
 0x390   : > { %v1829_v58 = vpack.c.bf16 %v1797_v57, %v1795_v7  ;;  %v5972_v7 = vmov 45   ;;  %v1786_v57 = vmax.f32 %v1706_v42, 0.0  ;;  %v1782_v54 = vmax.f32 %v1696_v39, 0.0  ;;  %v7456_v28 = vpop.permute.xlu1 %3255 }
 0x391   : > { %v1823_v52 = vpack.c.bf16 %v1785_v22, %v1783_v6  ;;  %9710 = vst [vmem:[#allocation52_spill] sm:$0xff] %v7456_v28  ;;  %v1779_v19 = vmax.f32 %v1688_v9, 0.0  ;;  %v5973_v50 = vmov 47   ;;  %v1778_v3 = vmax.f32 %v1686_v26, 0.0 }
 0x392   : > { %1866 = vmatprep.subr.bf16.mxu0 %v1829_v58  ;;  %5267 = vset.pattern.permute.xlu0 %v9706_v15  ;;  %v1824_v48 = vpack.c.bf16 %v1788_v18, %v1786_v57  ;;  %v1682_v58 = vadd.f32 %v7343_v56, %v9709_v55  ;;  %v1780_v56 = vmax.f32 %v1690_v33, 0.0  ;;  %v1822_v23 = vpack.c.bf16 %v1784_v40, %v1782_v54  ;;  %v5377_v15 = vld [vmem:[%s9106_s3] ss:$8 sps:$4 sm:$0x1f]  }
 0x393   : > { %1867 = vmatpush2.bf16.msra.mxu0 %v1828_v36  ;;  %3587 = vperm.xlu0 %5267, %v7370_v27   ;;  %v9711_v36 = vld [vmem:[#allocation64_spill] sm:$0xff]  ;;  %v5974_v35 = vmov 51   ;;  %v5978_v5 = vmov 49   ;;  %v5979_v47 = vmov 53   ;;  %v5980_v39 = vmov 48  }
 0x394   : > { %1868 = vmatprep.subr.bf16.mxu0 %v1827_v2  ;;  %5288 = vset.pattern.permute.xlu1 %v5972_v7  ;;  %v1678_v60 = vadd.f32 %v7327_v12, %v9711_v36  ;;  %v1777_v29 = vmax.f32 %v1682_v58, 0.0  ;;  %v1821_v2 = vpack.c.bf16 %v1781_v13, %v1779_v19  ;;  %v1676_v42 = vadd.f32 %v7320_v25, %v9711_v36 }
 0x395   : > { %3803 = vperm.xlu1 %5288, %v7179_v59   ;;  %v1820_v38 = vpack.c.bf16 %v1780_v56, %v1778_v3  ;;  %v5982_v9 = vmov 55   ;;  %v5983_v40 = vmov 56   ;;  %v5984_v58 = vmov 57  }
 0x396   : > { %v1775_v12 = vmax.f32 %v1678_v60, 0.0  ;;  %v1774_v18 = vmax.f32 %v1676_v42, 0.0  ;;  %v5985_v26 = vmov 59   ;;  %v5986_v60 = vmov 58  }
 0x397   : > { %1869 = vmatpush2.bf16.msra.mxu0 %v1826_v21  ;;  %5270 = vset.pattern.permute.xlu0 %v5962_v24  ;;  %v1680_v24 = vadd.f32 %v7337_v20, %v9709_v55  ;;  %v7469_v20 = vpop.permute.xlu1 %3259  ;;  %v5975_v21 = vmov 46   ;;  %v9728_v19 = vmov 1  }
 0x398   : > { %1870 = vmatprep.subr.bf16.mxu0 %v1825_v30  ;;  %3611 = vperm.xlu0 %5270, %v7179_v59   ;;  %v1819_v4 = vpack.c.bf16 %v1777_v29, %v1775_v12  ;;  %v7513_v30 = vpop.permute.xlu0 %3115 }
 0x399   : > { %5289 = vset.pattern.permute.xlu1 %v5973_v50  ;;  %v1776_v53 = vmax.f32 %v1680_v24, 0.0  ;;  %9717 = vst [vmem:[#allocation32_spill] sm:$0xff] %v7513_v30  ;;  %v5722_v24 = vld [vmem:[%s9111_s8] sm:$0xf] }
 0x39a   : > { %3855 = vperm.xlu1 %5289, %v7179_v59  }
 0x39b   : > { %1871 = vmatpush2.bf16.msra.mxu0 %v1824_v48  ;;  %v1818_v25 = vpack.c.bf16 %v1776_v53, %v1774_v18 }
 0x39c   : > { %1872 = vmatprep.subr.bf16.mxu0 %v1823_v52  ;;  %5272 = vset.pattern.permute.xlu0 %v5965_v31  ;;  %v7474_v31 = vpop.permute.xlu1 %3271  ;;  %v7519_v57 = vpop.permute.xlu0 %3139 }
 0x39d   : > { %3639 = vperm.xlu0 %5272, %v7179_v59   ;;  %9719 = vst [vmem:[#allocation62_spill] sm:$0xff] %v7519_v57 }
 0x39e   : > { %5291 = vset.pattern.permute.xlu1 %v5974_v35 }
 0x39f   : > { %1873 = vmatpush2.bf16.msra.mxu0 %v1822_v23  ;;  %3787 = vperm.xlu1 %5291, %v7370_v27  }
 0x3a0   : > { %1874 = vmatprep.subr.bf16.mxu0 %v1821_v2  ;;  %v7526_v6 = vpop.permute.xlu0 %2473 }
 0x3a1   : > { %5275 = vset.pattern.permute.xlu0 %v5964_v43  ;;  %v7483_v43 = vpop.permute.xlu1 %3283  ;;  %9721 = vst [vmem:[#allocation64_spill] sm:$0xff] %v7526_v6 }
 0x3a2   : > { %3647 = vperm.xlu0 %5275, %v7370_v27   ;;  %9712 = vst [vmem:[#allocation55_spill] sm:$0xff] %v7483_v43 }
 0x3a3   : > { %1875 = vmatpush2.bf16.msra.mxu0 %v1820_v38  ;;  %5292 = vset.pattern.permute.xlu1 %v5972_v7 }
 0x3a4   : > { %1876 = vmatprep.subr.bf16.mxu0 %v1819_v4  ;;  %3799 = vperm.xlu1 %5292, %v7370_v27   ;;  %v7532_v48 = vpop.permute.xlu0 %2485 }
 0x3a5   : > { %9723 = vst [vmem:[#allocation100_spill] sm:$0xff] %v7532_v48 }
 0x3a6   : > { %5277 = vset.pattern.permute.xlu0 %v5968_v32  ;;  %v9714_v32 = vmov 0  }
 0x3a7   : > { %1877 = vmatpush2.bf16.msra.mxu0 %v1818_v25  ;;  %3687 = vperm.xlu0 %5277, %v7179_v59  }
 0x3a8   : > { %1878 = vmatprep.subr.bf16.mxu0 %v7334_v41  ;;  %5294 = vset.pattern.permute.xlu1 %v5975_v21  ;;  %v5976_v41 = vmov 52   ;;  %v7539_v13 = vpop.permute.xlu0 %2493 }
 0x3a9   : > { %3819 = vperm.xlu1 %5294, %v7179_v59   ;;  %9725 = vst [vmem:[#allocation102_spill] sm:$0xff] %v7539_v13 }
 0x3ab   : > { %1879 = vmatpush2.bf16.msra.mxu0 %v7322_v37  ;;  %5280 = vset.pattern.permute.xlu0 %v5967_v44  ;;  %v5977_v37 = vmov 44  }
 0x3ac   : > { %1880 = vmatprep.subr.bf16.mxu0 %v7297_v8  ;;  %3699 = vperm.xlu0 %5280, %v7370_v27   ;;  %v7492_v8 = vpop.permute.xlu1 %3303  ;;  %v7545_v54 = vpop.permute.xlu0 %2501 }
 0x3ad   : > { %5295 = vset.pattern.permute.xlu1 %v5976_v41  ;;  %9713 = vst [vmem:[#allocation51_spill] sm:$0xff] %v7492_v8  ;;  %9726 = vst [vmem:[#allocation103_spill] sm:$0xff] %v7545_v54 }
 0x3ae   : > { %3867 = vperm.xlu1 %5295, %v7179_v59  }
 0x3af   : > { %1881 = vmatpush2.bf16.msra.mxu0 %v7287_v34 }
 0x3b0   : > { %5283 = vset.pattern.permute.xlu0 %v5977_v37  ;;  %v7498_v34 = vpop.permute.xlu1 %3307 }
 0x3b1   : > { %3779 = vperm.xlu0 %5283, %v7179_v59   ;;  %9715 = vst [vmem:[#allocation30_spill] sm:$0xff] %v7498_v34 }
 0x3b2   : > { %1883 = vmatmul.mubr.bf16.vlgmr.msra.gmra.mxu0 %v5377_v15  ;;  %5297 = vset.pattern.permute.xlu1 %v5975_v21 }
 0x3b3   : > { %2211 = vmatprep.mubr.bf16.mxu0 %v9714_v32  ;;  %3815 = vperm.xlu1 %5297, %v7370_v27  }
 0x3b4   : > { %v7502_v44 = vpop.permute.xlu1 %3323 }
 0x3b5   : > { %3775 = vperm.xlu0 %5283, %v7370_v27   ;;  %9716 = vst [vmem:[#allocation22_spill] sm:$0xff] %v7502_v44 }
 0x3b7   : > { %5298 = vset.pattern.permute.xlu1 %v5976_v41 }
 0x3b8   : > { %3863 = vperm.xlu1 %5298, %v7370_v27   ;;  %v7507_v22 = vpop.permute.xlu1 %3331 }
 0x3b9   : > { %5287 = vset.pattern.permute.xlu0 %v5974_v35 }
 0x3ba   : > { %3791 = vperm.xlu0 %5287, %v7179_v59  }
 0x3bc   : > { %5299 = vset.pattern.permute.xlu1 %v5978_v5  ;;  %v7515_v7 = vpop.permute.xlu1 %3343 }
 0x3bd   : > { %3895 = vperm.xlu1 %5299, %v7179_v59   ;;  %9718 = vst [vmem:[#allocation23_spill] sm:$0xff] %v7515_v7 }
 0x3be   : > { %5290 = vset.pattern.permute.xlu0 %v5971_v49  ;;  %v5981_v49 = vmov 54  }
 0x3bf   : > { %3739 = vperm.xlu0 %5290, %v7370_v27  }
 0x3c0   : > { %v7522_v1 = vpop.permute.xlu1 %3347 }
 0x3c1   : > { %5301 = vset.pattern.permute.xlu1 %v5979_v47  ;;  %9720 = vst [vmem:[#allocation24_spill] sm:$0xff] %v7522_v1 }
 0x3c2   : > { %3763 = vperm.xlu1 %5301, %v7179_v59  }
 0x3c3   : > { %5293 = vset.pattern.permute.xlu0 %v5973_v50  ;;  %v7552_v50 = vpop.permute.xlu0 %2509 }
 0x3c4   : > { %3851 = vperm.xlu0 %5293, %v7370_v27   ;;  %v7528_v33 = vpop.permute.xlu1 %3363  ;;  %9729 = vst [vmem:[#allocation105_spill] sm:$0xff] %v7552_v50 }
 0x3c5   : > { %9722 = vst [vmem:[#allocation99_spill] sm:$0xff] %v7528_v33 }
 0x3c6   : > { %3759 = vperm.xlu1 %5301, %v7370_v27  }
 0x3c7   : > { %v7562_v29 = vpop.permute.xlu0 %2517 }
 0x3c8   : > { %5296 = vset.pattern.permute.xlu0 %v5980_v39  ;;  %v7535_v55 = vpop.permute.xlu1 %3379  ;;  %9732 = vst [vmem:[#allocation108_spill] sm:$0xff] %v7562_v29 }
 0x3c9   : > { %3879 = vperm.xlu0 %5296, %v7179_v59   ;;  %9724 = vst [vmem:[#allocation101_spill] sm:$0xff] %v7535_v55 }
 0x3ca   : > { %5303 = vset.pattern.permute.xlu1 %v5981_v49 }
 0x3cb   : > { %3835 = vperm.xlu1 %5303, %v7370_v27  }
 0x3cc   : > { %v7541_v52 = vpop.permute.xlu1 %3395 }
 0x3cd   : > { %3875 = vperm.xlu0 %5296, %v7370_v27  }
 0x3cf   : > { %5304 = vset.pattern.permute.xlu1 %v5982_v9 }
 0x3d0   : > { %3915 = vperm.xlu1 %5304, %v7179_v59   ;;  %v7547_v36 = vpop.permute.xlu1 %3399 }
 0x3d1   : > { %5300 = vset.pattern.permute.xlu0 %v5978_v5  ;;  %9727 = vst [vmem:[#allocation104_spill] sm:$0xff] %v7547_v36 }
 0x3d2   : > { %3891 = vperm.xlu0 %5300, %v7370_v27  }
 0x3d4   : > { %3911 = vperm.xlu1 %5304, %v7370_v27   ;;  %v7557_v56 = vpop.permute.xlu1 %3411 }
 0x3d5   : > { %9730 = vst [vmem:[#allocation106_spill] sm:$0xff] %v7557_v56 }
 0x3d6   : > { %5302 = vset.pattern.permute.xlu0 %v5981_v49 }
 0x3d7   : > { %3839 = vperm.xlu0 %5302, %v7179_v59  }
 0x3d8   : > { %5306 = vset.pattern.permute.xlu1 %v5983_v40  ;;  %v7560_v23 = vpop.permute.xlu1 %3419 }
 0x3d9   : > { %3927 = vperm.xlu1 %5306, %v7370_v27   ;;  %9731 = vst [vmem:[#allocation107_spill] sm:$0xff] %v7560_v23 }
 0x3db   : > { %5305 = vset.pattern.permute.xlu0 %v5983_v40  ;;  %v9753_v40 = vld [vmem:[#allocation31_spill] sm:$0xff] }
 0x3dc   : > { %3931 = vperm.xlu0 %5305, %v7179_v59   ;;  %v7564_v2 = vpop.permute.xlu1 %3435 }
 0x3dd   : > { %5308 = vset.pattern.permute.xlu1 %v5984_v58  ;;  %9733 = vst [vmem:[#allocation109_spill] sm:$0xff] %v7564_v2 }
 0x3de   : > { %3955 = vperm.xlu1 %5308, %v7179_v59  }
 0x3e0   : > { %5307 = vset.pattern.permute.xlu0 %v5985_v26  ;;  %v7568_v42 = vpop.permute.xlu1 %3439 }
 0x3e1   : > { %3943 = vperm.xlu0 %5307, %v7179_v59   ;;  %9735 = vst [vmem:[#allocation111_spill] sm:$0xff] %v7568_v42 }
 0x3e2   : > { %5309 = vset.pattern.permute.xlu1 %v5985_v26 }
 0x3e3   : > { %3939 = vperm.xlu1 %5309, %v7370_v27  }
 0x3e4   : > { %v7572_v12 = vpop.permute.xlu1 %3459 }
 0x3e5   : > { %5310 = vset.pattern.permute.xlu0 %v5984_v58  ;;  %9737 = vst [vmem:[#allocation113_spill] sm:$0xff] %v7572_v12 }
 0x3e6   : > { %3951 = vperm.xlu0 %5310, %v7370_v27  }
 0x3e7   : > { %5311 = vset.pattern.permute.xlu1 %v5986_v60  ;;  %v9754_v60 = vld [vmem:[#allocation36_spill] sm:$0xff] }
 0x3e8   : > { %3971 = vperm.xlu1 %5311, %v7179_v59   ;;  %v7566_v59 = vpop.permute.xlu0 %2525  ;;  %v7576_v38 = vpop.permute.xlu1 %3471 }
 0x3e9   : > { %9734 = vst [vmem:[#allocation110_spill] sm:$0xff] %v7566_v59  ;;  %9739 = vst [vmem:[#allocation115_spill] sm:$0xff] %v7576_v38 }
 0x3ea   : > { %5312 = vset.pattern.permute.xlu0 %v9728_v19 }
 0x3eb   : > { %4106 = vperm.xlu0 %5312, %v5722_v24  }
 0x3ec   : > { %3967 = vperm.xlu1 %5311, %v7370_v27   ;;  %v7570_v3 = vpop.permute.xlu0 %2533  ;;  %v7580_v27 = vpop.permute.xlu1 %3483 }
 0x3ed   : > { %9736 = vst [vmem:[#allocation112_spill] sm:$0xff] %v7570_v3  ;;  %9741 = vst [vmem:[#allocation117_spill] sm:$0xff] %v7580_v27 }
 0x3f0   : > { %v7574_v53 = vpop.permute.xlu0 %2541  ;;  %v7584_v18 = vpop.permute.xlu1 %3487 }
 0x3f1   : > { %9738 = vst [vmem:[#allocation114_spill] sm:$0xff] %v7574_v53  ;;  %9743 = vst [vmem:[#allocation119_spill] sm:$0xff] %v7584_v18 }
 0x3f4   : > { %v7578_v35 = vpop.permute.xlu0 %2549  ;;  %v7588_v21 = vpop.permute.xlu1 %3499 }
 0x3f5   : > { %9740 = vst [vmem:[#allocation116_spill] sm:$0xff] %v7578_v35  ;;  %9745 = vst [vmem:[#allocation121_spill] sm:$0xff] %v7588_v21 }
 0x3f8   : > { %v7582_v4 = vpop.permute.xlu0 %2557  ;;  %v7592_v41 = vpop.permute.xlu1 %3511 }
 0x3f9   : > { %9742 = vst [vmem:[#allocation118_spill] sm:$0xff] %v7582_v4  ;;  %9747 = vst [vmem:[#allocation123_spill] sm:$0xff] %v7592_v41 }
 0x3fc   : > { %v7586_v25 = vpop.permute.xlu0 %2565  ;;  %v7596_v5 = vpop.permute.xlu1 %3531 }
 0x3fd   : > { %9744 = vst [vmem:[#allocation120_spill] sm:$0xff] %v7586_v25  ;;  %9749 = vst [vmem:[#allocation125_spill] sm:$0xff] %v7596_v5 }
 0x400   : > { %v7590_v15 = vpop.permute.xlu0 %2573  ;;  %v7600_v39 = vpop.permute.xlu1 %3535 }
 0x401   : > { %9746 = vst [vmem:[#allocation122_spill] sm:$0xff] %v7590_v15  ;;  %9751 = vst [vmem:[#allocation127_spill] sm:$0xff] %v7600_v39 }
 0x404   : > { %v7594_v37 = vpop.permute.xlu0 %2581  ;;  %v7608_v15 = vpop.permute.xlu1 %3551 }
 0x405   : > { %9748 = vst [vmem:[#allocation124_spill] sm:$0xff] %v7594_v37  ;;  %9755 = vst [vmem:[#allocation31_spill] sm:$0xff] %v7608_v15  ;;  %v9756_v37 = vld [vmem:[#allocation25_spill] sm:$0xff] }
 0x408   : > { %v7598_v47 = vpop.permute.xlu0 %2589  ;;  %v7616_v39 = vpop.permute.xlu1 %3559 }
 0x409   : > { %9750 = vst [vmem:[#allocation126_spill] sm:$0xff] %v7598_v47  ;;  %9759 = vst [vmem:[#allocation25_spill] sm:$0xff] %v7616_v39 }
 0x40c   : > { %v7602_v9 = vpop.permute.xlu0 %3047 }
 0x40d   : > { %9752 = vst [vmem:[#allocation128_spill] sm:$0xff] %v7602_v9 }
 0x410   : > { %v7611_v53 = vpop.permute.xlu0 %3159 }
 0x411   : > { %9757 = vst [vmem:[#allocation36_spill] sm:$0xff] %v7611_v53 }
 0x472   : > { %v1884_v49 = vpop.f32.mrf.mxu0 }
 0x473   : > { %v1885_v58 = vadd.f32 %v1884_v49, %v9753_v40  ;;  %v9758_v49 = vld [vmem:[#allocation26_spill] sm:$0xff] }
 0x474   : > { %v1886_v26 = vpop.f32.mrf.mxu0 }
 0x475   : > { %v1901_v19 = vsub.f32 %v1885_v58, %v9754_v60  ;;  %v1887_v24 = vadd.f32 %v1886_v26, %v9753_v40 }
 0x476   : > { %v1888_v35 = vpop.f32.mrf.mxu0 }
 0x477   : > { %v5005_v4 = vcvt.f32.s32 %v1901_v19  ;;  %v1902_v25 = vsub.f32 %v1887_v24, %v9754_v60  ;;  %v1889_v47 = vadd.f32 %v1888_v35, %v9756_v37  ;;  %v5003_v54 = vand.u32 2147483647, %v1901_v19 }
 0x478   : > { %v1890_v48 = vpop.f32.mrf.mxu0  ;;  %v5008_v40 = vand.u32 2147483648, %v1901_v19 }
 0x479   : > { %v5006_v13 = vcvt.s32.f32 %v5005_v4  ;;  %v5013_v9 = vcvt.f32.s32 %v1902_v25  ;;  %v1903_v3 = vsub.f32 %v1889_v47, %v9758_v49  ;;  %v1891_v58 = vadd.f32 %v1890_v48, %v9756_v37  ;;  %v7618_v4 = vpop.permute.xlu0 %3183 }
 0x47a   : > { %v5011_v29 = vand.u32 2147483647, %v1902_v25  ;;  %v5016_v35 = vand.u32 2147483648, %v1902_v25  ;;  %vm5004_vm3 = vcmp.lt.f32.partialorder %v5003_v54, 8388608.0  ;;  %9760 = vst [vmem:[#allocation26_spill] sm:$0xff] %v7618_v4 }
 0x47b   : > { %v5007_v50 = vand.u32 2147483647, %v5006_v13  ;;  %v5014_v26 = vcvt.s32.f32 %v5013_v9  ;;  %v5021_v59 = vcvt.f32.s32 %v1903_v3  ;;  %v1904_v24 = vsub.f32 %v1891_v58, %v9758_v49  ;;  %v7622_v58 = vpop.permute.xlu1 %3571 }
 0x47c   : > { %vm5012_vm4 = vcmp.lt.f32.partialorder %v5011_v29, 8388608.0  ;;  %9761 = vst [vmem:[#allocation129_spill] sm:$0xff] %v7622_v58  ;;  %v5024_v54 = vand.u32 2147483648, %v1903_v3 }
 0x47d   : > { %v5009_v6 = vor.u32 %v5008_v40, %v5007_v50  ;;  %v5015_v5 = vand.u32 2147483647, %v5014_v26  ;;  %v5022_v27 = vcvt.s32.f32 %v5021_v59  ;;  %v5029_v38 = vcvt.f32.s32 %v1904_v24  ;;  %v7624_v40 = vpop.permute.xlu0 %3203 }
 0x47e   : > { %9762 = vst [vmem:[#allocation130_spill] sm:$0xff] %v7624_v40 }
 0x47f   : > { %v5017_v41 = vor.u32 %v5016_v35, %v5015_v5  ;;  %v5010_v47 = vsel %vm5004_vm3, %v5009_v6, %v1901_v19  ;;  %v5023_v9 = vand.u32 2147483647, %v5022_v27  ;;  %v5030_v50 = vcvt.s32.f32 %v5029_v38  ;;  %v9763_v6 = vld [vmem:[#allocation88_spill] sm:$0xff] }
 0x480   : > { %v1909_v48 = vadd.f32 %v5010_v47, %v9754_v60  ;;  %v5019_v5 = vand.u32 2147483647, %v1903_v3  ;;  %v5032_v38 = vand.u32 2147483648, %v1904_v24 }
 0x481   : > { %v5018_v13 = vsel %vm5012_vm4, %v5017_v41, %v1902_v25  ;;  %v5025_v59 = vor.u32 %v5024_v54, %v5023_v9  ;;  %v5031_v35 = vand.u32 2147483647, %v5030_v50  ;;  %v5027_v41 = vand.u32 2147483647, %v1904_v24  ;;  %v7634_v58 = vpop.permute.xlu0 %3227 }
 0x482   : > { %v1910_v37 = vadd.f32 %v5018_v13, %v9754_v60  ;;  %3098 = vst [vmem:[#allocation2 + $0x10] sm:$0xff] %v1909_v48  ;;  %v7630_v60 = vpop.permute.xlu1 %3575  ;;  %vm5020_vm5 = vcmp.lt.f32.partialorder %v5019_v5, 8388608.0  ;;  %9765 = vst [vmem:[#allocation132_spill] sm:$0xff] %v7634_v58 }
 0x483   : > { %9764 = vst [vmem:[#allocation131_spill] sm:$0xff] %v7630_v60  ;;  %v5033_v50 = vor.u32 %v5032_v38, %v5031_v35  ;;  %vm5028_vm6 = vcmp.lt.f32.partialorder %v5027_v41, 8388608.0 }
 0x484   : > { %v4986_v26 = vadd.f32 -0.5, %v1910_v37  ;;  %v4119_v39 = vadd.f32 0.5, %v1910_v37 }
 0x485   : > { %v5034_v21 = vsel %vm5028_vm6, %v5033_v50, %v1904_v24 }
 0x486   : > { %v4121_v19 = vmul.f32 %v4986_v26, %v9763_v6  ;;  %v4122_v29 = vmul.f32 %v4119_v39, %v9763_v6  ;;  %v4141_v25 = vmul.f32 %v4986_v26, %v7351_v62  ;;  %v4142_v27 = vmul.f32 %v4119_v39, %v7351_v62 }
 0x487   : > { %v4161_v13 = vmul.f32 %v4986_v26, %v7396_v0  ;;  %v4162_v54 = vmul.f32 %v4119_v39, %v7396_v0  ;;  %v5026_v6 = vsel %vm5020_vm5, %v5025_v59, %v1903_v3  ;;  %v1912_v5 = vadd.f32 %v5034_v21, %v9758_v49  ;;  %v7644_v3 = vpop.permute.xlu1 %3591  ;;  %v5380_v21 = vld [vmem:[%s9107_s4] sm:$0xff]  }
 0x488   : > { %v4125_v47 = vadd.f32 %v4121_v19, %v7280_v11  ;;  %v4126_v9 = vadd.f32 %v4122_v29, %v7280_v11  ;;  %v4145_v55 = vadd.f32 %v4141_v25, %v7364_v10  ;;  %v1911_v62 = vadd.f32 %v5026_v6, %v9758_v49  ;;  %9766 = vst [vmem:[#allocation133_spill] sm:$0xff] %v7644_v3  ;;  %v7646_v6 = vpop.permute.xlu0 %3247 }
 0x489   : > { %v4146_v60 = vadd.f32 %v4142_v27, %v7364_v10  ;;  %v4165_v26 = vadd.f32 %v4161_v13, %v7402_v61  ;;  %v4166_v39 = vadd.f32 %v4162_v54, %v7402_v61  ;;  %3101 = vst [vmem:[#allocation2 + $0x8] sm:$0x3] %v1912_v5  ;;  %v1914_v59 = vpack.c.bf16 %v1912_v5, %v1910_v37 }
 0x48a   : > { %5446 = vtanh.f32 %v4125_v47  ;;  %3100 = vst [vmem:[#allocation2 + $0x18] sm:$0x3] %v1911_v62  ;;  %v1913_v19 = vpack.c.bf16 %v1911_v62, %v1909_v48  ;;  %v5381_v48 = vld [vmem:[%s9107_s4 + $0x8] sm:$0xff]  }
 0x48b   : > { %5448 = vtanh.f32 %v4126_v9  ;;  %4929 = vmatprep.subr.msk.bf16.mxu0 %vm2172_vm7, %v1914_v59  ;;  %v7651_v62 = vpop.permute.xlu1 %3607 }
 0x48c   : > { %5450 = vtanh.f32 %v4145_v55  ;;  %v2174_v24 = vsel %vm2172_vm7, %v1913_v19, 0  ;;  %9767 = vst [vmem:[#allocation134_spill] sm:$0xff] %v7651_v62  ;;  %v7654_v49 = vpop.permute.xlu0 %3267 }
 0x48d   : > { %5452 = vtanh.f32 %v4146_v60  ;;  %2194 = vmatpush1.bf16.msra.mxu0 %v2174_v24  ;;  %9768 = vst [vmem:[#allocation135_spill] sm:$0xff] %v7654_v49 }
 0x48e   : > { %5454 = vtanh.f32 %v4165_v26 }
 0x48f   : > { %5456 = vtanh.f32 %v4166_v39  ;;  %v7660_v35 = vpop.permute.xlu1 %3627 }
 0x490   : > { %4930 = vmatmul.mubr.msk.bf16.vlgmr.msra.gmra.mxu0 %vm2123_vm8, %v5380_v21  ;;  %v7663_v27 = vpop.permute.xlu0 %3287 }
 0x491   : > { %2221 = vmatprep.mubr.bf16.mxu0 %v9714_v32 }
 0x497   : > { %v5447_v37 = vpop.eup %5446 }
 0x498   : > { %v5449_v29 = vpop.eup %5448  ;;  %v4133_v25 = vmul.f32 %v5447_v37, %v7519_v57  ;;  %4931 = vmatmul.mubr.msk.bf16.gmra.mxu0 %vm2123_vm8, %v5381_v48  ;;  %v7684_v48 = vpop.permute.xlu1 %3623 }
 0x499   : > { %v5451_v41 = vpop.eup %5450  ;;  %v4134_v38 = vmul.f32 %v5449_v29, %v7519_v57  ;;  %2231 = vmatprep.mubr.bf16.mxu0 %v9714_v32  ;;  %9769 = vst [vmem:[#allocation136_spill] sm:$0xff] %v7684_v48 }
 0x49a   : > { %v5453_v13 = vpop.eup %5452  ;;  %v7666_v54 = vadd.f32 %v4133_v25, %v4125_v47  ;;  %v4153_v50 = vmul.f32 %v5451_v41, %v7618_v4 }
 0x49b   : > { %v5455_v5 = vpop.eup %5454  ;;  %v7670_v19 = vadd.f32 %v4134_v38, %v4126_v9  ;;  %v4154_v59 = vmul.f32 %v5453_v13, %v7618_v4  ;;  %v5382_v13 = vld [vmem:[%s9107_s4 + $0x10] sm:$0xff]  }
 0x49c   : > { %v5457_v24 = vpop.eup %5456  ;;  %v7674_v21 = vadd.f32 %v4153_v50, %v4145_v55  ;;  %v4173_v37 = vmul.f32 %v5455_v5, %v7634_v58  ;;  %v4181_v47 = vmul.f32 %v7666_v54, %v7438_v14 }
 0x49d   : > { %v7679_v29 = vadd.f32 %v4154_v59, %v4146_v60  ;;  %v4174_v25 = vmul.f32 %v5457_v24, %v7634_v58  ;;  %v4182_v9 = vmul.f32 %v7670_v19, %v7438_v14  ;;  %v7694_v60 = vpop.permute.xlu0 %3319 }
 0x49e   : > { %v7686_v41 = vadd.f32 %v4173_v37, %v4165_v26  ;;  %v4185_v38 = vadd.f32 %v4181_v47, %v7456_v28  ;;  %v4189_v55 = vmul.f32 %v7674_v21, %v7654_v49 }
 0x49f   : > { %v7696_v50 = vadd.f32 %v4174_v25, %v4166_v39  ;;  %v4186_v5 = vadd.f32 %v4182_v9, %v7456_v28  ;;  %v4190_v59 = vmul.f32 %v7679_v29, %v7654_v49  ;;  %v7707_v39 = vpop.permute.xlu1 %3651  ;;  %v4116_v9 = vld [vmem:[#allocation2 + $0x8] sm:$0x3] }
 0x4a0   : > { %v4193_v26 = vadd.f32 %v4189_v55, %v4185_v38  ;;  %v4197_v24 = vmul.f32 %v7686_v41, %v7483_v43  ;;  %4932 = vmatmul.mubr.msk.bf16.gmra.mxu0 %vm2123_vm8, %v5382_v13  ;;  %9770 = vst [vmem:[#allocation137_spill] sm:$0xff] %v7707_v39  ;;  %v5383_v38 = vld [vmem:[%s9107_s4 + $0x18] sm:$0xff]   ;;  %v4987_v55 = vadd.f32 -0.5, %v4116_v9 }
 0x4a1   : > { %v4194_v37 = vadd.f32 %v4190_v59, %v4186_v5  ;;  %v4198_v47 = vmul.f32 %v7696_v50, %v7483_v43  ;;  %2241 = vmatprep.mubr.bf16.mxu0 %v9714_v32  ;;  %v7709_v25 = vpop.permute.xlu0 %3335  ;;  %v4120_v5 = vadd.f32 0.5, %v4116_v9  ;;  %v5384_v9 = vld [vmem:[%s9107_s4 + $0x20] sm:$0xff]  }
 0x4a2   : > { %v4201_v58 = vadd.f32 %v4197_v24, %v4193_v26  ;;  %9771 = vst [vmem:[#allocation138_spill] sm:$0xff] %v7709_v25  ;;  %v4123_v26 = vmul.f32 %v4987_v55, %v7513_v30  ;;  %v4163_v57 = vmul.f32 %v4987_v55, %v7624_v40 }
 0x4a3   : > { %v4202_v14 = vadd.f32 %v4198_v47, %v4194_v37  ;;  %v7714_v59 = vpop.permute.xlu1 %3635  ;;  %v4124_v24 = vmul.f32 %v4120_v5, %v7513_v30  ;;  %v4143_v37 = vmul.f32 %v4987_v55, %v7611_v53  ;;  %v4144_v43 = vmul.f32 %v4120_v5, %v7611_v53 }
 0x4a4   : > { %5458 = vtanh.f32 %v4201_v58  ;;  %9772 = vst [vmem:[#allocation139_spill] sm:$0xff] %v7714_v59  ;;  %v4127_v47 = vadd.f32 %v4123_v26, %v7305_v46  ;;  %v4164_v0 = vmul.f32 %v4120_v5, %v7624_v40 }
 0x4a5   : > { %5460 = vtanh.f32 %v4202_v14  ;;  %v7717_v13 = vpop.permute.xlu0 %3359  ;;  %v4147_v4 = vadd.f32 %v4143_v37, %v7379_v45  ;;  %v4148_v53 = vadd.f32 %v4144_v43, %v7379_v45 }
 0x4a6   : > { %5462 = vtanh.f32 %v4127_v47  ;;  %v4168_v43 = vadd.f32 %v4164_v0, %v7408_v63 }
 0x4a7   : > { %v7729_v49 = vpop.permute.xlu1 %3667 }
 0x4a8   : > { %4933 = vmatmul.mubr.msk.bf16.gmra.mxu0 %vm2123_vm8, %v5383_v38  ;;  %v4128_v38 = vadd.f32 %v4124_v24, %v7305_v46  ;;  %9773 = vst [vmem:[#allocation140_spill] sm:$0xff] %v7729_v49  ;;  %v4167_v46 = vadd.f32 %v4163_v57, %v7408_v63 }
 0x4a9   : > { %2251 = vmatprep.mubr.bf16.mxu0 %v9714_v32  ;;  %v7733_v61 = vpop.permute.xlu0 %3383 }
 0x4aa   : > { %9774 = vst [vmem:[#allocation141_spill] sm:$0xff] %v7733_v61  ;;  %5464 = vtanh.f32 %v4128_v38 }
 0x4ab   : > { %5466 = vtanh.f32 %v4147_v4  ;;  %v7749_v5 = vpop.permute.xlu1 %3663 }
 0x4ac   : > { %5468 = vtanh.f32 %v4148_v53  ;;  %9775 = vst [vmem:[#allocation142_spill] sm:$0xff] %v7749_v5 }
 0x4ad   : > { %5470 = vtanh.f32 %v4167_v46 }
 0x4ae   : > { %5472 = vtanh.f32 %v4168_v43 }
 0x4af   : > { %v7766_v0 = vpop.permute.xlu1 %3703 }
 0x4b0   : > { %4934 = vmatmul.mubr.msk.bf16.gmra.mxu0 %vm2123_vm8, %v5384_v9  ;;  %9777 = vst [vmem:[#allocation144_spill] sm:$0xff] %v7766_v0 }
 0x4b1   : > { %v5459_v28 = vpop.eup %5458  ;;  %2261 = vmatprep.mubr.bf16.mxu0 %v9714_v32 }
 0x4b2   : > { %v5461_v10 = vpop.eup %5460  ;;  %v4209_v26 = vmul.f32 %v5459_v28, %v7492_v8 }
 0x4b3   : > { %v4210_v24 = vmul.f32 %v5461_v10, %v7492_v8  ;;  %v5385_v10 = vld [vmem:[%s9107_s4 + $0x28] sm:$0xff]   ;;  %v7775_v63 = vpop.permute.xlu1 %3683 }
 0x4b4   : > { %v7741_v37 = vadd.f32 %v4209_v26, %v4201_v58  ;;  %9779 = vst [vmem:[#allocation146_spill] sm:$0xff] %v7775_v63 }
 0x4b5   : > { %v7743_v55 = vadd.f32 %v4210_v24, %v4202_v14  ;;  %v7756_v14 = vpop.permute.xlu0 %3407  ;;  %v5386_v24 = vld [vmem:[%s9107_s4 + $0x30] sm:$0xff]  }
 0x4b6   : > { %v4361_v28 = vmul.f32 %v7741_v37, %v7684_v48  ;;  %9776 = vst [vmem:[#allocation143_spill] sm:$0xff] %v7756_v14 }
 0x4b7   : > { %v4362_v58 = vmul.f32 %v7743_v55, %v7684_v48  ;;  %v5463_v48 = vpop.eup %5462 }
 0x4b8   : > { %v7759_v9 = vadd.f32 %v4361_v28, %v7714_v59  ;;  %4935 = vmatmul.mubr.msk.bf16.gmra.mxu0 %vm2123_vm8, %v5385_v10  ;;  %v5465_v28 = vpop.eup %5464  ;;  %v4135_v8 = vmul.f32 %v5463_v48, %v7329_v51  ;;  %v5387_v48 = vld [vmem:[%s9107_s4 + $0x38] sm:$0xff]  }
 0x4b9   : > { %v7762_v57 = vadd.f32 %v4362_v58, %v7714_v59  ;;  %2271 = vmatprep.mubr.bf16.mxu0 %v9714_v32  ;;  %v7768_v26 = vpop.permute.xlu0 %3423  ;;  %v4136_v58 = vmul.f32 %v5465_v28, %v7329_v51  ;;  %v5467_v59 = vpop.eup %5466 }
 0x4ba   : > { %9778 = vst [vmem:[#allocation145_spill] sm:$0xff] %v7768_v26  ;;  %v5469_v10 = vpop.eup %5468  ;;  %v4139_v40 = vadd.f32 %v4135_v8, %v4127_v47  ;;  %v4155_v11 = vmul.f32 %v5467_v59, %v7389_v17  ;;  %v7788_v8 = vpop.permute.xlu1 %3715 }
 0x4bb   : > { %v4140_v30 = vadd.f32 %v4136_v58, %v4128_v38  ;;  %v5471_v62 = vpop.eup %5470  ;;  %v4156_v49 = vmul.f32 %v5469_v10, %v7389_v17  ;;  %9781 = vst [vmem:[#allocation148_spill] sm:$0xff] %v7788_v8 }
 0x4bc   : > { %v5473_v28 = vpop.eup %5472  ;;  %v4219_v51 = vmul.f32 %v4139_v40, %v7502_v44  ;;  %v4159_v47 = vadd.f32 %v4155_v11, %v4147_v4  ;;  %v4175_v63 = vmul.f32 %v5471_v62, %v7422_v16  ;;  %v4255_v10 = vmul.f32 %v4139_v40, %v7547_v36 }
 0x4bd   : > { %v7778_v45 = vpop.permute.xlu0 %3455  ;;  %v4160_v59 = vadd.f32 %v4156_v49, %v4148_v53  ;;  %v4176_v58 = vmul.f32 %v5473_v28, %v7422_v16  ;;  %v4256_v5 = vmul.f32 %v4140_v30, %v7547_v36 }
 0x4be   : > { %9780 = vst [vmem:[#allocation147_spill] sm:$0xff] %v7778_v45  ;;  %v4223_v17 = vadd.f32 %v4219_v51, %v7709_v25  ;;  %v4179_v11 = vadd.f32 %v4175_v63, %v4167_v46  ;;  %v4227_v4 = vmul.f32 %v4159_v47, %v7522_v1  ;;  %v4259_v49 = vadd.f32 %v4255_v10, %v7557_v56  ;;  %v7803_v28 = vpop.permute.xlu1 %3727  ;;  %v5388_v51 = vld [vmem:[%s9107_s4 + $0x40] sm:$0xff]  }
 0x4bf   : > { %v4180_v62 = vadd.f32 %v4176_v58, %v4168_v43  ;;  %v4228_v53 = vmul.f32 %v4160_v59, %v7522_v1  ;;  %9783 = vst [vmem:[#allocation150_spill] sm:$0xff] %v7803_v28  ;;  %v4260_v36 = vadd.f32 %v4256_v5, %v7557_v56  ;;  %v4263_v46 = vmul.f32 %v4159_v47, %v7768_v26 }
 0x4c0   : > { %4936 = vmatmul.mubr.msk.bf16.gmra.mxu0 %vm2123_vm8, %v5386_v24  ;;  %v4220_v24 = vmul.f32 %v4140_v30, %v7502_v44  ;;  %v4217_v63 = vmul.f32 %v7666_v54, %v7694_v60  ;;  %v4235_v43 = vmul.f32 %v4179_v11, %v7528_v33  ;;  %v4264_v58 = vmul.f32 %v4160_v59, %v7768_v26 }
 0x4c1   : > { %2281 = vmatprep.mubr.bf16.mxu0 %v9714_v32  ;;  %v7791_v38 = vpop.permute.xlu0 %3475  ;;  %v4218_v10 = vmul.f32 %v7670_v19, %v7694_v60  ;;  %v4236_v1 = vmul.f32 %v4180_v62, %v7528_v33  ;;  %v4225_v26 = vmul.f32 %v7674_v21, %v7515_v7 }
 0x4c2   : > { %9782 = vst [vmem:[#allocation149_spill] sm:$0xff] %v7791_v38  ;;  %v4224_v44 = vadd.f32 %v4220_v24, %v7709_v25  ;;  %v4271_v25 = vmul.f32 %v4179_v11, %v7568_v42  ;;  %v7830_v33 = vpop.permute.xlu1 %3711 }
 0x4c3   : > { %9785 = vst [vmem:[#allocation152_spill] sm:$0xff] %v7830_v33 }
 0x4c4   : > { %v4232_v24 = vadd.f32 %v4228_v53, %v4224_v44  ;;  %v4268_v44 = vadd.f32 %v4264_v58, %v4260_v36  ;;  %v4184_v53 = vmul.f32 %v4140_v30, %v7646_v6 }
 0x4c5   : > { %v7809_v16 = vpop.permute.xlu0 %3495 }
 0x4c6   : > { %9784 = vst [vmem:[#allocation151_spill] sm:$0xff] %v7809_v16  ;;  %v7827_v56 = vadd.f32 %v4236_v1, %v4232_v24  ;;  %v4253_v1 = vmul.f32 %v7666_v54, %v7541_v52  ;;  %v4254_v54 = vmul.f32 %v7670_v19, %v7541_v52  ;;  %v4233_v19 = vmul.f32 %v7686_v41, %v7717_v13 }
 0x4c8   : > { %4937 = vmatmul.mubr.msk.bf16.gmra.mxu0 %vm2123_vm8, %v5387_v48  ;;  %v4231_v48 = vadd.f32 %v4227_v4, %v4223_v17  ;;  %v4267_v17 = vadd.f32 %v4263_v46, %v4259_v49  ;;  %v4183_v4 = vmul.f32 %v4139_v40, %v7646_v6  ;;  %v4221_v49 = vadd.f32 %v4217_v63, %v7507_v22  ;;  %v5389_v63 = vld [vmem:[%s9107_s4 + $0x48] sm:$0xff]  }
 0x4c9   : > { %2291 = vmatprep.mubr.bf16.mxu0 %v9714_v32  ;;  %v4188_v40 = vadd.f32 %v4184_v53, %v7469_v20  ;;  %v7836_v30 = vpop.permute.xlu0 %3515  ;;  %v4191_v46 = vmul.f32 %v4159_v47, %v7474_v31  ;;  %v4199_v47 = vmul.f32 %v4179_v11, %v7663_v27  ;;  %v4200_v53 = vmul.f32 %v4180_v62, %v7663_v27 }
 0x4ca   : > { %v7820_v5 = vadd.f32 %v4235_v43, %v4231_v48  ;;  %v4187_v36 = vadd.f32 %v4183_v4, %v7469_v20  ;;  %9786 = vst [vmem:[#allocation153_spill] sm:$0xff] %v7836_v30  ;;  %v4222_v48 = vadd.f32 %v4218_v10, %v7507_v22  ;;  %v7841_v24 = vadd.f32 %v4271_v25, %v4267_v17 }
 0x4cb   : > { %v4226_v43 = vmul.f32 %v7679_v29, %v7515_v7  ;;  %v4192_v10 = vmul.f32 %v4160_v59, %v7474_v31  ;;  %v4229_v17 = vadd.f32 %v4225_v26, %v4221_v49  ;;  %v4257_v7 = vadd.f32 %v4253_v1, %v7756_v14 }
 0x4cc   : > { %5474 = vtanh.f32 %v7820_v5  ;;  %v4195_v25 = vadd.f32 %v4191_v46, %v4187_v36  ;;  %v4234_v11 = vmul.f32 %v7696_v50, %v7717_v13  ;;  %v4258_v49 = vadd.f32 %v4254_v54, %v7756_v14  ;;  %v5390_v46 = vld [vmem:[%s9107_s4 + $0x50] sm:$0xff]  }
 0x4cd   : > { %5476 = vtanh.f32 %v7827_v56  ;;  %v4196_v4 = vadd.f32 %v4192_v10, %v4188_v40  ;;  %v7866_v26 = vpop.permute.xlu0 %3547  ;;  %v7874_v36 = vadd.f32 %v4233_v19, %v4229_v17 }
 0x4ce   : > { %5478 = vtanh.f32 %v7841_v24  ;;  %9788 = vst [vmem:[#allocation155_spill] sm:$0xff] %v7866_v26 }
 0x4cf   : > { %v4204_v59 = vadd.f32 %v4200_v53, %v4196_v4 }
 0x4d0   : > { %4938 = vmatmul.mubr.msk.bf16.gmra.mxu0 %vm2123_vm8, %v5388_v51  ;;  %v4272_v51 = vmul.f32 %v4180_v62, %v7568_v42  ;;  %v4230_v42 = vadd.f32 %v4226_v43, %v4222_v48  ;;  %v4261_v62 = vmul.f32 %v7674_v21, %v7560_v23  ;;  %v4262_v48 = vmul.f32 %v7679_v29, %v7560_v23 }
 0x4d1   : > { %2301 = vmatprep.mubr.bf16.mxu0 %v9714_v32  ;;  %v4269_v21 = vmul.f32 %v7686_v41, %v7564_v2  ;;  %v7888_v10 = vpop.permute.xlu0 %3563 }
 0x4d2   : > { %v7850_v58 = vadd.f32 %v4272_v51, %v4268_v44  ;;  %v4203_v44 = vadd.f32 %v4199_v47, %v4195_v25  ;;  %v7860_v51 = vpop.permute.xlu1 %3723  ;;  %v7876_v40 = vadd.f32 %v4234_v11, %v4230_v42  ;;  %v4265_v1 = vadd.f32 %v4261_v62, %v4257_v7  ;;  %9790 = vst [vmem:[#allocation157_spill] sm:$0xff] %v7888_v10  ;;  %v5391_v47 = vld [vmem:[%s9107_s4 + $0x58] sm:$0xff]  }
 0x4d3   : > { %9787 = vst [vmem:[#allocation154_spill] sm:$0xff] %v7860_v51  ;;  %v4270_v42 = vmul.f32 %v7696_v50, %v7564_v2 }
 0x4d4   : > { %5480 = vtanh.f32 %v7850_v58  ;;  %v7893_v7 = vadd.f32 %v4269_v21, %v4265_v1 }
 0x4d5   : > { %5482 = vtanh.f32 %v4203_v44  ;;  %v7905_v50 = vpop.permute.xlu0 %3587 }
 0x4d6   : > { %5484 = vtanh.f32 %v4204_v59  ;;  %v7885_v43 = vpop.permute.xlu1 %3743  ;;  %9792 = vst [vmem:[#allocation159_spill] sm:$0xff] %v7905_v50 }
 0x4d7   : > { %9789 = vst [vmem:[#allocation156_spill] sm:$0xff] %v7885_v43  ;;  %5486 = vtanh.f32 %v7874_v36 }
 0x4d8   : > { %4939 = vmatmul.mubr.msk.bf16.gmra.mxu0 %vm2123_vm8, %v5389_v63  ;;  %v4266_v63 = vadd.f32 %v4262_v48, %v4258_v49  ;;  %5488 = vtanh.f32 %v7876_v40 }
 0x4d9   : > { %2311 = vmatprep.mubr.bf16.mxu0 %v9714_v32  ;;  %v5475_v29 = vpop.eup %5474  ;;  %5490 = vtanh.f32 %v7893_v7 }
 0x4da   : > { %v7897_v54 = vadd.f32 %v4270_v42, %v4266_v63  ;;  %v5477_v41 = vpop.eup %5476  ;;  %v7900_v25 = vpop.permute.xlu1 %3803  ;;  %v4247_v53 = vmul.f32 %v5475_v29, %v7733_v61 }
 0x4db   : > { %9791 = vst [vmem:[#allocation158_spill] sm:$0xff] %v7900_v25  ;;  %v5479_v17 = vpop.eup %5478  ;;  %v4248_v19 = vmul.f32 %v5477_v41, %v7733_v61 }
 0x4dc   : > { %5492 = vtanh.f32 %v7897_v54  ;;  %v4283_v48 = vmul.f32 %v5479_v17, %v7572_v12  ;;  %v7917_v63 = vadd.f32 %v4247_v53, %v7820_v5  ;;  %v7928_v17 = vpop.permute.xlu0 %3611 }
 0x4dd   : > { %v7920_v21 = vadd.f32 %v4248_v19, %v7827_v56  ;;  %9794 = vst [vmem:[#allocation161_spill] sm:$0xff] %v7928_v17  ;;  %v5392_v56 = vld [vmem:[%s9107_s4 + $0x60] sm:$0xff]  }
 0x4de   : > { %v7924_v29 = vpop.permute.xlu1 %3855 }
 0x4df   : > { %9793 = vst [vmem:[#allocation160_spill] sm:$0xff] %v7924_v29 }
 0x4e0   : > { %4940 = vmatmul.mubr.msk.bf16.gmra.mxu0 %vm2123_vm8, %v5390_v46 }
 0x4e1   : > { %2321 = vmatprep.mubr.bf16.mxu0 %v9714_v32  ;;  %v5481_v4 = vpop.eup %5480 }
 0x4e2   : > { %v5483_v11 = vpop.eup %5482  ;;  %v4284_v46 = vmul.f32 %v5481_v4, %v7572_v12  ;;  %v7963_v23 = vpop.permute.xlu1 %3787 }
 0x4e3   : > { %v5485_v62 = vpop.eup %5484  ;;  %v4211_v49 = vmul.f32 %v5483_v11, %v7498_v34  ;;  %v7933_v11 = vadd.f32 %v4283_v48, %v7841_v24 }
 0x4e4   : > { %v4212_v1 = vmul.f32 %v5485_v62, %v7498_v34  ;;  %v7943_v53 = vadd.f32 %v4284_v46, %v7850_v58  ;;  %v9795_v62 = vld [vmem:[#allocation121_spill] sm:$0xff] }
 0x4e5   : > { %v7922_v42 = vadd.f32 %v4211_v49, %v4203_v44  ;;  %v4299_v49 = vmul.f32 %v7917_v63, %v9795_v62  ;;  %v4300_v48 = vmul.f32 %v7920_v21, %v9795_v62  ;;  %v4307_v62 = vmul.f32 %v7933_v11, %v7836_v30 }
 0x4e6   : > { %v7926_v41 = vadd.f32 %v4212_v1, %v4204_v59  ;;  %v9796_v1 = vld [vmem:[#allocation131_spill] sm:$0xff] }
 0x4e7   : > { %v4291_v4 = vmul.f32 %v7922_v42, %v7791_v38  ;;  %v4327_v5 = vmul.f32 %v7922_v42, %v7608_v15  ;;  %v4335_v12 = vmul.f32 %v7917_v63, %v9796_v1  ;;  %v4336_v58 = vmul.f32 %v7920_v21, %v9796_v1 }
 0x4e8   : > { %4941 = vmatmul.mubr.msk.bf16.gmra.mxu0 %vm2123_vm8, %v5391_v47  ;;  %v5487_v47 = vpop.eup %5486  ;;  %v4292_v59 = vmul.f32 %v7926_v41, %v7791_v38  ;;  %v4328_v19 = vmul.f32 %v7926_v41, %v7608_v15  ;;  %v9797_v38 = vld [vmem:[#allocation101_spill] sm:$0xff]  ;;  %v4308_v1 = vmul.f32 %v7943_v53, %v7836_v30 }
 0x4e9   : > { %2331 = vmatprep.mubr.bf16.mxu0 %v9714_v32  ;;  %v5489_v44 = vpop.eup %5488  ;;  %v4295_v24 = vadd.f32 %v4291_v4, %v7584_v18  ;;  %v4331_v46 = vadd.f32 %v4327_v5, %v7888_v10  ;;  %v4245_v4 = vmul.f32 %v5487_v47, %v9797_v38  ;;  %9798 = vst [vmem:[#allocation101_spill] sm:$0xff] %v7963_v23  ;;  %v9800_v47 = vld [vmem:[#allocation115_spill] sm:$0xff] }
 0x4ea   : > { %v4296_v61 = vadd.f32 %v4292_v59, %v7584_v18  ;;  %v4332_v15 = vadd.f32 %v4328_v19, %v7888_v10  ;;  %v4246_v34 = vmul.f32 %v5489_v44, %v9797_v38  ;;  %v5491_v59 = vpop.eup %5490  ;;  %v7968_v19 = vpop.permute.xlu0 %3639  ;;  %v4289_v44 = vmul.f32 %v7741_v37, %v9800_v47 }
 0x4eb   : > { %v4303_v2 = vadd.f32 %v4299_v49, %v4295_v24  ;;  %v4339_v5 = vadd.f32 %v4335_v12, %v4331_v46  ;;  %9799 = vst [vmem:[#allocation162_spill] sm:$0xff] %v7968_v19  ;;  %v5493_v49 = vpop.eup %5492  ;;  %v4290_v12 = vmul.f32 %v7743_v55, %v9800_v47  ;;  %v4343_v46 = vmul.f32 %v7933_v11, %v7644_v3 }
 0x4ec   : > { %v4304_v18 = vadd.f32 %v4300_v48, %v4296_v61  ;;  %v4340_v14 = vadd.f32 %v4336_v58, %v4332_v15  ;;  %v4281_v61 = vmul.f32 %v5491_v59, %v7778_v45  ;;  %v5393_v15 = vld [vmem:[%s9107_s4 + $0x68] sm:$0xff]   ;;  %v4250_v48 = vadd.f32 %v4246_v34, %v7876_v40 }
 0x4ed   : > { %v7973_v24 = vadd.f32 %v4307_v62, %v4303_v2  ;;  %v4282_v2 = vmul.f32 %v5493_v49, %v7778_v45  ;;  %v4326_v58 = vmul.f32 %v7743_v55, %v7866_v26  ;;  %v4344_v34 = vmul.f32 %v7943_v53, %v7644_v3 }
 0x4ee   : > { %v7975_v10 = vadd.f32 %v4308_v1, %v4304_v18  ;;  %v9801_v18 = vld [vmem:[#allocation117_spill] sm:$0xff]  ;;  %v7991_v1 = vpop.permute.xlu1 %3799  ;;  %v7999_v40 = vpop.permute.xlu0 %3647  ;;  %v8006_v49 = vadd.f32 %v4343_v46, %v4339_v5 }
 0x4ef   : > { %5494 = vtanh.f32 %v7973_v24  ;;  %v4293_v62 = vadd.f32 %v4289_v44, %v9801_v18  ;;  %9802 = vst [vmem:[#allocation115_spill] sm:$0xff] %v7991_v1  ;;  %9803 = vst [vmem:[#allocation163_spill] sm:$0xff] %v7999_v40  ;;  %v4294_v59 = vadd.f32 %v4290_v12, %v9801_v18  ;;  %v8008_v55 = vadd.f32 %v4344_v34, %v4340_v14  ;;  %v9806_v14 = vld [vmem:[#allocation129_spill] sm:$0xff] }
 0x4f0   : > { %4942 = vmatmul.mubr.msk.bf16.gmra.mxu0 %vm2123_vm8, %v5392_v56  ;;  %v4249_v56 = vadd.f32 %v4245_v4, %v7874_v36  ;;  %5496 = vtanh.f32 %v7975_v10  ;;  %v4325_v36 = vmul.f32 %v7741_v37, %v7866_v26  ;;  %v4285_v4 = vadd.f32 %v4281_v61, %v7893_v7  ;;  %v9804_v26 = vld [vmem:[#allocation25_spill] sm:$0xff] }
 0x4f1   : > { %2341 = vmatprep.mubr.bf16.mxu0 %v9714_v32  ;;  %v4298_v37 = vmul.f32 %v4250_v48, %v7809_v16  ;;  %v4286_v3 = vadd.f32 %v4282_v2, %v7897_v54  ;;  %v4363_v7 = vmul.f32 %v7922_v42, %v7660_v35  ;;  %v4330_v61 = vadd.f32 %v4326_v58, %v9804_v26  ;;  %v5394_v54 = vld [vmem:[%s9107_s4 + $0x70] sm:$0xff]  }
 0x4f2   : > { %v4297_v44 = vmul.f32 %v4249_v56, %v7809_v16  ;;  %v4329_v45 = vadd.f32 %v4325_v36, %v9804_v26  ;;  %v4364_v12 = vmul.f32 %v7926_v41, %v7660_v35  ;;  %v4333_v34 = vmul.f32 %v4249_v56, %v9806_v14  ;;  %v8021_v18 = vpop.permute.xlu1 %3819  ;;  %v8032_v36 = vpop.permute.xlu0 %3687 }
 0x4f3   : > { %v4302_v46 = vadd.f32 %v4298_v37, %v4294_v59  ;;  %v4367_v16 = vadd.f32 %v4363_v7, %v7968_v19  ;;  %9807 = vst [vmem:[#allocation25_spill] sm:$0xff] %v8021_v18  ;;  %v4334_v42 = vmul.f32 %v4250_v48, %v9806_v14  ;;  %v4371_v2 = vmul.f32 %v7917_v63, %v7707_v39 }
 0x4f4   : > { %v4301_v30 = vadd.f32 %v4297_v44, %v4293_v62  ;;  %v4372_v41 = vmul.f32 %v7920_v21, %v7707_v39  ;;  %v4368_v62 = vadd.f32 %v4364_v12, %v7968_v19  ;;  %v4337_v44 = vadd.f32 %v4333_v34, %v4329_v45  ;;  %v9809_v45 = vld [vmem:[#allocation127_spill] sm:$0xff] }
 0x4f5   : > { %5498 = vtanh.f32 %v8006_v49  ;;  %v4338_v37 = vadd.f32 %v4334_v42, %v4330_v61  ;;  %v4375_v7 = vadd.f32 %v4371_v2, %v4367_v16  ;;  %v4341_v21 = vmul.f32 %v4285_v4, %v7905_v50 }
 0x4f6   : > { %5500 = vtanh.f32 %v8008_v55  ;;  %v4376_v14 = vadd.f32 %v4372_v41, %v4368_v62  ;;  %v4342_v39 = vmul.f32 %v4286_v3, %v7905_v50  ;;  %v4369_v61 = vmul.f32 %v4249_v56, %v7999_v40  ;;  %v8049_v16 = vpop.permute.xlu1 %3867  ;;  %v8054_v2 = vpop.permute.xlu0 %3699  ;;  %v5395_v56 = vld [vmem:[%s9107_s4 + $0x78] sm:$0xff]  }
 0x4f7   : > { %v8046_v34 = vadd.f32 %v4341_v21, %v4337_v44  ;;  %9810 = vst [vmem:[#allocation164_spill] sm:$0xff] %v8049_v16  ;;  %9811 = vst [vmem:[#allocation165_spill] sm:$0xff] %v8054_v2 }
 0x4f8   : > { %4943 = vmatmul.mubr.msk.bf16.gmra.mxu0 %vm2123_vm8, %v5393_v15  ;;  %v9805_v15 = vld [vmem:[#allocation123_spill] sm:$0xff]  ;;  %v4346_v42 = vadd.f32 %v4342_v39, %v4338_v37  ;;  %v4373_v41 = vadd.f32 %v4369_v61, %v7759_v9 }
 0x4f9   : > { %2351 = vmatprep.mubr.bf16.mxu0 %v9714_v32  ;;  %v4305_v5 = vmul.f32 %v4285_v4, %v9805_v15  ;;  %9808 = vst [vmem:[#allocation123_spill] sm:$0xff] %v8032_v36  ;;  %v4306_v58 = vmul.f32 %v4286_v3, %v9805_v15 }
 0x4fb   : > { %v8035_v59 = vadd.f32 %v4305_v5, %v4301_v30  ;;  %v8039_v63 = vadd.f32 %v4306_v58, %v4302_v46  ;;  %v9812_v58 = vld [vmem:[#allocation142_spill] sm:$0xff] }
 0x4fc   : > { %v5495_v12 = vpop.eup %5494  ;;  %v4377_v44 = vmul.f32 %v4285_v4, %v9812_v58  ;;  %v4378_v9 = vmul.f32 %v4286_v3, %v9812_v58 }
 0x4fd   : > { %v5497_v30 = vpop.eup %5496  ;;  %v4319_v5 = vmul.f32 %v5495_v12, %v9809_v45  ;;  %5502 = vtanh.f32 %v8035_v59 }
 0x4fe   : > { %v4320_v46 = vmul.f32 %v5497_v30, %v9809_v45  ;;  %5504 = vtanh.f32 %v8039_v63  ;;  %v4381_v21 = vadd.f32 %v4377_v44, %v4373_v41  ;;  %v8080_v30 = vpop.permute.xlu0 %3779 }
 0x4ff   : > { %5506 = vtanh.f32 %v8046_v34  ;;  %9814 = vst [vmem:[#allocation167_spill] sm:$0xff] %v8080_v30 }
 0x500   : > { %4944 = vmatmul.mubr.msk.bf16.gmra.mxu0 %vm2123_vm8, %v5394_v54  ;;  %v4370_v54 = vmul.f32 %v4250_v48, %v7999_v40  ;;  %v8065_v62 = vadd.f32 %v4320_v46, %v7975_v10  ;;  %5508 = vtanh.f32 %v4346_v42  ;;  %v8076_v10 = vpop.permute.xlu1 %3815 }
 0x501   : > { %2361 = vmatprep.mubr.bf16.mxu0 %v9714_v32  ;;  %v8058_v32 = vadd.f32 %v4319_v5, %v7973_v24  ;;  %9813 = vst [vmem:[#allocation166_spill] sm:$0xff] %v8076_v10  ;;  %5510 = vtanh.f32 %v4381_v21 }
 0x502   : > { %v4374_v39 = vadd.f32 %v4370_v54, %v7762_v57  ;;  %v4400_v24 = vmul.f32 %v8065_v62, %v7766_v0  ;;  %v5499_v5 = vpop.eup %5498  ;;  %v9815_v54 = vld [vmem:[#allocation140_spill] sm:$0xff]  ;;  %v8096_v44 = vpop.permute.xlu0 %3775 }
 0x503   : > { %v4399_v48 = vmul.f32 %v8058_v32, %v7766_v0  ;;  %v5501_v4 = vpop.eup %5500  ;;  %v4355_v61 = vmul.f32 %v5499_v5, %v7928_v17  ;;  %v4379_v41 = vmul.f32 %v7933_v11, %v9815_v54  ;;  %9817 = vst [vmem:[#allocation169_spill] sm:$0xff] %v8096_v44  ;;  %v9818_v0 = vld [vmem:[#allocation125_spill] sm:$0xff] }
 0x504   : > { %v4404_v57 = vadd.f32 %v4400_v24, %v7788_v8  ;;  %v4382_v12 = vadd.f32 %v4378_v9, %v4374_v39  ;;  %v4356_v46 = vmul.f32 %v5501_v4, %v7928_v17 }
 0x505   : > { %v4403_v37 = vadd.f32 %v4399_v48, %v7788_v8  ;;  %v8085_v3 = vadd.f32 %v4355_v61, %v8006_v49  ;;  %v4380_v48 = vmul.f32 %v7943_v53, %v9815_v54  ;;  %v4383_v5 = vadd.f32 %v4379_v41, %v4375_v7  ;;  %v9821_v7 = vld [vmem:[#allocation134_spill] sm:$0xff] }
 0x506   : > { %5512 = vtanh.f32 %v4382_v12  ;;  %v8092_v39 = vadd.f32 %v4356_v46, %v8008_v55  ;;  %v8106_v58 = vpop.permute.xlu0 %3791 }
 0x507   : > { %v4407_v9 = vmul.f32 %v8085_v3, %v7803_v28  ;;  %v4384_v11 = vadd.f32 %v4380_v48, %v4376_v14  ;;  %5514 = vtanh.f32 %v4383_v5  ;;  %9820 = vst [vmem:[#allocation171_spill] sm:$0xff] %v8106_v58 }
 0x508   : > { %4945 = vmatmul.mubr.msk.bf16.gmra.mxu0 %vm2123_vm8, %v5395_v56  ;;  %v8089_v56 = vpop.permute.xlu1 %3863  ;;  %v4408_v4 = vmul.f32 %v8092_v39, %v7803_v28 }
 0x509   : > { %9816 = vst [vmem:[#allocation168_spill] sm:$0xff] %v8089_v56  ;;  %v4411_v61 = vadd.f32 %v4407_v9, %v4403_v37  ;;  %5516 = vtanh.f32 %v4384_v11 }
 0x50a   : > { %v5503_v24 = vpop.eup %5502  ;;  %v4412_v55 = vadd.f32 %v4408_v4, %v4404_v57  ;;  %v8127_v4 = vpop.permute.xlu0 %3739 }
 0x50b   : > { %v5505_v49 = vpop.eup %5504  ;;  %v4317_v53 = vmul.f32 %v5503_v24, %v9818_v0  ;;  %9823 = vst [vmem:[#allocation173_spill] sm:$0xff] %v8127_v4 }
 0x50c   : > { %v5507_v8 = vpop.eup %5506  ;;  %v4318_v17 = vmul.f32 %v5505_v49, %v9818_v0  ;;  %v8104_v45 = vpop.permute.xlu1 %3895 }
 0x50d   : > { %v5509_v46 = vpop.eup %5508  ;;  %9819 = vst [vmem:[#allocation170_spill] sm:$0xff] %v8104_v45  ;;  %v4353_v41 = vmul.f32 %v5507_v8, %v9821_v7  ;;  %v8110_v54 = vadd.f32 %v4317_v53, %v8035_v59 }
 0x50e   : > { %v8113_v14 = vadd.f32 %v4318_v17, %v8039_v63  ;;  %v4354_v37 = vmul.f32 %v5509_v46, %v9821_v7  ;;  %v5511_v57 = vpop.eup %5510  ;;  %v9824_v63 = vld [vmem:[#allocation146_spill] sm:$0xff] }
 0x50f   : > { %v4433_v48 = vmul.f32 %v8110_v54, %v8096_v44  ;;  %v8121_v49 = vadd.f32 %v4353_v41, %v8046_v34  ;;  %v4389_v46 = vmul.f32 %v5511_v57, %v9824_v63 }
 0x510   : > { %v4434_v24 = vmul.f32 %v8113_v14, %v8096_v44  ;;  %v8123_v8 = vpop.permute.xlu1 %3763  ;;  %v8125_v59 = vadd.f32 %v4354_v37, %v4346_v42 }
 0x511   : > { %9822 = vst [vmem:[#allocation172_spill] sm:$0xff] %v8123_v8  ;;  %v4437_v17 = vadd.f32 %v4433_v48, %v7963_v23  ;;  %v4441_v44 = vmul.f32 %v8121_v49, %v7991_v1  ;;  %v8135_v7 = vadd.f32 %v4389_v46, %v4381_v21 }
 0x512   : > { %v4438_v53 = vadd.f32 %v4434_v24, %v7963_v23  ;;  %v4442_v42 = vmul.f32 %v8125_v59, %v7991_v1  ;;  %v8145_v23 = vpop.permute.xlu0 %3851 }
 0x513   : > { %v5513_v9 = vpop.eup %5512  ;;  %v4445_v0 = vadd.f32 %v4441_v44, %v4437_v17  ;;  %9826 = vst [vmem:[#allocation175_spill] sm:$0xff] %v8145_v23  ;;  %v4449_v21 = vmul.f32 %v8135_v7, %v8076_v10 }
 0x514   : > { %v4390_v28 = vmul.f32 %v5513_v9, %v9824_v63  ;;  %v5515_v34 = vpop.eup %5514  ;;  %v8142_v57 = vpop.permute.xlu1 %3759  ;;  %v4446_v9 = vadd.f32 %v4442_v42, %v4438_v53  ;;  %v4398_v53 = vmul.f32 %v8113_v14, %v8054_v2 }
 0x515   : > { %v4391_v48 = vmul.f32 %v5515_v34, %v8032_v36  ;;  %9825 = vst [vmem:[#allocation174_spill] sm:$0xff] %v8142_v57 }
 0x516   : > { %v8139_v41 = vadd.f32 %v4390_v28, %v4382_v12  ;;  %v5517_v37 = vpop.eup %5516  ;;  %v4435_v28 = vmul.f32 %v8058_v32, %v8080_v30  ;;  %v4436_v12 = vmul.f32 %v8065_v62, %v8080_v30  ;;  %v8183_v30 = vpop.permute.xlu0 %3879 }
 0x517   : > { %v4392_v24 = vmul.f32 %v5517_v37, %v8032_v36  ;;  %v8147_v63 = vadd.f32 %v4391_v48, %v4383_v5  ;;  %v4397_v5 = vmul.f32 %v8110_v54, %v8054_v2  ;;  %v4443_v37 = vmul.f32 %v8085_v3, %v7900_v25  ;;  %9828 = vst [vmem:[#allocation177_spill] sm:$0xff] %v8183_v30  ;;  %v9851_v2 = vld [vmem:[#allocation57_spill] sm:$0xff]  ;;  %v9854_v36 = vld [vmem:[#allocation82_spill] sm:$0xff] }
 0x518   : > { %v4450_v44 = vmul.f32 %v8139_v41, %v8076_v10  ;;  %v4444_v10 = vmul.f32 %v8092_v39, %v7900_v25  ;;  %v4406_v25 = vmul.f32 %v8125_v59, %v7860_v51 }
 0x519   : > { %v8151_v46 = vadd.f32 %v4392_v24, %v4384_v11  ;;  %v4415_v17 = vmul.f32 %v8147_v63, %v7885_v43  ;;  %v8165_v11 = vadd.f32 %v4449_v21, %v4445_v0  ;;  %v8175_v24 = vpop.permute.xlu1 %3835  ;;  %v4439_v0 = vadd.f32 %v4435_v28, %v8106_v58 }
 0x51a   : > { %v8169_v42 = vadd.f32 %v4450_v44, %v4446_v9  ;;  %9827 = vst [vmem:[#allocation176_spill] sm:$0xff] %v8175_v24  ;;  %v4440_v21 = vadd.f32 %v4436_v12, %v8106_v58  ;;  %v4401_v9 = vadd.f32 %v4397_v5, %v7830_v33  ;;  %v4402_v44 = vadd.f32 %v4398_v53, %v7830_v33  ;;  %v8201_v53 = vpop.permute.xlu0 %3875 }
 0x51b   : > { %v4416_v34 = vmul.f32 %v8151_v46, %v7885_v43  ;;  %v8173_v48 = vadd.f32 %v4415_v17, %v4411_v61  ;;  %v4447_v43 = vadd.f32 %v4443_v37, %v4439_v0  ;;  %v4405_v17 = vmul.f32 %v8121_v49, %v7860_v51  ;;  %9830 = vst [vmem:[#allocation179_spill] sm:$0xff] %v8201_v53 }
 0x51c   : > { %v4448_v61 = vadd.f32 %v4444_v10, %v4440_v21  ;;  %v4413_v28 = vmul.f32 %v8135_v7, %v8127_v4  ;;  %v4414_v12 = vmul.f32 %v8139_v41, %v8127_v4  ;;  %v4471_v5 = vmul.f32 %v8058_v32, %v7924_v29  ;;  %v9848_v4 = vld [vmem:[#allocation38_spill] sm:$0xff] }
 0x51d   : > { %v8179_v1 = vadd.f32 %v4416_v34, %v4412_v55  ;;  %v4409_v55 = vadd.f32 %v4405_v17, %v4401_v9  ;;  %v4410_v34 = vadd.f32 %v4406_v25, %v4402_v44  ;;  %v8195_v58 = vpop.permute.xlu1 %3915  ;;  %v4472_v10 = vmul.f32 %v8065_v62, %v7924_v29 }
 0x51e   : > { %9829 = vst [vmem:[#allocation178_spill] sm:$0xff] %v8195_v58  ;;  %v4469_v25 = vmul.f32 %v8110_v54, %v8145_v23  ;;  %v4470_v21 = vmul.f32 %v8113_v14, %v8145_v23  ;;  %v4475_v9 = vadd.f32 %v4471_v5, %v8049_v16  ;;  %v4479_v62 = vmul.f32 %v8085_v3, %v8183_v30  ;;  %v8216_v54 = vpop.permute.xlu0 %3891 }
 0x51f   : > { %v4417_v37 = vadd.f32 %v4413_v28, %v4409_v55  ;;  %v4418_v0 = vadd.f32 %v4414_v12, %v4410_v34  ;;  %v4476_v44 = vadd.f32 %v4472_v10, %v8049_v16  ;;  %v4480_v17 = vmul.f32 %v8092_v39, %v8183_v30  ;;  %9832 = vst [vmem:[#allocation181_spill] sm:$0xff] %v8216_v54 }
 0x520   : > { %v4473_v14 = vadd.f32 %v4469_v25, %v8089_v56  ;;  %v4474_v55 = vadd.f32 %v4470_v21, %v8089_v56  ;;  %v4487_v34 = vmul.f32 %v8147_v63, %v8104_v45  ;;  %v4488_v28 = vmul.f32 %v8151_v46, %v8104_v45 }
 0x521   : > { %5518 = vtanh.f32 %v4417_v37  ;;  %v8209_v32 = vpop.permute.xlu1 %3911  ;;  %v4483_v12 = vadd.f32 %v4479_v62, %v4475_v9  ;;  %v4484_v5 = vadd.f32 %v4480_v17, %v4476_v44  ;;  %v4477_v3 = vmul.f32 %v8121_v49, %v8201_v53 }
 0x522   : > { %5520 = vtanh.f32 %v4418_v0  ;;  %9831 = vst [vmem:[#allocation180_spill] sm:$0xff] %v8209_v32  ;;  %v4478_v39 = vmul.f32 %v8125_v59, %v8201_v53  ;;  %v8235_v21 = vpop.permute.xlu0 %3839  ;;  %v4451_v44 = vmul.f32 %v8147_v63, %v8021_v18  ;;  %v4452_v49 = vmul.f32 %v8151_v46, %v8021_v18  ;;  %v9846_v53 = vld [vmem:[#allocation56_spill] sm:$0xff]  ;;  %v9847_v18 = vld [vmem:[#allocation27_spill] sm:$0xff] }
 0x523   : > { %5522 = vtanh.f32 %v8165_v11  ;;  %v8231_v10 = vadd.f32 %v4487_v34, %v4483_v12  ;;  %v8233_v25 = vadd.f32 %v4488_v28, %v4484_v5  ;;  %9833 = vst [vmem:[#allocation182_spill] sm:$0xff] %v8235_v21  ;;  %v4481_v56 = vadd.f32 %v4477_v3, %v4473_v14 }
 0x524   : > { %5524 = vtanh.f32 %v8169_v42  ;;  %v4482_v45 = vadd.f32 %v4478_v39, %v4474_v55  ;;  %v4485_v59 = vmul.f32 %v8135_v7, %v8216_v54  ;;  %v4486_v62 = vmul.f32 %v8139_v41, %v8216_v54 }
 0x525   : > { %5526 = vtanh.f32 %v8173_v48  ;;  %v8237_v9 = vpop.permute.xlu1 %3927  ;;  %v8247_v17 = vadd.f32 %v4451_v44, %v4447_v43  ;;  %v8249_v14 = vadd.f32 %v4452_v49, %v4448_v61 }
 0x526   : > { %5528 = vtanh.f32 %v8179_v1  ;;  %9834 = vst [vmem:[#allocation183_spill] sm:$0xff] %v8237_v9  ;;  %v4489_v34 = vadd.f32 %v4485_v59, %v4481_v56  ;;  %v4490_v28 = vadd.f32 %v4486_v62, %v4482_v45  ;;  %v8252_v55 = vpop.permute.xlu0 %3931 }
 0x527   : > { %5530 = vtanh.f32 %v8231_v10  ;;  %9835 = vst [vmem:[#allocation184_spill] sm:$0xff] %v8252_v55 }
 0x528   : > { %5532 = vtanh.f32 %v8233_v25 }
 0x529   : > { %v8255_v46 = vpop.permute.xlu1 %3955  ;;  %5534 = vtanh.f32 %v4489_v34 }
 0x52a   : > { %9836 = vst [vmem:[#allocation185_spill] sm:$0xff] %v8255_v46  ;;  %5536 = vtanh.f32 %v4490_v28  ;;  %v8261_v39 = vpop.permute.xlu0 %3943 }
 0x52b   : > { %5538 = vtanh.f32 %v8247_v17  ;;  %9837 = vst [vmem:[#allocation186_spill] sm:$0xff] %v8261_v39 }
 0x52c   : > { %5540 = vtanh.f32 %v8249_v14 }
 0x52e   : > { %v5519_v63 = vpop.eup %5518 }
 0x52f   : > { %v5521_v12 = vpop.eup %5520  ;;  %v4425_v7 = vmul.f32 %v5519_v63, %v8142_v57  ;;  %v8267_v63 = vpop.permute.xlu1 %3939 }
 0x530   : > { %v5523_v41 = vpop.eup %5522  ;;  %v4426_v43 = vmul.f32 %v5521_v12, %v8142_v57  ;;  %9838 = vst [vmem:[#allocation187_spill] sm:$0xff] %v8267_v63 }
 0x531   : > { %v5525_v45 = vpop.eup %5524  ;;  %v4429_v56 = vadd.f32 %v4425_v7, %v4417_v37  ;;  %v4461_v3 = vmul.f32 %v5523_v41, %v8175_v24 }
 0x532   : > { %v4430_v61 = vadd.f32 %v4426_v43, %v4418_v0  ;;  %v5527_v5 = vpop.eup %5526  ;;  %v4462_v49 = vmul.f32 %v5525_v45, %v8175_v24  ;;  %v8275_v45 = vpop.permute.xlu0 %3951 }
 0x533   : > { %v5529_v44 = vpop.eup %5528  ;;  %v4505_v59 = vmul.f32 %v4429_v56, %v8237_v9  ;;  %v4427_v37 = vmul.f32 %v5527_v5, %v8123_v8  ;;  %v4465_v41 = vadd.f32 %v4461_v3, %v8165_v11  ;;  %9839 = vst [vmem:[#allocation188_spill] sm:$0xff] %v8275_v45 }
 0x534   : > { %v4506_v62 = vmul.f32 %v4430_v61, %v8237_v9  ;;  %v4428_v0 = vmul.f32 %v5529_v44, %v8123_v8  ;;  %v4466_v43 = vadd.f32 %v4462_v49, %v8169_v42  ;;  %v5531_v56 = vpop.eup %5530  ;;  %v8277_v61 = vpop.permute.xlu1 %3971 }
 0x535   : > { %v4509_v12 = vadd.f32 %v4505_v59, %v8267_v63  ;;  %9840 = vst [vmem:[#allocation189_spill] sm:$0xff] %v8277_v61  ;;  %v4513_v9 = vmul.f32 %v4465_v41, %v8275_v45  ;;  %v5533_v5 = vpop.eup %5532  ;;  %v4431_v44 = vadd.f32 %v4427_v37, %v8173_v48  ;;  %v4499_v49 = vmul.f32 %v5531_v56, %v8195_v58 }
 0x536   : > { %v4510_v7 = vadd.f32 %v4506_v62, %v8267_v63  ;;  %v4514_v24 = vmul.f32 %v4466_v43, %v8275_v45  ;;  %v5535_v57 = vpop.eup %5534  ;;  %v4432_v59 = vadd.f32 %v4428_v0, %v8179_v1  ;;  %v4500_v43 = vmul.f32 %v5533_v5, %v8195_v58 }
 0x537   : > { %v4517_v62 = vadd.f32 %v4513_v9, %v4509_v12  ;;  %v5537_v11 = vpop.eup %5536  ;;  %v4497_v42 = vmul.f32 %v5535_v57, %v8209_v32  ;;  %v4507_v8 = vmul.f32 %v4431_v44, %v8252_v55  ;;  %v4503_v5 = vadd.f32 %v4499_v49, %v8231_v10 }
 0x538   : > { %v4518_v63 = vadd.f32 %v4514_v24, %v4510_v7  ;;  %v4498_v3 = vmul.f32 %v5537_v11, %v8209_v32  ;;  %v5539_v54 = vpop.eup %5538  ;;  %v4508_v48 = vmul.f32 %v4432_v59, %v8252_v55  ;;  %v8289_v37 = vpop.permute.xlu1 %3967  ;;  %v4504_v11 = vadd.f32 %v4500_v43, %v8233_v25 }
 0x539   : > { %v4501_v41 = vadd.f32 %v4497_v42, %v4489_v34  ;;  %9841 = vst [vmem:[#allocation190_spill] sm:$0xff] %v8289_v37  ;;  %v5541_v24 = vpop.eup %5540  ;;  %v4463_v0 = vmul.f32 %v5539_v54, %v8235_v21  ;;  %v4511_v44 = vadd.f32 %v4507_v8, %v8261_v39 }
 0x53a   : > { %v4502_v1 = vadd.f32 %v4498_v3, %v4490_v28  ;;  %v4464_v12 = vmul.f32 %v5541_v24, %v8235_v21  ;;  %v4512_v54 = vadd.f32 %v4508_v48, %v8261_v39  ;;  %v4524_v8 = vmul.f32 %v4504_v11, %v8277_v61 }
 0x53b   : > { %v4521_v57 = vmul.f32 %v4501_v41, %v8289_v37  ;;  %v4467_v34 = vadd.f32 %v4463_v0, %v8247_v17  ;;  %v4523_v17 = vmul.f32 %v4503_v5, %v8277_v61 }
 0x53c   : > { %v4522_v7 = vmul.f32 %v4502_v1, %v8289_v37  ;;  %v4468_v28 = vadd.f32 %v4464_v12, %v8249_v14 }
 0x53d   : > { %v4525_v59 = vadd.f32 %v4521_v57, %v4517_v62  ;;  %v4515_v41 = vmul.f32 %v4467_v34, %v8255_v46  ;;  %v9842_v57 = vld [vmem:[#allocation68_spill] sm:$0xff] }
 0x53e   : > { %v4526_v42 = vadd.f32 %v4522_v7, %v4518_v63  ;;  %v4516_v1 = vmul.f32 %v4468_v28, %v8255_v46  ;;  %v9447_v63 = vmov 0.0  }
 0x53f   : > { %v4519_v0 = vadd.f32 %v4515_v41, %v4511_v44  ;;  %v9843_v44 = vld [vmem:[#allocation59_spill] sm:$0xff] }
 0x540   : > { %v4529_v10 = vadd.f32 %v4526_v42, %v4525_v59  ;;  %v4520_v62 = vadd.f32 %v4516_v1, %v4512_v54 }
 0x541   : > { %v4527_v14 = vadd.f32 %v4523_v17, %v4519_v0 }
 0x542   : > { %vm4531_vm9 = vcmp.lt.f32.partialorder %v4529_v10, 0.0  ;;  %v4528_v25 = vadd.f32 %v4524_v8, %v4520_v62  ;;  %vm4533_vm10 = vcmp.gt.f32.partialorder %v4529_v10, 0.0 }
 0x543   : > { %v4535_v48 = vsel %vm4533_vm10, -1.0, %v9447_v63 }
 0x544   : > { %v4530_v34 = vadd.f32 %v4528_v25, %v4527_v14  ;;  %v4537_v5 = vsel %vm4531_vm9, 1.0, %v4535_v48 }
 0x545   : > { %v4539_v41 = vmul.f32 %v4537_v5, %v4525_v59  ;;  %v4540_v1 = vmul.f32 %v4537_v5, %v4526_v42  ;;  %v9844_v42 = vld [vmem:[#allocation66_spill] sm:$0xff] }
 0x546   : > { %vm4532_vm11 = vcmp.lt.f32.partialorder %v4530_v34, 0.0  ;;  %vm4534_vm12 = vcmp.gt.f32.partialorder %v4530_v34, 0.0 }
 0x547   : > { %v4536_v0 = vsel %vm4534_vm12, -1.0, %v9447_v63  ;;  %v4988_v10 = vmul.f32 -1.442695, %v4539_v41 }
 0x548   : > { %v4538_v62 = vsel %vm4532_vm11, 1.0, %v4536_v0 }
 0x549   : > { %v4541_v48 = vmul.f32 %v4538_v62, %v4527_v14  ;;  %5542 = vpow2.f32 %v4988_v10 }
 0x550   : > { %v2213_v9 = vpop.f32.mrf.mxu0 }
 0x551   : > { %v2214_v12 = vadd.f32 %v2213_v9, %v9842_v57 }
 0x552   : > { %v2215_v56 = vpop.f32.mrf.mxu0 }
 0x553   : > { %v2216_v7 = vadd.f32 %v2215_v56, %v9842_v57  ;;  %v2372_v8 = vmax.f32 %v2214_v12, 0.0  ;;  %v4989_v12 = vmul.f32 -1.442695, %v4540_v1 }
 0x554   : > { %v2217_v3 = vpop.f32.mrf.mxu0 }
 0x555   : > { %v2218_v28 = vadd.f32 %v2217_v3, %v9843_v44  ;;  %v2373_v9 = vmax.f32 %v2216_v7, 0.0  ;;  %v4542_v3 = vmul.f32 %v4538_v62, %v4528_v25 }
 0x556   : > { %v2219_v24 = vpop.f32.mrf.mxu0 }
 0x557   : > { %v2220_v11 = vadd.f32 %v2219_v24, %v9843_v44  ;;  %v2374_v37 = vmax.f32 %v2218_v28, 0.0  ;;  %v4990_v44 = vmul.f32 -1.442695, %v4541_v48  ;;  %v4991_v41 = vmul.f32 -1.442695, %v4542_v3  ;;  %v9845_v28 = vld [vmem:[#allocation60_spill] sm:$0xff] }
 0x558   : > { %v2223_v49 = vpop.f32.mrf.mxu0 }
 0x559   : > { %v2375_v56 = vmax.f32 %v2220_v11, 0.0  ;;  %v8313_v24 = vpack.c.bf16 %v2374_v37, %v2372_v8  ;;  %v2224_v34 = vadd.f32 %v2223_v49, %v9844_v42  ;;  %5544 = vpow2.f32 %v4990_v44  ;;  %v5398_v44 = vld [vmem:[%s9108_s5 + $0x4] ss:$8 sps:$4 sm:$0xff]  }
 0x55a   : > { %v2225_v43 = vpop.f32.mrf.mxu0  ;;  %5546 = vpow2.f32 %v4991_v41  ;;  %2788 = vmatprep.mubr.bf16.mxu1 %v5398_v44 }
 0x55b   : > { %v8315_v59 = vpack.c.bf16 %v2375_v56, %v2373_v9  ;;  %v2226_v7 = vadd.f32 %v2225_v43, %v9844_v42  ;;  %v2376_v37 = vmax.f32 %v2224_v34, 0.0  ;;  %5548 = vpow2.f32 %v4989_v12  ;;  %v5543_v56 = vpop.eup %5542 }
 0x55c   : > { %v2227_v54 = vpop.f32.mrf.mxu0  ;;  %v4555_v48 = vadd.f32 1.0, %v5543_v56 }
 0x55d   : > { %v2228_v11 = vadd.f32 %v2227_v54, %v9845_v28  ;;  %v2377_v25 = vmax.f32 %v2226_v7, 0.0 }
 0x55e   : > { %v2229_v17 = vpop.f32.mrf.mxu0  ;;  %5550 = vrcp.f32 %v4555_v48 }
 0x55f   : > { %v2230_v0 = vadd.f32 %v2229_v17, %v9845_v28  ;;  %v2378_v10 = vmax.f32 %v2228_v11, 0.0 }
 0x560   : > { %v8311_v57 = vpop.f32.mrf.mxu0 }
 0x561   : > { %v2379_v8 = vmax.f32 %v2230_v0, 0.0  ;;  %v8327_v62 = vpack.c.bf16 %v2378_v10, %v2376_v37 }
 0x562   : > { %v8318_v5 = vpop.f32.mrf.mxu0 }
 0x563   : > { %v8329_v1 = vpack.c.bf16 %v2379_v8, %v2377_v25 }
 0x564   : > { %v8323_v14 = vpop.f32.mrf.mxu0 }
 0x566   : > { %v8325_v49 = vpop.f32.mrf.mxu0  ;;  %v5545_v42 = vpop.eup %5544 }
 0x567   : > { %v5547_v41 = vpop.eup %5546  ;;  %v4557_v12 = vadd.f32 1.0, %v5545_v42 }
 0x568   : > { %v8331_v43 = vpop.f32.mrf.mxu0  ;;  %v5549_v7 = vpop.eup %5548  ;;  %v4558_v28 = vadd.f32 1.0, %v5547_v41 }
 0x569   : > { %5552 = vrcp.f32 %v4557_v12  ;;  %v4556_v0 = vadd.f32 1.0, %v5549_v7 }
 0x56a   : > { %v8333_v54 = vpop.f32.mrf.mxu0  ;;  %5554 = vrcp.f32 %v4558_v28 }
 0x56b   : > { %5556 = vrcp.f32 %v4556_v0  ;;  %v5551_v61 = vpop.eup %5550 }
 0x56c   : > { %v8335_v17 = vpop.f32.mrf.mxu0 }
 0x56e   : > { %v2249_v9 = vpop.f32.mrf.mxu0 }
 0x570   : > { %v8337_v3 = vpop.f32.mrf.mxu0 }
 0x572   : > { %v8339_v34 = vpop.f32.mrf.mxu0 }
 0x574   : > { %v8344_v11 = vpop.f32.mrf.mxu0 }
 0x576   : > { %v2259_v37 = vpop.f32.mrf.mxu0  ;;  %v5553_v45 = vpop.eup %5552 }
 0x577   : > { %v5555_v42 = vpop.eup %5554 }
 0x578   : > { %v2263_v25 = vpop.f32.mrf.mxu0  ;;  %v5557_v32 = vpop.eup %5556  ;;  %v4568_v48 = vsub.f32 %v5555_v42, %v5553_v45 }
 0x579   : > { %v4567_v39 = vsub.f32 %v5557_v32, %v5551_v61  ;;  %v9849_v32 = vld [vmem:[#allocation28_spill] sm:$0xff] }
 0x57a   : > { %v2265_v10 = vpop.f32.mrf.mxu0  ;;  %v4570_v44 = vand.u32 2147483647, %v4568_v48 }
 0x57b   : > { %v4569_v12 = vand.u32 2147483647, %v4567_v39 }
 0x57c   : > { %v2267_v8 = vpop.f32.mrf.mxu0  ;;  %v4572_v28 = vmax.f32 %v4570_v44, 1e-09 }
 0x57d   : > { %v4571_v55 = vmax.f32 %v4569_v12, 1e-09  ;;  %v9850_v12 = vld [vmem:[#allocation54_spill] sm:$0xff] }
 0x57e   : > { %v2269_v56 = vpop.f32.mrf.mxu0  ;;  %5558 = vlog2.f32 %v4572_v28 }
 0x57f   : > { %5560 = vlog2.f32 %v4571_v55  ;;  %v2270_v55 = vadd.f32 %v2269_v56, %v9850_v12 }
 0x580   : > { %v2273_v63 = vpop.f32.mrf.mxu0 }
 0x581   : > { %v2395_v50 = vmax.f32 %v2270_v55, 0.0 }
 0x582   : > { %v2275_v46 = vpop.f32.mrf.mxu0 }
 0x583   : > { %v2276_v61 = vadd.f32 %v2275_v46, %v9849_v32  ;;  %v2274_v46 = vadd.f32 %v2273_v63, %v9849_v32  ;;  %v9856_v63 = vld [vmem:[#allocation37_spill] sm:$0xff] }
 0x584   : > { %v2277_v41 = vpop.f32.mrf.mxu0  ;;  %v9857_v32 = vld [vmem:[#allocation45_spill] sm:$0xff] }
 0x585   : > { %v2278_v42 = vadd.f32 %v2277_v41, %v9846_v53 }
 0x586   : > { %v2279_v58 = vpop.f32.mrf.mxu0 }
 0x587   : > { %v2280_v30 = vadd.f32 %v2279_v58, %v9846_v53  ;;  %v2398_v29 = vmax.f32 %v2278_v42, 0.0 }
 0x588   : > { %v2283_v7 = vpop.f32.mrf.mxu0 }
 0x589   : > { %v2284_v51 = vadd.f32 %v2283_v7, %v9847_v18  ;;  %v2399_v28 = vmax.f32 %v2280_v30, 0.0  ;;  %v9855_v30 = vld [vmem:[#allocation29_spill] sm:$0xff] }
 0x58a   : > { %v2285_v0 = vpop.f32.mrf.mxu0 }
 0x58b   : > { %v2286_v23 = vadd.f32 %v2285_v0, %v9847_v18  ;;  %v8356_v0 = vadd.f32 %v8325_v49, %v9851_v2  ;;  %v2400_v7 = vmax.f32 %v2284_v51, 0.0  ;;  %v5559_v42 = vpop.eup %5558 }
 0x58c   : > { %v2287_v21 = vpop.f32.mrf.mxu0 }
 0x58d   : > { %v2288_v16 = vadd.f32 %v2287_v21, %v9848_v4  ;;  %v2401_v33 = vmax.f32 %v2286_v23, 0.0  ;;  %v9852_v21 = vld [vmem:[#allocation58_spill] sm:$0xff]  ;;  %v2260_v23 = vadd.f32 %v2259_v37, %v9855_v30 }
 0x58e   : > { %v2289_v45 = vpop.f32.mrf.mxu0  ;;  %v8359_v18 = vadd.f32 %v2249_v9, %v9852_v21 }
 0x58f   : > { %v2290_v39 = vadd.f32 %v2289_v45, %v9848_v4  ;;  %v2402_v48 = vmax.f32 %v2288_v16, 0.0  ;;  %v9853_v45 = vld [vmem:[#allocation42_spill] sm:$0xff]  ;;  %v2397_v16 = vmax.f32 %v2276_v61, 0.0  ;;  %v2396_v61 = vmax.f32 %v2274_v46, 0.0 }
 0x590   : > { %v2293_v44 = vpop.f32.mrf.mxu0  ;;  %v2266_v53 = vadd.f32 %v2265_v10, %v9853_v45  ;;  %v2256_v10 = vadd.f32 %v8339_v34, %v9857_v32  ;;  %v2264_v37 = vadd.f32 %v2263_v25, %v9853_v45  ;;  %v2391_v55 = vmax.f32 %v2260_v23, 0.0 }
 0x591   : > { %v2403_v58 = vmax.f32 %v2290_v39, 0.0  ;;  %v2294_v56 = vadd.f32 %v2293_v44, %v9854_v36  ;;  %v2268_v39 = vadd.f32 %v2267_v8, %v9850_v12  ;;  %v2450_v49 = vpack.c.bf16 %v2402_v48, %v2400_v7 }
 0x592   : > { %v2295_v4 = vpop.f32.mrf.mxu0  ;;  %v2449_v9 = vpack.c.bf16 %v2399_v28, %v2397_v16  ;;  %v2393_v48 = vmax.f32 %v2266_v53, 0.0  ;;  %v4576_v7 = vmul.f32 0.6931472, %v5559_v42  ;;  %v2254_v46 = vadd.f32 %v8337_v3, %v9857_v32 }
 0x593   : > { %v2451_v41 = vpack.c.bf16 %v2403_v58, %v2401_v33  ;;  %v2296_v19 = vadd.f32 %v2295_v4, %v9854_v36  ;;  %v2258_v33 = vadd.f32 %v8344_v11, %v9855_v30  ;;  %v2404_v44 = vmax.f32 %v2294_v56, 0.0  ;;  %v9858_v30 = vld [vmem:[#allocation48_spill] sm:$0xff] }
 0x594   : > { %v2297_v40 = vpop.f32.mrf.mxu0  ;;  %v2394_v28 = vmax.f32 %v2268_v39, 0.0  ;;  %v2448_v58 = vpack.c.bf16 %v2398_v29, %v2396_v61  ;;  %v2447_v4 = vpack.c.bf16 %v2395_v50, %v2393_v48  ;;  %v2392_v45 = vmax.f32 %v2264_v37, 0.0  ;;  %v9859_v50 = vld [vmem:[#allocation80_spill] sm:$0xff] }
 0x595   : > { %v2298_v51 = vadd.f32 %v2297_v40, %v9856_v63  ;;  %2756 = vmatprep.subr.bf16.mxu1 %v2451_v41  ;;  %v5561_v40 = vpop.eup %5560  ;;  %v2405_v11 = vmax.f32 %v2296_v19, 0.0  ;;  %v4577_v56 = vsel %vm957_vm0, %v4576_v7, 0.0  ;;  %v2246_v23 = vadd.f32 %v8333_v54, %v9858_v30  ;;  %v9860_v54 = vld [vmem:[#allocation34_spill] sm:$0xff] }
 0x596   : > { %v2299_v8 = vpop.f32.mrf.mxu0  ;;  %2757 = vmatpush1.bf16.msra.mxu1 %v2450_v49  ;;  %v4574_v41 = vmul.f32 0.6931472, %v5561_v40  ;;  %v2389_v29 = vmax.f32 %v2256_v10, 0.0  ;;  %v2248_v49 = vadd.f32 %v8335_v17, %v9852_v21  ;;  %v2446_v3 = vpack.c.bf16 %v2394_v28, %v2392_v45 }
 0x597   : > { %v2406_v12 = vmax.f32 %v2298_v51, 0.0  ;;  %v2300_v36 = vadd.f32 %v2299_v8, %v9856_v63  ;;  %2758 = vmatprep.subr.bf16.mxu1 %v2449_v9  ;;  %v2390_v9 = vmax.f32 %v2258_v33, 0.0  ;;  %v2387_v32 = vmax.f32 %v8359_v18, 0.0  ;;  %v9861_v8 = vld [vmem:[#allocation50_spill] sm:$0xff] }
 0x598   : > { %v2303_v34 = vpop.f32.mrf.mxu0  ;;  %v8386_v51 = vadd.f32 %v4577_v56, %v4574_v41  ;;  %v2445_v37 = vpack.c.bf16 %v2391_v55, %v2389_v29  ;;  %v2236_v42 = vadd.f32 %v8318_v5, %v9861_v8  ;;  %v2244_v48 = vadd.f32 %v8331_v43, %v9858_v30 }
 0x599   : > { %v8374_v16 = vpack.c.bf16 %v2406_v12, %v2404_v44  ;;  %v2407_v25 = vmax.f32 %v2300_v36, 0.0  ;;  %v2304_v19 = vadd.f32 %v2303_v34, %v9859_v50  ;;  %v2388_v44 = vmax.f32 %v2254_v46, 0.0 }
 0x59a   : > { %v2305_v53 = vpop.f32.mrf.mxu0  ;;  %2759 = vmatpush1.bf16.msra.mxu1 %v2448_v58  ;;  %v2385_v21 = vmax.f32 %v2246_v23, 0.0  ;;  %v2238_v18 = vadd.f32 %v8323_v14, %v9851_v2  ;;  %v2383_v40 = vmax.f32 %v8356_v0, 0.0  ;;  %v2386_v55 = vmax.f32 %v2248_v49, 0.0 }
 0x59b   : > { %v8381_v39 = vpack.c.bf16 %v2407_v25, %v2405_v11  ;;  %2760 = vmatprep.subr.bf16.mxu1 %v2447_v4  ;;  %v2306_v61 = vadd.f32 %v2305_v53, %v9859_v50  ;;  %v2408_v33 = vmax.f32 %v2304_v19, 0.0  ;;  %v2444_v28 = vpack.c.bf16 %v2390_v9, %v2388_v44 }
 0x59c   : > { %v2307_v63 = vpop.f32.mrf.mxu0  ;;  %v2443_v58 = vpack.c.bf16 %v2387_v32, %v2385_v21  ;;  %v2234_v4 = vadd.f32 %v8311_v57, %v9861_v8  ;;  %v2384_v11 = vmax.f32 %v2244_v48, 0.0  ;;  %v2381_v46 = vmax.f32 %v2236_v42, 0.0 }
 0x59d   : > { %v2308_v10 = vadd.f32 %v2307_v63, %v9860_v54  ;;  %v2409_v43 = vmax.f32 %v2306_v61, 0.0  ;;  %v2382_v14 = vmax.f32 %v2238_v18, 0.0  ;;  %v9865_v18 = vld [vmem:[#allocation72_spill] sm:$0xff] }
 0x59e   : > { %v2309_v17 = vpop.f32.mrf.mxu0  ;;  %2761 = vmatpush1.bf16.msra.mxu1 %v2446_v3  ;;  %v2442_v0 = vpack.c.bf16 %v2386_v55, %v2384_v11  ;;  %v2441_v53 = vpack.c.bf16 %v2383_v40, %v2381_v46  ;;  %v2380_v41 = vmax.f32 %v2234_v4, 0.0 }
 0x59f   : > { %v2410_v12 = vmax.f32 %v2308_v10, 0.0  ;;  %v2310_v36 = vadd.f32 %v2309_v17, %v9860_v54  ;;  %2762 = vmatprep.subr.bf16.mxu1 %v2445_v37 }
 0x5a0   : > { %v8399_v5 = vpop.f32.mrf.mxu0  ;;  %v2440_v30 = vpack.c.bf16 %v2382_v14, %v2380_v41 }
 0x5a1   : > { %v8401_v34 = vpack.c.bf16 %v2410_v12, %v2408_v33  ;;  %v2411_v7 = vmax.f32 %v2310_v36, 0.0  ;;  %v9864_v33 = vld [vmem:[#allocation33_spill] sm:$0xff] }
 0x5a2   : > { %v8405_v25 = vpop.f32.mrf.mxu0  ;;  %2763 = vmatpush1.bf16.msra.mxu1 %v2444_v28 }
 0x5a3   : > { %v8407_v2 = vpack.c.bf16 %v2411_v7, %v2409_v43  ;;  %2764 = vmatprep.subr.bf16.mxu1 %v2443_v58  ;;  %v9866_v43 = vld [vmem:[#allocation35_spill] sm:$0xff] }
 0x5a4   : > { %v8409_v45 = vpop.f32.mrf.mxu0 }
 0x5a6   : > { %v8411_v56 = vpop.f32.mrf.mxu0  ;;  %2765 = vmatpush1.bf16.msra.mxu1 %v2442_v0 }
 0x5a7   : > { %2766 = vmatprep.subr.bf16.mxu1 %v2441_v53  ;;  %v9867_v53 = vld [vmem:[#allocation73_spill] sm:$0xff] }
 0x5a8   : > { %v8413_v57 = vpop.f32.mrf.mxu0 }
 0x5aa   : > { %v8415_v23 = vpop.f32.mrf.mxu0  ;;  %2767 = vmatpush1.bf16.msra.mxu1 %v2440_v30 }
 0x5ab   : > { %2768 = vmatprep.subr.bf16.mxu1 %v8329_v1 }
 0x5ac   : > { %v8418_v29 = vpop.f32.mrf.mxu0 }
 0x5ae   : > { %v2329_v50 = vpop.f32.mrf.mxu0  ;;  %2769 = vmatpush1.bf16.msra.mxu1 %v8327_v62  ;;  %v9862_v62 = vld [vmem:[#allocation61_spill] sm:$0xff] }
 0x5af   : > { %2770 = vmatprep.subr.bf16.mxu1 %v8315_v59  ;;  %v9863_v59 = vld [vmem:[#allocation70_spill] sm:$0xff] }
 0x5b0   : > { %v2333_v19 = vpop.f32.mrf.mxu0 }
 0x5b2   : > { %v2335_v49 = vpop.f32.mrf.mxu0  ;;  %2771 = vmatpush1.bf16.msra.mxu1 %v8313_v24 }
 0x5b4   : > { %v2337_v9 = vpop.f32.mrf.mxu0 }
 0x5b6   : > { %v2339_v3 = vpop.f32.mrf.mxu0 }
 0x5b8   : > { %v2343_v63 = vpop.f32.mrf.mxu0 }
 0x5ba   : > { %v2345_v32 = vpop.f32.mrf.mxu0 }
 0x5bb   : > { %v2346_v41 = vadd.f32 %v2345_v32, %v9867_v53 }
 0x5bc   : > { %v2347_v37 = vpop.f32.mrf.mxu0 }
 0x5be   : > { %v2349_v61 = vpop.f32.mrf.mxu0 }
 0x5bf   : > { %v2350_v7 = vadd.f32 %v2349_v61, %v9866_v43  ;;  %v2344_v61 = vadd.f32 %v2343_v63, %v9867_v53 }
 0x5c0   : > { %v2353_v54 = vpop.f32.mrf.mxu0 }
 0x5c1   : > { %v2354_v14 = vadd.f32 %v2353_v54, %v9865_v18 }
 0x5c2   : > { %v2355_v10 = vpop.f32.mrf.mxu0 }
 0x5c3   : > { %v2356_v40 = vadd.f32 %v2355_v10, %v9865_v18 }
 0x5c4   : > { %v2357_v1 = vpop.f32.mrf.mxu0 }
 0x5c5   : > { %v2358_v28 = vadd.f32 %v2357_v1, %v9862_v62  ;;  %v2429_v30 = vmax.f32 %v2356_v40, 0.0  ;;  %v2427_v1 = vmax.f32 %v2350_v7, 0.0  ;;  %v9872_v7 = vld [vmem:[#allocation39_spill] sm:$0xff] }
 0x5c6   : > { %v2359_v8 = vpop.f32.mrf.mxu0 }
 0x5c7   : > { %v2360_v17 = vadd.f32 %v2359_v8, %v9862_v62  ;;  %v2430_v10 = vmax.f32 %v2358_v28, 0.0  ;;  %v9871_v28 = vld [vmem:[#allocation77_spill] sm:$0xff] }
 0x5c8   : > { %v2363_v42 = vpop.f32.mrf.mxu0  ;;  %v2326_v63 = vadd.f32 %v8415_v23, %v9871_v28 }
 0x5c9   : > { %v2364_v24 = vadd.f32 %v2363_v42, %v9863_v59  ;;  %v2431_v4 = vmax.f32 %v2360_v17, 0.0  ;;  %v2348_v42 = vadd.f32 %v2347_v37, %v9866_v43  ;;  %v2428_v17 = vmax.f32 %v2354_v14, 0.0  ;;  %v9870_v37 = vld [vmem:[#allocation40_spill] sm:$0xff]  ;;  %v9873_v14 = vld [vmem:[#allocation78_spill] sm:$0xff] }
 0x5ca   : > { %v2365_v48 = vpop.f32.mrf.mxu0  ;;  %v2316_v23 = vadd.f32 %v8405_v25, %v9873_v14 }
 0x5cb   : > { %v2366_v21 = vadd.f32 %v2365_v48, %v9863_v59  ;;  %v2432_v0 = vmax.f32 %v2364_v24, 0.0  ;;  %v2465_v62 = vpack.c.bf16 %v2431_v4, %v2429_v30  ;;  %v2464_v24 = vpack.c.bf16 %v2430_v10, %v2428_v17  ;;  %v5411_v17 = vld [vmem:[%s9108_s5 + $0x54] ss:$8 sps:$4 sm:$0xff]  }
 0x5cc   : > { %v2367_v44 = vpop.f32.mrf.mxu0  ;;  %v2320_v4 = vadd.f32 %v8411_v56, %v9872_v7  ;;  %v2314_v56 = vadd.f32 %v8399_v5, %v9873_v14  ;;  %v5396_v5 = vld [vmem:[%s9108_s5] ss:$8 sps:$4 sm:$0xff]  }
 0x5cd   : > { %v2368_v12 = vadd.f32 %v2367_v44, %v9864_v33  ;;  %v2433_v11 = vmax.f32 %v2366_v21, 0.0  ;;  %v9868_v44 = vld [vmem:[#allocation63_spill] sm:$0xff] }
 0x5ce   : > { %v2369_v36 = vpop.f32.mrf.mxu0  ;;  %v2340_v59 = vadd.f32 %v2339_v3, %v9868_v44  ;;  %v9869_v21 = vld [vmem:[#allocation75_spill] sm:$0xff]  ;;  %v2338_v32 = vadd.f32 %v2337_v9, %v9868_v44  ;;  %v2415_v30 = vmax.f32 %v2320_v4, 0.0  ;;  %v2412_v25 = vmax.f32 %v2314_v56, 0.0 }
 0x5cf   : > { %v2370_v55 = vadd.f32 %v2369_v36, %v9864_v33  ;;  %v2434_v58 = vmax.f32 %v2368_v12, 0.0  ;;  %v2336_v54 = vadd.f32 %v2335_v49, %v9869_v21  ;;  %v2425_v33 = vmax.f32 %v2346_v41, 0.0  ;;  %v5443_v4 = vld [vmem:[%s9108_s5 + $0xf4] ss:$8 sps:$4 sm:$0xff]  }
 0x5d0   : > { %v2426_v12 = vmax.f32 %v2348_v42, 0.0  ;;  %v2330_v36 = vadd.f32 %v2329_v50, %v9870_v37  ;;  %v2423_v18 = vmax.f32 %v2340_v59, 0.0  ;;  %v2334_v3 = vadd.f32 %v2333_v19, %v9869_v21  ;;  %v5413_v21 = vld [vmem:[%s9108_s5 + $0x50] ss:$8 sps:$4 sm:$0xff]  }
 0x5d1   : > { %v2435_v46 = vmax.f32 %v2370_v55, 0.0  ;;  %v2466_v48 = vpack.c.bf16 %v2434_v58, %v2432_v0  ;;  %v2463_v40 = vpack.c.bf16 %v2427_v1, %v2425_v33  ;;  %v2424_v55 = vmax.f32 %v2344_v61, 0.0  ;;  %v5407_v1 = vld [vmem:[%s9108_s5 + $0x30] ss:$8 sps:$4 sm:$0xff]   ;;  %v5410_v61 = vld [vmem:[%s9108_s5 + $0x40] ss:$8 sps:$4 sm:$0xff]  }
 0x5d2   : > { %v2421_v58 = vmax.f32 %v2336_v54, 0.0  ;;  %v2328_v49 = vadd.f32 %v8418_v29, %v9870_v37  ;;  %v2422_v43 = vmax.f32 %v2338_v32, 0.0  ;;  %v2419_v50 = vmax.f32 %v2330_v36, 0.0  ;;  %v5414_v54 = vld [vmem:[%s9108_s5 + $0x64] ss:$8 sps:$4 sm:$0xff]  }
 0x5d3   : > { %v2467_v8 = vpack.c.bf16 %v2435_v46, %v2433_v11  ;;  %v2462_v9 = vpack.c.bf16 %v2426_v12, %v2424_v55  ;;  %v2324_v19 = vadd.f32 %v8413_v57, %v9871_v28  ;;  %v2420_v46 = vmax.f32 %v2334_v3, 0.0  ;;  %v5416_v33 = vld [vmem:[%s9108_s5 + $0x60] ss:$8 sps:$4 sm:$0xff]   ;;  %v5417_v32 = vld [vmem:[%s9108_s5 + $0x74] ss:$8 sps:$4 sm:$0xff]  }
 0x5d4   : > { %v2461_v11 = vpack.c.bf16 %v2423_v18, %v2421_v58  ;;  %v2417_v0 = vmax.f32 %v2326_v63, 0.0  ;;  %v2318_v29 = vadd.f32 %v8409_v45, %v9872_v7  ;;  %v2418_v53 = vmax.f32 %v2328_v49, 0.0  ;;  %v5399_v45 = vld [vmem:[%s9108_s5 + $0x14] ss:$8 sps:$4 sm:$0xff]   ;;  %v5419_v12 = vld [vmem:[%s9108_s5 + $0x70] ss:$8 sps:$4 sm:$0xff]  }
 0x5d5   : > { %2772 = vmatprep.subr.bf16.mxu1 %v2467_v8  ;;  %v2460_v41 = vpack.c.bf16 %v2422_v43, %v2420_v46  ;;  %v2416_v42 = vmax.f32 %v2324_v19, 0.0  ;;  %v2413_v57 = vmax.f32 %v2316_v23, 0.0  ;;  %v5422_v37 = vld [vmem:[%s9108_s5 + $0x80] ss:$8 sps:$4 sm:$0xff]   ;;  %v5423_v36 = vld [vmem:[%s9108_s5 + $0x94] ss:$8 sps:$4 sm:$0xff]  }
 0x5d6   : > { %2773 = vmatpush2.bf16.msra.mxu1 %v2466_v48  ;;  %v2459_v8 = vpack.c.bf16 %v2419_v50, %v2417_v0  ;;  %v2414_v10 = vmax.f32 %v2318_v29, 0.0  ;;  %v5425_v18 = vld [vmem:[%s9108_s5 + $0x90] ss:$8 sps:$4 sm:$0xff]   ;;  %v5428_v3 = vld [vmem:[%s9108_s5 + $0xa0] ss:$8 sps:$4 sm:$0xff]  }
 0x5d7   : > { %2774 = vmatprep.subr.bf16.mxu1 %v2465_v62  ;;  %v2458_v48 = vpack.c.bf16 %v2418_v53, %v2416_v42  ;;  %v2457_v44 = vpack.c.bf16 %v2415_v30, %v2413_v57  ;;  %v5408_v62 = vld [vmem:[%s9108_s5 + $0x44] ss:$8 sps:$4 sm:$0xff]   ;;  %v5429_v55 = vld [vmem:[%s9108_s5 + $0xb4] ss:$8 sps:$4 sm:$0xff]   ;;  %v5431_v28 = vld [vmem:[%s9108_s5 + $0xb0] ss:$8 sps:$4 sm:$0xff]  }
 0x5d8   : > { %v2456_v59 = vpack.c.bf16 %v2414_v10, %v2412_v25  ;;  %v5434_v63 = vld [vmem:[%s9108_s5 + $0xc4] ss:$8 sps:$4 sm:$0xff]   ;;  %v5432_v58 = vld [vmem:[%s9108_s5 + $0xc0] ss:$8 sps:$4 sm:$0xff]   ;;  %v5437_v49 = vld [vmem:[%s9108_s5 + $0xd4] ss:$8 sps:$4 sm:$0xff]  }
 0x5d9   : > { %v5435_v43 = vld [vmem:[%s9108_s5 + $0xd0] ss:$8 sps:$4 sm:$0xff]   ;;  %v5438_v7 = vld [vmem:[%s9108_s5 + $0xe0] ss:$8 sps:$4 sm:$0xff]  }
 0x5da   : > { %2775 = vmatpush2.bf16.msra.mxu1 %v2464_v24  ;;  %v5420_v24 = vld [vmem:[%s9108_s5 + $0x84] ss:$8 sps:$4 sm:$0xff]   ;;  %v5441_v50 = vld [vmem:[%s9108_s5 + $0xf0] ss:$8 sps:$4 sm:$0xff]  }
 0x5db   : > { %2776 = vmatprep.subr.bf16.mxu1 %v2463_v40  ;;  %v5426_v40 = vld [vmem:[%s9108_s5 + $0xa4] ss:$8 sps:$4 sm:$0xff]   ;;  %v9875_v29 = vld [vmem:[#allocation64_spill] sm:$0xff] }
 0x5dc   : > { %v9874_v46 = vld [vmem:[#allocation41_spill] sm:$0xff] }
 0x5de   : > { %2777 = vmatpush2.bf16.msra.mxu1 %v2462_v9  ;;  %v5440_v9 = vld [vmem:[%s9108_s5 + $0xe4] ss:$8 sps:$4 sm:$0xff]  }
 0x5df   : > { %2778 = vmatprep.subr.bf16.mxu1 %v2461_v11 }
 0x5e2   : > { %2779 = vmatpush2.bf16.msra.mxu1 %v2460_v41 }
 0x5e3   : > { %2780 = vmatprep.subr.bf16.mxu1 %v2459_v8 }
 0x5e6   : > { %2781 = vmatpush2.bf16.msra.mxu1 %v2458_v48 }
 0x5e7   : > { %2782 = vmatprep.subr.bf16.mxu1 %v2457_v44 }
 0x5ea   : > { %2783 = vmatpush2.bf16.msra.mxu1 %v2456_v59  ;;  %v9876_v59 = vld [vmem:[#allocation44_spill] sm:$0xff] }
 0x5eb   : > { %2784 = vmatprep.subr.bf16.mxu1 %v8407_v2  ;;  %v5401_v2 = vld [vmem:[%s9108_s5 + $0x10] ss:$8 sps:$4 sm:$0xff]  }
 0x5ee   : > { %2785 = vmatpush2.bf16.msra.mxu1 %v8401_v34  ;;  %v5405_v34 = vld [vmem:[%s9108_s5 + $0x34] ss:$8 sps:$4 sm:$0xff]  }
 0x5ef   : > { %2786 = vmatprep.subr.bf16.mxu1 %v8381_v39  ;;  %v5402_v39 = vld [vmem:[%s9108_s5 + $0x24] ss:$8 sps:$4 sm:$0xff]  }
 0x5f2   : > { %2787 = vmatpush2.bf16.msra.mxu1 %v8374_v16  ;;  %v5404_v16 = vld [vmem:[%s9108_s5 + $0x20] ss:$8 sps:$4 sm:$0xff]  }
 0x5f5   : > { %2789 = vmatmul.mubr.bf16.vlgmr.msra.gmra.mxu1 %v5396_v5 }
 0x5f6   : > { %2798 = vmatprep.mubr.bf16.mxu1 %v5399_v45 }
 0x5fd   : > { %2799 = vmatmul.mubr.bf16.gmra.mxu1 %v5401_v2 }
 0x5fe   : > { %2808 = vmatprep.mubr.bf16.mxu1 %v5402_v39  ;;  %v9877_v39 = vld [vmem:[#allocation47_spill] sm:$0xff] }
 0x605   : > { %2809 = vmatmul.mubr.bf16.gmra.mxu1 %v5404_v16 }
 0x606   : > { %2818 = vmatprep.mubr.bf16.mxu1 %v5405_v34 }
 0x60d   : > { %2819 = vmatmul.mubr.bf16.gmra.mxu1 %v5407_v1 }
 0x60e   : > { %2828 = vmatprep.mubr.bf16.mxu1 %v5408_v62 }
 0x615   : > { %2829 = vmatmul.mubr.bf16.gmra.mxu1 %v5410_v61 }
 0x616   : > { %2838 = vmatprep.mubr.bf16.mxu1 %v5411_v17 }
 0x61d   : > { %2839 = vmatmul.mubr.bf16.gmra.mxu1 %v5413_v21 }
 0x61e   : > { %2848 = vmatprep.mubr.bf16.mxu1 %v5414_v54 }
 0x625   : > { %2849 = vmatmul.mubr.bf16.gmra.mxu1 %v5416_v33 }
 0x626   : > { %2858 = vmatprep.mubr.bf16.mxu1 %v5417_v32 }
 0x62d   : > { %2859 = vmatmul.mubr.bf16.gmra.mxu1 %v5419_v12 }
 0x62e   : > { %2868 = vmatprep.mubr.bf16.mxu1 %v5420_v24 }
 0x635   : > { %2869 = vmatmul.mubr.bf16.gmra.mxu1 %v5422_v37 }
 0x636   : > { %2878 = vmatprep.mubr.bf16.mxu1 %v5423_v36 }
 0x63d   : > { %2879 = vmatmul.mubr.bf16.gmra.mxu1 %v5425_v18 }
 0x63e   : > { %2888 = vmatprep.mubr.bf16.mxu1 %v5426_v40 }
 0x645   : > { %2889 = vmatmul.mubr.bf16.gmra.mxu1 %v5428_v3 }
 0x646   : > { %2898 = vmatprep.mubr.bf16.mxu1 %v5429_v55 }
 0x64d   : > { %2899 = vmatmul.mubr.bf16.gmra.mxu1 %v5431_v28 }
 0x64e   : > { %2908 = vmatprep.mubr.bf16.mxu1 %v5434_v63  ;;  %v8583_v63 = vld [vmem:[#allocation7] sm:$0xff] }
 0x655   : > { %2909 = vmatmul.mubr.bf16.gmra.mxu1 %v5432_v58 }
 0x656   : > { %2918 = vmatprep.mubr.bf16.mxu1 %v5437_v49  ;;  %v4979_v49 = vcombine.high %v8583_v63, %v8583_v63 }
 0x658   : > { %3089 = vmatprep.mubr.bf16.mxu0 %v4979_v49 }
 0x65d   : > { %2919 = vmatmul.mubr.bf16.gmra.mxu1 %v5435_v43 }
 0x65e   : > { %2928 = vmatprep.mubr.bf16.mxu1 %v5440_v9 }
 0x665   : > { %2929 = vmatmul.mubr.bf16.gmra.mxu1 %v5438_v7 }
 0x666   : > { %2938 = vmatprep.mubr.bf16.mxu1 %v5443_v4 }
 0x66d   : > { %2939 = vmatmul.mubr.bf16.gmra.mxu1 %v5441_v50 }
 0x6b5   : > { %v2790_v11 = vpop.f32.mrf.mxu1 }
 0x6b6   : > { %v2791_v14 = vadd.f32 %v2790_v11, %v9874_v46 }
 0x6b7   : > { %v2792_v19 = vpop.f32.mrf.mxu1 }
 0x6b8   : > { %v2793_v0 = vadd.f32 %v2792_v19, %v9874_v46  ;;  %v2949_v30 = vmax.f32 %v2791_v14, 0.0 }
 0x6b9   : > { %v2794_v23 = vpop.f32.mrf.mxu1 }
 0x6ba   : > { %v2795_v53 = vadd.f32 %v2794_v23, %v9875_v29  ;;  %v2950_v57 = vmax.f32 %v2793_v0, 0.0 }
 0x6bb   : > { %v2796_v41 = vpop.f32.mrf.mxu1 }
 0x6bc   : > { %v2951_v8 = vmax.f32 %v2795_v53, 0.0  ;;  %v2797_v56 = vadd.f32 %v2796_v41, %v9875_v29  ;;  %v9878_v53 = vld [vmem:[#allocation71_spill] sm:$0xff] }
 0x6bd   : > { %v2800_v42 = vpop.f32.mrf.mxu1 }
 0x6be   : > { %v8555_v10 = vpack.c.bf16 %v2951_v8, %v2949_v30  ;;  %v2952_v48 = vmax.f32 %v2797_v56, 0.0  ;;  %v2801_v5 = vadd.f32 %v2800_v42, %v9876_v59  ;;  %v9879_v30 = vld [vmem:[#allocation110_spill] sm:$0xff] }
 0x6bf   : > { %v2802_v44 = vpop.f32.mrf.mxu1  ;;  %v9880_v56 = vld [vmem:[#allocation74_spill] sm:$0xff] }
 0x6c0   : > { %v8557_v25 = vpack.c.bf16 %v2952_v48, %v2950_v57  ;;  %v2803_v2 = vadd.f32 %v2802_v44, %v9876_v59  ;;  %v2953_v1 = vmax.f32 %v2801_v5, 0.0  ;;  %v9881_v44 = vld [vmem:[#allocation108_spill] sm:$0xff] }
 0x6c1   : > { %v2804_v45 = vpop.f32.mrf.mxu1 }
 0x6c2   : > { %v2805_v16 = vadd.f32 %v2804_v45, %v9877_v39  ;;  %v2954_v21 = vmax.f32 %v2803_v2, 0.0 }
 0x6c3   : > { %v2806_v34 = vpop.f32.mrf.mxu1 }
 0x6c4   : > { %v2955_v62 = vmax.f32 %v2805_v16, 0.0  ;;  %v2807_v61 = vadd.f32 %v2806_v34, %v9877_v39  ;;  %v9882_v16 = vld [vmem:[#allocation69_spill] sm:$0xff] }
 0x6c5   : > { %v8563_v17 = vpop.f32.mrf.mxu1 }
 0x6c6   : > { %v8565_v54 = vpack.c.bf16 %v2955_v62, %v2953_v1  ;;  %v2956_v33 = vmax.f32 %v2807_v61, 0.0 }
 0x6c7   : > { %v8567_v32 = vpop.f32.mrf.mxu1 }
 0x6c8   : > { %v8569_v12 = vpack.c.bf16 %v2956_v33, %v2954_v21 }
 0x6c9   : > { %v8571_v24 = vpop.f32.mrf.mxu1 }
 0x6cb   : > { %v8573_v37 = vpop.f32.mrf.mxu1 }
 0x6cd   : > { %v8575_v36 = vpop.f32.mrf.mxu1 }
 0x6cf   : > { %v8577_v18 = vpop.f32.mrf.mxu1 }
 0x6d1   : > { %v8579_v40 = vpop.f32.mrf.mxu1 }
 0x6d3   : > { %v2826_v3 = vpop.f32.mrf.mxu1 }
 0x6d5   : > { %v8581_v55 = vpop.f32.mrf.mxu1 }
 0x6d7   : > { %v2832_v28 = vpop.f32.mrf.mxu1 }
 0x6d9   : > { %v2834_v58 = vpop.f32.mrf.mxu1 }
 0x6db   : > { %v2836_v43 = vpop.f32.mrf.mxu1 }
 0x6dd   : > { %v2840_v9 = vpop.f32.mrf.mxu1 }
 0x6df   : > { %v2842_v7 = vpop.f32.mrf.mxu1 }
 0x6e1   : > { %v2844_v4 = vpop.f32.mrf.mxu1 }
 0x6e3   : > { %v2846_v50 = vpop.f32.mrf.mxu1 }
 0x6e4   : > { %v2847_v34 = vadd.f32 %v2846_v50, %v9882_v16 }
 0x6e5   : > { %v2850_v11 = vpop.f32.mrf.mxu1 }
 0x6e6   : > { %v2851_v21 = vadd.f32 %v2850_v11, %v9881_v44  ;;  %v9886_v11 = vld [vmem:[#allocation76_spill] sm:$0xff] }
 0x6e7   : > { %v2852_v19 = vpop.f32.mrf.mxu1 }
 0x6e8   : > { %v2853_v59 = vadd.f32 %v2852_v19, %v9881_v44  ;;  %v9884_v19 = vld [vmem:[#allocation112_spill] sm:$0xff]  ;;  %v9887_v44 = vld [vmem:[#allocation65_spill] sm:$0xff] }
 0x6e9   : > { %v2854_v46 = vpop.f32.mrf.mxu1 }
 0x6ea   : > { %v2855_v45 = vadd.f32 %v2854_v46, %v9878_v53  ;;  %v2845_v46 = vadd.f32 %v2844_v4, %v9882_v16 }
 0x6eb   : > { %v2856_v14 = vpop.f32.mrf.mxu1 }
 0x6ec   : > { %v2857_v41 = vadd.f32 %v2856_v14, %v9878_v53  ;;  %v9883_v14 = vld [vmem:[#allocation105_spill] sm:$0xff]  ;;  %v2975_v53 = vmax.f32 %v2855_v45, 0.0 }
 0x6ed   : > { %v2860_v23 = vpop.f32.mrf.mxu1 }
 0x6ee   : > { %v2861_v57 = vadd.f32 %v2860_v23, %v9879_v30  ;;  %v2976_v1 = vmax.f32 %v2857_v41, 0.0  ;;  %v2843_v23 = vadd.f32 %v2842_v7, %v9883_v14  ;;  %v2972_v41 = vmax.f32 %v2847_v34, 0.0 }
 0x6ef   : > { %v2862_v0 = vpop.f32.mrf.mxu1  ;;  %v2827_v7 = vadd.f32 %v2826_v3, %v9887_v44 }
 0x6f0   : > { %v2863_v8 = vadd.f32 %v2862_v0, %v9879_v30  ;;  %v2977_v33 = vmax.f32 %v2861_v57, 0.0  ;;  %v2974_v0 = vmax.f32 %v2853_v59, 0.0  ;;  %v9888_v59 = vld [vmem:[#allocation103_spill] sm:$0xff]  ;;  %v2970_v4 = vmax.f32 %v2843_v23, 0.0 }
 0x6f1   : > { %v2864_v29 = vpop.f32.mrf.mxu1 }
 0x6f2   : > { %v2865_v42 = vadd.f32 %v2864_v29, %v9880_v56  ;;  %v2978_v62 = vmax.f32 %v2863_v8, 0.0  ;;  %v3026_v8 = vpack.c.bf16 %v2976_v1, %v2974_v0  ;;  %v3024_v3 = vpack.c.bf16 %v2972_v41, %v2970_v4 }
 0x6f3   : > { %v2866_v48 = vpop.f32.mrf.mxu1 }
 0x6f4   : > { %v2867_v5 = vadd.f32 %v2866_v48, %v9880_v56  ;;  %v2979_v2 = vmax.f32 %v2865_v42, 0.0  ;;  %v9885_v56 = vld [vmem:[#allocation67_spill] sm:$0xff] }
 0x6f5   : > { %v2870_v39 = vpop.f32.mrf.mxu1  ;;  %v2837_v48 = vadd.f32 %v2836_v43, %v9885_v56  ;;  %v2835_v34 = vadd.f32 %v2834_v58, %v9885_v56  ;;  %v9890_v56 = vld [vmem:[#allocation114_spill] sm:$0xff] }
 0x6f6   : > { %v2980_v61 = vmax.f32 %v2867_v5, 0.0  ;;  %v2871_v30 = vadd.f32 %v2870_v39, %v9884_v19  ;;  %v3027_v42 = vpack.c.bf16 %v2979_v2, %v2977_v33  ;;  %v2841_v39 = vadd.f32 %v2840_v9, %v9883_v14 }
 0x6f7   : > { %v2872_v49 = vpop.f32.mrf.mxu1  ;;  %v2968_v1 = vmax.f32 %v2837_v48, 0.0  ;;  %v2971_v33 = vmax.f32 %v2845_v46, 0.0  ;;  %v9891_v46 = vld [vmem:[#allocation49_spill] sm:$0xff]  ;;  %v2967_v41 = vmax.f32 %v2835_v34, 0.0 }
 0x6f8   : > { %v3028_v29 = vpack.c.bf16 %v2980_v61, %v2978_v62  ;;  %v2873_v5 = vadd.f32 %v2872_v49, %v9884_v19  ;;  %v2833_v62 = vadd.f32 %v2832_v28, %v9888_v59  ;;  %v2973_v61 = vmax.f32 %v2851_v21, 0.0  ;;  %v9889_v19 = vld [vmem:[#allocation102_spill] sm:$0xff] }
 0x6f9   : > { %v2874_v50 = vpop.f32.mrf.mxu1  ;;  %v2981_v45 = vmax.f32 %v2871_v30, 0.0  ;;  %v2831_v21 = vadd.f32 %v8581_v55, %v9888_v59  ;;  %v2969_v14 = vmax.f32 %v2841_v39, 0.0  ;;  %v2823_v30 = vadd.f32 %v8577_v18, %v9889_v19  ;;  %v9892_v18 = vld [vmem:[#allocation79_spill] sm:$0xff] }
 0x6fa   : > { %v2875_v57 = vadd.f32 %v2874_v50, %v9886_v11  ;;  %3057 = vmatprep.subr.bf16.mxu0 %v3028_v29  ;;  %v3025_v49 = vpack.c.bf16 %v2975_v53, %v2973_v61  ;;  %v2982_v29 = vmax.f32 %v2873_v5, 0.0  ;;  %v2817_v53 = vadd.f32 %v8573_v37, %v9891_v46 }
 0x6fb   : > { %v2876_v43 = vpop.f32.mrf.mxu1  ;;  %3058 = vmatpush1.bf16.msra.mxu0 %v3027_v42  ;;  %v2966_v42 = vmax.f32 %v2833_v62, 0.0  ;;  %v2825_v50 = vadd.f32 %v8579_v40, %v9887_v44  ;;  %v3023_v55 = vpack.c.bf16 %v2971_v33, %v2969_v14  ;;  %v2964_v5 = vmax.f32 %v2827_v7, 0.0  ;;  %v9893_v62 = vld [vmem:[#allocation100_spill] sm:$0xff] }
 0x6fc   : > { %v2983_v2 = vmax.f32 %v2875_v57, 0.0  ;;  %v2877_v16 = vadd.f32 %v2876_v43, %v9886_v11  ;;  %3059 = vmatprep.subr.bf16.mxu0 %v3026_v8  ;;  %v2813_v39 = vadd.f32 %v8567_v32, %v9893_v62  ;;  %v2821_v61 = vadd.f32 %v8575_v36, %v9889_v19 }
 0x6fd   : > { %v2880_v0 = vpop.f32.mrf.mxu1  ;;  %v3022_v11 = vpack.c.bf16 %v2968_v1, %v2966_v42  ;;  %v2965_v43 = vmax.f32 %v2831_v21, 0.0  ;;  %v2962_v4 = vmax.f32 %v2823_v30, 0.0  ;;  %v2815_v7 = vadd.f32 %v8571_v24, %v9891_v46 }
 0x6fe   : > { %v8607_v28 = vpack.c.bf16 %v2983_v2, %v2981_v45  ;;  %v2984_v9 = vmax.f32 %v2877_v16, 0.0  ;;  %v2881_v48 = vadd.f32 %v2880_v0, %v9890_v56  ;;  %v2960_v2 = vmax.f32 %v2817_v53, 0.0 }
 0x6ff   : > { %v2882_v23 = vpop.f32.mrf.mxu1  ;;  %3060 = vmatpush1.bf16.msra.mxu0 %v3025_v49  ;;  %v2963_v16 = vmax.f32 %v2825_v50, 0.0  ;;  %v3021_v34 = vpack.c.bf16 %v2967_v41, %v2965_v43  ;;  %v3020_v32 = vpack.c.bf16 %v2964_v5, %v2962_v4  ;;  %v2811_v0 = vadd.f32 %v8563_v17, %v9893_v62 }
 0x700   : > { %v8613_v58 = vpack.c.bf16 %v2984_v9, %v2982_v29  ;;  %3061 = vmatprep.subr.bf16.mxu0 %v3024_v3  ;;  %v2883_v57 = vadd.f32 %v2882_v23, %v9890_v56  ;;  %v2985_v40 = vmax.f32 %v2881_v48, 0.0  ;;  %v2961_v3 = vmax.f32 %v2821_v61, 0.0 }
 0x701   : > { %v2884_v8 = vpop.f32.mrf.mxu1  ;;  %v2958_v9 = vmax.f32 %v2813_v39, 0.0  ;;  %v2959_v24 = vmax.f32 %v2815_v7, 0.0  ;;  %v2957_v30 = vmax.f32 %v2811_v0, 0.0 }
 0x702   : > { %v2885_v59 = vadd.f32 %v2884_v8, %v9892_v18  ;;  %v2986_v33 = vmax.f32 %v2883_v57, 0.0  ;;  %v3019_v14 = vpack.c.bf16 %v2963_v16, %v2961_v3 }
 0x703   : > { %v2886_v37 = vpop.f32.mrf.mxu1  ;;  %3062 = vmatpush1.bf16.msra.mxu0 %v3023_v55  ;;  %v3018_v19 = vpack.c.bf16 %v2960_v2, %v2958_v9  ;;  %v3017_v56 = vpack.c.bf16 %v2959_v24, %v2957_v30  ;;  %v9897_v2 = vld [vmem:[#allocation124_spill] sm:$0xff]  ;;  %v9899_v30 = vld [vmem:[#allocation122_spill] sm:$0xff] }
 0x704   : > { %v2987_v44 = vmax.f32 %v2885_v59, 0.0  ;;  %v2887_v45 = vadd.f32 %v2886_v37, %v9892_v18  ;;  %3063 = vmatprep.subr.bf16.mxu0 %v3022_v11 }
 0x705   : > { %v8629_v1 = vpop.f32.mrf.mxu1 }
 0x706   : > { %v8631_v36 = vpack.c.bf16 %v2987_v44, %v2985_v40  ;;  %v2988_v49 = vmax.f32 %v2887_v45, 0.0  ;;  %v9896_v44 = vld [vmem:[#allocation87_spill] sm:$0xff] }
 0x707   : > { %v8635_v29 = vpop.f32.mrf.mxu1  ;;  %3064 = vmatpush1.bf16.msra.mxu0 %v3021_v34 }
 0x708   : > { %v8637_v21 = vpack.c.bf16 %v2988_v49, %v2986_v33  ;;  %3065 = vmatprep.subr.bf16.mxu0 %v3020_v32  ;;  %v9898_v49 = vld [vmem:[#allocation85_spill] sm:$0xff] }
 0x709   : > { %v8639_v23 = vpop.f32.mrf.mxu1 }
 0x70b   : > { %v8641_v42 = vpop.f32.mrf.mxu1  ;;  %3066 = vmatpush1.bf16.msra.mxu0 %v3019_v14 }
 0x70c   : > { %3067 = vmatprep.subr.bf16.mxu0 %v3018_v19 }
 0x70d   : > { %v8643_v17 = vpop.f32.mrf.mxu1 }
 0x70f   : > { %v8645_v48 = vpop.f32.mrf.mxu1  ;;  %3068 = vmatpush1.bf16.msra.mxu0 %v3017_v56 }
 0x710   : > { %3069 = vmatprep.subr.bf16.mxu0 %v8569_v12 }
 0x711   : > { %v8648_v46 = vpop.f32.mrf.mxu1 }
 0x713   : > { %v2906_v53 = vpop.f32.mrf.mxu1  ;;  %3070 = vmatpush1.bf16.msra.mxu0 %v8565_v54  ;;  %v9894_v54 = vld [vmem:[#allocation86_spill] sm:$0xff] }
 0x714   : > { %3071 = vmatprep.subr.bf16.mxu0 %v8557_v25  ;;  %v9895_v25 = vld [vmem:[#allocation126_spill] sm:$0xff] }
 0x715   : > { %v2910_v50 = vpop.f32.mrf.mxu1 }
 0x717   : > { %v2912_v41 = vpop.f32.mrf.mxu1  ;;  %3072 = vmatpush1.bf16.msra.mxu0 %v8555_v10 }
 0x719   : > { %v2914_v55 = vpop.f32.mrf.mxu1 }
 0x71b   : > { %v2916_v8 = vpop.f32.mrf.mxu1 }
 0x71d   : > { %v2920_v5 = vpop.f32.mrf.mxu1 }
 0x71f   : > { %v2922_v11 = vpop.f32.mrf.mxu1 }
 0x720   : > { %v2923_v56 = vadd.f32 %v2922_v11, %v9899_v30 }
 0x721   : > { %v2924_v57 = vpop.f32.mrf.mxu1 }
 0x723   : > { %v2926_v18 = vpop.f32.mrf.mxu1 }
 0x724   : > { %v2927_v0 = vadd.f32 %v2926_v18, %v9898_v49  ;;  %v2921_v18 = vadd.f32 %v2920_v5, %v9899_v30 }
 0x725   : > { %v2930_v59 = vpop.f32.mrf.mxu1 }
 0x726   : > { %v2931_v14 = vadd.f32 %v2930_v59, %v9897_v2 }
 0x727   : > { %v2932_v62 = vpop.f32.mrf.mxu1 }
 0x728   : > { %v2933_v16 = vadd.f32 %v2932_v62, %v9897_v2 }
 0x729   : > { %v2934_v12 = vpop.f32.mrf.mxu1 }
 0x72a   : > { %v2935_v32 = vadd.f32 %v2934_v12, %v9894_v54  ;;  %v3004_v12 = vmax.f32 %v2927_v0, 0.0 }
 0x72b   : > { %v2936_v39 = vpop.f32.mrf.mxu1 }
 0x72c   : > { %v2937_v4 = vadd.f32 %v2936_v39, %v9894_v54  ;;  %v3006_v39 = vmax.f32 %v2933_v16, 0.0  ;;  %v3007_v62 = vmax.f32 %v2935_v32, 0.0  ;;  %v3001_v32 = vmax.f32 %v2921_v18, 0.0 }
 0x72d   : > { %v2940_v61 = vpop.f32.mrf.mxu1 }
 0x72e   : > { %v2941_v10 = vadd.f32 %v2940_v61, %v9895_v25  ;;  %v3008_v3 = vmax.f32 %v2937_v4, 0.0  ;;  %v3005_v4 = vmax.f32 %v2931_v14, 0.0 }
 0x72f   : > { %v2942_v43 = vpop.f32.mrf.mxu1 }
 0x730   : > { %v2943_v40 = vadd.f32 %v2942_v43, %v9895_v25  ;;  %v3009_v19 = vmax.f32 %v2941_v10, 0.0  ;;  %v2925_v43 = vadd.f32 %v2924_v57, %v9898_v49  ;;  %v9900_v25 = vld [vmem:[#allocation84_spill] sm:$0xff]  ;;  %v3042_v54 = vpack.c.bf16 %v3008_v3, %v3006_v39  ;;  %v9902_v57 = vld [vmem:[#allocation83_spill] sm:$0xff]  ;;  %v9904_v3 = vld [vmem:[#allocation81_spill] sm:$0xff] }
 0x731   : > { %v2944_v37 = vpop.f32.mrf.mxu1  ;;  %v2915_v11 = vadd.f32 %v2914_v55, %v9900_v25  ;;  %v2907_v2 = vadd.f32 %v2906_v53, %v9902_v57 }
 0x732   : > { %v2945_v45 = vadd.f32 %v2944_v37, %v9896_v44  ;;  %v3010_v9 = vmax.f32 %v2943_v40, 0.0  ;;  %v9901_v40 = vld [vmem:[#allocation120_spill] sm:$0xff]  ;;  %v3003_v10 = vmax.f32 %v2925_v43, 0.0 }
 0x733   : > { %v2946_v7 = vpop.f32.mrf.mxu1  ;;  %v2913_v59 = vadd.f32 %v2912_v41, %v9901_v40  ;;  %v2905_v41 = vadd.f32 %v8648_v46, %v9902_v57  ;;  %v2999_v0 = vmax.f32 %v2915_v11, 0.0  ;;  %v2996_v53 = vmax.f32 %v2907_v2, 0.0 }
 0x734   : > { %v2947_v34 = vadd.f32 %v2946_v7, %v9896_v44  ;;  %v3011_v33 = vmax.f32 %v2945_v45, 0.0  ;;  %v2917_v44 = vadd.f32 %v2916_v8, %v9900_v25  ;;  %v3002_v45 = vmax.f32 %v2923_v56, 0.0 }
 0x735   : > { %v3041_v7 = vpack.c.bf16 %v3007_v62, %v3005_v4  ;;  %v2911_v8 = vadd.f32 %v2910_v50, %v9901_v40  ;;  %v2998_v49 = vmax.f32 %v2913_v59, 0.0  ;;  %v3039_v55 = vpack.c.bf16 %v3003_v10, %v3001_v32  ;;  %v3105_v4 = vld [vmem:[#allocation2 + $0x18] sm:$0x3]  ;;  %v9907_v10 = vld [vmem:[#allocation89_spill] sm:$0xff]  ;;  %v9911_v32 = vld [vmem:[#allocation90_spill] sm:$0xff] }
 0x736   : > { %v3012_v24 = vmax.f32 %v2947_v34, 0.0  ;;  %v3043_v37 = vpack.c.bf16 %v3011_v33, %v3009_v19  ;;  %v3000_v16 = vmax.f32 %v2917_v44, 0.0  ;;  %v3040_v34 = vpack.c.bf16 %v3004_v12, %v3002_v45  ;;  %v9903_v33 = vld [vmem:[#allocation118_spill] sm:$0xff]  ;;  %v9905_v19 = vld [vmem:[#allocation116_spill] sm:$0xff] }
 0x737   : > { %v2903_v5 = vadd.f32 %v8645_v48, %v9903_v33  ;;  %v2901_v50 = vadd.f32 %v8643_v17, %v9903_v33  ;;  %v2997_v14 = vmax.f32 %v2911_v8, 0.0  ;;  %v2893_v48 = vadd.f32 %v8635_v29, %v9905_v19  ;;  %v9906_v40 = vld [vmem:[#allocation88_spill] sm:$0xff] }
 0x738   : > { %v3044_v61 = vpack.c.bf16 %v3012_v24, %v3010_v9  ;;  %v2897_v9 = vadd.f32 %v8641_v42, %v9904_v3  ;;  %v3038_v24 = vpack.c.bf16 %v3000_v16, %v2998_v49  ;;  %v2895_v46 = vadd.f32 %v8639_v23, %v9904_v3  ;;  %v5723_v23 = vld [vmem:[#allocation2 + $0x10] sm:$0xff] }
 0x739   : > { %v2994_v30 = vmax.f32 %v2903_v5, 0.0  ;;  %v2995_v56 = vmax.f32 %v2905_v41, 0.0  ;;  %v3037_v39 = vpack.c.bf16 %v2999_v0, %v2997_v14  ;;  %v2891_v42 = vadd.f32 %v8629_v1, %v9905_v19  ;;  %v9912_v41 = vld [vmem:[#allocation93_spill] sm:$0xff]  ;;  %v9915_v19 = vld [vmem:[#allocation94_spill] sm:$0xff] }
 0x73a   : > { %3073 = vmatprep.subr.bf16.mxu0 %v3044_v61  ;;  %v2992_v61 = vmax.f32 %v2897_v9, 0.0  ;;  %v2993_v62 = vmax.f32 %v2901_v50, 0.0  ;;  %v2990_v17 = vmax.f32 %v2893_v48, 0.0  ;;  %v4978_v1 = vcombine.low %v8583_v63, %v8583_v63 }
 0x73b   : > { %3074 = vmatpush2.bf16.msra.mxu0 %v3043_v37  ;;  %v3036_v43 = vpack.c.bf16 %v2996_v53, %v2994_v30  ;;  %v2991_v37 = vmax.f32 %v2895_v46, 0.0  ;;  %v2989_v29 = vmax.f32 %v2891_v42, 0.0  ;;  %v3108_v18 = vadd.f32 0.5, %v5723_v23  ;;  %v9916_v30 = vld [vmem:[#allocation130_spill] sm:$0xff] }
 0x73c   : > { %3075 = vmatprep.subr.bf16.mxu0 %v3042_v54  ;;  %v3035_v25 = vpack.c.bf16 %v2995_v56, %v2993_v62  ;;  %v3034_v44 = vpack.c.bf16 %v2992_v61, %v2990_v17  ;;  %v4980_v54 = vadd.f32 -0.5, %v5723_v23  ;;  %v4981_v45 = vadd.f32 -0.5, %v3105_v4  ;;  %v9917_v61 = vld [vmem:[#allocation98_spill] sm:$0xff] }
 0x73d   : > { %v3033_v12 = vpack.c.bf16 %v2991_v37, %v2989_v29  ;;  %v3119_v11 = vmul.f32 %v9906_v40, %v3108_v18  ;;  %v9918_v37 = vld [vmem:[#allocation62_spill] sm:$0xff] }
 0x73e   : > { %v3118_v59 = vmul.f32 %v4980_v54, %v9906_v40  ;;  %v3208_v46 = vmul.f32 %v4981_v45, %v9916_v30 }
 0x73f   : > { %3076 = vmatpush2.bf16.msra.mxu0 %v3041_v7  ;;  %v9908_v7 = vld [vmem:[#allocation32_spill] sm:$0xff]  ;;  %v3131_v57 = vadd.f32 %v9907_v10, %v3119_v11 }
 0x740   : > { %3077 = vmatprep.subr.bf16.mxu0 %v3040_v34  ;;  %v9910_v34 = vld [vmem:[#allocation96_spill] sm:$0xff] }
 0x741   : > { %v3206_v8 = vmul.f32 %v4980_v54, %v9910_v34  ;;  %v3207_v5 = vmul.f32 %v9910_v34, %v3108_v18  ;;  %v9922_v34 = vld [vmem:[#allocation132_spill] sm:$0xff] }
 0x743   : > { %3078 = vmatpush2.bf16.msra.mxu0 %v3039_v55  ;;  %v9913_v55 = vld [vmem:[#allocation36_spill] sm:$0xff] }
 0x744   : > { %3079 = vmatprep.subr.bf16.mxu0 %v3038_v24  ;;  %v3164_v3 = vmul.f32 %v4981_v45, %v9913_v55  ;;  %v9914_v24 = vld [vmem:[#allocation97_spill] sm:$0xff] }
 0x745   : > { %v3218_v50 = vadd.f32 %v9914_v24, %v3206_v8  ;;  %v3219_v14 = vadd.f32 %v9914_v24, %v3207_v5 }
 0x746   : > { %v3176_v48 = vadd.f32 %v9915_v19, %v3164_v3 }
 0x747   : > { %3080 = vmatpush2.bf16.msra.mxu0 %v3037_v39 }
 0x748   : > { %3081 = vmatprep.subr.bf16.mxu0 %v3036_v43  ;;  %v3220_v43 = vadd.f32 %v9917_v61, %v3208_v46 }
 0x74b   : > { %3082 = vmatpush2.bf16.msra.mxu0 %v3035_v25 }
 0x74c   : > { %3083 = vmatprep.subr.bf16.mxu0 %v3034_v44 }
 0x74f   : > { %3084 = vmatpush2.bf16.msra.mxu0 %v3033_v12 }
 0x750   : > { %3085 = vmatprep.subr.bf16.mxu0 %v8637_v21  ;;  %v3109_v21 = vadd.f32 0.5, %v3105_v4 }
 0x752   : > { %v3121_v63 = vmul.f32 %v9908_v7, %v3109_v21  ;;  %v3165_v53 = vmul.f32 %v9913_v55, %v3109_v21  ;;  %v3209_v39 = vmul.f32 %v9916_v30, %v3109_v21  ;;  %v9920_v21 = vld [vmem:[#allocation26_spill] sm:$0xff]  ;;  %v9924_v30 = vld [vmem:[#allocation52_spill] sm:$0xff] }
 0x753   : > { %3086 = vmatpush2.bf16.msra.mxu0 %v8631_v36  ;;  %v3130_v36 = vadd.f32 %v9907_v10, %v3118_v59 }
 0x754   : > { %3087 = vmatprep.subr.bf16.mxu0 %v8613_v58  ;;  %v3120_v58 = vmul.f32 %v4981_v45, %v9908_v7  ;;  %v3133_v49 = vadd.f32 %v9911_v32, %v3121_v63  ;;  %v3177_v56 = vadd.f32 %v9915_v19, %v3165_v53  ;;  %v3221_v42 = vadd.f32 %v9917_v61, %v3209_v39 }
 0x755   : > { %5562 = vtanh.f32 %v3130_v36 }
 0x756   : > { %v3132_v33 = vadd.f32 %v9911_v32, %v3120_v58  ;;  %5564 = vtanh.f32 %v3131_v57 }
 0x757   : > { %3088 = vmatpush2.bf16.msra.mxu0 %v8607_v28  ;;  %v9909_v28 = vld [vmem:[#allocation92_spill] sm:$0xff] }
 0x758   : > { %v3162_v2 = vmul.f32 %v4980_v54, %v9909_v28  ;;  %v3163_v16 = vmul.f32 %v9909_v28, %v3108_v18  ;;  %5566 = vtanh.f32 %v3132_v33  ;;  %v9919_v18 = vld [vmem:[#allocation91_spill] sm:$0xff]  ;;  %v9921_v28 = vld [vmem:[#allocation53_spill] sm:$0xff] }
 0x759   : > { %5568 = vtanh.f32 %v3133_v49 }
 0x75a   : > { %3090 = vmatmul.mubr.bf16.vlgmr.msra.gmra.mxu0 %v4978_v1  ;;  %v3174_v0 = vadd.f32 %v9912_v41, %v3162_v2  ;;  %v3175_v9 = vadd.f32 %v9912_v41, %v3163_v16  ;;  %v9923_v41 = vld [vmem:[#allocation95_spill] sm:$0xff] }
 0x75c   : > { %5570 = vtanh.f32 %v3174_v0 }
 0x75d   : > { %5572 = vtanh.f32 %v3175_v9 }
 0x75e   : > { %5574 = vtanh.f32 %v3218_v50 }
 0x75f   : > { %5576 = vtanh.f32 %v3219_v14 }
 0x760   : > { %5578 = vtanh.f32 %v3176_v48 }
 0x761   : > { %5580 = vtanh.f32 %v3177_v56 }
 0x762   : > { %v5563_v62 = vpop.eup %5562  ;;  %5582 = vtanh.f32 %v3220_v43 }
 0x763   : > { %v5565_v17 = vpop.eup %5564  ;;  %5584 = vtanh.f32 %v3221_v42  ;;  %v3146_v25 = vmul.f32 %v5563_v62, %v9918_v37  ;;  %v9925_v62 = vld [vmem:[#allocation135_spill] sm:$0xff] }
 0x764   : > { %v3147_v29 = vmul.f32 %v5565_v17, %v9918_v37 }
 0x765   : > { %v5567_v44 = vpop.eup %5566  ;;  %v3150_v54 = vadd.f32 %v3146_v25, %v3130_v36 }
 0x766   : > { %v5569_v12 = vpop.eup %5568  ;;  %v3148_v4 = vmul.f32 %v5567_v44, %v9919_v18  ;;  %v3151_v59 = vadd.f32 %v3147_v29, %v3131_v57 }
 0x767   : > { %v3149_v45 = vmul.f32 %v5569_v12, %v9919_v18  ;;  %v3250_v2 = vmul.f32 %v9921_v28, %v3150_v54  ;;  %v3326_v29 = vmul.f32 %v7694_v60, %v3150_v54 }
 0x768   : > { %v3152_v16 = vadd.f32 %v3148_v4, %v3132_v33  ;;  %v3251_v36 = vmul.f32 %v9921_v28, %v3151_v59  ;;  %v3327_v4 = vmul.f32 %v7694_v60, %v3151_v59 }
 0x769   : > { %v5571_v1 = vpop.eup %5570  ;;  %v3153_v32 = vadd.f32 %v3149_v45, %v3133_v49  ;;  %v3262_v46 = vadd.f32 %v9924_v30, %v3250_v2 }
 0x76a   : > { %v5573_v23 = vpop.eup %5572  ;;  %v3190_v10 = vmul.f32 %v5571_v1, %v9920_v21  ;;  %v3252_v33 = vmul.f32 %v7646_v6, %v3152_v16  ;;  %v3263_v61 = vadd.f32 %v9924_v30, %v3251_v36  ;;  %v3339_v36 = vadd.f32 %v7507_v22, %v3327_v4 }
 0x76b   : > { %v5575_v40 = vpop.eup %5574  ;;  %v3191_v58 = vmul.f32 %v5573_v23, %v9920_v21  ;;  %v3253_v49 = vmul.f32 %v7646_v6, %v3153_v32  ;;  %v9927_v6 = vld [vmem:[#allocation55_spill] sm:$0xff] }
 0x76c   : > { %v5577_v11 = vpop.eup %5576  ;;  %v3234_v8 = vmul.f32 %v5575_v40, %v9922_v34  ;;  %v3194_v5 = vadd.f32 %v3190_v10, %v3174_v0  ;;  %v3264_v23 = vadd.f32 %v7469_v20, %v3252_v33  ;;  %v3338_v10 = vadd.f32 %v7507_v22, %v3326_v29 }
 0x76d   : > { %v5579_v7 = vpop.eup %5578  ;;  %v3235_v57 = vmul.f32 %v5577_v11, %v9922_v34  ;;  %v8725_v53 = vadd.f32 %v3191_v58, %v3175_v9  ;;  %v9926_v9 = vld [vmem:[#allocation21_spill] sm:$0xff]  ;;  %v9928_v11 = vld [vmem:[#allocation22_spill] sm:$0xff]  ;;  %v3403_v22 = vmul.f32 %v7541_v52, %v3151_v59 }
 0x76e   : > { %v5581_v63 = vpop.eup %5580  ;;  %v3192_v55 = vmul.f32 %v5579_v7, %v9923_v41  ;;  %v8730_v39 = vadd.f32 %v3234_v8, %v3218_v50  ;;  %v3274_v17 = vmul.f32 %v9925_v62, %v3194_v5  ;;  %v3328_v21 = vmul.f32 %v9928_v11, %v3152_v16 }
 0x76f   : > { %v5583_v3 = vpop.eup %5582  ;;  %v3193_v24 = vmul.f32 %v5581_v63, %v9923_v41  ;;  %v8734_v0 = vadd.f32 %v3235_v57, %v3219_v14  ;;  %v3275_v44 = vmul.f32 %v9925_v62, %v8725_v53  ;;  %v3329_v58 = vmul.f32 %v9928_v11, %v3153_v32  ;;  %v9930_v57 = vld [vmem:[#allocation138_spill] sm:$0xff]  ;;  %v9933_v62 = vld [vmem:[#allocation143_spill] sm:$0xff] }
 0x770   : > { %v5585_v19 = vpop.eup %5584  ;;  %v3196_v37 = vadd.f32 %v3192_v55, %v3176_v48  ;;  %v3236_v25 = vmul.f32 %v5583_v3, %v9926_v9  ;;  %v3278_v1 = vadd.f32 %v3274_v17, %v3262_v46  ;;  %v3290_v14 = vmul.f32 %v9927_v6, %v8730_v39  ;;  %v9931_v55 = vld [vmem:[#allocation104_spill] sm:$0xff] }
 0x771   : > { %v3197_v12 = vadd.f32 %v3193_v24, %v3177_v56  ;;  %v3237_v50 = vmul.f32 %v5585_v19, %v9926_v9  ;;  %v3279_v18 = vadd.f32 %v3275_v44, %v3263_v61  ;;  %v3265_v48 = vadd.f32 %v7469_v20, %v3253_v49  ;;  %v9929_v20 = vld [vmem:[#allocation23_spill] sm:$0xff] }
 0x772   : > { %v3291_v40 = vmul.f32 %v9927_v6, %v8734_v0  ;;  %v3240_v45 = vadd.f32 %v3236_v25, %v3220_v43  ;;  %v3276_v56 = vmul.f32 %v7474_v31, %v3196_v37  ;;  %v8754_v28 = vadd.f32 %v3290_v14, %v3278_v1  ;;  %v9934_v25 = vld [vmem:[#allocation106_spill] sm:$0xff]  ;;  %v9935_v1 = vld [vmem:[#allocation107_spill] sm:$0xff]  ;;  %v9937_v14 = vld [vmem:[#allocation145_spill] sm:$0xff] }
 0x773   : > { %v3241_v7 = vadd.f32 %v3237_v50, %v3221_v42  ;;  %v3277_v63 = vmul.f32 %v7474_v31, %v3197_v12  ;;  %v3350_v34 = vmul.f32 %v9929_v20, %v3194_v5  ;;  %v3402_v43 = vmul.f32 %v7541_v52, %v3150_v54  ;;  %v9932_v54 = vld [vmem:[#allocation24_spill] sm:$0xff] }
 0x774   : > { %v3280_v60 = vadd.f32 %v3276_v56, %v3264_v23  ;;  %v8756_v2 = vadd.f32 %v3291_v40, %v3279_v18  ;;  %v3340_v41 = vadd.f32 %v9930_v57, %v3328_v21  ;;  %v3404_v42 = vmul.f32 %v9931_v55, %v3152_v16  ;;  %v9936_v23 = vld [vmem:[#allocation99_spill] sm:$0xff] }
 0x775   : > { %v3281_v8 = vadd.f32 %v3277_v63, %v3265_v48  ;;  %v3292_v3 = vmul.f32 %v7663_v27, %v3240_v45  ;;  %v3354_v24 = vadd.f32 %v3350_v34, %v3338_v10  ;;  %v3341_v31 = vadd.f32 %v9930_v57, %v3329_v58  ;;  %v9939_v34 = vld [vmem:[#allocation111_spill] sm:$0xff] }
 0x776   : > { %v3405_v19 = vmul.f32 %v9931_v55, %v3153_v32  ;;  %v3293_v30 = vmul.f32 %v7663_v27, %v3241_v7  ;;  %v3351_v46 = vmul.f32 %v9929_v20, %v8725_v53  ;;  %v3352_v33 = vmul.f32 %v9932_v54, %v3196_v37 }
 0x777   : > { %v3296_v61 = vadd.f32 %v3292_v3, %v3280_v60  ;;  %v3366_v16 = vmul.f32 %v7717_v13, %v8730_v39  ;;  %v3353_v49 = vmul.f32 %v9932_v54, %v3197_v12  ;;  %v3414_v17 = vadd.f32 %v9933_v62, %v3402_v43  ;;  %v9940_v3 = vld [vmem:[#allocation30_spill] sm:$0xff] }
 0x778   : > { %v3297_v9 = vadd.f32 %v3293_v30, %v3281_v8  ;;  %5586 = vtanh.f32 %v8754_v28  ;;  %v3355_v32 = vadd.f32 %v3351_v46, %v3339_v36  ;;  %v3356_v27 = vadd.f32 %v3352_v33, %v3340_v41 }
 0x779   : > { %v3416_v44 = vadd.f32 %v9934_v25, %v3404_v42  ;;  %v8777_v29 = vadd.f32 %v3366_v16, %v3354_v24  ;;  %v3357_v50 = vadd.f32 %v3353_v49, %v3341_v31  ;;  %v3426_v52 = vmul.f32 %v9935_v1, %v3194_v5  ;;  %v9941_v24 = vld [vmem:[#allocation51_spill] sm:$0xff] }
 0x77a   : > { %v3417_v59 = vadd.f32 %v9934_v25, %v3405_v19  ;;  %v3368_v18 = vmul.f32 %v9936_v23, %v3240_v45  ;;  %v3415_v6 = vadd.f32 %v9933_v62, %v3403_v22  ;;  %v3428_v4 = vmul.f32 %v9937_v14, %v3196_v37  ;;  %v9938_v37 = vld [vmem:[#allocation109_spill] sm:$0xff] }
 0x77b   : > { %5588 = vtanh.f32 %v3296_v61  ;;  %v3369_v48 = vmul.f32 %v9936_v23, %v3241_v7  ;;  %v3430_v40 = vadd.f32 %v3426_v52, %v3414_v17  ;;  %v3429_v11 = vmul.f32 %v9937_v14, %v3197_v12 }
 0x77c   : > { %5590 = vtanh.f32 %v3297_v9  ;;  %v3367_v5 = vmul.f32 %v7717_v13, %v8734_v0  ;;  %v3372_v21 = vadd.f32 %v3368_v18, %v3356_v27  ;;  %v3432_v56 = vadd.f32 %v3428_v4, %v3416_v44 }
 0x77d   : > { %5592 = vtanh.f32 %v8756_v2  ;;  %v3373_v10 = vadd.f32 %v3369_v48, %v3357_v50  ;;  %v3427_v58 = vmul.f32 %v9935_v1, %v8725_v53  ;;  %v3433_v63 = vadd.f32 %v3429_v11, %v3417_v59  ;;  %v9943_v59 = vld [vmem:[#allocation149_spill] sm:$0xff]  ;;  %v9945_v48 = vld [vmem:[#allocation147_spill] sm:$0xff] }
 0x77e   : > { %v3442_v60 = vmul.f32 %v9938_v37, %v8730_v39  ;;  %v3371_v20 = vadd.f32 %v3367_v5, %v3355_v32  ;;  %v3444_v43 = vmul.f32 %v9939_v34, %v3240_v45  ;;  %5594 = vtanh.f32 %v8777_v29  ;;  %v9942_v32 = vld [vmem:[#allocation141_spill] sm:$0xff] }
 0x77f   : > { %v3431_v12 = vadd.f32 %v3427_v58, %v3415_v6  ;;  %v3445_v8 = vmul.f32 %v9939_v34, %v3241_v7  ;;  %5596 = vtanh.f32 %v3372_v21  ;;  %v3443_v53 = vmul.f32 %v9938_v37, %v8734_v0  ;;  %v9944_v6 = vld [vmem:[#allocation113_spill] sm:$0xff] }
 0x780   : > { %v3446_v36 = vadd.f32 %v3442_v60, %v3430_v40  ;;  %v3448_v13 = vadd.f32 %v3444_v43, %v3432_v56  ;;  %5598 = vtanh.f32 %v3373_v10  ;;  %v9946_v56 = vld [vmem:[#allocation119_spill] sm:$0xff]  ;;  %v9947_v37 = vld [vmem:[#allocation117_spill] sm:$0xff] }
 0x781   : > { %v3449_v57 = vadd.f32 %v3445_v8, %v3433_v63  ;;  %5600 = vtanh.f32 %v3371_v20  ;;  %v3447_v41 = vadd.f32 %v3443_v53, %v3431_v12  ;;  %v9948_v34 = vld [vmem:[#allocation121_spill] sm:$0xff]  ;;  %v9949_v12 = vld [vmem:[#allocation31_spill] sm:$0xff] }
 0x782   : > { %5602 = vtanh.f32 %v3446_v36 }
 0x783   : > { %5604 = vtanh.f32 %v3448_v13 }
 0x784   : > { %5606 = vtanh.f32 %v3449_v57 }
 0x785   : > { %v5587_v39 = vpop.eup %5586  ;;  %5608 = vtanh.f32 %v3447_v41 }
 0x786   : > { %v3310_v31 = vmul.f32 %v5587_v39, %v9941_v24 }
 0x788   : > { %v5589_v45 = vpop.eup %5588  ;;  %v3314_v16 = vadd.f32 %v3310_v31, %v8754_v28 }
 0x789   : > { %v5591_v55 = vpop.eup %5590  ;;  %v3312_v7 = vmul.f32 %v5589_v45, %v9940_v3  ;;  %v9950_v45 = vld [vmem:[#allocation151_spill] sm:$0xff] }
 0x78a   : > { %v5593_v42 = vpop.eup %5592  ;;  %v3313_v19 = vmul.f32 %v5591_v55, %v9940_v3  ;;  %v3478_v28 = vmul.f32 %v9800_v47, %v3314_v16 }
 0x78b   : > { %v5595_v30 = vpop.eup %5594  ;;  %v3311_v46 = vmul.f32 %v5593_v42, %v9941_v24  ;;  %v3316_v33 = vadd.f32 %v3312_v7, %v3296_v61  ;;  %v9951_v7 = vld [vmem:[#allocation155_spill] sm:$0xff]  ;;  %v9952_v24 = vld [vmem:[#allocation136_spill] sm:$0xff] }
 0x78c   : > { %v5597_v0 = vpop.eup %5596  ;;  %v3317_v49 = vadd.f32 %v3313_v19, %v3297_v9  ;;  %v3386_v1 = vmul.f32 %v5595_v30, %v9797_v38  ;;  %v3630_v31 = vmul.f32 %v9952_v24, %v3314_v16 }
 0x78d   : > { %v5599_v54 = vpop.eup %5598  ;;  %v3315_v17 = vadd.f32 %v3311_v46, %v8756_v2  ;;  %v3388_v27 = vmul.f32 %v5597_v0, %v9942_v32  ;;  %v3480_v23 = vmul.f32 %v9943_v59, %v3316_v33  ;;  %v3556_v8 = vmul.f32 %v9949_v12, %v3316_v33  ;;  %v9953_v0 = vld [vmem:[#allocation153_spill] sm:$0xff] }
 0x78e   : > { %v5601_v22 = vpop.eup %5600  ;;  %v3389_v44 = vmul.f32 %v5599_v54, %v9942_v32  ;;  %v3481_v61 = vmul.f32 %v9943_v59, %v3317_v49  ;;  %v8816_v5 = vadd.f32 %v3386_v1, %v8777_v29  ;;  %v3557_v39 = vmul.f32 %v9949_v12, %v3317_v49 }
 0x78f   : > { %v5603_v62 = vpop.eup %5602  ;;  %v3387_v52 = vmul.f32 %v5601_v22, %v9797_v38  ;;  %v3392_v18 = vadd.f32 %v3388_v27, %v3372_v21  ;;  %v3479_v2 = vmul.f32 %v9800_v47, %v3315_v17  ;;  %v3492_v58 = vadd.f32 %v9946_v56, %v3480_v23  ;;  %v9954_v22 = vld [vmem:[#allocation157_spill] sm:$0xff] }
 0x790   : > { %v5605_v25 = vpop.eup %5604  ;;  %v3393_v4 = vadd.f32 %v3389_v44, %v3373_v10  ;;  %v3462_v40 = vmul.f32 %v5603_v62, %v9945_v48  ;;  %v3493_v21 = vadd.f32 %v9946_v56, %v3481_v61  ;;  %v3490_v47 = vadd.f32 %v9947_v37, %v3478_v28 }
 0x791   : > { %v5607_v50 = vpop.eup %5606  ;;  %v3464_v14 = vmul.f32 %v5605_v25, %v9944_v6  ;;  %v8818_v38 = vadd.f32 %v3387_v52, %v3371_v20  ;;  %v3491_v60 = vadd.f32 %v9947_v37, %v3479_v2  ;;  %v3504_v43 = vmul.f32 %v9948_v34, %v3392_v18 }
 0x792   : > { %v5609_v9 = vpop.eup %5608  ;;  %v3465_v11 = vmul.f32 %v5607_v50, %v9944_v6  ;;  %v8827_v53 = vadd.f32 %v3462_v40, %v3446_v36  ;;  %v3505_v20 = vmul.f32 %v9948_v34, %v3393_v4  ;;  %v3502_v55 = vmul.f32 %v9950_v45, %v8816_v5  ;;  %v9955_v50 = vld [vmem:[#allocation131_spill] sm:$0xff]  ;;  %v9956_v6 = vld [vmem:[#allocation129_spill] sm:$0xff] }
 0x793   : > { %v3463_v63 = vmul.f32 %v5609_v9, %v9945_v48  ;;  %v3468_v10 = vadd.f32 %v3464_v14, %v3448_v13  ;;  %v3503_v42 = vmul.f32 %v9950_v45, %v8818_v38  ;;  %v3508_v3 = vadd.f32 %v3504_v43, %v3492_v58  ;;  %v9961_v34 = vld [vmem:[#allocation159_spill] sm:$0xff] }
 0x794   : > { %v3469_v29 = vadd.f32 %v3465_v11, %v3449_v57  ;;  %v3554_v13 = vmul.f32 %v9951_v7, %v3314_v16  ;;  %v3509_v30 = vadd.f32 %v3505_v20, %v3493_v21  ;;  %v3555_v36 = vmul.f32 %v9951_v7, %v3315_v17  ;;  %v9958_v11 = vld [vmem:[#allocation133_spill] sm:$0xff] }
 0x795   : > { %v3467_v19 = vadd.f32 %v3463_v63, %v3447_v41  ;;  %v3506_v57 = vadd.f32 %v3502_v55, %v3490_v47  ;;  %v3507_v46 = vadd.f32 %v3503_v42, %v3491_v60  ;;  %v3520_v54 = vmul.f32 %v9953_v0, %v3468_v10  ;;  %v9959_v21 = vld [vmem:[#allocation137_spill] sm:$0xff]  ;;  %v9960_v47 = vld [vmem:[#allocation139_spill] sm:$0xff] }
 0x796   : > { %v3568_v62 = vadd.f32 %v9954_v22, %v3556_v8  ;;  %v3518_v32 = vmul.f32 %v9805_v15, %v8827_v53  ;;  %v3521_v27 = vmul.f32 %v9953_v0, %v3469_v29  ;;  %v3569_v25 = vadd.f32 %v9954_v22, %v3557_v39  ;;  %v9964_v0 = vld [vmem:[#allocation142_spill] sm:$0xff] }
 0x797   : > { %v3632_v44 = vmul.f32 %v7660_v35, %v3316_v33  ;;  %v8845_v16 = vadd.f32 %v3520_v54, %v3508_v3  ;;  %v3566_v41 = vadd.f32 %v9804_v26, %v3554_v13  ;;  %v3580_v1 = vmul.f32 %v9955_v50, %v3392_v18 }
 0x798   : > { %v3633_v52 = vmul.f32 %v7660_v35, %v3317_v49  ;;  %v3519_v59 = vmul.f32 %v9805_v15, %v3467_v19  ;;  %v8851_v23 = vadd.f32 %v3521_v27, %v3509_v30  ;;  %v3567_v61 = vadd.f32 %v9804_v26, %v3555_v36  ;;  %v9957_v15 = vld [vmem:[#allocation162_spill] sm:$0xff] }
 0x799   : > { %v3581_v28 = vmul.f32 %v9955_v50, %v3393_v4  ;;  %v3631_v9 = vmul.f32 %v9952_v24, %v3315_v17  ;;  %v8856_v2 = vadd.f32 %v3518_v32, %v3506_v57  ;;  %v3584_v33 = vadd.f32 %v3580_v1, %v3568_v62  ;;  %v9966_v1 = vld [vmem:[#allocation125_spill] sm:$0xff] }
 0x79a   : > { %v3578_v14 = vmul.f32 %v9956_v6, %v8816_v5  ;;  %v8860_v48 = vadd.f32 %v3519_v59, %v3507_v46  ;;  %v3579_v35 = vmul.f32 %v9956_v6, %v8818_v38  ;;  %v3644_v49 = vadd.f32 %v9957_v15, %v3632_v44 }
 0x79b   : > { %v3585_v40 = vadd.f32 %v3581_v28, %v3569_v25  ;;  %5610 = vtanh.f32 %v8845_v16  ;;  %v3596_v56 = vmul.f32 %v9958_v11, %v3468_v10  ;;  %v3645_v17 = vadd.f32 %v9957_v15, %v3633_v52 }
 0x79c   : > { %v3582_v26 = vadd.f32 %v3578_v14, %v3566_v41  ;;  %5612 = vtanh.f32 %v8851_v23  ;;  %v3583_v58 = vadd.f32 %v3579_v35, %v3567_v61  ;;  %v3597_v63 = vmul.f32 %v9958_v11, %v3469_v29  ;;  %v9968_v35 = vld [vmem:[#allocation144_spill] sm:$0xff]  ;;  %v9969_v11 = vld [vmem:[#allocation134_spill] sm:$0xff] }
 0x79d   : > { %v3656_v37 = vmul.f32 %v9959_v21, %v3392_v18  ;;  %v3642_v60 = vadd.f32 %v9960_v47, %v3630_v31  ;;  %v3594_v43 = vmul.f32 %v9961_v34, %v8827_v53  ;;  %v3600_v12 = vadd.f32 %v3596_v56, %v3584_v33  ;;  %v9962_v18 = vld [vmem:[#allocation163_spill] sm:$0xff]  ;;  %v9967_v33 = vld [vmem:[#allocation161_spill] sm:$0xff] }
 0x79e   : > { %v3657_v8 = vmul.f32 %v9959_v21, %v3393_v4  ;;  %v3643_v20 = vadd.f32 %v9960_v47, %v3631_v9  ;;  %v3595_v39 = vmul.f32 %v9961_v34, %v3467_v19  ;;  %v3601_v45 = vadd.f32 %v3597_v63, %v3585_v40  ;;  %v9963_v4 = vld [vmem:[#allocation140_spill] sm:$0xff] }
 0x79f   : > { %v3660_v55 = vadd.f32 %v3656_v37, %v3644_v49  ;;  %5614 = vtanh.f32 %v8856_v2  ;;  %v3598_v42 = vadd.f32 %v3594_v43, %v3582_v26  ;;  %v3654_v7 = vmul.f32 %v9962_v18, %v8816_v5  ;;  %v9970_v37 = vld [vmem:[#allocation160_spill] sm:$0xff] }
 0x7a0   : > { %v3661_v3 = vadd.f32 %v3657_v8, %v3645_v17  ;;  %5616 = vtanh.f32 %v8860_v48  ;;  %v3599_v13 = vadd.f32 %v3595_v39, %v3583_v58  ;;  %v3655_v24 = vmul.f32 %v9962_v18, %v8818_v38  ;;  %v9972_v8 = vld [vmem:[#allocation148_spill] sm:$0xff] }
 0x7a1   : > { %v3672_v31 = vmul.f32 %v9963_v4, %v3468_v10  ;;  %5618 = vtanh.f32 %v3600_v12  ;;  %v3658_v30 = vadd.f32 %v3654_v7, %v3642_v60  ;;  %v3673_v36 = vmul.f32 %v9963_v4, %v3469_v29  ;;  %v9965_v29 = vld [vmem:[#allocation127_spill] sm:$0xff]  ;;  %v9975_v4 = vld [vmem:[#allocation158_spill] sm:$0xff] }
 0x7a2   : > { %5620 = vtanh.f32 %v3601_v45  ;;  %v3659_v57 = vadd.f32 %v3655_v24, %v3643_v20  ;;  %v3670_v54 = vmul.f32 %v9964_v0, %v8827_v53  ;;  %v3671_v22 = vmul.f32 %v9964_v0, %v3467_v19  ;;  %v9971_v60 = vld [vmem:[#allocation123_spill] sm:$0xff] }
 0x7a3   : > { %v3676_v46 = vadd.f32 %v3672_v31, %v3660_v55  ;;  %5622 = vtanh.f32 %v3598_v42  ;;  %v3677_v5 = vadd.f32 %v3673_v36, %v3661_v3  ;;  %v9973_v55 = vld [vmem:[#allocation165_spill] sm:$0xff] }
 0x7a4   : > { %5624 = vtanh.f32 %v3599_v13  ;;  %v3674_v62 = vadd.f32 %v3670_v54, %v3658_v30  ;;  %v8888_v32 = vadd.f32 %v3671_v22, %v3659_v57  ;;  %v9976_v30 = vld [vmem:[#allocation169_spill] sm:$0xff]  ;;  %v9977_v57 = vld [vmem:[#allocation146_spill] sm:$0xff] }
 0x7a5   : > { %5626 = vtanh.f32 %v3676_v46 }
 0x7a6   : > { %5628 = vtanh.f32 %v3677_v5 }
 0x7a7   : > { %5630 = vtanh.f32 %v3674_v62 }
 0x7a8   : > { %v5611_v38 = vpop.eup %5610  ;;  %5632 = vtanh.f32 %v8888_v32 }
 0x7a9   : > { %v5613_v10 = vpop.eup %5612  ;;  %v3540_v27 = vmul.f32 %v5611_v38, %v9965_v29  ;;  %v9978_v38 = vld [vmem:[#allocation167_spill] sm:$0xff] }
 0x7aa   : > { %v3541_v44 = vmul.f32 %v5613_v10, %v9965_v29  ;;  %v9979_v29 = vld [vmem:[#allocation152_spill] sm:$0xff] }
 0x7ab   : > { %v3544_v19 = vadd.f32 %v3540_v27, %v8845_v16 }
 0x7ac   : > { %v5615_v25 = vpop.eup %5614  ;;  %v3545_v61 = vadd.f32 %v3541_v44, %v8851_v23 }
 0x7ad   : > { %v5617_v53 = vpop.eup %5616  ;;  %v3538_v52 = vmul.f32 %v5615_v25, %v9966_v1  ;;  %v3708_v15 = vmul.f32 %v9968_v35, %v3544_v19  ;;  %v3860_v47 = vmul.f32 %v9970_v37, %v3544_v19 }
 0x7ae   : > { %v5619_v41 = vpop.eup %5618  ;;  %v3539_v28 = vmul.f32 %v5617_v53, %v9966_v1  ;;  %v3709_v16 = vmul.f32 %v9968_v35, %v3545_v61  ;;  %v3861_v20 = vmul.f32 %v9970_v37, %v3545_v61  ;;  %v3785_v25 = vmul.f32 %v9978_v38, %v3545_v61 }
 0x7af   : > { %v5621_v50 = vpop.eup %5620  ;;  %v3616_v6 = vmul.f32 %v5619_v41, %v9967_v33  ;;  %v3542_v49 = vadd.f32 %v3538_v52, %v8856_v2  ;;  %v3720_v2 = vadd.f32 %v9972_v8, %v3708_v15  ;;  %v9980_v52 = vld [vmem:[#allocation115_spill] sm:$0xff] }
 0x7b0   : > { %v5623_v59 = vpop.eup %5622  ;;  %v3617_v14 = vmul.f32 %v5621_v50, %v9967_v33  ;;  %v3543_v23 = vadd.f32 %v3539_v28, %v8860_v48  ;;  %v3721_v48 = vadd.f32 %v9972_v8, %v3709_v16  ;;  %v9983_v33 = vld [vmem:[#allocation156_spill] sm:$0xff]  ;;  %v9987_v8 = vld [vmem:[#allocation175_spill] sm:$0xff] }
 0x7b1   : > { %v5625_v9 = vpop.eup %5624  ;;  %v3614_v56 = vmul.f32 %v5623_v59, %v9969_v11  ;;  %v3620_v58 = vadd.f32 %v3616_v6, %v3600_v12  ;;  %v3706_v3 = vmul.f32 %v9973_v55, %v3542_v49  ;;  %v3782_v36 = vmul.f32 %v9976_v30, %v3542_v49  ;;  %v9981_v59 = vld [vmem:[#allocation101_spill] sm:$0xff] }
 0x7b2   : > { %v5627_v40 = vpop.eup %5626  ;;  %v3615_v17 = vmul.f32 %v5625_v9, %v9969_v11  ;;  %v8905_v21 = vadd.f32 %v3617_v14, %v3601_v45  ;;  %v3707_v12 = vmul.f32 %v9973_v55, %v3543_v23  ;;  %v9974_v45 = vld [vmem:[#allocation150_spill] sm:$0xff]  ;;  %v3783_v44 = vmul.f32 %v9976_v30, %v3543_v23  ;;  %v9984_v14 = vld [vmem:[#allocation171_spill] sm:$0xff] }
 0x7b3   : > { %v5629_v26 = vpop.eup %5628  ;;  %v3692_v34 = vmul.f32 %v5627_v40, %v9971_v60  ;;  %v3618_v18 = vadd.f32 %v3614_v56, %v3598_v42  ;;  %v3732_v24 = vmul.f32 %v9974_v45, %v3620_v58  ;;  %v3808_v31 = vmul.f32 %v9975_v4, %v3620_v58  ;;  %v9982_v9 = vld [vmem:[#allocation154_spill] sm:$0xff] }
 0x7b4   : > { %v5631_v63 = vpop.eup %5630  ;;  %v3693_v39 = vmul.f32 %v5629_v26, %v9971_v60  ;;  %v8913_v7 = vadd.f32 %v3615_v17, %v3599_v13  ;;  %v3733_v54 = vmul.f32 %v9974_v45, %v8905_v21  ;;  %v3784_v42 = vmul.f32 %v9978_v38, %v3544_v19  ;;  %v9985_v17 = vld [vmem:[#allocation164_spill] sm:$0xff] }
 0x7b5   : > { %v5633_v43 = vpop.eup %5632  ;;  %v3690_v0 = vmul.f32 %v5631_v63, %v9977_v57  ;;  %v3696_v22 = vadd.f32 %v3692_v34, %v3676_v46  ;;  %v3718_v27 = vadd.f32 %v9979_v29, %v3706_v3  ;;  %v3736_v53 = vadd.f32 %v3732_v24, %v3720_v2  ;;  %v9986_v34 = vld [vmem:[#allocation173_spill] sm:$0xff] }
 0x7b6   : > { %v3691_v13 = vmul.f32 %v5633_v43, %v9977_v57  ;;  %v3697_v10 = vadd.f32 %v3693_v39, %v3677_v5  ;;  %v3737_v41 = vadd.f32 %v3733_v54, %v3721_v48  ;;  %v3809_v50 = vmul.f32 %v9975_v4, %v8905_v21  ;;  %v9990_v57 = vld [vmem:[#allocation177_spill] sm:$0xff] }
 0x7b7   : > { %v3719_v1 = vadd.f32 %v9979_v29, %v3707_v12  ;;  %v3806_v46 = vmul.f32 %v9980_v52, %v3618_v18  ;;  %v3794_v19 = vadd.f32 %v9981_v59, %v3782_v36  ;;  %v3694_v28 = vadd.f32 %v3690_v0, %v3674_v62  ;;  %v9988_v12 = vld [vmem:[#allocation25_spill] sm:$0xff] }
 0x7b8   : > { %v3730_v5 = vmul.f32 %v9982_v9, %v3618_v18  ;;  %v3748_v6 = vmul.f32 %v9983_v33, %v3696_v22  ;;  %v3695_v61 = vadd.f32 %v3691_v13, %v8888_v32  ;;  %v3796_v40 = vadd.f32 %v9984_v14, %v3784_v42 }
 0x7b9   : > { %v3731_v35 = vmul.f32 %v9982_v9, %v8913_v7  ;;  %v3749_v15 = vmul.f32 %v9983_v33, %v3697_v10  ;;  %v3795_v26 = vadd.f32 %v9981_v59, %v3783_v44  ;;  %v3797_v16 = vadd.f32 %v9984_v14, %v3785_v25  ;;  %v9992_v25 = vld [vmem:[#allocation179_spill] sm:$0xff] }
 0x7ba   : > { %v3734_v11 = vadd.f32 %v3730_v5, %v3718_v27  ;;  %v8942_v56 = vadd.f32 %v3748_v6, %v3736_v53  ;;  %v3807_v62 = vmul.f32 %v9980_v52, %v8913_v7  ;;  %v3872_v63 = vadd.f32 %v9985_v17, %v3860_v47  ;;  %v9989_v47 = vld [vmem:[#allocation166_spill] sm:$0xff]  ;;  %v9994_v5 = vld [vmem:[#allocation181_spill] sm:$0xff] }
 0x7bb   : > { %v3735_v32 = vadd.f32 %v3731_v35, %v3719_v1  ;;  %v3753_v37 = vadd.f32 %v3749_v15, %v3737_v41  ;;  %v3873_v60 = vadd.f32 %v9985_v17, %v3861_v20  ;;  %v3746_v43 = vmul.f32 %v9986_v34, %v3694_v28  ;;  %v9993_v41 = vld [vmem:[#allocation170_spill] sm:$0xff]  ;;  %v9995_v35 = vld [vmem:[#allocation172_spill] sm:$0xff] }
 0x7bc   : > { %v3858_v2 = vmul.f32 %v9987_v8, %v3542_v49  ;;  %v3810_v39 = vadd.f32 %v3806_v46, %v3794_v19  ;;  %v3812_v55 = vadd.f32 %v3808_v31, %v3796_v40  ;;  %v3747_v3 = vmul.f32 %v9986_v34, %v3695_v61  ;;  %v9991_v31 = vld [vmem:[#allocation168_spill] sm:$0xff] }
 0x7bd   : > { %v3859_v48 = vmul.f32 %v9987_v8, %v3543_v23  ;;  %v3824_v45 = vmul.f32 %v9988_v12, %v3696_v22  ;;  %v3811_v24 = vadd.f32 %v3807_v62, %v3795_v26  ;;  %v3813_v4 = vadd.f32 %v3809_v50, %v3797_v16 }
 0x7be   : > { %v3750_v30 = vadd.f32 %v3746_v43, %v3734_v11  ;;  %5634 = vtanh.f32 %v8942_v56  ;;  %v3822_v36 = vmul.f32 %v9989_v47, %v3694_v28  ;;  %v3751_v20 = vadd.f32 %v3747_v3, %v3735_v32  ;;  %v9996_v11 = vld [vmem:[#allocation174_spill] sm:$0xff] }
 0x7bf   : > { %v3884_v0 = vmul.f32 %v9990_v57, %v3620_v58  ;;  %5636 = vtanh.f32 %v3753_v37  ;;  %v3825_v49 = vmul.f32 %v9988_v12, %v3697_v10  ;;  %v3870_v54 = vadd.f32 %v9991_v31, %v3858_v2  ;;  %v9997_v43 = vld [vmem:[#allocation182_spill] sm:$0xff] }
 0x7c0   : > { %v3885_v23 = vmul.f32 %v9990_v57, %v8905_v21  ;;  %v3823_v38 = vmul.f32 %v9989_v47, %v3695_v61  ;;  %v3871_v42 = vadd.f32 %v9991_v31, %v3859_v48  ;;  %v3828_v29 = vadd.f32 %v3824_v45, %v3812_v55  ;;  %v9998_v48 = vld [vmem:[#allocation184_spill] sm:$0xff] }
 0x7c1   : > { %v3888_v13 = vadd.f32 %v3884_v0, %v3872_v63  ;;  %5638 = vtanh.f32 %v3750_v30  ;;  %v3882_v44 = vmul.f32 %v9992_v25, %v3618_v18  ;;  %v3829_v53 = vadd.f32 %v3825_v49, %v3813_v4  ;;  %v9999_v4 = vld [vmem:[#allocation176_spill] sm:$0xff] }
 0x7c2   : > { %v3889_v27 = vadd.f32 %v3885_v23, %v3873_v60  ;;  %v3826_v58 = vadd.f32 %v3822_v36, %v3810_v39  ;;  %5640 = vtanh.f32 %v3751_v20  ;;  %v3900_v50 = vmul.f32 %v9993_v41, %v3696_v22 }
 0x7c3   : > { %v3883_v1 = vmul.f32 %v9992_v25, %v8913_v7  ;;  %v3827_v52 = vadd.f32 %v3823_v38, %v3811_v24  ;;  %v3901_v21 = vmul.f32 %v9993_v41, %v3697_v10  ;;  %v3886_v46 = vadd.f32 %v3882_v44, %v3870_v54  ;;  %v10001_v54 = vld [vmem:[#allocation183_spill] sm:$0xff] }
 0x7c4   : > { %v3904_v59 = vadd.f32 %v3900_v50, %v3888_v13  ;;  %5642 = vtanh.f32 %v3828_v29  ;;  %v3898_v33 = vmul.f32 %v9994_v5, %v3694_v28  ;;  %v3899_v18 = vmul.f32 %v9994_v5, %v3695_v61  ;;  %v10003_v13 = vld [vmem:[#allocation180_spill] sm:$0xff] }
 0x7c5   : > { %v3887_v19 = vadd.f32 %v3883_v1, %v3871_v42  ;;  %v3905_v9 = vadd.f32 %v3901_v21, %v3889_v27  ;;  %5644 = vtanh.f32 %v3829_v53  ;;  %v10004_v21 = vld [vmem:[#allocation185_spill] sm:$0xff] }
 0x7c6   : > { %5646 = vtanh.f32 %v3826_v58  ;;  %v3902_v6 = vadd.f32 %v3898_v33, %v3886_v46 }
 0x7c7   : > { %5648 = vtanh.f32 %v3827_v52  ;;  %v3903_v22 = vadd.f32 %v3899_v18, %v3887_v19 }
 0x7c8   : > { %5650 = vtanh.f32 %v3904_v59 }
 0x7c9   : > { %5652 = vtanh.f32 %v3905_v9 }
 0x7ca   : > { %5654 = vtanh.f32 %v3902_v6 }
 0x7cb   : > { %v5635_v7 = vpop.eup %5634  ;;  %5656 = vtanh.f32 %v3903_v22 }
 0x7cc   : > { %v5637_v14 = vpop.eup %5636  ;;  %v3768_v15 = vmul.f32 %v5635_v7, %v9995_v35 }
 0x7cd   : > { %v3769_v26 = vmul.f32 %v5637_v14, %v9995_v35 }
 0x7ce   : > { %v5639_v10 = vpop.eup %5638  ;;  %v3772_v63 = vadd.f32 %v3768_v15, %v8942_v56 }
 0x7cf   : > { %v5641_v40 = vpop.eup %5640  ;;  %v3766_v62 = vmul.f32 %v5639_v10, %v9996_v11  ;;  %v3773_v32 = vadd.f32 %v3769_v26, %v3753_v37  ;;  %v10000_v37 = vld [vmem:[#allocation178_spill] sm:$0xff]  ;;  %v10006_v10 = vld [vmem:[#allocation188_spill] sm:$0xff] }
 0x7d0   : > { %v3767_v61 = vmul.f32 %v5641_v40, %v9996_v11  ;;  %v3936_v12 = vmul.f32 %v9998_v48, %v3772_v63  ;;  %v4040_v63 = vld [vmem:[%s6179_s21] sm:$0xf] }
 0x7d1   : > { %v5643_v28 = vpop.eup %5642  ;;  %v3770_v55 = vadd.f32 %v3766_v62, %v3750_v30  ;;  %v3937_v45 = vmul.f32 %v9998_v48, %v3773_v32  ;;  %v4587_v32 = vld [vmem:[%s6179_s21 + $0x4] sm:$0xf]  ;;  %s5001_s21 = sshll.u32 %s5910_s20, 7 }
 0x7d2   : > { %v5645_v16 = vpop.eup %5644  ;;  %v3844_v8 = vmul.f32 %v5643_v28, %v9997_v43  ;;  %v3771_v3 = vadd.f32 %v3767_v61, %v3751_v20  ;;  %v10002_v20 = vld [vmem:[#allocation186_spill] sm:$0xff]  ;;  %s9016_s15 = scalar_lea.hbm %s9113_s10, %s5001_s21 }
 0x7d3   : > { %v5647_v17 = vpop.eup %5646  ;;  %v3845_v2 = vmul.f32 %v5645_v16, %v9997_v43  ;;  %v3934_v23 = vmul.f32 %v10001_v54, %v3770_v55  ;;  %v3948_v38 = vadd.f32 %v10002_v20, %v3936_v12  ;;  %v3949_v42 = vadd.f32 %v10002_v20, %v3937_v45  ;;  %v10008_v16 = vld [vmem:[#allocation190_spill] sm:$0xff] }
 0x7d4   : > { %v5649_v60 = vpop.eup %5648  ;;  %v3842_v47 = vmul.f32 %v5647_v17, %v9999_v4  ;;  %v3848_v49 = vadd.f32 %v3844_v8, %v3828_v29  ;;  %v3935_v30 = vmul.f32 %v10001_v54, %v3771_v3  ;;  %v10010_v43 = vmov 0.0   ;;  %v10012_v48 = vld [vmem:[#allocation46_spill] sm:$0xff] }
 0x7d5   : > { %v5651_v34 = vpop.eup %5650  ;;  %v3843_v36 = vmul.f32 %v5649_v60, %v9999_v4  ;;  %v3849_v31 = vadd.f32 %v3845_v2, %v3829_v53  ;;  %v10005_v53 = vld [vmem:[#allocation187_spill] sm:$0xff] }
 0x7d6   : > { %v5653_v39 = vpop.eup %5652  ;;  %v3920_v57 = vmul.f32 %v5651_v34, %v10000_v37  ;;  %v3846_v44 = vadd.f32 %v3842_v47, %v3826_v58  ;;  %v3960_v46 = vmul.f32 %v10004_v21, %v3848_v49  ;;  %v3946_v19 = vadd.f32 %v10005_v53, %v3934_v23  ;;  %v10009_v60 = vld [vmem:[#allocation43_spill] sm:$0xff] }
 0x7d7   : > { %v5655_v24 = vpop.eup %5654  ;;  %v3921_v0 = vmul.f32 %v5653_v39, %v10000_v37  ;;  %v3847_v41 = vadd.f32 %v3843_v36, %v3827_v52  ;;  %v3961_v29 = vmul.f32 %v10004_v21, %v3849_v31  ;;  %v3947_v5 = vadd.f32 %v10005_v53, %v3935_v30  ;;  %v10007_v52 = vld [vmem:[#allocation189_spill] sm:$0xff]  ;;  %v10011_v39 = vld [vmem:[#allocation128_spill] sm:$0xff] }
 0x7d8   : > { %v5657_v56 = vpop.eup %5656  ;;  %v3918_v27 = vmul.f32 %v5655_v24, %v10003_v13  ;;  %v3924_v50 = vadd.f32 %v3920_v57, %v3904_v59  ;;  %v3964_v33 = vadd.f32 %v3960_v46, %v3948_v38  ;;  %v3958_v40 = vmul.f32 %v10006_v10, %v3846_v44 }
 0x7d9   : > { %v3919_v25 = vmul.f32 %v5657_v56, %v10003_v13  ;;  %v3925_v1 = vadd.f32 %v3921_v0, %v3905_v9  ;;  %v3965_v18 = vadd.f32 %v3961_v29, %v3949_v42  ;;  %v3959_v58 = vmul.f32 %v10006_v10, %v3847_v41 }
 0x7da   : > { %v3922_v7 = vadd.f32 %v3918_v27, %v3902_v6  ;;  %v3976_v59 = vmul.f32 %v10007_v52, %v3924_v50  ;;  %v3962_v35 = vadd.f32 %v3958_v40, %v3946_v19  ;;  %v4042_v34 = vadd.f32 %v4040_v63, %v10009_v60  ;;  %v4107_v40 = vpop.permute.xlu0 %4106 }
 0x7db   : > { %v3923_v14 = vadd.f32 %v3919_v25, %v3903_v22  ;;  %v3977_v9 = vmul.f32 %v10007_v52, %v3925_v1  ;;  %v3963_v15 = vadd.f32 %v3959_v58, %v3947_v5  ;;  %v4588_v3 = vadd.f32 %v4587_v32, %v10009_v60 }
 0x7dc   : > { %v3980_v26 = vadd.f32 %v3976_v59, %v3964_v33  ;;  %v3974_v11 = vmul.f32 %v10008_v16, %v3922_v7  ;;  %v4044_v12 = vmul.f32 %v4042_v34, %v10012_v48 }
 0x7dd   : > { %v3981_v28 = vadd.f32 %v3977_v9, %v3965_v18  ;;  %v3975_v62 = vmul.f32 %v10008_v16, %v3923_v14  ;;  %v4589_v37 = vmul.f32 %v4588_v3, %v10012_v48 }
 0x7de   : > { %v3978_v6 = vadd.f32 %v3974_v11, %v3962_v35 }
 0x7df   : > { %v3979_v61 = vadd.f32 %v3975_v62, %v3963_v15  ;;  %v3983_v22 = vadd.f32 %v3981_v28, %v3980_v26 }
 0x7e1   : > { %v3982_v17 = vadd.f32 %v3979_v61, %v3978_v6  ;;  %vm3987_vm13 = vcmp.gt.f32.partialorder %v3983_v22, 0.0  ;;  %vm3985_vm14 = vcmp.lt.f32.partialorder %v3983_v22, 0.0 }
 0x7e2   : > { %v3989_v8 = vsel %vm3987_vm13, -1.0, %v10010_v43 }
 0x7e3   : > { %vm3986_vm15 = vcmp.gt.f32.partialorder %v3982_v17, 0.0  ;;  %vm3984_vm1 = vcmp.lt.f32.partialorder %v3982_v17, 0.0  ;;  %v3991_v24 = vsel %vm3985_vm14, 1.0, %v3989_v8 }
 0x7e4   : > { %v3988_v4 = vsel %vm3986_vm15, -1.0, %v10010_v43  ;;  %v3994_v49 = vmul.f32 %v3991_v24, %v3980_v26  ;;  %v3995_v30 = vmul.f32 %v3991_v24, %v3981_v28 }
 0x7e5   : > { %v3990_v31 = vsel %vm3984_vm1, 1.0, %v3988_v4 }
 0x7e6   : > { %v3992_v13 = vmul.f32 %v3990_v31, %v3978_v6  ;;  %v4984_v44 = vmul.f32 -1.442695, %v3994_v49  ;;  %v3993_v41 = vmul.f32 %v3990_v31, %v3979_v61  ;;  %v4985_v1 = vmul.f32 -1.442695, %v3995_v30 }
 0x7e8   : > { %v4982_v18 = vmul.f32 -1.442695, %v3992_v13  ;;  %v4983_v7 = vmul.f32 -1.442695, %v3993_v41 }
 0x81a   : > { %v3091_v2 = vpop.f32.mrf.mxu0 }
 0x81b   : > { %v3092_v55 = vadd.f32 %v3091_v2, %v10011_v39 }
 0x81c   : > { %v3093_v45 = vpop.f32.mrf.mxu0 }
 0x81d   : > { %v4046_v47 = vcombine.high %v3092_v55, %v3092_v55  ;;  %v3094_v36 = vadd.f32 %v3093_v45, %v10011_v39  ;;  %v4053_v54 = vmax.f32 %v3092_v55, 0.11 }
 0x81e   : > { %v3095_v56 = vpop.f32.mrf.mxu0 }
 0x81f   : > { %v4048_v57 = vsub.f32 %v4044_v12, %v4046_v47  ;;  %v4591_v0 = vcombine.high %v3094_v36, %v3094_v36  ;;  %v4598_v42 = vmax.f32 %v3094_v36, 0.11  ;;  %5658 = vrcp.f32 %v4053_v54 }
 0x820   : > { %v3096_v23 = vpop.f32.mrf.mxu0 }
 0x821   : > { %v4593_v20 = vsub.f32 %v4589_v37, %v4591_v0  ;;  %v5037_v38 = vcvt.f32.s32 %v4048_v57  ;;  %v5035_v50 = vand.u32 2147483647, %v4048_v57  ;;  %v5040_v46 = vand.u32 2147483648, %v4048_v57 }
 0x822   : > { %5660 = vrcp.f32 %v4598_v42 }
 0x823   : > { %v5038_v27 = vcvt.s32.f32 %v5037_v38  ;;  %v5045_v25 = vcvt.f32.s32 %v4593_v20  ;;  %v5043_v53 = vand.u32 2147483647, %v4593_v20  ;;  %v5048_v33 = vand.u32 2147483648, %v4593_v20 }
 0x824   : > { %5662 = vpow2.f32 %v4984_v44  ;;  %vm5036_vm3 = vcmp.lt.f32.partialorder %v5035_v50, 8388608.0 }
 0x825   : > { %v5039_v21 = vand.u32 2147483647, %v5038_v27  ;;  %v5046_v29 = vcvt.s32.f32 %v5045_v25  ;;  %5664 = vpow2.f32 %v4985_v1  ;;  %vm5044_vm4 = vcmp.lt.f32.partialorder %v5043_v53, 8388608.0 }
 0x826   : > { %5666 = vpow2.f32 %v4982_v18 }
 0x827   : > { %v5041_v19 = vor.u32 %v5040_v46, %v5039_v21  ;;  %v5047_v5 = vand.u32 2147483647, %v5046_v29  ;;  %5668 = vpow2.f32 %v4983_v7 }
 0x829   : > { %v5042_v14 = vsel %vm5036_vm3, %v5041_v19, %v4048_v57  ;;  %v5049_v10 = vor.u32 %v5048_v33, %v5047_v5 }
 0x82a   : > { %v4050_v58 = vadd.f32 %v5042_v14, %v4046_v47 }
 0x82b   : > { %v5050_v52 = vsel %vm5044_vm4, %v5049_v10, %v4593_v20 }
 0x82c   : > { %v4051_v59 = vsub.f32 %v4050_v58, %v4046_v47  ;;  %v4595_v9 = vadd.f32 %v5050_v52, %v4591_v0  ;;  %v4109_v35 = vmul.f32 %v4107_v40, %v4050_v58  ;;  %v5659_v22 = vpop.eup %5658 }
 0x82e   : > { %v4052_v15 = vand.u32 2147483647, %v4051_v59  ;;  %v4596_v26 = vsub.f32 %v4595_v9, %v4591_v0  ;;  %v4110_v28 = vsub.f32 %v4109_v35, %v10009_v60  ;;  %v4650_v16 = vmul.f32 %v4595_v9, %v4107_v40 }
 0x82f   : > { %v5661_v34 = vpop.eup %5660 }
 0x830   : > { %v4056_v11 = vsub.f32 0.5, %v4052_v15  ;;  %v4058_v62 = vsub.f32 -0.5, %v4052_v15  ;;  %v4597_v6 = vand.u32 2147483647, %v4596_v26  ;;  %4111 = vst [vmem:[%s453_s24] sm:$0xf] %v4110_v28  ;;  %v4651_v61 = vsub.f32 %v4650_v16, %v10009_v60 }
 0x832   : > { %v4059_v17 = vmul.f32 %v5659_v22, %v4058_v62  ;;  %v4601_v63 = vsub.f32 0.5, %v4597_v6  ;;  %v4603_v32 = vsub.f32 -0.5, %v4597_v6  ;;  %4652 = vst [vmem:[%s453_s24 + $0x4] sm:$0xf] %v4651_v61 }
 0x833   : > { %5817 = shalt.err (!%p5814_p0)
}
 0x834   : > { %s5818_s28 = scalar_lea.hbm %s9016_s15, 128  ;;  %s5822_s25 = scalar_lea.hbm %s9113_s10, 256 }
 0x835   : > { %p5819_p1 = scmp.ne.s32.totalorder %s9016_s15, %s5818_s28  ;;  %p5823_p6 = scmp.lt.s32.totalorder %s9016_s15, %s9113_s10 }
 0x836   : > { %p5824_p8 = scmp.lt.s32.totalorder %s5822_s25, %s5818_s28 }
 0x837   : > { %p5820_p2 = pnand %p5819_p1, %p6146_p12 }
 0x838   : > { %p5825_p9 = por %p5824_p8, %p5823_p6 }
 0x839   : > { %p5821_p4 = pneg %p5820_p2 }
 0x83b   : > { %p5826_p3 = pnand %p5825_p9, %p5821_p4 }
 0x83d   : > { %5829 = shalt.err (!%p5826_p3)
}
 0x83e   : > { %5061 = dma.vmem_to_hbm [thread:$0]  (%p6146_p12), %s9018_s13, 128, %s9016_s15, %s4656_s16   ;;  %v4057_v60 = vmul.f32 %v5659_v22, %v4056_v11  ;;  %v4061_v43 = vcombine.low %v4059_v17, %v4059_v17  ;;  %v4604_v8 = vmul.f32 %v5661_v34, %v4603_v32  ;;  %v5663_v2 = vpop.eup %5662  ;;  %v4602_v3 = vmul.f32 %v5661_v34, %v4601_v63 }
 0x83f   : > { %v5665_v39 = vpop.eup %5664  ;;  %v4010_v45 = vadd.f32 1.0, %v5663_v2  ;;  %s4845_s13 = sshll.u32 %s6173_s17, 2  ;;  %s5002_s23 = sshll.u32 %s5910_s20, 6 }
 0x840   : > { %v4063_v55 = vsel %vm471_vm2, %v4057_v60, %v4061_v43  ;;  %v4606_v48 = vcombine.low %v4604_v8, %v4604_v8  ;;  %v5667_v4 = vpop.eup %5666  ;;  %v4011_v47 = vadd.f32 1.0, %v5665_v39  ;;  %v5989_v60 = vmov 1.0   ;;  %s460_s26 = scalar_lea.vmem [#allocation11], %s4845_s13  ;;  %s10013_s9 = sld [smem:[#allocation193_spill]] }
 0x841   : > { %v9042_v12 = vmul.f32 0.70710677, %v4063_v55  ;;  %v5669_v37 = vpop.eup %5668  ;;  %5670 = vrcp.f32 %v4010_v45  ;;  %v4008_v49 = vadd.f32 1.0, %v5667_v4  ;;  %s4693_s15 = sshll.u32 %s460_s26, 4  ;;  %s4661_s11 = scalar_lea.sflag [#allocation12], %s6173_s17  ;;  %s4694_s15 = int_to_ptr.vmem [resolvable:$true] %s4693_s15 }
 0x842   : > { %v4608_v24 = vsel %vm471_vm2, %v4602_v3, %v4606_v48  ;;  %5672 = vrcp.f32 %v4011_v47  ;;  %v4009_v31 = vadd.f32 1.0, %v5669_v37  ;;  %s5830_s28 = scalar_lea.vmem %s4694_s15, 64  ;;  %s5990_s20 = smov [#allocation11]  }
 0x843   : > { %v4067_v36 = vand.u32 2147483647, %v9042_v12  ;;  %v9046_v56 = vmul.f32 0.70710677, %v4608_v24  ;;  %vm4065_vm5 = vcmp.lt.f32.partialorder %v9042_v12, 0.0  ;;  %p5831_p11 = scmp.ne.s32.totalorder %s4694_s15, %s5830_s28  ;;  %s5834_s27 = sshll.u32 %s5990_s20, 4  ;;  %s5835_s27 = int_to_ptr.vmem [resolvable:$false] %s5834_s27 }
 0x844   : > { %v4066_v43 = vsel %vm4065_vm5, -1.0, %v5989_v60  ;;  %s5836_s29 = scalar_lea.vmem %s5835_s27, 128  ;;  %p5837_p10 = scmp.lt.s32.totalorder %s4694_s15, %s5835_s27 }
 0x845   : > { %v4068_v57 = vmul.f32 0.3275911, %v4067_v36  ;;  %v4612_v0 = vand.u32 2147483647, %v9046_v56  ;;  %v4081_v20 = vsub.f32 0.0, %v4067_v36  ;;  %vm4610_vm6 = vcmp.lt.f32.partialorder %v9046_v56, 0.0  ;;  %p5832_p5 = pnand %p5831_p11, %p6146_p12  ;;  %p5838_p13 = scmp.lt.s32.totalorder %s5836_s29, %s5830_s28 }
 0x846   : > { %v4611_v3 = vsel %vm4610_vm6, -1.0, %v5989_v60  ;;  %s9061_s14 = scalar_lea.hbm %s10013_s9, %s5002_s23 }
 0x847   : > { %v4069_v54 = vadd.f32 1.0, %v4068_v57  ;;  %v4613_v23 = vmul.f32 0.3275911, %v4612_v0  ;;  %v4626_v38 = vsub.f32 0.0, %v4612_v0  ;;  %v4082_v13 = vmul.f32 %v4081_v20, %v4067_v36  ;;  %p5833_p7 = pneg %p5832_p5  ;;  %p5839_p0 = por %p5838_p13, %p5837_p10 }
 0x849   : > { %5674 = vrcp.f32 %v4069_v54  ;;  %v4614_v30 = vadd.f32 1.0, %v4613_v23  ;;  %v4627_v44 = vmul.f32 %v4626_v38, %v4612_v0  ;;  %v4083_v1 = vmul.f32 1.442695, %v4082_v13  ;;  %p5840_p1 = pnand %p5839_p0, %p5833_p7 }
 0x84a   : > { %5676 = vrcp.f32 %v4008_v49  ;;  %v4579_v38 = vrot.slane %v8386_v51, 4 }
 0x84b   : > { %5678 = vrcp.f32 %v4009_v31  ;;  %v4628_v5 = vmul.f32 1.442695, %v4627_v44 }
 0x84c   : > { %5680 = vrcp.f32 %v4614_v30  ;;  %v4580_v13 = vadd.f32 %v4579_v38, %v8386_v51 }
 0x84d   : > { %5682 = vpow2.f32 %v4083_v1 }
 0x84e   : > { %v5671_v42 = vpop.eup %5670  ;;  %5684 = vpow2.f32 %v4628_v5  ;;  %v4581_v1 = vrot.slane %v4580_v13, 2 }
 0x84f   : > { %v5673_v27 = vpop.eup %5672 }
 0x850   : > { %v4021_v21 = vsub.f32 %v5673_v27, %v5671_v42  ;;  %v4582_v5 = vadd.f32 %v4581_v1, %v4580_v13 }
 0x852   : > { %v4023_v18 = vand.u32 2147483647, %v4021_v21 }
 0x854   : > { %v4025_v52 = vmax.f32 %v4023_v18, 1e-09 }
 0x856   : > { %v5675_v25 = vpop.eup %5674  ;;  %5686 = vlog2.f32 %v4025_v52 }
 0x857   : > { %v5677_v41 = vpop.eup %5676  ;;  %v4072_v50 = vmul.f32 1.0614054, %v5675_v25 }
 0x858   : > { %v5679_v46 = vpop.eup %5678 }
 0x859   : > { %v5681_v29 = vpop.eup %5680  ;;  %v4073_v53 = vadd.f32 -1.4531521, %v4072_v50  ;;  %v4020_v14 = vsub.f32 %v5679_v46, %v5677_v41 }
 0x85a   : > { %v4617_v19 = vmul.f32 1.0614054, %v5681_v29  ;;  %v5683_v61 = vpop.eup %5682 }
 0x85b   : > { %v4074_v33 = vmul.f32 %v5675_v25, %v4073_v53  ;;  %v4022_v9 = vand.u32 2147483647, %v4020_v14  ;;  %v5685_v32 = vpop.eup %5684 }
 0x85c   : > { %v4618_v7 = vadd.f32 -1.4531521, %v4617_v19 }
 0x85d   : > { %v4075_v10 = vadd.f32 1.4214138, %v4074_v33  ;;  %v4024_v16 = vmax.f32 %v4022_v9, 1e-09 }
 0x85e   : > { %v4619_v40 = vmul.f32 %v5681_v29, %v4618_v7 }
 0x85f   : > { %v4076_v58 = vmul.f32 %v5675_v25, %v4075_v10  ;;  %5688 = vlog2.f32 %v4024_v16  ;;  %v4583_v10 = vrot.slane %v4582_v5, 1 }
 0x860   : > { %v4620_v59 = vadd.f32 1.4214138, %v4619_v40 }
 0x861   : > { %v4077_v35 = vadd.f32 -0.28449672, %v4076_v58 }
 0x862   : > { %v4621_v15 = vmul.f32 %v5681_v29, %v4620_v59 }
 0x863   : > { %v4078_v26 = vmul.f32 %v5675_v25, %v4077_v35  ;;  %v5687_v48 = vpop.eup %5686  ;;  %v4584_v35 = vadd.f32 %v4583_v10, %v4582_v5 }
 0x864   : > { %v4622_v28 = vadd.f32 -0.28449672, %v4621_v15  ;;  %v4029_v36 = vmul.f32 0.6931472, %v5687_v48 }
 0x865   : > { %v4079_v11 = vadd.f32 0.2548296, %v4078_v26 }
 0x866   : > { %v4623_v62 = vmul.f32 %v5681_v29, %v4622_v28  ;;  %v4030_v31 = vsel %vm957_vm0, %v4029_v36, 0.0  ;;  %vm4112_vm0 = vcmask 1040384  }
 0x867   : > { %v4080_v6 = vmul.f32 %v5675_v25, %v4079_v11 }
 0x868   : > { %v4624_v22 = vadd.f32 0.2548296, %v4623_v62  ;;  %v4585_v62 = vsub.f32 0.0, %v4584_v35 }
 0x869   : > { %v4085_v17 = vmul.f32 %v5683_v61, %v4080_v6 }
 0x86a   : > { %v4625_v63 = vmul.f32 %v5681_v29, %v4624_v22 }
 0x86b   : > { %v4086_v34 = vsub.f32 1.0, %v4085_v17 }
 0x86c   : > { %v4630_v8 = vmul.f32 %v5685_v32, %v4625_v63  ;;  %v5689_v37 = vpop.eup %5688 }
 0x86d   : > { %v4087_v2 = vmul.f32 %v4086_v34, %v4066_v43  ;;  %v4027_v56 = vmul.f32 0.6931472, %v5689_v37 }
 0x86e   : > { %v4631_v39 = vsub.f32 1.0, %v4630_v8 }
 0x86f   : > { %v4088_v55 = vadd.f32 1.0, %v4087_v2  ;;  %v4031_v30 = vadd.f32 %v4030_v31, %v4027_v56 }
 0x870   : > { %v4632_v45 = vmul.f32 %v4631_v39, %v4611_v3 }
 0x871   : > { %v4089_v24 = vmul.f32 0.5, %v4088_v55  ;;  %v4032_v20 = vrot.slane %v4031_v30, 4 }
 0x872   : > { %v4633_v4 = vadd.f32 1.0, %v4632_v45 }
 0x873   : > { %v4091_v47 = vrot.slane %v4089_v24, 4  ;;  %v4033_v42 = vadd.f32 %v4032_v20, %v4031_v30 }
 0x874   : > { %v4634_v12 = vmul.f32 0.5, %v4633_v4 }
 0x875   : > { %v4093_v57 = vsub.f32 %v4089_v24, %v4091_v47  ;;  %v4034_v25 = vrot.slane %v4033_v42, 2 }
 0x876   : > { %v4636_v0 = vrot.slane %v4634_v12, 4 }
 0x877   : > { %v4094_v49 = vmax.f32 %v4093_v57, 1e-09  ;;  %v4035_v21 = vadd.f32 %v4034_v25, %v4033_v42 }
 0x878   : > { %v4638_v54 = vsub.f32 %v4634_v12, %v4636_v0 }
 0x879   : > { %5690 = vlog2.f32 %v4094_v49  ;;  %v4036_v18 = vrot.slane %v4035_v21, 1 }
 0x87a   : > { %v4639_v23 = vmax.f32 %v4638_v54, 1e-09 }
 0x87b   : > { %v4037_v58 = vadd.f32 %v4036_v18, %v4035_v21 }
 0x87c   : > { %5692 = vlog2.f32 %v4639_v23 }
 0x87d   : > { %v4038_v26 = vsub.f32 0.0, %v4037_v58 }
 0x886   : > { %v5691_v27 = vpop.eup %5690 }
 0x887   : > { %v4096_v44 = vmul.f32 0.6931472, %v5691_v27 }
 0x889   : > { %v5693_v41 = vpop.eup %5692  ;;  %v4097_v50 = vsel %vm471_vm2, %v4096_v44, 0.0 }
 0x88a   : > { %v4098_v46 = vrot.slane %v4097_v50, 4  ;;  %v4641_v29 = vmul.f32 0.6931472, %v5693_v41 }
 0x88c   : > { %v4099_v53 = vadd.f32 %v4098_v46, %v4097_v50  ;;  %v4642_v19 = vsel %vm471_vm2, %v4641_v29, 0.0 }
 0x88d   : > { %v4643_v33 = vrot.slane %v4642_v19, 4 }
 0x88e   : > { %v4100_v7 = vrot.slane %v4099_v53, 2 }
 0x88f   : > { %v4644_v51 = vadd.f32 %v4643_v33, %v4642_v19 }
 0x890   : > { %v4101_v14 = vadd.f32 %v4100_v7, %v4099_v53 }
 0x891   : > { %v4645_v40 = vrot.slane %v4644_v51, 2 }
 0x892   : > { %v4102_v52 = vrot.slane %v4101_v14, 1 }
 0x893   : > { %v4646_v59 = vadd.f32 %v4645_v40, %v4644_v51 }
 0x894   : > { %v4103_v9 = vadd.f32 %v4102_v52, %v4101_v14 }
 0x895   : > { %v4647_v15 = vrot.slane %v4646_v59, 1 }
 0x896   : > { %v4104_v28 = vsub.f32 0.0, %v4103_v9 }
 0x897   : > { %v4648_v16 = vadd.f32 %v4647_v15, %v4646_v59 }
 0x898   : > { %v4113_v11 = vsel %vm4112_vm0, %v4038_v26, %v4104_v28 }
 0x899   : > { %4114 = vst [vmem:[%s460_s26] sm:$0x3] %v4113_v11  ;;  %v4649_v6 = vsub.f32 0.0, %v4648_v16 }
 0x89b   : > { %v4653_v61 = vsel %vm4112_vm0, %v4585_v62, %v4649_v6 }
 0x89c   : > { %4654 = vst [vmem:[%s460_s26 + $0x2] sm:$0x3] %v4653_v61 }
 0x89d   : > { %5843 = shalt.err (!%p5840_p1)
}
 0x89e   : > { %s5844_s25 = scalar_lea.hbm %s9061_s14, 64  ;;  %s5848_s24 = scalar_lea.hbm %s10013_s9, 128 }
 0x89f   : > { %p5845_p2 = scmp.ne.s32.totalorder %s9061_s14, %s5844_s25  ;;  %p5849_p8 = scmp.lt.s32.totalorder %s9061_s14, %s10013_s9 }
 0x8a0   : > { %p5850_p9 = scmp.lt.s32.totalorder %s5848_s24, %s5844_s25 }
 0x8a1   : > { %p5846_p4 = pnand %p5845_p2, %p6146_p12 }
 0x8a2   : > { %p5851_p3 = por %p5850_p9, %p5849_p8 }
 0x8a3   : > { %p5847_p6 = pneg %p5846_p4 }
 0x8a5   : > { %p5852_p11 = pnand %p5851_p3, %p5847_p6 }
 0x8a7   : > { %5855 = shalt.err (!%p5852_p11)
}
 0x8a8   : > { %5062 = dma.vmem_to_hbm [thread:$0]  (%p6146_p12), %s4694_s15, 64, %s9061_s14, %s4661_s11  }
 0x8a9 PF: > { %s10014_s26 = sld [smem:[#allocation17_spill]]  ;;  %p10017_p7 = scmp.ge.s32.totalorder %s5918_s22, 2 }
 0x8aa   : > { %s10015_s16 = sld [smem:[#allocation19_spill]] }
 0x8af   : > { %s4705_s30 = sand.u32 1, %s10014_s26  }
 0x8b0   : > { %p10016_p5 = scmp.ne.s32.totalorder %s10015_s16, 0  ;;  %s4706_s28 = scalar_lea.sflag [#allocation6], %s4705_s30 }
 0x8b2   : > { %p5077_p10 = pnand %p10017_p7, %p10016_p5 }
 0x8b4   : > { %p5078_p13 = pneg %p5077_p10 }
 0x8b6   : > { %5889 = dma.done.wait (%p5078_p13), %s4706_s28, 128  }
 0x8b7   : > { %5891 = vsyncadd (%p5078_p13), %s4706_s28, 4294967168  ;;  %s4715_s20 = scalar_lea.sflag [#allocation12], %s4705_s30 }
 0x8b8   : > { %5893 = dma.done.wait (%p5078_p13), %s4715_s20, 64  }
 0x8b9   : > { %5895 = vsyncadd (%p5078_p13), %s4715_s20, 4294967232  ;;  %s32_s22 = sadd.s32 1, %s5918_s22   ;;  %s10018_s20 = sld [smem:[#allocation18_spill]] }
 0x8ba   : > { %p29_p0 = scmp.ge.s32.totalorder %s32_s22, 4   ;;  %s10019_s21 = sld [smem:[#allocation20_spill]] }
 0x8bb   : > { %s10020_s17 = smov %s5902_s18  ;;  %s10021_s18 = smov %s5906_s19 }
 0x8bc   : > { %s10022_s19 = smov %s6155_s12  ;;  %31 = sbr.rel (!%p29_p0) target bundleno = 13 (0xd), region = 130 }
 0x8c1   :  { %4720 = vsyncpa [#allocation5], 1 }
 0x8c2   :  { %4722 = vsyncpa [#allocation5 + $0x1], 1 }
 0x8c3   :  { %4723 = vsyncpa [#allocation8], 1 }
 0x8c4   :  { %4724 = vsyncpa [#allocation6], 1 }
 0x8c5   :  { %4726 = vsyncpa [#allocation6 + $0x1], 1 }
 0x8c6   :  { %4727 = vsyncpa [#allocation12], 1 }
 0x8c7   :  { %4729 = vsyncpa [#allocation12 + $0x1], 1 }

</bundles_post_ra>
